<compile_context>
chip_gen: v7x
topology: tpu7x:2x2x1
jax: 0.10.0
libtpu: 0.0.40
codegen_flags: <defaults>
</compile_context>

<pallas_src>
import math
import functools

import jax
import jax.numpy as jnp
from jax import lax
from jax.experimental import pallas as pl
from jax.experimental.pallas import tpu as pltpu


# --------------------------------------------------------------------------
# Fused forward kernel
# --------------------------------------------------------------------------

def _fused_forward_kernel(
        hist_ref, pe_h_ref, fcst_ref, pe_f_ref,
        hist_w_ref, hist_b_ref, fcst_w_ref, fcst_b_ref,
        wq_ref, bq_ref, wk_ref, bk_ref, wv_ref, bv_ref, wo_ref, bo_ref,
        ln1w_ref, ln1b_ref, ln2w_ref, ln2b_ref,
        w1_ref, b1_ref, w2_ref, b2_ref,
        hw1_ref, hb1_ref, hw2_ref, hb2_ref,
        o_ref, *, B, num_heads, num_layers, has_fcst):
    f32 = jnp.float32
    D = hist_w_ref.shape[1]
    hd = D // num_heads
    scale = 1.0 / math.sqrt(hd)

    def batch_mask(M):
        # Token-major slab: row m holds (t = m // B, b = m % B).  Additive mask
        # blocks attention between rows belonging to different batch elements.
        r = lax.broadcasted_iota(jnp.int32, (M, M), 0)
        c = lax.broadcasted_iota(jnp.int32, (M, M), 1)
        same = (r % B) == (c % B)
        return jnp.where(same, 0.0, -1e30).astype(f32)

    def layernorm(x, w, b, eps=1e-5):
        mu = jnp.mean(x, axis=-1, keepdims=True)
        xc = x - mu
        var = jnp.mean(xc * xc, axis=-1, keepdims=True)
        return xc * lax.rsqrt(var + eps) * w + b

    def encoder(x):
        # x: (M, D) token-major slab.  Post-norm (PyTorch norm_first=False).
        M = x.shape[0]
        mask = batch_mask(M)
        for l in range(num_layers):
            attn = jnp.zeros_like(x) + bo_ref[l]                 # (M, D)
            for h in range(num_heads):
                lh = l * num_heads + h
                qh = (jnp.dot(x, wq_ref[lh], preferred_element_type=f32)
                      + bq_ref[lh]) * scale                      # (M, hd)
                kh = jnp.dot(x, wk_ref[lh], preferred_element_type=f32) + bk_ref[lh]
                vh = jnp.dot(x, wv_ref[lh], preferred_element_type=f32) + bv_ref[lh]
                # scores = qh @ kh^T (contract head dim, no explicit transpose)
                s = lax.dot_general(qh, kh, (((1,), (1,)), ((), ())),
                                    preferred_element_type=f32) + mask
                s = s - jnp.max(s, axis=-1, keepdims=True)
                p = jnp.exp(s)
                p = p * pl.reciprocal(jnp.sum(p, axis=-1, keepdims=True), approx=True)
                ctx = jnp.dot(p, vh, preferred_element_type=f32)  # (M, hd)
                # accumulate output projection per head (== concat(heads) @ Wo)
                attn = attn + jnp.dot(ctx, wo_ref[lh], preferred_element_type=f32)
            y = layernorm(x + attn, ln1w_ref[l], ln1b_ref[l])     # residual 1
            ff = jnp.maximum(
                jnp.dot(y, w1_ref[l], preferred_element_type=f32) + b1_ref[l], 0.0)
            ff = jnp.dot(ff, w2_ref[l], preferred_element_type=f32) + b2_ref[l]
            x = layernorm(y + ff, ln2w_ref[l], ln2b_ref[l])       # residual 2
        return x

    # ---- history branch: input projection + positional encoding + encoder ----
    hx = (jnp.dot(hist_ref[...], hist_w_ref[...], preferred_element_type=f32)
          + hist_b_ref[...] + pe_h_ref[...])
    h_enc = encoder(hx)

    # ---- head: flat @ W1 decomposed per token position (no reshape/concat) ----
    Sh = hist_ref.shape[0] // B
    hidden = hb1_ref.shape[-1]
    acc = jnp.zeros((B, hidden), f32) + hb1_ref[...]
    for t in range(Sh):
        acc = acc + jnp.dot(h_enc[t * B:(t + 1) * B, :], hw1_ref[t],
                            preferred_element_type=f32)

    if has_fcst:
        fx = (jnp.dot(fcst_ref[...], fcst_w_ref[...], preferred_element_type=f32)
              + fcst_b_ref[...] + pe_f_ref[...])
        f_enc = encoder(fx)
        Sf = fcst_ref.shape[0] // B
        for t in range(Sf):
            acc = acc + jnp.dot(f_enc[t * B:(t + 1) * B, :], hw1_ref[Sh + t],
                                preferred_element_type=f32)

    h1 = jnp.maximum(acc, 0.0)
    y = jnp.dot(h1, hw2_ref[...], preferred_element_type=f32) + hb2_ref[...]
    # Softplus, PyTorch default (beta=1, threshold=20)
    o_ref[...] = jnp.where(y > 20.0, y, jnp.log1p(jnp.exp(jnp.minimum(y, 20.0))))


# --------------------------------------------------------------------------
# Host-side wrapper (plain JAX glue: layout prep + single pallas_call)
# --------------------------------------------------------------------------

def positional_encoding(d_model, max_len=1000):
    pos = jnp.arange(max_len, dtype=jnp.float32)[:, None]
    div = jnp.exp(jnp.arange(0, d_model, 2, dtype=jnp.float32)
                  * (-math.log(10000.0) / d_model))
    pe = jnp.zeros((max_len, d_model), dtype=jnp.float32)
    pe = pe.at[:, 0::2].set(jnp.sin(pos * div))
    pe = pe.at[:, 1::2].set(jnp.cos(pos * div))
    return pe


def make_forward(cfg):
    """Returns a jitted forward(packed_params, hist, fcst) -> (B, future_hours)."""

    @jax.jit
    def fwd(packed, hist, fcst=None):
        B, Sh, _ = hist.shape
        d = cfg['d_model']
        use_fcst = (cfg.get('use_forecast', False) and fcst is not None
                    and 'fcst_w' in packed)
        pe = positional_encoding(d)

        def tok_major(x):          # (B, S, C) -> (S*B, C), row = t*B + b
            return jnp.transpose(x, (1, 0, 2)).reshape(-1, x.shape[-1])

        hist_tok = tok_major(hist)
        pe_h = jnp.repeat(pe[:Sh], B, axis=0)

        if use_fcst:
            Sf = fcst.shape[1]
            fcst_tok = tok_major(fcst)
            pe_f = jnp.repeat(pe[:Sf], B, axis=0)
            fcst_w, fcst_b = packed['fcst_w'], packed['fcst_b']
        else:
            dummy = jnp.zeros((1, 1), jnp.float32)
            fcst_tok = pe_f = fcst_w = fcst_b = dummy

        kern = functools.partial(_fused_forward_kernel, B=B,
                                 num_heads=cfg['num_heads'],
                                 num_layers=cfg['num_layers'],
                                 has_fcst=use_fcst)
        args = (hist_tok, pe_h, fcst_tok, pe_f,
                packed['hist_w'], packed['hist_b'], fcst_w, fcst_b,
                packed['wq'], packed['bq'], packed['wk'], packed['bk'],
                packed['wv'], packed['bv'], packed['wo'], packed['bo'],
                packed['ln1w'], packed['ln1b'], packed['ln2w'], packed['ln2b'],
                packed['w1'], packed['b1'], packed['w2'], packed['b2'],
                packed['head_w1'], packed['head_b1'],
                packed['head_w2'], packed['head_b2'])
        vmem = pl.BlockSpec(memory_space=pltpu.MemorySpace.VMEM)
        return pl.pallas_call(
            kern,
            out_shape=jax.ShapeDtypeStruct((B, cfg['future_hours']), jnp.float32),
            in_specs=[vmem] * len(args),
            out_specs=vmem,
        )(*args)

    return fwd


# --------------------------------------------------------------------------
# Parameters (PyTorch-like layout, then packed for the fused kernel)
# --------------------------------------------------------------------------

def init_params(key, hist_dim, fcst_dim, cfg):
    d = cfg['d_model']
    keys = iter(jax.random.split(key, 256))

    def w(shape, scale=0.05):
        return scale * jax.random.normal(next(keys), shape, jnp.float32)

    p = {'hist_w': w((hist_dim, d)), 'hist_b': jnp.zeros((1, d), jnp.float32)}
    if fcst_dim > 0:
        p['fcst_w'] = w((fcst_dim, d))
        p['fcst_b'] = jnp.zeros((1, d), jnp.float32)

    layers = []
    for _ in range(cfg['num_layers']):
        layers.append(dict(
            wq=w((d, d)), bq=jnp.zeros((d,), jnp.float32),
            wk=w((d, d)), bk=jnp.zeros((d,), jnp.float32),
            wv=w((d, d)), bv=jnp.zeros((d,), jnp.float32),
            wo=w((d, d)), bo=jnp.zeros((1, d), jnp.float32),
            ln1w=jnp.ones((1, d), jnp.float32), ln1b=jnp.zeros((1, d), jnp.float32),
            ln2w=jnp.ones((1, d), jnp.float32), ln2b=jnp.zeros((1, d), jnp.float32),
            w1=w((d, 4 * d)), b1=jnp.zeros((1, 4 * d), jnp.float32),
            w2=w((4 * d, d)), b2=jnp.zeros((1, d), jnp.float32)))
    p['layers'] = layers

    total_seq = cfg['past_hours'] + (cfg['future_hours']
                                     if cfg.get('use_forecast', False) else 0)
    p['head_w1'] = w((total_seq * d, cfg['hidden_dim']))
    p['head_b1'] = jnp.zeros((1, cfg['hidden_dim']), jnp.float32)
    p['head_w2'] = w((cfg['hidden_dim'], cfg['future_hours']))
    p['head_b2'] = jnp.zeros((1, cfg['future_hours']), jnp.float32)
    return p


def pack_params(p, cfg):
    """Stack layers and pre-split attention weights per head (host side, free)."""
    d = cfg['d_model']
    H = cfg['num_heads']
    hd = d // H
    Ls = p['layers']

    def heads_out(wm):    # (d, d) -> H x (d, hd): head h owns output cols
        return [wm[:, h * hd:(h + 1) * hd] for h in range(H)]

    def heads_out_b(bv):  # (d,) -> H x (1, hd)
        return [bv[h * hd:(h + 1) * hd][None, :] for h in range(H)]

    def heads_in(wm):     # (d, d) -> H x (hd, d): head h owns input rows
        return [wm[h * hd:(h + 1) * hd, :] for h in range(H)]

    packed = dict(
        hist_w=p['hist_w'], hist_b=p['hist_b'],
        wq=jnp.stack([wh for l in Ls for wh in heads_out(l['wq'])]),    # (L*H, d, hd)
        bq=jnp.stack([bh for l in Ls for bh in heads_out_b(l['bq'])]),  # (L*H, 1, hd)
        wk=jnp.stack([wh for l in Ls for wh in heads_out(l['wk'])]),
        bk=jnp.stack([bh for l in Ls for bh in heads_out_b(l['bk'])]),
        wv=jnp.stack([wh for l in Ls for wh in heads_out(l['wv'])]),
        bv=jnp.stack([bh for l in Ls for bh in heads_out_b(l['bv'])]),
        wo=jnp.stack([wh for l in Ls for wh in heads_in(l['wo'])]),     # (L*H, hd, d)
        bo=jnp.stack([l['bo'] for l in Ls]),                            # (L, 1, d)
        ln1w=jnp.stack([l['ln1w'] for l in Ls]),
        ln1b=jnp.stack([l['ln1b'] for l in Ls]),
        ln2w=jnp.stack([l['ln2w'] for l in Ls]),
        ln2b=jnp.stack([l['ln2b'] for l in Ls]),
        w1=jnp.stack([l['w1'] for l in Ls]),                            # (L, d, 4d)
        b1=jnp.stack([l['b1'] for l in Ls]),
        w2=jnp.stack([l['w2'] for l in Ls]),                            # (L, 4d, d)
        b2=jnp.stack([l['b2'] for l in Ls]),
        head_w1=p['head_w1'].reshape(-1, d, cfg['hidden_dim']),         # (T, d, hidden)
        head_b1=p['head_b1'], head_w2=p['head_w2'], head_b2=p['head_b2'])
    if 'fcst_w' in p:
        packed['fcst_w'] = p['fcst_w']
        packed['fcst_b'] = p['fcst_b']
    return packed


# --------------------------------------------------------------------------
# Pure-JAX reference (same math, batched layout) for a sanity check
# --------------------------------------------------------------------------

def reference_forward(params, cfg, hist, fcst):
    d = cfg['d_model']
    H = cfg['num_heads']
    hd = d // H
    pe = positional_encoding(d)

    def ln(x, w, b, eps=1e-5):
        mu = jnp.mean(x, axis=-1, keepdims=True)
        var = jnp.mean((x - mu) ** 2, axis=-1, keepdims=True)
        return (x - mu) * lax.rsqrt(var + eps) * w + b

    def enc(x):
        B, S, _ = x.shape
        for l in params['layers']:
            q = (x @ l['wq'] + l['bq']).reshape(B, S, H, hd).transpose(0, 2, 1, 3)
            k = (x @ l['wk'] + l['bk']).reshape(B, S, H, hd).transpose(0, 2, 1, 3)
            v = (x @ l['wv'] + l['bv']).reshape(B, S, H, hd).transpose(0, 2, 1, 3)
            s = jnp.einsum('bhqd,bhkd->bhqk', q, k) / math.sqrt(hd)
            p = jax.nn.softmax(s, axis=-1)
            ctx = jnp.einsum('bhqk,bhkd->bhqd', p, v).transpose(0, 2, 1, 3).reshape(B, S, d)
            y = ln(x + ctx @ l['wo'] + l['bo'], l['ln1w'], l['ln1b'])
            ff = jnp.maximum(y @ l['w1'] + l['b1'], 0.0) @ l['w2'] + l['b2']
            x = ln(y + ff, l['ln2w'], l['ln2b'])
        return x

    Sh = hist.shape[1]
    h = enc(hist @ params['hist_w'] + params['hist_b'] + pe[:Sh])
    if cfg.get('use_forecast', False) and fcst is not None and 'fcst_w' in params:
        Sf = fcst.shape[1]
        f = enc(fcst @ params['fcst_w'] + params['fcst_b'] + pe[:Sf])
        seq = jnp.concatenate([h, f], axis=1)
    else:
        seq = h
    flat = seq.reshape(seq.shape[0], -1)
    h1 = jnp.maximum(flat @ params['head_w1'] + params['head_b1'], 0.0)
    y = h1 @ params['head_w2'] + params['head_b2']
    return jax.nn.softplus(y)


# --------------------------------------------------------------------------
# main
# --------------------------------------------------------------------------

if __name__ == "__main__":
    cfg = dict(d_model=32, num_heads=4, num_layers=2, dropout=0.0,
               past_hours=8, future_hours=4, use_forecast=True, hidden_dim=32)
    hist_dim, fcst_dim = 6, 3

    key = jax.random.PRNGKey(0)
    kp, kh, kf = jax.random.split(key, 3)

    params = init_params(kp, hist_dim, fcst_dim, cfg)
    packed = pack_params(params, cfg)

    hist = jax.random.normal(kh, (2, cfg['past_hours'], hist_dim), jnp.float32)
    fcst = jax.random.normal(kf, (2, cfg['future_hours'], fcst_dim), jnp.float32)

    fwd = make_forward(cfg)
    out = jax.block_until_ready(fwd(packed, hist, fcst))

    assert out.shape == (2, cfg['future_hours'])
    assert bool(jnp.all(jnp.isfinite(out)))
    assert bool(jnp.all(out >= 0.0))   # Softplus output is non-negative

    ref = reference_forward(params, cfg, hist, fcst)
    assert bool(jnp.allclose(out, ref, rtol=2e-2, atol=2e-2))

    print("KERNEL_OK")
</pallas_src>

<mosaic_0001>
module attributes {stable_mosaic.version = 11 : i64} {
  func.func @_fused_forward_kernel(%arg0: memref<16x6xf32, #tpu.memory_space<vmem>>, %arg1: memref<16x32xf32, #tpu.memory_space<vmem>>, %arg2: memref<8x3xf32, #tpu.memory_space<vmem>>, %arg3: memref<8x32xf32, #tpu.memory_space<vmem>>, %arg4: memref<6x32xf32, #tpu.memory_space<vmem>>, %arg5: memref<1x32xf32, #tpu.memory_space<vmem>>, %arg6: memref<3x32xf32, #tpu.memory_space<vmem>>, %arg7: memref<1x32xf32, #tpu.memory_space<vmem>>, %arg8: memref<8x32x8xf32, #tpu.memory_space<vmem>>, %arg9: memref<8x1x8xf32, #tpu.memory_space<vmem>>, %arg10: memref<8x32x8xf32, #tpu.memory_space<vmem>>, %arg11: memref<8x1x8xf32, #tpu.memory_space<vmem>>, %arg12: memref<8x32x8xf32, #tpu.memory_space<vmem>>, %arg13: memref<8x1x8xf32, #tpu.memory_space<vmem>>, %arg14: memref<8x8x32xf32, #tpu.memory_space<vmem>>, %arg15: memref<2x1x32xf32, #tpu.memory_space<vmem>>, %arg16: memref<2x1x32xf32, #tpu.memory_space<vmem>>, %arg17: memref<2x1x32xf32, #tpu.memory_space<vmem>>, %arg18: memref<2x1x32xf32, #tpu.memory_space<vmem>>, %arg19: memref<2x1x32xf32, #tpu.memory_space<vmem>>, %arg20: memref<2x32x128xf32, #tpu.memory_space<vmem>>, %arg21: memref<2x1x128xf32, #tpu.memory_space<vmem>>, %arg22: memref<2x128x32xf32, #tpu.memory_space<vmem>>, %arg23: memref<2x1x32xf32, #tpu.memory_space<vmem>>, %arg24: memref<12x32x32xf32, #tpu.memory_space<vmem>>, %arg25: memref<1x32xf32, #tpu.memory_space<vmem>>, %arg26: memref<32x4xf32, #tpu.memory_space<vmem>>, %arg27: memref<1x4xf32, #tpu.memory_space<vmem>>, %arg28: memref<2x4xf32, #tpu.memory_space<vmem>>) attributes {dimension_semantics = [], scalar_prefetch = 0 : i64, scratch_operands = 0 : i64, tpu.core_type = #tpu.core_type<tc>} {
    %c0 = arith.constant 0 : index
    %c0_0 = arith.constant 0 : index
    %0 = vector.load %arg0[%c0, %c0_0] : memref<16x6xf32, #tpu.memory_space<vmem>>, vector<16x6xf32>
    %c0_1 = arith.constant 0 : index
    %c0_2 = arith.constant 0 : index
    %1 = vector.load %arg4[%c0_1, %c0_2] : memref<6x32xf32, #tpu.memory_space<vmem>>, vector<6x32xf32>
    %cst = arith.constant dense<0.000000e+00> : vector<16x32xf32>
    %2 = tpu.matmul %0, %1, %cst {dimension_numbers = #tpu.dot_dimension_numbers<[1], [0], [0], [1], [0, 0, 1, 1], [], []>} : vector<16x6xf32>, vector<6x32xf32>, vector<16x32xf32> -> vector<16x32xf32>
    %c0_3 = arith.constant 0 : index
    %c0_4 = arith.constant 0 : index
    %3 = vector.load %arg5[%c0_3, %c0_4] : memref<1x32xf32, #tpu.memory_space<vmem>>, vector<1x32xf32>
    %4 = vector.broadcast %3 : vector<1x32xf32> to vector<16x32xf32>
    %5 = arith.addf %2, %4 : vector<16x32xf32>
    %c0_5 = arith.constant 0 : index
    %c0_6 = arith.constant 0 : index
    %6 = vector.load %arg1[%c0_5, %c0_6] : memref<16x32xf32, #tpu.memory_space<vmem>>, vector<16x32xf32>
    %7 = arith.addf %5, %6 : vector<16x32xf32>
    %8 = tpu.iota {dimensions = array<i32: 0>} : vector<16x16xi32>
    %9 = tpu.iota {dimensions = array<i32: 1>} : vector<16x16xi32>
    %c2_i32 = arith.constant 2 : i32
    %c0_i32 = arith.constant 0 : i32
    %10 = arith.cmpi eq, %c2_i32, %c0_i32 : i32
    %c1_i32 = arith.constant 1 : i32
    %11 = arith.select %10, %c1_i32, %c2_i32 : i32
    %12 = vector.broadcast %11 : i32 to vector<16x16xi32>
    %13 = arith.remsi %8, %12 : vector<16x16xi32>
    %c0_i32_7 = arith.constant 0 : i32
    %14 = vector.broadcast %c0_i32_7 : i32 to vector<16x16xi32>
    %15 = arith.cmpi ne, %13, %14 : vector<16x16xi32>
    %c0_i32_8 = arith.constant 0 : i32
    %16 = vector.broadcast %c0_i32_8 : i32 to vector<16x16xi32>
    %17 = arith.cmpi slt, %13, %16 : vector<16x16xi32>
    %c0_i32_9 = arith.constant 0 : i32
    %18 = arith.cmpi slt, %11, %c0_i32_9 : i32
    %19 = vector.broadcast %18 : i1 to vector<16x16xi1>
    %20 = vector.broadcast %19 : vector<16x16xi1> to vector<16x16xi1>
    %21 = arith.xori %17, %20 : vector<16x16xi1>
    %22 = arith.andi %21, %15 : vector<16x16xi1>
    %23 = vector.broadcast %11 : i32 to vector<16x16xi32>
    %24 = arith.addi %13, %23 : vector<16x16xi32>
    %25 = arith.select %22, %24, %13 : vector<16x16xi1>, vector<16x16xi32>
    %c2_i32_10 = arith.constant 2 : i32
    %c0_i32_11 = arith.constant 0 : i32
    %26 = arith.cmpi eq, %c2_i32_10, %c0_i32_11 : i32
    %c1_i32_12 = arith.constant 1 : i32
    %27 = arith.select %26, %c1_i32_12, %c2_i32_10 : i32
    %28 = vector.broadcast %27 : i32 to vector<16x16xi32>
    %29 = arith.remsi %9, %28 : vector<16x16xi32>
    %c0_i32_13 = arith.constant 0 : i32
    %30 = vector.broadcast %c0_i32_13 : i32 to vector<16x16xi32>
    %31 = arith.cmpi ne, %29, %30 : vector<16x16xi32>
    %c0_i32_14 = arith.constant 0 : i32
    %32 = vector.broadcast %c0_i32_14 : i32 to vector<16x16xi32>
    %33 = arith.cmpi slt, %29, %32 : vector<16x16xi32>
    %c0_i32_15 = arith.constant 0 : i32
    %34 = arith.cmpi slt, %27, %c0_i32_15 : i32
    %35 = vector.broadcast %34 : i1 to vector<16x16xi1>
    %36 = vector.broadcast %35 : vector<16x16xi1> to vector<16x16xi1>
    %37 = arith.xori %33, %36 : vector<16x16xi1>
    %38 = arith.andi %37, %31 : vector<16x16xi1>
    %39 = vector.broadcast %27 : i32 to vector<16x16xi32>
    %40 = arith.addi %29, %39 : vector<16x16xi32>
    %41 = arith.select %38, %40, %29 : vector<16x16xi1>, vector<16x16xi32>
    %42 = arith.cmpi eq, %25, %41 : vector<16x16xi32>
    %cst_16 = arith.constant 0.000000e+00 : f32
    %cst_17 = arith.constant -1.000000e+30 : f32
    %43 = vector.broadcast %cst_16 : f32 to vector<16x16xf32>
    %44 = vector.broadcast %cst_17 : f32 to vector<16x16xf32>
    %45 = arith.select %42, %43, %44 : vector<16x16xi1>, vector<16x16xf32>
    %cst_18 = arith.constant 0.000000e+00 : f32
    %46 = vector.broadcast %cst_18 : f32 to vector<16x32xf32>
    %c0_19 = arith.constant 0 : index
    %c0_20 = arith.constant 0 : index
    %c0_21 = arith.constant 0 : index
    %47 = vector.load %arg15[%c0_19, %c0_20, %c0_21] : memref<2x1x32xf32, #tpu.memory_space<vmem>>, vector<1x1x32xf32>
    %48 = vector.shape_cast %47 : vector<1x1x32xf32> to vector<1x32xf32>
    %49 = vector.broadcast %48 : vector<1x32xf32> to vector<16x32xf32>
    %50 = arith.addf %46, %49 : vector<16x32xf32>
    %c0_22 = arith.constant 0 : index
    %c0_23 = arith.constant 0 : index
    %c0_24 = arith.constant 0 : index
    %51 = vector.load %arg8[%c0_22, %c0_23, %c0_24] : memref<8x32x8xf32, #tpu.memory_space<vmem>>, vector<1x32x8xf32>
    %52 = vector.shape_cast %51 : vector<1x32x8xf32> to vector<32x8xf32>
    %cst_25 = arith.constant dense<0.000000e+00> : vector<16x8xf32>
    %53 = tpu.matmul %7, %52, %cst_25 {dimension_numbers = #tpu.dot_dimension_numbers<[1], [0], [0], [1], [0, 0, 1, 1], [], []>} : vector<16x32xf32>, vector<32x8xf32>, vector<16x8xf32> -> vector<16x8xf32>
    %c0_26 = arith.constant 0 : index
    %c0_27 = arith.constant 0 : index
    %c0_28 = arith.constant 0 : index
    %54 = vector.load %arg9[%c0_26, %c0_27, %c0_28] : memref<8x1x8xf32, #tpu.memory_space<vmem>>, vector<1x1x8xf32>
    %55 = vector.shape_cast %54 : vector<1x1x8xf32> to vector<1x8xf32>
    %56 = vector.broadcast %55 : vector<1x8xf32> to vector<16x8xf32>
    %57 = arith.addf %53, %56 : vector<16x8xf32>
    %cst_29 = arith.constant 0.353553385 : f32
    %58 = vector.broadcast %cst_29 : f32 to vector<16x8xf32>
    %59 = arith.mulf %57, %58 : vector<16x8xf32>
    %c0_30 = arith.constant 0 : index
    %c0_31 = arith.constant 0 : index
    %c0_32 = arith.constant 0 : index
    %60 = vector.load %arg10[%c0_30, %c0_31, %c0_32] : memref<8x32x8xf32, #tpu.memory_space<vmem>>, vector<1x32x8xf32>
    %61 = vector.shape_cast %60 : vector<1x32x8xf32> to vector<32x8xf32>
    %cst_33 = arith.constant dense<0.000000e+00> : vector<16x8xf32>
    %62 = tpu.matmul %7, %61, %cst_33 {dimension_numbers = #tpu.dot_dimension_numbers<[1], [0], [0], [1], [0, 0, 1, 1], [], []>} : vector<16x32xf32>, vector<32x8xf32>, vector<16x8xf32> -> vector<16x8xf32>
    %c0_34 = arith.constant 0 : index
    %c0_35 = arith.constant 0 : index
    %c0_36 = arith.constant 0 : index
    %63 = vector.load %arg11[%c0_34, %c0_35, %c0_36] : memref<8x1x8xf32, #tpu.memory_space<vmem>>, vector<1x1x8xf32>
    %64 = vector.shape_cast %63 : vector<1x1x8xf32> to vector<1x8xf32>
    %65 = vector.broadcast %64 : vector<1x8xf32> to vector<16x8xf32>
    %66 = arith.addf %62, %65 : vector<16x8xf32>
    %c0_37 = arith.constant 0 : index
    %c0_38 = arith.constant 0 : index
    %c0_39 = arith.constant 0 : index
    %67 = vector.load %arg12[%c0_37, %c0_38, %c0_39] : memref<8x32x8xf32, #tpu.memory_space<vmem>>, vector<1x32x8xf32>
    %68 = vector.shape_cast %67 : vector<1x32x8xf32> to vector<32x8xf32>
    %cst_40 = arith.constant dense<0.000000e+00> : vector<16x8xf32>
    %69 = tpu.matmul %7, %68, %cst_40 {dimension_numbers = #tpu.dot_dimension_numbers<[1], [0], [0], [1], [0, 0, 1, 1], [], []>} : vector<16x32xf32>, vector<32x8xf32>, vector<16x8xf32> -> vector<16x8xf32>
    %c0_41 = arith.constant 0 : index
    %c0_42 = arith.constant 0 : index
    %c0_43 = arith.constant 0 : index
    %70 = vector.load %arg13[%c0_41, %c0_42, %c0_43] : memref<8x1x8xf32, #tpu.memory_space<vmem>>, vector<1x1x8xf32>
    %71 = vector.shape_cast %70 : vector<1x1x8xf32> to vector<1x8xf32>
    %72 = vector.broadcast %71 : vector<1x8xf32> to vector<16x8xf32>
    %73 = arith.addf %69, %72 : vector<16x8xf32>
    %cst_44 = arith.constant dense<0.000000e+00> : vector<16x16xf32>
    %74 = tpu.matmul %59, %66, %cst_44 {dimension_numbers = #tpu.dot_dimension_numbers<[1], [1], [0], [0], [0, 0, 1, 0], [], []>} : vector<16x8xf32>, vector<16x8xf32>, vector<16x16xf32> -> vector<16x16xf32>
    %75 = arith.addf %74, %45 : vector<16x16xf32>
    %cst_45 = arith.constant dense<0xFF800000> : vector<16xf32>
    %76 = vector.multi_reduction <maximumf>, %75, %cst_45 [1] : vector<16x16xf32> to vector<16xf32>
    %77 = vector.shape_cast %76 : vector<16xf32> to vector<16x1xf32>
    %78 = vector.broadcast %77 : vector<16x1xf32> to vector<16x16xf32>
    %79 = arith.subf %75, %78 : vector<16x16xf32>
    %80 = math.exp %79 : vector<16x16xf32>
    %cst_46 = arith.constant dense<0.000000e+00> : vector<16xf32>
    %81 = vector.multi_reduction <add>, %80, %cst_46 [1] : vector<16x16xf32> to vector<16xf32>
    %82 = vector.shape_cast %81 : vector<16xf32> to vector<16x1xf32>
    %83 = tpu.reciprocal %82 {approx = true} : vector<16x1xf32> -> vector<16x1xf32>
    %84 = vector.broadcast %83 : vector<16x1xf32> to vector<16x16xf32>
    %85 = arith.mulf %80, %84 : vector<16x16xf32>
    %cst_47 = arith.constant dense<0.000000e+00> : vector<16x8xf32>
    %86 = tpu.matmul %85, %73, %cst_47 {dimension_numbers = #tpu.dot_dimension_numbers<[1], [0], [0], [1], [0, 0, 1, 1], [], []>} : vector<16x16xf32>, vector<16x8xf32>, vector<16x8xf32> -> vector<16x8xf32>
    %c0_48 = arith.constant 0 : index
    %c0_49 = arith.constant 0 : index
    %c0_50 = arith.constant 0 : index
    %87 = vector.load %arg14[%c0_48, %c0_49, %c0_50] : memref<8x8x32xf32, #tpu.memory_space<vmem>>, vector<1x8x32xf32>
    %88 = vector.shape_cast %87 : vector<1x8x32xf32> to vector<8x32xf32>
    %cst_51 = arith.constant dense<0.000000e+00> : vector<16x32xf32>
    %89 = tpu.matmul %86, %88, %cst_51 {dimension_numbers = #tpu.dot_dimension_numbers<[1], [0], [0], [1], [0, 0, 1, 1], [], []>} : vector<16x8xf32>, vector<8x32xf32>, vector<16x32xf32> -> vector<16x32xf32>
    %90 = arith.addf %50, %89 : vector<16x32xf32>
    %c1 = arith.constant 1 : index
    %c0_52 = arith.constant 0 : index
    %c0_53 = arith.constant 0 : index
    %91 = vector.load %arg8[%c1, %c0_52, %c0_53] : memref<8x32x8xf32, #tpu.memory_space<vmem>>, vector<1x32x8xf32>
    %92 = vector.shape_cast %91 : vector<1x32x8xf32> to vector<32x8xf32>
    %cst_54 = arith.constant dense<0.000000e+00> : vector<16x8xf32>
    %93 = tpu.matmul %7, %92, %cst_54 {dimension_numbers = #tpu.dot_dimension_numbers<[1], [0], [0], [1], [0, 0, 1, 1], [], []>} : vector<16x32xf32>, vector<32x8xf32>, vector<16x8xf32> -> vector<16x8xf32>
    %c1_55 = arith.constant 1 : index
    %c0_56 = arith.constant 0 : index
    %c0_57 = arith.constant 0 : index
    %94 = vector.load %arg9[%c1_55, %c0_56, %c0_57] : memref<8x1x8xf32, #tpu.memory_space<vmem>>, vector<1x1x8xf32>
    %95 = vector.shape_cast %94 : vector<1x1x8xf32> to vector<1x8xf32>
    %96 = vector.broadcast %95 : vector<1x8xf32> to vector<16x8xf32>
    %97 = arith.addf %93, %96 : vector<16x8xf32>
    %cst_58 = arith.constant 0.353553385 : f32
    %98 = vector.broadcast %cst_58 : f32 to vector<16x8xf32>
    %99 = arith.mulf %97, %98 : vector<16x8xf32>
    %c1_59 = arith.constant 1 : index
    %c0_60 = arith.constant 0 : index
    %c0_61 = arith.constant 0 : index
    %100 = vector.load %arg10[%c1_59, %c0_60, %c0_61] : memref<8x32x8xf32, #tpu.memory_space<vmem>>, vector<1x32x8xf32>
    %101 = vector.shape_cast %100 : vector<1x32x8xf32> to vector<32x8xf32>
    %cst_62 = arith.constant dense<0.000000e+00> : vector<16x8xf32>
    %102 = tpu.matmul %7, %101, %cst_62 {dimension_numbers = #tpu.dot_dimension_numbers<[1], [0], [0], [1], [0, 0, 1, 1], [], []>} : vector<16x32xf32>, vector<32x8xf32>, vector<16x8xf32> -> vector<16x8xf32>
    %c1_63 = arith.constant 1 : index
    %c0_64 = arith.constant 0 : index
    %c0_65 = arith.constant 0 : index
    %103 = vector.load %arg11[%c1_63, %c0_64, %c0_65] : memref<8x1x8xf32, #tpu.memory_space<vmem>>, vector<1x1x8xf32>
    %104 = vector.shape_cast %103 : vector<1x1x8xf32> to vector<1x8xf32>
    %105 = vector.broadcast %104 : vector<1x8xf32> to vector<16x8xf32>
    %106 = arith.addf %102, %105 : vector<16x8xf32>
    %c1_66 = arith.constant 1 : index
    %c0_67 = arith.constant 0 : index
    %c0_68 = arith.constant 0 : index
    %107 = vector.load %arg12[%c1_66, %c0_67, %c0_68] : memref<8x32x8xf32, #tpu.memory_space<vmem>>, vector<1x32x8xf32>
    %108 = vector.shape_cast %107 : vector<1x32x8xf32> to vector<32x8xf32>
    %cst_69 = arith.constant dense<0.000000e+00> : vector<16x8xf32>
    %109 = tpu.matmul %7, %108, %cst_69 {dimension_numbers = #tpu.dot_dimension_numbers<[1], [0], [0], [1], [0, 0, 1, 1], [], []>} : vector<16x32xf32>, vector<32x8xf32>, vector<16x8xf32> -> vector<16x8xf32>
    %c1_70 = arith.constant 1 : index
    %c0_71 = arith.constant 0 : index
    %c0_72 = arith.constant 0 : index
    %110 = vector.load %arg13[%c1_70, %c0_71, %c0_72] : memref<8x1x8xf32, #tpu.memory_space<vmem>>, vector<1x1x8xf32>
    %111 = vector.shape_cast %110 : vector<1x1x8xf32> to vector<1x8xf32>
    %112 = vector.broadcast %111 : vector<1x8xf32> to vector<16x8xf32>
    %113 = arith.addf %109, %112 : vector<16x8xf32>
    %cst_73 = arith.constant dense<0.000000e+00> : vector<16x16xf32>
    %114 = tpu.matmul %99, %106, %cst_73 {dimension_numbers = #tpu.dot_dimension_numbers<[1], [1], [0], [0], [0, 0, 1, 0], [], []>} : vector<16x8xf32>, vector<16x8xf32>, vector<16x16xf32> -> vector<16x16xf32>
    %115 = arith.addf %114, %45 : vector<16x16xf32>
    %cst_74 = arith.constant dense<0xFF800000> : vector<16xf32>
    %116 = vector.multi_reduction <maximumf>, %115, %cst_74 [1] : vector<16x16xf32> to vector<16xf32>
    %117 = vector.shape_cast %116 : vector<16xf32> to vector<16x1xf32>
    %118 = vector.broadcast %117 : vector<16x1xf32> to vector<16x16xf32>
    %119 = arith.subf %115, %118 : vector<16x16xf32>
    %120 = math.exp %119 : vector<16x16xf32>
    %cst_75 = arith.constant dense<0.000000e+00> : vector<16xf32>
    %121 = vector.multi_reduction <add>, %120, %cst_75 [1] : vector<16x16xf32> to vector<16xf32>
    %122 = vector.shape_cast %121 : vector<16xf32> to vector<16x1xf32>
    %123 = tpu.reciprocal %122 {approx = true} : vector<16x1xf32> -> vector<16x1xf32>
    %124 = vector.broadcast %123 : vector<16x1xf32> to vector<16x16xf32>
    %125 = arith.mulf %120, %124 : vector<16x16xf32>
    %cst_76 = arith.constant dense<0.000000e+00> : vector<16x8xf32>
    %126 = tpu.matmul %125, %113, %cst_76 {dimension_numbers = #tpu.dot_dimension_numbers<[1], [0], [0], [1], [0, 0, 1, 1], [], []>} : vector<16x16xf32>, vector<16x8xf32>, vector<16x8xf32> -> vector<16x8xf32>
    %c1_77 = arith.constant 1 : index
    %c0_78 = arith.constant 0 : index
    %c0_79 = arith.constant 0 : index
    %127 = vector.load %arg14[%c1_77, %c0_78, %c0_79] : memref<8x8x32xf32, #tpu.memory_space<vmem>>, vector<1x8x32xf32>
    %128 = vector.shape_cast %127 : vector<1x8x32xf32> to vector<8x32xf32>
    %cst_80 = arith.constant dense<0.000000e+00> : vector<16x32xf32>
    %129 = tpu.matmul %126, %128, %cst_80 {dimension_numbers = #tpu.dot_dimension_numbers<[1], [0], [0], [1], [0, 0, 1, 1], [], []>} : vector<16x8xf32>, vector<8x32xf32>, vector<16x32xf32> -> vector<16x32xf32>
    %130 = arith.addf %90, %129 : vector<16x32xf32>
    %c2 = arith.constant 2 : index
    %c0_81 = arith.constant 0 : index
    %c0_82 = arith.constant 0 : index
    %131 = vector.load %arg8[%c2, %c0_81, %c0_82] : memref<8x32x8xf32, #tpu.memory_space<vmem>>, vector<1x32x8xf32>
    %132 = vector.shape_cast %131 : vector<1x32x8xf32> to vector<32x8xf32>
    %cst_83 = arith.constant dense<0.000000e+00> : vector<16x8xf32>
    %133 = tpu.matmul %7, %132, %cst_83 {dimension_numbers = #tpu.dot_dimension_numbers<[1], [0], [0], [1], [0, 0, 1, 1], [], []>} : vector<16x32xf32>, vector<32x8xf32>, vector<16x8xf32> -> vector<16x8xf32>
    %c2_84 = arith.constant 2 : index
    %c0_85 = arith.constant 0 : index
    %c0_86 = arith.constant 0 : index
    %134 = vector.load %arg9[%c2_84, %c0_85, %c0_86] : memref<8x1x8xf32, #tpu.memory_space<vmem>>, vector<1x1x8xf32>
    %135 = vector.shape_cast %134 : vector<1x1x8xf32> to vector<1x8xf32>
    %136 = vector.broadcast %135 : vector<1x8xf32> to vector<16x8xf32>
    %137 = arith.addf %133, %136 : vector<16x8xf32>
    %cst_87 = arith.constant 0.353553385 : f32
    %138 = vector.broadcast %cst_87 : f32 to vector<16x8xf32>
    %139 = arith.mulf %137, %138 : vector<16x8xf32>
    %c2_88 = arith.constant 2 : index
    %c0_89 = arith.constant 0 : index
    %c0_90 = arith.constant 0 : index
    %140 = vector.load %arg10[%c2_88, %c0_89, %c0_90] : memref<8x32x8xf32, #tpu.memory_space<vmem>>, vector<1x32x8xf32>
    %141 = vector.shape_cast %140 : vector<1x32x8xf32> to vector<32x8xf32>
    %cst_91 = arith.constant dense<0.000000e+00> : vector<16x8xf32>
    %142 = tpu.matmul %7, %141, %cst_91 {dimension_numbers = #tpu.dot_dimension_numbers<[1], [0], [0], [1], [0, 0, 1, 1], [], []>} : vector<16x32xf32>, vector<32x8xf32>, vector<16x8xf32> -> vector<16x8xf32>
    %c2_92 = arith.constant 2 : index
    %c0_93 = arith.constant 0 : index
    %c0_94 = arith.constant 0 : index
    %143 = vector.load %arg11[%c2_92, %c0_93, %c0_94] : memref<8x1x8xf32, #tpu.memory_space<vmem>>, vector<1x1x8xf32>
    %144 = vector.shape_cast %143 : vector<1x1x8xf32> to vector<1x8xf32>
    %145 = vector.broadcast %144 : vector<1x8xf32> to vector<16x8xf32>
    %146 = arith.addf %142, %145 : vector<16x8xf32>
    %c2_95 = arith.constant 2 : index
    %c0_96 = arith.constant 0 : index
    %c0_97 = arith.constant 0 : index
    %147 = vector.load %arg12[%c2_95, %c0_96, %c0_97] : memref<8x32x8xf32, #tpu.memory_space<vmem>>, vector<1x32x8xf32>
    %148 = vector.shape_cast %147 : vector<1x32x8xf32> to vector<32x8xf32>
    %cst_98 = arith.constant dense<0.000000e+00> : vector<16x8xf32>
    %149 = tpu.matmul %7, %148, %cst_98 {dimension_numbers = #tpu.dot_dimension_numbers<[1], [0], [0], [1], [0, 0, 1, 1], [], []>} : vector<16x32xf32>, vector<32x8xf32>, vector<16x8xf32> -> vector<16x8xf32>
    %c2_99 = arith.constant 2 : index
    %c0_100 = arith.constant 0 : index
    %c0_101 = arith.constant 0 : index
    %150 = vector.load %arg13[%c2_99, %c0_100, %c0_101] : memref<8x1x8xf32, #tpu.memory_space<vmem>>, vector<1x1x8xf32>
    %151 = vector.shape_cast %150 : vector<1x1x8xf32> to vector<1x8xf32>
    %152 = vector.broadcast %151 : vector<1x8xf32> to vector<16x8xf32>
    %153 = arith.addf %149, %152 : vector<16x8xf32>
    %cst_102 = arith.constant dense<0.000000e+00> : vector<16x16xf32>
    %154 = tpu.matmul %139, %146, %cst_102 {dimension_numbers = #tpu.dot_dimension_numbers<[1], [1], [0], [0], [0, 0, 1, 0], [], []>} : vector<16x8xf32>, vector<16x8xf32>, vector<16x16xf32> -> vector<16x16xf32>
    %155 = arith.addf %154, %45 : vector<16x16xf32>
    %cst_103 = arith.constant dense<0xFF800000> : vector<16xf32>
    %156 = vector.multi_reduction <maximumf>, %155, %cst_103 [1] : vector<16x16xf32> to vector<16xf32>
    %157 = vector.shape_cast %156 : vector<16xf32> to vector<16x1xf32>
    %158 = vector.broadcast %157 : vector<16x1xf32> to vector<16x16xf32>
    %159 = arith.subf %155, %158 : vector<16x16xf32>
    %160 = math.exp %159 : vector<16x16xf32>
    %cst_104 = arith.constant dense<0.000000e+00> : vector<16xf32>
    %161 = vector.multi_reduction <add>, %160, %cst_104 [1] : vector<16x16xf32> to vector<16xf32>
    %162 = vector.shape_cast %161 : vector<16xf32> to vector<16x1xf32>
    %163 = tpu.reciprocal %162 {approx = true} : vector<16x1xf32> -> vector<16x1xf32>
    %164 = vector.broadcast %163 : vector<16x1xf32> to vector<16x16xf32>
    %165 = arith.mulf %160, %164 : vector<16x16xf32>
    %cst_105 = arith.constant dense<0.000000e+00> : vector<16x8xf32>
    %166 = tpu.matmul %165, %153, %cst_105 {dimension_numbers = #tpu.dot_dimension_numbers<[1], [0], [0], [1], [0, 0, 1, 1], [], []>} : vector<16x16xf32>, vector<16x8xf32>, vector<16x8xf32> -> vector<16x8xf32>
    %c2_106 = arith.constant 2 : index
    %c0_107 = arith.constant 0 : index
    %c0_108 = arith.constant 0 : index
    %167 = vector.load %arg14[%c2_106, %c0_107, %c0_108] : memref<8x8x32xf32, #tpu.memory_space<vmem>>, vector<1x8x32xf32>
    %168 = vector.shape_cast %167 : vector<1x8x32xf32> to vector<8x32xf32>
    %cst_109 = arith.constant dense<0.000000e+00> : vector<16x32xf32>
    %169 = tpu.matmul %166, %168, %cst_109 {dimension_numbers = #tpu.dot_dimension_numbers<[1], [0], [0], [1], [0, 0, 1, 1], [], []>} : vector<16x8xf32>, vector<8x32xf32>, vector<16x32xf32> -> vector<16x32xf32>
    %170 = arith.addf %130, %169 : vector<16x32xf32>
    %c3 = arith.constant 3 : index
    %c0_110 = arith.constant 0 : index
    %c0_111 = arith.constant 0 : index
    %171 = vector.load %arg8[%c3, %c0_110, %c0_111] : memref<8x32x8xf32, #tpu.memory_space<vmem>>, vector<1x32x8xf32>
    %172 = vector.shape_cast %171 : vector<1x32x8xf32> to vector<32x8xf32>
    %cst_112 = arith.constant dense<0.000000e+00> : vector<16x8xf32>
    %173 = tpu.matmul %7, %172, %cst_112 {dimension_numbers = #tpu.dot_dimension_numbers<[1], [0], [0], [1], [0, 0, 1, 1], [], []>} : vector<16x32xf32>, vector<32x8xf32>, vector<16x8xf32> -> vector<16x8xf32>
    %c3_113 = arith.constant 3 : index
    %c0_114 = arith.constant 0 : index
    %c0_115 = arith.constant 0 : index
    %174 = vector.load %arg9[%c3_113, %c0_114, %c0_115] : memref<8x1x8xf32, #tpu.memory_space<vmem>>, vector<1x1x8xf32>
    %175 = vector.shape_cast %174 : vector<1x1x8xf32> to vector<1x8xf32>
    %176 = vector.broadcast %175 : vector<1x8xf32> to vector<16x8xf32>
    %177 = arith.addf %173, %176 : vector<16x8xf32>
    %cst_116 = arith.constant 0.353553385 : f32
    %178 = vector.broadcast %cst_116 : f32 to vector<16x8xf32>
    %179 = arith.mulf %177, %178 : vector<16x8xf32>
    %c3_117 = arith.constant 3 : index
    %c0_118 = arith.constant 0 : index
    %c0_119 = arith.constant 0 : index
    %180 = vector.load %arg10[%c3_117, %c0_118, %c0_119] : memref<8x32x8xf32, #tpu.memory_space<vmem>>, vector<1x32x8xf32>
    %181 = vector.shape_cast %180 : vector<1x32x8xf32> to vector<32x8xf32>
    %cst_120 = arith.constant dense<0.000000e+00> : vector<16x8xf32>
    %182 = tpu.matmul %7, %181, %cst_120 {dimension_numbers = #tpu.dot_dimension_numbers<[1], [0], [0], [1], [0, 0, 1, 1], [], []>} : vector<16x32xf32>, vector<32x8xf32>, vector<16x8xf32> -> vector<16x8xf32>
    %c3_121 = arith.constant 3 : index
    %c0_122 = arith.constant 0 : index
    %c0_123 = arith.constant 0 : index
    %183 = vector.load %arg11[%c3_121, %c0_122, %c0_123] : memref<8x1x8xf32, #tpu.memory_space<vmem>>, vector<1x1x8xf32>
    %184 = vector.shape_cast %183 : vector<1x1x8xf32> to vector<1x8xf32>
    %185 = vector.broadcast %184 : vector<1x8xf32> to vector<16x8xf32>
    %186 = arith.addf %182, %185 : vector<16x8xf32>
    %c3_124 = arith.constant 3 : index
    %c0_125 = arith.constant 0 : index
    %c0_126 = arith.constant 0 : index
    %187 = vector.load %arg12[%c3_124, %c0_125, %c0_126] : memref<8x32x8xf32, #tpu.memory_space<vmem>>, vector<1x32x8xf32>
    %188 = vector.shape_cast %187 : vector<1x32x8xf32> to vector<32x8xf32>
    %cst_127 = arith.constant dense<0.000000e+00> : vector<16x8xf32>
    %189 = tpu.matmul %7, %188, %cst_127 {dimension_numbers = #tpu.dot_dimension_numbers<[1], [0], [0], [1], [0, 0, 1, 1], [], []>} : vector<16x32xf32>, vector<32x8xf32>, vector<16x8xf32> -> vector<16x8xf32>
    %c3_128 = arith.constant 3 : index
    %c0_129 = arith.constant 0 : index
    %c0_130 = arith.constant 0 : index
    %190 = vector.load %arg13[%c3_128, %c0_129, %c0_130] : memref<8x1x8xf32, #tpu.memory_space<vmem>>, vector<1x1x8xf32>
    %191 = vector.shape_cast %190 : vector<1x1x8xf32> to vector<1x8xf32>
    %192 = vector.broadcast %191 : vector<1x8xf32> to vector<16x8xf32>
    %193 = arith.addf %189, %192 : vector<16x8xf32>
    %cst_131 = arith.constant dense<0.000000e+00> : vector<16x16xf32>
    %194 = tpu.matmul %179, %186, %cst_131 {dimension_numbers = #tpu.dot_dimension_numbers<[1], [1], [0], [0], [0, 0, 1, 0], [], []>} : vector<16x8xf32>, vector<16x8xf32>, vector<16x16xf32> -> vector<16x16xf32>
    %195 = arith.addf %194, %45 : vector<16x16xf32>
    %cst_132 = arith.constant dense<0xFF800000> : vector<16xf32>
    %196 = vector.multi_reduction <maximumf>, %195, %cst_132 [1] : vector<16x16xf32> to vector<16xf32>
    %197 = vector.shape_cast %196 : vector<16xf32> to vector<16x1xf32>
    %198 = vector.broadcast %197 : vector<16x1xf32> to vector<16x16xf32>
    %199 = arith.subf %195, %198 : vector<16x16xf32>
    %200 = math.exp %199 : vector<16x16xf32>
    %cst_133 = arith.constant dense<0.000000e+00> : vector<16xf32>
    %201 = vector.multi_reduction <add>, %200, %cst_133 [1] : vector<16x16xf32> to vector<16xf32>
    %202 = vector.shape_cast %201 : vector<16xf32> to vector<16x1xf32>
    %203 = tpu.reciprocal %202 {approx = true} : vector<16x1xf32> -> vector<16x1xf32>
    %204 = vector.broadcast %203 : vector<16x1xf32> to vector<16x16xf32>
    %205 = arith.mulf %200, %204 : vector<16x16xf32>
    %cst_134 = arith.constant dense<0.000000e+00> : vector<16x8xf32>
    %206 = tpu.matmul %205, %193, %cst_134 {dimension_numbers = #tpu.dot_dimension_numbers<[1], [0], [0], [1], [0, 0, 1, 1], [], []>} : vector<16x16xf32>, vector<16x8xf32>, vector<16x8xf32> -> vector<16x8xf32>
    %c3_135 = arith.constant 3 : index
    %c0_136 = arith.constant 0 : index
    %c0_137 = arith.constant 0 : index
    %207 = vector.load %arg14[%c3_135, %c0_136, %c0_137] : memref<8x8x32xf32, #tpu.memory_space<vmem>>, vector<1x8x32xf32>
    %208 = vector.shape_cast %207 : vector<1x8x32xf32> to vector<8x32xf32>
    %cst_138 = arith.constant dense<0.000000e+00> : vector<16x32xf32>
    %209 = tpu.matmul %206, %208, %cst_138 {dimension_numbers = #tpu.dot_dimension_numbers<[1], [0], [0], [1], [0, 0, 1, 1], [], []>} : vector<16x8xf32>, vector<8x32xf32>, vector<16x32xf32> -> vector<16x32xf32>
    %210 = arith.addf %170, %209 : vector<16x32xf32>
    %211 = arith.addf %7, %210 : vector<16x32xf32>
    %c0_139 = arith.constant 0 : index
    %c0_140 = arith.constant 0 : index
    %c0_141 = arith.constant 0 : index
    %212 = vector.load %arg16[%c0_139, %c0_140, %c0_141] : memref<2x1x32xf32, #tpu.memory_space<vmem>>, vector<1x1x32xf32>
    %213 = vector.shape_cast %212 : vector<1x1x32xf32> to vector<1x32xf32>
    %c0_142 = arith.constant 0 : index
    %c0_143 = arith.constant 0 : index
    %c0_144 = arith.constant 0 : index
    %214 = vector.load %arg17[%c0_142, %c0_143, %c0_144] : memref<2x1x32xf32, #tpu.memory_space<vmem>>, vector<1x1x32xf32>
    %215 = vector.shape_cast %214 : vector<1x1x32xf32> to vector<1x32xf32>
    %cst_145 = arith.constant dense<0.000000e+00> : vector<16xf32>
    %216 = vector.multi_reduction <add>, %211, %cst_145 [1] : vector<16x32xf32> to vector<16xf32>
    %217 = vector.shape_cast %216 : vector<16xf32> to vector<16x1xf32>
    %cst_146 = arith.constant 3.200000e+01 : f32
    %218 = vector.broadcast %cst_146 : f32 to vector<16x1xf32>
    %219 = arith.divf %217, %218 : vector<16x1xf32>
    %220 = vector.broadcast %219 : vector<16x1xf32> to vector<16x32xf32>
    %221 = arith.subf %211, %220 : vector<16x32xf32>
    %222 = arith.mulf %221, %221 : vector<16x32xf32>
    %cst_147 = arith.constant dense<0.000000e+00> : vector<16xf32>
    %223 = vector.multi_reduction <add>, %222, %cst_147 [1] : vector<16x32xf32> to vector<16xf32>
    %224 = vector.shape_cast %223 : vector<16xf32> to vector<16x1xf32>
    %cst_148 = arith.constant 3.200000e+01 : f32
    %225 = vector.broadcast %cst_148 : f32 to vector<16x1xf32>
    %226 = arith.divf %224, %225 : vector<16x1xf32>
    %cst_149 = arith.constant 9.99999974E-6 : f32
    %227 = vector.broadcast %cst_149 : f32 to vector<16x1xf32>
    %228 = arith.addf %226, %227 : vector<16x1xf32>
    %229 = math.rsqrt %228 : vector<16x1xf32>
    %230 = vector.broadcast %229 : vector<16x1xf32> to vector<16x32xf32>
    %231 = arith.mulf %221, %230 : vector<16x32xf32>
    %232 = vector.broadcast %213 : vector<1x32xf32> to vector<16x32xf32>
    %233 = arith.mulf %231, %232 : vector<16x32xf32>
    %234 = vector.broadcast %215 : vector<1x32xf32> to vector<16x32xf32>
    %235 = arith.addf %233, %234 : vector<16x32xf32>
    %c0_150 = arith.constant 0 : index
    %c0_151 = arith.constant 0 : index
    %c0_152 = arith.constant 0 : index
    %236 = vector.load %arg20[%c0_150, %c0_151, %c0_152] : memref<2x32x128xf32, #tpu.memory_space<vmem>>, vector<1x32x128xf32>
    %237 = vector.shape_cast %236 : vector<1x32x128xf32> to vector<32x128xf32>
    %cst_153 = arith.constant dense<0.000000e+00> : vector<16x128xf32>
    %238 = tpu.matmul %235, %237, %cst_153 {dimension_numbers = #tpu.dot_dimension_numbers<[1], [0], [0], [1], [0, 0, 1, 1], [], []>} : vector<16x32xf32>, vector<32x128xf32>, vector<16x128xf32> -> vector<16x128xf32>
    %c0_154 = arith.constant 0 : index
    %c0_155 = arith.constant 0 : index
    %c0_156 = arith.constant 0 : index
    %239 = vector.load %arg21[%c0_154, %c0_155, %c0_156] : memref<2x1x128xf32, #tpu.memory_space<vmem>>, vector<1x1x128xf32>
    %240 = vector.shape_cast %239 : vector<1x1x128xf32> to vector<1x128xf32>
    %241 = vector.broadcast %240 : vector<1x128xf32> to vector<16x128xf32>
    %242 = arith.addf %238, %241 : vector<16x128xf32>
    %cst_157 = arith.constant 0.000000e+00 : f32
    %243 = vector.broadcast %cst_157 : f32 to vector<16x128xf32>
    %244 = arith.maximumf %242, %243 : vector<16x128xf32>
    %c0_158 = arith.constant 0 : index
    %c0_159 = arith.constant 0 : index
    %c0_160 = arith.constant 0 : index
    %245 = vector.load %arg22[%c0_158, %c0_159, %c0_160] : memref<2x128x32xf32, #tpu.memory_space<vmem>>, vector<1x128x32xf32>
    %246 = vector.shape_cast %245 : vector<1x128x32xf32> to vector<128x32xf32>
    %cst_161 = arith.constant dense<0.000000e+00> : vector<16x32xf32>
    %247 = tpu.matmul %244, %246, %cst_161 {dimension_numbers = #tpu.dot_dimension_numbers<[1], [0], [0], [1], [0, 0, 1, 1], [], []>} : vector<16x128xf32>, vector<128x32xf32>, vector<16x32xf32> -> vector<16x32xf32>
    %c0_162 = arith.constant 0 : index
    %c0_163 = arith.constant 0 : index
    %c0_164 = arith.constant 0 : index
    %248 = vector.load %arg23[%c0_162, %c0_163, %c0_164] : memref<2x1x32xf32, #tpu.memory_space<vmem>>, vector<1x1x32xf32>
    %249 = vector.shape_cast %248 : vector<1x1x32xf32> to vector<1x32xf32>
    %250 = vector.broadcast %249 : vector<1x32xf32> to vector<16x32xf32>
    %251 = arith.addf %247, %250 : vector<16x32xf32>
    %252 = arith.addf %235, %251 : vector<16x32xf32>
    %c0_165 = arith.constant 0 : index
    %c0_166 = arith.constant 0 : index
    %c0_167 = arith.constant 0 : index
    %253 = vector.load %arg18[%c0_165, %c0_166, %c0_167] : memref<2x1x32xf32, #tpu.memory_space<vmem>>, vector<1x1x32xf32>
    %254 = vector.shape_cast %253 : vector<1x1x32xf32> to vector<1x32xf32>
    %c0_168 = arith.constant 0 : index
    %c0_169 = arith.constant 0 : index
    %c0_170 = arith.constant 0 : index
    %255 = vector.load %arg19[%c0_168, %c0_169, %c0_170] : memref<2x1x32xf32, #tpu.memory_space<vmem>>, vector<1x1x32xf32>
    %256 = vector.shape_cast %255 : vector<1x1x32xf32> to vector<1x32xf32>
    %cst_171 = arith.constant dense<0.000000e+00> : vector<16xf32>
    %257 = vector.multi_reduction <add>, %252, %cst_171 [1] : vector<16x32xf32> to vector<16xf32>
    %258 = vector.shape_cast %257 : vector<16xf32> to vector<16x1xf32>
    %cst_172 = arith.constant 3.200000e+01 : f32
    %259 = vector.broadcast %cst_172 : f32 to vector<16x1xf32>
    %260 = arith.divf %258, %259 : vector<16x1xf32>
    %261 = vector.broadcast %260 : vector<16x1xf32> to vector<16x32xf32>
    %262 = arith.subf %252, %261 : vector<16x32xf32>
    %263 = arith.mulf %262, %262 : vector<16x32xf32>
    %cst_173 = arith.constant dense<0.000000e+00> : vector<16xf32>
    %264 = vector.multi_reduction <add>, %263, %cst_173 [1] : vector<16x32xf32> to vector<16xf32>
    %265 = vector.shape_cast %264 : vector<16xf32> to vector<16x1xf32>
    %cst_174 = arith.constant 3.200000e+01 : f32
    %266 = vector.broadcast %cst_174 : f32 to vector<16x1xf32>
    %267 = arith.divf %265, %266 : vector<16x1xf32>
    %cst_175 = arith.constant 9.99999974E-6 : f32
    %268 = vector.broadcast %cst_175 : f32 to vector<16x1xf32>
    %269 = arith.addf %267, %268 : vector<16x1xf32>
    %270 = math.rsqrt %269 : vector<16x1xf32>
    %271 = vector.broadcast %270 : vector<16x1xf32> to vector<16x32xf32>
    %272 = arith.mulf %262, %271 : vector<16x32xf32>
    %273 = vector.broadcast %254 : vector<1x32xf32> to vector<16x32xf32>
    %274 = arith.mulf %272, %273 : vector<16x32xf32>
    %275 = vector.broadcast %256 : vector<1x32xf32> to vector<16x32xf32>
    %276 = arith.addf %274, %275 : vector<16x32xf32>
    %cst_176 = arith.constant 0.000000e+00 : f32
    %277 = vector.broadcast %cst_176 : f32 to vector<16x32xf32>
    %c1_177 = arith.constant 1 : index
    %c0_178 = arith.constant 0 : index
    %c0_179 = arith.constant 0 : index
    %278 = vector.load %arg15[%c1_177, %c0_178, %c0_179] : memref<2x1x32xf32, #tpu.memory_space<vmem>>, vector<1x1x32xf32>
    %279 = vector.shape_cast %278 : vector<1x1x32xf32> to vector<1x32xf32>
    %280 = vector.broadcast %279 : vector<1x32xf32> to vector<16x32xf32>
    %281 = arith.addf %277, %280 : vector<16x32xf32>
    %c4 = arith.constant 4 : index
    %c0_180 = arith.constant 0 : index
    %c0_181 = arith.constant 0 : index
    %282 = vector.load %arg8[%c4, %c0_180, %c0_181] : memref<8x32x8xf32, #tpu.memory_space<vmem>>, vector<1x32x8xf32>
    %283 = vector.shape_cast %282 : vector<1x32x8xf32> to vector<32x8xf32>
    %cst_182 = arith.constant dense<0.000000e+00> : vector<16x8xf32>
    %284 = tpu.matmul %276, %283, %cst_182 {dimension_numbers = #tpu.dot_dimension_numbers<[1], [0], [0], [1], [0, 0, 1, 1], [], []>} : vector<16x32xf32>, vector<32x8xf32>, vector<16x8xf32> -> vector<16x8xf32>
    %c4_183 = arith.constant 4 : index
    %c0_184 = arith.constant 0 : index
    %c0_185 = arith.constant 0 : index
    %285 = vector.load %arg9[%c4_183, %c0_184, %c0_185] : memref<8x1x8xf32, #tpu.memory_space<vmem>>, vector<1x1x8xf32>
    %286 = vector.shape_cast %285 : vector<1x1x8xf32> to vector<1x8xf32>
    %287 = vector.broadcast %286 : vector<1x8xf32> to vector<16x8xf32>
    %288 = arith.addf %284, %287 : vector<16x8xf32>
    %cst_186 = arith.constant 0.353553385 : f32
    %289 = vector.broadcast %cst_186 : f32 to vector<16x8xf32>
    %290 = arith.mulf %288, %289 : vector<16x8xf32>
    %c4_187 = arith.constant 4 : index
    %c0_188 = arith.constant 0 : index
    %c0_189 = arith.constant 0 : index
    %291 = vector.load %arg10[%c4_187, %c0_188, %c0_189] : memref<8x32x8xf32, #tpu.memory_space<vmem>>, vector<1x32x8xf32>
    %292 = vector.shape_cast %291 : vector<1x32x8xf32> to vector<32x8xf32>
    %cst_190 = arith.constant dense<0.000000e+00> : vector<16x8xf32>
    %293 = tpu.matmul %276, %292, %cst_190 {dimension_numbers = #tpu.dot_dimension_numbers<[1], [0], [0], [1], [0, 0, 1, 1], [], []>} : vector<16x32xf32>, vector<32x8xf32>, vector<16x8xf32> -> vector<16x8xf32>
    %c4_191 = arith.constant 4 : index
    %c0_192 = arith.constant 0 : index
    %c0_193 = arith.constant 0 : index
    %294 = vector.load %arg11[%c4_191, %c0_192, %c0_193] : memref<8x1x8xf32, #tpu.memory_space<vmem>>, vector<1x1x8xf32>
    %295 = vector.shape_cast %294 : vector<1x1x8xf32> to vector<1x8xf32>
    %296 = vector.broadcast %295 : vector<1x8xf32> to vector<16x8xf32>
    %297 = arith.addf %293, %296 : vector<16x8xf32>
    %c4_194 = arith.constant 4 : index
    %c0_195 = arith.constant 0 : index
    %c0_196 = arith.constant 0 : index
    %298 = vector.load %arg12[%c4_194, %c0_195, %c0_196] : memref<8x32x8xf32, #tpu.memory_space<vmem>>, vector<1x32x8xf32>
    %299 = vector.shape_cast %298 : vector<1x32x8xf32> to vector<32x8xf32>
    %cst_197 = arith.constant dense<0.000000e+00> : vector<16x8xf32>
    %300 = tpu.matmul %276, %299, %cst_197 {dimension_numbers = #tpu.dot_dimension_numbers<[1], [0], [0], [1], [0, 0, 1, 1], [], []>} : vector<16x32xf32>, vector<32x8xf32>, vector<16x8xf32> -> vector<16x8xf32>
    %c4_198 = arith.constant 4 : index
    %c0_199 = arith.constant 0 : index
    %c0_200 = arith.constant 0 : index
    %301 = vector.load %arg13[%c4_198, %c0_199, %c0_200] : memref<8x1x8xf32, #tpu.memory_space<vmem>>, vector<1x1x8xf32>
    %302 = vector.shape_cast %301 : vector<1x1x8xf32> to vector<1x8xf32>
    %303 = vector.broadcast %302 : vector<1x8xf32> to vector<16x8xf32>
    %304 = arith.addf %300, %303 : vector<16x8xf32>
    %cst_201 = arith.constant dense<0.000000e+00> : vector<16x16xf32>
    %305 = tpu.matmul %290, %297, %cst_201 {dimension_numbers = #tpu.dot_dimension_numbers<[1], [1], [0], [0], [0, 0, 1, 0], [], []>} : vector<16x8xf32>, vector<16x8xf32>, vector<16x16xf32> -> vector<16x16xf32>
    %306 = arith.addf %305, %45 : vector<16x16xf32>
    %cst_202 = arith.constant dense<0xFF800000> : vector<16xf32>
    %307 = vector.multi_reduction <maximumf>, %306, %cst_202 [1] : vector<16x16xf32> to vector<16xf32>
    %308 = vector.shape_cast %307 : vector<16xf32> to vector<16x1xf32>
    %309 = vector.broadcast %308 : vector<16x1xf32> to vector<16x16xf32>
    %310 = arith.subf %306, %309 : vector<16x16xf32>
    %311 = math.exp %310 : vector<16x16xf32>
    %cst_203 = arith.constant dense<0.000000e+00> : vector<16xf32>
    %312 = vector.multi_reduction <add>, %311, %cst_203 [1] : vector<16x16xf32> to vector<16xf32>
    %313 = vector.shape_cast %312 : vector<16xf32> to vector<16x1xf32>
    %314 = tpu.reciprocal %313 {approx = true} : vector<16x1xf32> -> vector<16x1xf32>
    %315 = vector.broadcast %314 : vector<16x1xf32> to vector<16x16xf32>
    %316 = arith.mulf %311, %315 : vector<16x16xf32>
    %cst_204 = arith.constant dense<0.000000e+00> : vector<16x8xf32>
    %317 = tpu.matmul %316, %304, %cst_204 {dimension_numbers = #tpu.dot_dimension_numbers<[1], [0], [0], [1], [0, 0, 1, 1], [], []>} : vector<16x16xf32>, vector<16x8xf32>, vector<16x8xf32> -> vector<16x8xf32>
    %c4_205 = arith.constant 4 : index
    %c0_206 = arith.constant 0 : index
    %c0_207 = arith.constant 0 : index
    %318 = vector.load %arg14[%c4_205, %c0_206, %c0_207] : memref<8x8x32xf32, #tpu.memory_space<vmem>>, vector<1x8x32xf32>
    %319 = vector.shape_cast %318 : vector<1x8x32xf32> to vector<8x32xf32>
    %cst_208 = arith.constant dense<0.000000e+00> : vector<16x32xf32>
    %320 = tpu.matmul %317, %319, %cst_208 {dimension_numbers = #tpu.dot_dimension_numbers<[1], [0], [0], [1], [0, 0, 1, 1], [], []>} : vector<16x8xf32>, vector<8x32xf32>, vector<16x32xf32> -> vector<16x32xf32>
    %321 = arith.addf %281, %320 : vector<16x32xf32>
    %c5 = arith.constant 5 : index
    %c0_209 = arith.constant 0 : index
    %c0_210 = arith.constant 0 : index
    %322 = vector.load %arg8[%c5, %c0_209, %c0_210] : memref<8x32x8xf32, #tpu.memory_space<vmem>>, vector<1x32x8xf32>
    %323 = vector.shape_cast %322 : vector<1x32x8xf32> to vector<32x8xf32>
    %cst_211 = arith.constant dense<0.000000e+00> : vector<16x8xf32>
    %324 = tpu.matmul %276, %323, %cst_211 {dimension_numbers = #tpu.dot_dimension_numbers<[1], [0], [0], [1], [0, 0, 1, 1], [], []>} : vector<16x32xf32>, vector<32x8xf32>, vector<16x8xf32> -> vector<16x8xf32>
    %c5_212 = arith.constant 5 : index
    %c0_213 = arith.constant 0 : index
    %c0_214 = arith.constant 0 : index
    %325 = vector.load %arg9[%c5_212, %c0_213, %c0_214] : memref<8x1x8xf32, #tpu.memory_space<vmem>>, vector<1x1x8xf32>
    %326 = vector.shape_cast %325 : vector<1x1x8xf32> to vector<1x8xf32>
    %327 = vector.broadcast %326 : vector<1x8xf32> to vector<16x8xf32>
    %328 = arith.addf %324, %327 : vector<16x8xf32>
    %cst_215 = arith.constant 0.353553385 : f32
    %329 = vector.broadcast %cst_215 : f32 to vector<16x8xf32>
    %330 = arith.mulf %328, %329 : vector<16x8xf32>
    %c5_216 = arith.constant 5 : index
    %c0_217 = arith.constant 0 : index
    %c0_218 = arith.constant 0 : index
    %331 = vector.load %arg10[%c5_216, %c0_217, %c0_218] : memref<8x32x8xf32, #tpu.memory_space<vmem>>, vector<1x32x8xf32>
    %332 = vector.shape_cast %331 : vector<1x32x8xf32> to vector<32x8xf32>
    %cst_219 = arith.constant dense<0.000000e+00> : vector<16x8xf32>
    %333 = tpu.matmul %276, %332, %cst_219 {dimension_numbers = #tpu.dot_dimension_numbers<[1], [0], [0], [1], [0, 0, 1, 1], [], []>} : vector<16x32xf32>, vector<32x8xf32>, vector<16x8xf32> -> vector<16x8xf32>
    %c5_220 = arith.constant 5 : index
    %c0_221 = arith.constant 0 : index
    %c0_222 = arith.constant 0 : index
    %334 = vector.load %arg11[%c5_220, %c0_221, %c0_222] : memref<8x1x8xf32, #tpu.memory_space<vmem>>, vector<1x1x8xf32>
    %335 = vector.shape_cast %334 : vector<1x1x8xf32> to vector<1x8xf32>
    %336 = vector.broadcast %335 : vector<1x8xf32> to vector<16x8xf32>
    %337 = arith.addf %333, %336 : vector<16x8xf32>
    %c5_223 = arith.constant 5 : index
    %c0_224 = arith.constant 0 : index
    %c0_225 = arith.constant 0 : index
    %338 = vector.load %arg12[%c5_223, %c0_224, %c0_225] : memref<8x32x8xf32, #tpu.memory_space<vmem>>, vector<1x32x8xf32>
    %339 = vector.shape_cast %338 : vector<1x32x8xf32> to vector<32x8xf32>
    %cst_226 = arith.constant dense<0.000000e+00> : vector<16x8xf32>
    %340 = tpu.matmul %276, %339, %cst_226 {dimension_numbers = #tpu.dot_dimension_numbers<[1], [0], [0], [1], [0, 0, 1, 1], [], []>} : vector<16x32xf32>, vector<32x8xf32>, vector<16x8xf32> -> vector<16x8xf32>
    %c5_227 = arith.constant 5 : index
    %c0_228 = arith.constant 0 : index
    %c0_229 = arith.constant 0 : index
    %341 = vector.load %arg13[%c5_227, %c0_228, %c0_229] : memref<8x1x8xf32, #tpu.memory_space<vmem>>, vector<1x1x8xf32>
    %342 = vector.shape_cast %341 : vector<1x1x8xf32> to vector<1x8xf32>
    %343 = vector.broadcast %342 : vector<1x8xf32> to vector<16x8xf32>
    %344 = arith.addf %340, %343 : vector<16x8xf32>
    %cst_230 = arith.constant dense<0.000000e+00> : vector<16x16xf32>
    %345 = tpu.matmul %330, %337, %cst_230 {dimension_numbers = #tpu.dot_dimension_numbers<[1], [1], [0], [0], [0, 0, 1, 0], [], []>} : vector<16x8xf32>, vector<16x8xf32>, vector<16x16xf32> -> vector<16x16xf32>
    %346 = arith.addf %345, %45 : vector<16x16xf32>
    %cst_231 = arith.constant dense<0xFF800000> : vector<16xf32>
    %347 = vector.multi_reduction <maximumf>, %346, %cst_231 [1] : vector<16x16xf32> to vector<16xf32>
    %348 = vector.shape_cast %347 : vector<16xf32> to vector<16x1xf32>
    %349 = vector.broadcast %348 : vector<16x1xf32> to vector<16x16xf32>
    %350 = arith.subf %346, %349 : vector<16x16xf32>
    %351 = math.exp %350 : vector<16x16xf32>
    %cst_232 = arith.constant dense<0.000000e+00> : vector<16xf32>
    %352 = vector.multi_reduction <add>, %351, %cst_232 [1] : vector<16x16xf32> to vector<16xf32>
    %353 = vector.shape_cast %352 : vector<16xf32> to vector<16x1xf32>
    %354 = tpu.reciprocal %353 {approx = true} : vector<16x1xf32> -> vector<16x1xf32>
    %355 = vector.broadcast %354 : vector<16x1xf32> to vector<16x16xf32>
    %356 = arith.mulf %351, %355 : vector<16x16xf32>
    %cst_233 = arith.constant dense<0.000000e+00> : vector<16x8xf32>
    %357 = tpu.matmul %356, %344, %cst_233 {dimension_numbers = #tpu.dot_dimension_numbers<[1], [0], [0], [1], [0, 0, 1, 1], [], []>} : vector<16x16xf32>, vector<16x8xf32>, vector<16x8xf32> -> vector<16x8xf32>
    %c5_234 = arith.constant 5 : index
    %c0_235 = arith.constant 0 : index
    %c0_236 = arith.constant 0 : index
    %358 = vector.load %arg14[%c5_234, %c0_235, %c0_236] : memref<8x8x32xf32, #tpu.memory_space<vmem>>, vector<1x8x32xf32>
    %359 = vector.shape_cast %358 : vector<1x8x32xf32> to vector<8x32xf32>
    %cst_237 = arith.constant dense<0.000000e+00> : vector<16x32xf32>
    %360 = tpu.matmul %357, %359, %cst_237 {dimension_numbers = #tpu.dot_dimension_numbers<[1], [0], [0], [1], [0, 0, 1, 1], [], []>} : vector<16x8xf32>, vector<8x32xf32>, vector<16x32xf32> -> vector<16x32xf32>
    %361 = arith.addf %321, %360 : vector<16x32xf32>
    %c6 = arith.constant 6 : index
    %c0_238 = arith.constant 0 : index
    %c0_239 = arith.constant 0 : index
    %362 = vector.load %arg8[%c6, %c0_238, %c0_239] : memref<8x32x8xf32, #tpu.memory_space<vmem>>, vector<1x32x8xf32>
    %363 = vector.shape_cast %362 : vector<1x32x8xf32> to vector<32x8xf32>
    %cst_240 = arith.constant dense<0.000000e+00> : vector<16x8xf32>
    %364 = tpu.matmul %276, %363, %cst_240 {dimension_numbers = #tpu.dot_dimension_numbers<[1], [0], [0], [1], [0, 0, 1, 1], [], []>} : vector<16x32xf32>, vector<32x8xf32>, vector<16x8xf32> -> vector<16x8xf32>
    %c6_241 = arith.constant 6 : index
    %c0_242 = arith.constant 0 : index
    %c0_243 = arith.constant 0 : index
    %365 = vector.load %arg9[%c6_241, %c0_242, %c0_243] : memref<8x1x8xf32, #tpu.memory_space<vmem>>, vector<1x1x8xf32>
    %366 = vector.shape_cast %365 : vector<1x1x8xf32> to vector<1x8xf32>
    %367 = vector.broadcast %366 : vector<1x8xf32> to vector<16x8xf32>
    %368 = arith.addf %364, %367 : vector<16x8xf32>
    %cst_244 = arith.constant 0.353553385 : f32
    %369 = vector.broadcast %cst_244 : f32 to vector<16x8xf32>
    %370 = arith.mulf %368, %369 : vector<16x8xf32>
    %c6_245 = arith.constant 6 : index
    %c0_246 = arith.constant 0 : index
    %c0_247 = arith.constant 0 : index
    %371 = vector.load %arg10[%c6_245, %c0_246, %c0_247] : memref<8x32x8xf32, #tpu.memory_space<vmem>>, vector<1x32x8xf32>
    %372 = vector.shape_cast %371 : vector<1x32x8xf32> to vector<32x8xf32>
    %cst_248 = arith.constant dense<0.000000e+00> : vector<16x8xf32>
    %373 = tpu.matmul %276, %372, %cst_248 {dimension_numbers = #tpu.dot_dimension_numbers<[1], [0], [0], [1], [0, 0, 1, 1], [], []>} : vector<16x32xf32>, vector<32x8xf32>, vector<16x8xf32> -> vector<16x8xf32>
    %c6_249 = arith.constant 6 : index
    %c0_250 = arith.constant 0 : index
    %c0_251 = arith.constant 0 : index
    %374 = vector.load %arg11[%c6_249, %c0_250, %c0_251] : memref<8x1x8xf32, #tpu.memory_space<vmem>>, vector<1x1x8xf32>
    %375 = vector.shape_cast %374 : vector<1x1x8xf32> to vector<1x8xf32>
    %376 = vector.broadcast %375 : vector<1x8xf32> to vector<16x8xf32>
    %377 = arith.addf %373, %376 : vector<16x8xf32>
    %c6_252 = arith.constant 6 : index
    %c0_253 = arith.constant 0 : index
    %c0_254 = arith.constant 0 : index
    %378 = vector.load %arg12[%c6_252, %c0_253, %c0_254] : memref<8x32x8xf32, #tpu.memory_space<vmem>>, vector<1x32x8xf32>
    %379 = vector.shape_cast %378 : vector<1x32x8xf32> to vector<32x8xf32>
    %cst_255 = arith.constant dense<0.000000e+00> : vector<16x8xf32>
    %380 = tpu.matmul %276, %379, %cst_255 {dimension_numbers = #tpu.dot_dimension_numbers<[1], [0], [0], [1], [0, 0, 1, 1], [], []>} : vector<16x32xf32>, vector<32x8xf32>, vector<16x8xf32> -> vector<16x8xf32>
    %c6_256 = arith.constant 6 : index
    %c0_257 = arith.constant 0 : index
    %c0_258 = arith.constant 0 : index
    %381 = vector.load %arg13[%c6_256, %c0_257, %c0_258] : memref<8x1x8xf32, #tpu.memory_space<vmem>>, vector<1x1x8xf32>
    %382 = vector.shape_cast %381 : vector<1x1x8xf32> to vector<1x8xf32>
    %383 = vector.broadcast %382 : vector<1x8xf32> to vector<16x8xf32>
    %384 = arith.addf %380, %383 : vector<16x8xf32>
    %cst_259 = arith.constant dense<0.000000e+00> : vector<16x16xf32>
    %385 = tpu.matmul %370, %377, %cst_259 {dimension_numbers = #tpu.dot_dimension_numbers<[1], [1], [0], [0], [0, 0, 1, 0], [], []>} : vector<16x8xf32>, vector<16x8xf32>, vector<16x16xf32> -> vector<16x16xf32>
    %386 = arith.addf %385, %45 : vector<16x16xf32>
    %cst_260 = arith.constant dense<0xFF800000> : vector<16xf32>
    %387 = vector.multi_reduction <maximumf>, %386, %cst_260 [1] : vector<16x16xf32> to vector<16xf32>
    %388 = vector.shape_cast %387 : vector<16xf32> to vector<16x1xf32>
    %389 = vector.broadcast %388 : vector<16x1xf32> to vector<16x16xf32>
    %390 = arith.subf %386, %389 : vector<16x16xf32>
    %391 = math.exp %390 : vector<16x16xf32>
    %cst_261 = arith.constant dense<0.000000e+00> : vector<16xf32>
    %392 = vector.multi_reduction <add>, %391, %cst_261 [1] : vector<16x16xf32> to vector<16xf32>
    %393 = vector.shape_cast %392 : vector<16xf32> to vector<16x1xf32>
    %394 = tpu.reciprocal %393 {approx = true} : vector<16x1xf32> -> vector<16x1xf32>
    %395 = vector.broadcast %394 : vector<16x1xf32> to vector<16x16xf32>
    %396 = arith.mulf %391, %395 : vector<16x16xf32>
    %cst_262 = arith.constant dense<0.000000e+00> : vector<16x8xf32>
    %397 = tpu.matmul %396, %384, %cst_262 {dimension_numbers = #tpu.dot_dimension_numbers<[1], [0], [0], [1], [0, 0, 1, 1], [], []>} : vector<16x16xf32>, vector<16x8xf32>, vector<16x8xf32> -> vector<16x8xf32>
    %c6_263 = arith.constant 6 : index
    %c0_264 = arith.constant 0 : index
    %c0_265 = arith.constant 0 : index
    %398 = vector.load %arg14[%c6_263, %c0_264, %c0_265] : memref<8x8x32xf32, #tpu.memory_space<vmem>>, vector<1x8x32xf32>
    %399 = vector.shape_cast %398 : vector<1x8x32xf32> to vector<8x32xf32>
    %cst_266 = arith.constant dense<0.000000e+00> : vector<16x32xf32>
    %400 = tpu.matmul %397, %399, %cst_266 {dimension_numbers = #tpu.dot_dimension_numbers<[1], [0], [0], [1], [0, 0, 1, 1], [], []>} : vector<16x8xf32>, vector<8x32xf32>, vector<16x32xf32> -> vector<16x32xf32>
    %401 = arith.addf %361, %400 : vector<16x32xf32>
    %c7 = arith.constant 7 : index
    %c0_267 = arith.constant 0 : index
    %c0_268 = arith.constant 0 : index
    %402 = vector.load %arg8[%c7, %c0_267, %c0_268] : memref<8x32x8xf32, #tpu.memory_space<vmem>>, vector<1x32x8xf32>
    %403 = vector.shape_cast %402 : vector<1x32x8xf32> to vector<32x8xf32>
    %cst_269 = arith.constant dense<0.000000e+00> : vector<16x8xf32>
    %404 = tpu.matmul %276, %403, %cst_269 {dimension_numbers = #tpu.dot_dimension_numbers<[1], [0], [0], [1], [0, 0, 1, 1], [], []>} : vector<16x32xf32>, vector<32x8xf32>, vector<16x8xf32> -> vector<16x8xf32>
    %c7_270 = arith.constant 7 : index
    %c0_271 = arith.constant 0 : index
    %c0_272 = arith.constant 0 : index
    %405 = vector.load %arg9[%c7_270, %c0_271, %c0_272] : memref<8x1x8xf32, #tpu.memory_space<vmem>>, vector<1x1x8xf32>
    %406 = vector.shape_cast %405 : vector<1x1x8xf32> to vector<1x8xf32>
    %407 = vector.broadcast %406 : vector<1x8xf32> to vector<16x8xf32>
    %408 = arith.addf %404, %407 : vector<16x8xf32>
    %cst_273 = arith.constant 0.353553385 : f32
    %409 = vector.broadcast %cst_273 : f32 to vector<16x8xf32>
    %410 = arith.mulf %408, %409 : vector<16x8xf32>
    %c7_274 = arith.constant 7 : index
    %c0_275 = arith.constant 0 : index
    %c0_276 = arith.constant 0 : index
    %411 = vector.load %arg10[%c7_274, %c0_275, %c0_276] : memref<8x32x8xf32, #tpu.memory_space<vmem>>, vector<1x32x8xf32>
    %412 = vector.shape_cast %411 : vector<1x32x8xf32> to vector<32x8xf32>
    %cst_277 = arith.constant dense<0.000000e+00> : vector<16x8xf32>
    %413 = tpu.matmul %276, %412, %cst_277 {dimension_numbers = #tpu.dot_dimension_numbers<[1], [0], [0], [1], [0, 0, 1, 1], [], []>} : vector<16x32xf32>, vector<32x8xf32>, vector<16x8xf32> -> vector<16x8xf32>
    %c7_278 = arith.constant 7 : index
    %c0_279 = arith.constant 0 : index
    %c0_280 = arith.constant 0 : index
    %414 = vector.load %arg11[%c7_278, %c0_279, %c0_280] : memref<8x1x8xf32, #tpu.memory_space<vmem>>, vector<1x1x8xf32>
    %415 = vector.shape_cast %414 : vector<1x1x8xf32> to vector<1x8xf32>
    %416 = vector.broadcast %415 : vector<1x8xf32> to vector<16x8xf32>
    %417 = arith.addf %413, %416 : vector<16x8xf32>
    %c7_281 = arith.constant 7 : index
    %c0_282 = arith.constant 0 : index
    %c0_283 = arith.constant 0 : index
    %418 = vector.load %arg12[%c7_281, %c0_282, %c0_283] : memref<8x32x8xf32, #tpu.memory_space<vmem>>, vector<1x32x8xf32>
    %419 = vector.shape_cast %418 : vector<1x32x8xf32> to vector<32x8xf32>
    %cst_284 = arith.constant dense<0.000000e+00> : vector<16x8xf32>
    %420 = tpu.matmul %276, %419, %cst_284 {dimension_numbers = #tpu.dot_dimension_numbers<[1], [0], [0], [1], [0, 0, 1, 1], [], []>} : vector<16x32xf32>, vector<32x8xf32>, vector<16x8xf32> -> vector<16x8xf32>
    %c7_285 = arith.constant 7 : index
    %c0_286 = arith.constant 0 : index
    %c0_287 = arith.constant 0 : index
    %421 = vector.load %arg13[%c7_285, %c0_286, %c0_287] : memref<8x1x8xf32, #tpu.memory_space<vmem>>, vector<1x1x8xf32>
    %422 = vector.shape_cast %421 : vector<1x1x8xf32> to vector<1x8xf32>
    %423 = vector.broadcast %422 : vector<1x8xf32> to vector<16x8xf32>
    %424 = arith.addf %420, %423 : vector<16x8xf32>
    %cst_288 = arith.constant dense<0.000000e+00> : vector<16x16xf32>
    %425 = tpu.matmul %410, %417, %cst_288 {dimension_numbers = #tpu.dot_dimension_numbers<[1], [1], [0], [0], [0, 0, 1, 0], [], []>} : vector<16x8xf32>, vector<16x8xf32>, vector<16x16xf32> -> vector<16x16xf32>
    %426 = arith.addf %425, %45 : vector<16x16xf32>
    %cst_289 = arith.constant dense<0xFF800000> : vector<16xf32>
    %427 = vector.multi_reduction <maximumf>, %426, %cst_289 [1] : vector<16x16xf32> to vector<16xf32>
    %428 = vector.shape_cast %427 : vector<16xf32> to vector<16x1xf32>
    %429 = vector.broadcast %428 : vector<16x1xf32> to vector<16x16xf32>
    %430 = arith.subf %426, %429 : vector<16x16xf32>
    %431 = math.exp %430 : vector<16x16xf32>
    %cst_290 = arith.constant dense<0.000000e+00> : vector<16xf32>
    %432 = vector.multi_reduction <add>, %431, %cst_290 [1] : vector<16x16xf32> to vector<16xf32>
    %433 = vector.shape_cast %432 : vector<16xf32> to vector<16x1xf32>
    %434 = tpu.reciprocal %433 {approx = true} : vector<16x1xf32> -> vector<16x1xf32>
    %435 = vector.broadcast %434 : vector<16x1xf32> to vector<16x16xf32>
    %436 = arith.mulf %431, %435 : vector<16x16xf32>
    %cst_291 = arith.constant dense<0.000000e+00> : vector<16x8xf32>
    %437 = tpu.matmul %436, %424, %cst_291 {dimension_numbers = #tpu.dot_dimension_numbers<[1], [0], [0], [1], [0, 0, 1, 1], [], []>} : vector<16x16xf32>, vector<16x8xf32>, vector<16x8xf32> -> vector<16x8xf32>
    %c7_292 = arith.constant 7 : index
    %c0_293 = arith.constant 0 : index
    %c0_294 = arith.constant 0 : index
    %438 = vector.load %arg14[%c7_292, %c0_293, %c0_294] : memref<8x8x32xf32, #tpu.memory_space<vmem>>, vector<1x8x32xf32>
    %439 = vector.shape_cast %438 : vector<1x8x32xf32> to vector<8x32xf32>
    %cst_295 = arith.constant dense<0.000000e+00> : vector<16x32xf32>
    %440 = tpu.matmul %437, %439, %cst_295 {dimension_numbers = #tpu.dot_dimension_numbers<[1], [0], [0], [1], [0, 0, 1, 1], [], []>} : vector<16x8xf32>, vector<8x32xf32>, vector<16x32xf32> -> vector<16x32xf32>
    %441 = arith.addf %401, %440 : vector<16x32xf32>
    %442 = arith.addf %276, %441 : vector<16x32xf32>
    %c1_296 = arith.constant 1 : index
    %c0_297 = arith.constant 0 : index
    %c0_298 = arith.constant 0 : index
    %443 = vector.load %arg16[%c1_296, %c0_297, %c0_298] : memref<2x1x32xf32, #tpu.memory_space<vmem>>, vector<1x1x32xf32>
    %444 = vector.shape_cast %443 : vector<1x1x32xf32> to vector<1x32xf32>
    %c1_299 = arith.constant 1 : index
    %c0_300 = arith.constant 0 : index
    %c0_301 = arith.constant 0 : index
    %445 = vector.load %arg17[%c1_299, %c0_300, %c0_301] : memref<2x1x32xf32, #tpu.memory_space<vmem>>, vector<1x1x32xf32>
    %446 = vector.shape_cast %445 : vector<1x1x32xf32> to vector<1x32xf32>
    %cst_302 = arith.constant dense<0.000000e+00> : vector<16xf32>
    %447 = vector.multi_reduction <add>, %442, %cst_302 [1] : vector<16x32xf32> to vector<16xf32>
    %448 = vector.shape_cast %447 : vector<16xf32> to vector<16x1xf32>
    %cst_303 = arith.constant 3.200000e+01 : f32
    %449 = vector.broadcast %cst_303 : f32 to vector<16x1xf32>
    %450 = arith.divf %448, %449 : vector<16x1xf32>
    %451 = vector.broadcast %450 : vector<16x1xf32> to vector<16x32xf32>
    %452 = arith.subf %442, %451 : vector<16x32xf32>
    %453 = arith.mulf %452, %452 : vector<16x32xf32>
    %cst_304 = arith.constant dense<0.000000e+00> : vector<16xf32>
    %454 = vector.multi_reduction <add>, %453, %cst_304 [1] : vector<16x32xf32> to vector<16xf32>
    %455 = vector.shape_cast %454 : vector<16xf32> to vector<16x1xf32>
    %cst_305 = arith.constant 3.200000e+01 : f32
    %456 = vector.broadcast %cst_305 : f32 to vector<16x1xf32>
    %457 = arith.divf %455, %456 : vector<16x1xf32>
    %cst_306 = arith.constant 9.99999974E-6 : f32
    %458 = vector.broadcast %cst_306 : f32 to vector<16x1xf32>
    %459 = arith.addf %457, %458 : vector<16x1xf32>
    %460 = math.rsqrt %459 : vector<16x1xf32>
    %461 = vector.broadcast %460 : vector<16x1xf32> to vector<16x32xf32>
    %462 = arith.mulf %452, %461 : vector<16x32xf32>
    %463 = vector.broadcast %444 : vector<1x32xf32> to vector<16x32xf32>
    %464 = arith.mulf %462, %463 : vector<16x32xf32>
    %465 = vector.broadcast %446 : vector<1x32xf32> to vector<16x32xf32>
    %466 = arith.addf %464, %465 : vector<16x32xf32>
    %c1_307 = arith.constant 1 : index
    %c0_308 = arith.constant 0 : index
    %c0_309 = arith.constant 0 : index
    %467 = vector.load %arg20[%c1_307, %c0_308, %c0_309] : memref<2x32x128xf32, #tpu.memory_space<vmem>>, vector<1x32x128xf32>
    %468 = vector.shape_cast %467 : vector<1x32x128xf32> to vector<32x128xf32>
    %cst_310 = arith.constant dense<0.000000e+00> : vector<16x128xf32>
    %469 = tpu.matmul %466, %468, %cst_310 {dimension_numbers = #tpu.dot_dimension_numbers<[1], [0], [0], [1], [0, 0, 1, 1], [], []>} : vector<16x32xf32>, vector<32x128xf32>, vector<16x128xf32> -> vector<16x128xf32>
    %c1_311 = arith.constant 1 : index
    %c0_312 = arith.constant 0 : index
    %c0_313 = arith.constant 0 : index
    %470 = vector.load %arg21[%c1_311, %c0_312, %c0_313] : memref<2x1x128xf32, #tpu.memory_space<vmem>>, vector<1x1x128xf32>
    %471 = vector.shape_cast %470 : vector<1x1x128xf32> to vector<1x128xf32>
    %472 = vector.broadcast %471 : vector<1x128xf32> to vector<16x128xf32>
    %473 = arith.addf %469, %472 : vector<16x128xf32>
    %cst_314 = arith.constant 0.000000e+00 : f32
    %474 = vector.broadcast %cst_314 : f32 to vector<16x128xf32>
    %475 = arith.maximumf %473, %474 : vector<16x128xf32>
    %c1_315 = arith.constant 1 : index
    %c0_316 = arith.constant 0 : index
    %c0_317 = arith.constant 0 : index
    %476 = vector.load %arg22[%c1_315, %c0_316, %c0_317] : memref<2x128x32xf32, #tpu.memory_space<vmem>>, vector<1x128x32xf32>
    %477 = vector.shape_cast %476 : vector<1x128x32xf32> to vector<128x32xf32>
    %cst_318 = arith.constant dense<0.000000e+00> : vector<16x32xf32>
    %478 = tpu.matmul %475, %477, %cst_318 {dimension_numbers = #tpu.dot_dimension_numbers<[1], [0], [0], [1], [0, 0, 1, 1], [], []>} : vector<16x128xf32>, vector<128x32xf32>, vector<16x32xf32> -> vector<16x32xf32>
    %c1_319 = arith.constant 1 : index
    %c0_320 = arith.constant 0 : index
    %c0_321 = arith.constant 0 : index
    %479 = vector.load %arg23[%c1_319, %c0_320, %c0_321] : memref<2x1x32xf32, #tpu.memory_space<vmem>>, vector<1x1x32xf32>
    %480 = vector.shape_cast %479 : vector<1x1x32xf32> to vector<1x32xf32>
    %481 = vector.broadcast %480 : vector<1x32xf32> to vector<16x32xf32>
    %482 = arith.addf %478, %481 : vector<16x32xf32>
    %483 = arith.addf %466, %482 : vector<16x32xf32>
    %c1_322 = arith.constant 1 : index
    %c0_323 = arith.constant 0 : index
    %c0_324 = arith.constant 0 : index
    %484 = vector.load %arg18[%c1_322, %c0_323, %c0_324] : memref<2x1x32xf32, #tpu.memory_space<vmem>>, vector<1x1x32xf32>
    %485 = vector.shape_cast %484 : vector<1x1x32xf32> to vector<1x32xf32>
    %c1_325 = arith.constant 1 : index
    %c0_326 = arith.constant 0 : index
    %c0_327 = arith.constant 0 : index
    %486 = vector.load %arg19[%c1_325, %c0_326, %c0_327] : memref<2x1x32xf32, #tpu.memory_space<vmem>>, vector<1x1x32xf32>
    %487 = vector.shape_cast %486 : vector<1x1x32xf32> to vector<1x32xf32>
    %cst_328 = arith.constant dense<0.000000e+00> : vector<16xf32>
    %488 = vector.multi_reduction <add>, %483, %cst_328 [1] : vector<16x32xf32> to vector<16xf32>
    %489 = vector.shape_cast %488 : vector<16xf32> to vector<16x1xf32>
    %cst_329 = arith.constant 3.200000e+01 : f32
    %490 = vector.broadcast %cst_329 : f32 to vector<16x1xf32>
    %491 = arith.divf %489, %490 : vector<16x1xf32>
    %492 = vector.broadcast %491 : vector<16x1xf32> to vector<16x32xf32>
    %493 = arith.subf %483, %492 : vector<16x32xf32>
    %494 = arith.mulf %493, %493 : vector<16x32xf32>
    %cst_330 = arith.constant dense<0.000000e+00> : vector<16xf32>
    %495 = vector.multi_reduction <add>, %494, %cst_330 [1] : vector<16x32xf32> to vector<16xf32>
    %496 = vector.shape_cast %495 : vector<16xf32> to vector<16x1xf32>
    %cst_331 = arith.constant 3.200000e+01 : f32
    %497 = vector.broadcast %cst_331 : f32 to vector<16x1xf32>
    %498 = arith.divf %496, %497 : vector<16x1xf32>
    %cst_332 = arith.constant 9.99999974E-6 : f32
    %499 = vector.broadcast %cst_332 : f32 to vector<16x1xf32>
    %500 = arith.addf %498, %499 : vector<16x1xf32>
    %501 = math.rsqrt %500 : vector<16x1xf32>
    %502 = vector.broadcast %501 : vector<16x1xf32> to vector<16x32xf32>
    %503 = arith.mulf %493, %502 : vector<16x32xf32>
    %504 = vector.broadcast %485 : vector<1x32xf32> to vector<16x32xf32>
    %505 = arith.mulf %503, %504 : vector<16x32xf32>
    %506 = vector.broadcast %487 : vector<1x32xf32> to vector<16x32xf32>
    %507 = arith.addf %505, %506 : vector<16x32xf32>
    %cst_333 = arith.constant 0.000000e+00 : f32
    %508 = vector.broadcast %cst_333 : f32 to vector<2x32xf32>
    %c0_334 = arith.constant 0 : index
    %c0_335 = arith.constant 0 : index
    %509 = vector.load %arg25[%c0_334, %c0_335] : memref<1x32xf32, #tpu.memory_space<vmem>>, vector<1x32xf32>
    %510 = vector.broadcast %509 : vector<1x32xf32> to vector<2x32xf32>
    %511 = arith.addf %508, %510 : vector<2x32xf32>
    %512 = vector.extract_strided_slice %507 {offsets = [0, 0], sizes = [2, 32], strides = [1, 1]} : vector<16x32xf32> to vector<2x32xf32>
    %c0_336 = arith.constant 0 : index
    %c0_337 = arith.constant 0 : index
    %c0_338 = arith.constant 0 : index
    %513 = vector.load %arg24[%c0_336, %c0_337, %c0_338] : memref<12x32x32xf32, #tpu.memory_space<vmem>>, vector<1x32x32xf32>
    %514 = vector.shape_cast %513 : vector<1x32x32xf32> to vector<32x32xf32>
    %cst_339 = arith.constant dense<0.000000e+00> : vector<2x32xf32>
    %515 = tpu.matmul %512, %514, %cst_339 {dimension_numbers = #tpu.dot_dimension_numbers<[1], [0], [0], [1], [0, 0, 1, 1], [], []>} : vector<2x32xf32>, vector<32x32xf32>, vector<2x32xf32> -> vector<2x32xf32>
    %516 = arith.addf %511, %515 : vector<2x32xf32>
    %517 = vector.extract_strided_slice %507 {offsets = [2, 0], sizes = [2, 32], strides = [1, 1]} : vector<16x32xf32> to vector<2x32xf32>
    %c1_340 = arith.constant 1 : index
    %c0_341 = arith.constant 0 : index
    %c0_342 = arith.constant 0 : index
    %518 = vector.load %arg24[%c1_340, %c0_341, %c0_342] : memref<12x32x32xf32, #tpu.memory_space<vmem>>, vector<1x32x32xf32>
    %519 = vector.shape_cast %518 : vector<1x32x32xf32> to vector<32x32xf32>
    %cst_343 = arith.constant dense<0.000000e+00> : vector<2x32xf32>
    %520 = tpu.matmul %517, %519, %cst_343 {dimension_numbers = #tpu.dot_dimension_numbers<[1], [0], [0], [1], [0, 0, 1, 1], [], []>} : vector<2x32xf32>, vector<32x32xf32>, vector<2x32xf32> -> vector<2x32xf32>
    %521 = arith.addf %516, %520 : vector<2x32xf32>
    %522 = vector.extract_strided_slice %507 {offsets = [4, 0], sizes = [2, 32], strides = [1, 1]} : vector<16x32xf32> to vector<2x32xf32>
    %c2_344 = arith.constant 2 : index
    %c0_345 = arith.constant 0 : index
    %c0_346 = arith.constant 0 : index
    %523 = vector.load %arg24[%c2_344, %c0_345, %c0_346] : memref<12x32x32xf32, #tpu.memory_space<vmem>>, vector<1x32x32xf32>
    %524 = vector.shape_cast %523 : vector<1x32x32xf32> to vector<32x32xf32>
    %cst_347 = arith.constant dense<0.000000e+00> : vector<2x32xf32>
    %525 = tpu.matmul %522, %524, %cst_347 {dimension_numbers = #tpu.dot_dimension_numbers<[1], [0], [0], [1], [0, 0, 1, 1], [], []>} : vector<2x32xf32>, vector<32x32xf32>, vector<2x32xf32> -> vector<2x32xf32>
    %526 = arith.addf %521, %525 : vector<2x32xf32>
    %527 = vector.extract_strided_slice %507 {offsets = [6, 0], sizes = [2, 32], strides = [1, 1]} : vector<16x32xf32> to vector<2x32xf32>
    %c3_348 = arith.constant 3 : index
    %c0_349 = arith.constant 0 : index
    %c0_350 = arith.constant 0 : index
    %528 = vector.load %arg24[%c3_348, %c0_349, %c0_350] : memref<12x32x32xf32, #tpu.memory_space<vmem>>, vector<1x32x32xf32>
    %529 = vector.shape_cast %528 : vector<1x32x32xf32> to vector<32x32xf32>
    %cst_351 = arith.constant dense<0.000000e+00> : vector<2x32xf32>
    %530 = tpu.matmul %527, %529, %cst_351 {dimension_numbers = #tpu.dot_dimension_numbers<[1], [0], [0], [1], [0, 0, 1, 1], [], []>} : vector<2x32xf32>, vector<32x32xf32>, vector<2x32xf32> -> vector<2x32xf32>
    %531 = arith.addf %526, %530 : vector<2x32xf32>
    %532 = vector.extract_strided_slice %507 {offsets = [8, 0], sizes = [2, 32], strides = [1, 1]} : vector<16x32xf32> to vector<2x32xf32>
    %c4_352 = arith.constant 4 : index
    %c0_353 = arith.constant 0 : index
    %c0_354 = arith.constant 0 : index
    %533 = vector.load %arg24[%c4_352, %c0_353, %c0_354] : memref<12x32x32xf32, #tpu.memory_space<vmem>>, vector<1x32x32xf32>
    %534 = vector.shape_cast %533 : vector<1x32x32xf32> to vector<32x32xf32>
    %cst_355 = arith.constant dense<0.000000e+00> : vector<2x32xf32>
    %535 = tpu.matmul %532, %534, %cst_355 {dimension_numbers = #tpu.dot_dimension_numbers<[1], [0], [0], [1], [0, 0, 1, 1], [], []>} : vector<2x32xf32>, vector<32x32xf32>, vector<2x32xf32> -> vector<2x32xf32>
    %536 = arith.addf %531, %535 : vector<2x32xf32>
    %537 = vector.extract_strided_slice %507 {offsets = [10, 0], sizes = [2, 32], strides = [1, 1]} : vector<16x32xf32> to vector<2x32xf32>
    %c5_356 = arith.constant 5 : index
    %c0_357 = arith.constant 0 : index
    %c0_358 = arith.constant 0 : index
    %538 = vector.load %arg24[%c5_356, %c0_357, %c0_358] : memref<12x32x32xf32, #tpu.memory_space<vmem>>, vector<1x32x32xf32>
    %539 = vector.shape_cast %538 : vector<1x32x32xf32> to vector<32x32xf32>
    %cst_359 = arith.constant dense<0.000000e+00> : vector<2x32xf32>
    %540 = tpu.matmul %537, %539, %cst_359 {dimension_numbers = #tpu.dot_dimension_numbers<[1], [0], [0], [1], [0, 0, 1, 1], [], []>} : vector<2x32xf32>, vector<32x32xf32>, vector<2x32xf32> -> vector<2x32xf32>
    %541 = arith.addf %536, %540 : vector<2x32xf32>
    %542 = vector.extract_strided_slice %507 {offsets = [12, 0], sizes = [2, 32], strides = [1, 1]} : vector<16x32xf32> to vector<2x32xf32>
    %c6_360 = arith.constant 6 : index
    %c0_361 = arith.constant 0 : index
    %c0_362 = arith.constant 0 : index
    %543 = vector.load %arg24[%c6_360, %c0_361, %c0_362] : memref<12x32x32xf32, #tpu.memory_space<vmem>>, vector<1x32x32xf32>
    %544 = vector.shape_cast %543 : vector<1x32x32xf32> to vector<32x32xf32>
    %cst_363 = arith.constant dense<0.000000e+00> : vector<2x32xf32>
    %545 = tpu.matmul %542, %544, %cst_363 {dimension_numbers = #tpu.dot_dimension_numbers<[1], [0], [0], [1], [0, 0, 1, 1], [], []>} : vector<2x32xf32>, vector<32x32xf32>, vector<2x32xf32> -> vector<2x32xf32>
    %546 = arith.addf %541, %545 : vector<2x32xf32>
    %547 = vector.extract_strided_slice %507 {offsets = [14, 0], sizes = [2, 32], strides = [1, 1]} : vector<16x32xf32> to vector<2x32xf32>
    %c7_364 = arith.constant 7 : index
    %c0_365 = arith.constant 0 : index
    %c0_366 = arith.constant 0 : index
    %548 = vector.load %arg24[%c7_364, %c0_365, %c0_366] : memref<12x32x32xf32, #tpu.memory_space<vmem>>, vector<1x32x32xf32>
    %549 = vector.shape_cast %548 : vector<1x32x32xf32> to vector<32x32xf32>
    %cst_367 = arith.constant dense<0.000000e+00> : vector<2x32xf32>
    %550 = tpu.matmul %547, %549, %cst_367 {dimension_numbers = #tpu.dot_dimension_numbers<[1], [0], [0], [1], [0, 0, 1, 1], [], []>} : vector<2x32xf32>, vector<32x32xf32>, vector<2x32xf32> -> vector<2x32xf32>
    %551 = arith.addf %546, %550 : vector<2x32xf32>
    %c0_368 = arith.constant 0 : index
    %c0_369 = arith.constant 0 : index
    %552 = vector.load %arg2[%c0_368, %c0_369] : memref<8x3xf32, #tpu.memory_space<vmem>>, vector<8x3xf32>
    %c0_370 = arith.constant 0 : index
    %c0_371 = arith.constant 0 : index
    %553 = vector.load %arg6[%c0_370, %c0_371] : memref<3x32xf32, #tpu.memory_space<vmem>>, vector<3x32xf32>
    %cst_372 = arith.constant dense<0.000000e+00> : vector<8x32xf32>
    %554 = tpu.matmul %552, %553, %cst_372 {dimension_numbers = #tpu.dot_dimension_numbers<[1], [0], [0], [1], [0, 0, 1, 1], [], []>} : vector<8x3xf32>, vector<3x32xf32>, vector<8x32xf32> -> vector<8x32xf32>
    %c0_373 = arith.constant 0 : index
    %c0_374 = arith.constant 0 : index
    %555 = vector.load %arg7[%c0_373, %c0_374] : memref<1x32xf32, #tpu.memory_space<vmem>>, vector<1x32xf32>
    %556 = vector.broadcast %555 : vector<1x32xf32> to vector<8x32xf32>
    %557 = arith.addf %554, %556 : vector<8x32xf32>
    %c0_375 = arith.constant 0 : index
    %c0_376 = arith.constant 0 : index
    %558 = vector.load %arg3[%c0_375, %c0_376] : memref<8x32xf32, #tpu.memory_space<vmem>>, vector<8x32xf32>
    %559 = arith.addf %557, %558 : vector<8x32xf32>
    %560 = tpu.iota {dimensions = array<i32: 0>} : vector<8x8xi32>
    %561 = tpu.iota {dimensions = array<i32: 1>} : vector<8x8xi32>
    %c2_i32_377 = arith.constant 2 : i32
    %c0_i32_378 = arith.constant 0 : i32
    %562 = arith.cmpi eq, %c2_i32_377, %c0_i32_378 : i32
    %c1_i32_379 = arith.constant 1 : i32
    %563 = arith.select %562, %c1_i32_379, %c2_i32_377 : i32
    %564 = vector.broadcast %563 : i32 to vector<8x8xi32>
    %565 = arith.remsi %560, %564 : vector<8x8xi32>
    %c0_i32_380 = arith.constant 0 : i32
    %566 = vector.broadcast %c0_i32_380 : i32 to vector<8x8xi32>
    %567 = arith.cmpi ne, %565, %566 : vector<8x8xi32>
    %c0_i32_381 = arith.constant 0 : i32
    %568 = vector.broadcast %c0_i32_381 : i32 to vector<8x8xi32>
    %569 = arith.cmpi slt, %565, %568 : vector<8x8xi32>
    %c0_i32_382 = arith.constant 0 : i32
    %570 = arith.cmpi slt, %563, %c0_i32_382 : i32
    %571 = vector.broadcast %570 : i1 to vector<8x8xi1>
    %572 = vector.broadcast %571 : vector<8x8xi1> to vector<8x8xi1>
    %573 = arith.xori %569, %572 : vector<8x8xi1>
    %574 = arith.andi %573, %567 : vector<8x8xi1>
    %575 = vector.broadcast %563 : i32 to vector<8x8xi32>
    %576 = arith.addi %565, %575 : vector<8x8xi32>
    %577 = arith.select %574, %576, %565 : vector<8x8xi1>, vector<8x8xi32>
    %c2_i32_383 = arith.constant 2 : i32
    %c0_i32_384 = arith.constant 0 : i32
    %578 = arith.cmpi eq, %c2_i32_383, %c0_i32_384 : i32
    %c1_i32_385 = arith.constant 1 : i32
    %579 = arith.select %578, %c1_i32_385, %c2_i32_383 : i32
    %580 = vector.broadcast %579 : i32 to vector<8x8xi32>
    %581 = arith.remsi %561, %580 : vector<8x8xi32>
    %c0_i32_386 = arith.constant 0 : i32
    %582 = vector.broadcast %c0_i32_386 : i32 to vector<8x8xi32>
    %583 = arith.cmpi ne, %581, %582 : vector<8x8xi32>
    %c0_i32_387 = arith.constant 0 : i32
    %584 = vector.broadcast %c0_i32_387 : i32 to vector<8x8xi32>
    %585 = arith.cmpi slt, %581, %584 : vector<8x8xi32>
    %c0_i32_388 = arith.constant 0 : i32
    %586 = arith.cmpi slt, %579, %c0_i32_388 : i32
    %587 = vector.broadcast %586 : i1 to vector<8x8xi1>
    %588 = vector.broadcast %587 : vector<8x8xi1> to vector<8x8xi1>
    %589 = arith.xori %585, %588 : vector<8x8xi1>
    %590 = arith.andi %589, %583 : vector<8x8xi1>
    %591 = vector.broadcast %579 : i32 to vector<8x8xi32>
    %592 = arith.addi %581, %591 : vector<8x8xi32>
    %593 = arith.select %590, %592, %581 : vector<8x8xi1>, vector<8x8xi32>
    %594 = arith.cmpi eq, %577, %593 : vector<8x8xi32>
    %cst_389 = arith.constant 0.000000e+00 : f32
    %cst_390 = arith.constant -1.000000e+30 : f32
    %595 = vector.broadcast %cst_389 : f32 to vector<8x8xf32>
    %596 = vector.broadcast %cst_390 : f32 to vector<8x8xf32>
    %597 = arith.select %594, %595, %596 : vector<8x8xi1>, vector<8x8xf32>
    %cst_391 = arith.constant 0.000000e+00 : f32
    %598 = vector.broadcast %cst_391 : f32 to vector<8x32xf32>
    %c0_392 = arith.constant 0 : index
    %c0_393 = arith.constant 0 : index
    %c0_394 = arith.constant 0 : index
    %599 = vector.load %arg15[%c0_392, %c0_393, %c0_394] : memref<2x1x32xf32, #tpu.memory_space<vmem>>, vector<1x1x32xf32>
    %600 = vector.shape_cast %599 : vector<1x1x32xf32> to vector<1x32xf32>
    %601 = vector.broadcast %600 : vector<1x32xf32> to vector<8x32xf32>
    %602 = arith.addf %598, %601 : vector<8x32xf32>
    %c0_395 = arith.constant 0 : index
    %c0_396 = arith.constant 0 : index
    %c0_397 = arith.constant 0 : index
    %603 = vector.load %arg8[%c0_395, %c0_396, %c0_397] : memref<8x32x8xf32, #tpu.memory_space<vmem>>, vector<1x32x8xf32>
    %604 = vector.shape_cast %603 : vector<1x32x8xf32> to vector<32x8xf32>
    %cst_398 = arith.constant dense<0.000000e+00> : vector<8x8xf32>
    %605 = tpu.matmul %559, %604, %cst_398 {dimension_numbers = #tpu.dot_dimension_numbers<[1], [0], [0], [1], [0, 0, 1, 1], [], []>} : vector<8x32xf32>, vector<32x8xf32>, vector<8x8xf32> -> vector<8x8xf32>
    %c0_399 = arith.constant 0 : index
    %c0_400 = arith.constant 0 : index
    %c0_401 = arith.constant 0 : index
    %606 = vector.load %arg9[%c0_399, %c0_400, %c0_401] : memref<8x1x8xf32, #tpu.memory_space<vmem>>, vector<1x1x8xf32>
    %607 = vector.shape_cast %606 : vector<1x1x8xf32> to vector<1x8xf32>
    %608 = vector.broadcast %607 : vector<1x8xf32> to vector<8x8xf32>
    %609 = arith.addf %605, %608 : vector<8x8xf32>
    %cst_402 = arith.constant 0.353553385 : f32
    %610 = vector.broadcast %cst_402 : f32 to vector<8x8xf32>
    %611 = arith.mulf %609, %610 : vector<8x8xf32>
    %c0_403 = arith.constant 0 : index
    %c0_404 = arith.constant 0 : index
    %c0_405 = arith.constant 0 : index
    %612 = vector.load %arg10[%c0_403, %c0_404, %c0_405] : memref<8x32x8xf32, #tpu.memory_space<vmem>>, vector<1x32x8xf32>
    %613 = vector.shape_cast %612 : vector<1x32x8xf32> to vector<32x8xf32>
    %cst_406 = arith.constant dense<0.000000e+00> : vector<8x8xf32>
    %614 = tpu.matmul %559, %613, %cst_406 {dimension_numbers = #tpu.dot_dimension_numbers<[1], [0], [0], [1], [0, 0, 1, 1], [], []>} : vector<8x32xf32>, vector<32x8xf32>, vector<8x8xf32> -> vector<8x8xf32>
    %c0_407 = arith.constant 0 : index
    %c0_408 = arith.constant 0 : index
    %c0_409 = arith.constant 0 : index
    %615 = vector.load %arg11[%c0_407, %c0_408, %c0_409] : memref<8x1x8xf32, #tpu.memory_space<vmem>>, vector<1x1x8xf32>
    %616 = vector.shape_cast %615 : vector<1x1x8xf32> to vector<1x8xf32>
    %617 = vector.broadcast %616 : vector<1x8xf32> to vector<8x8xf32>
    %618 = arith.addf %614, %617 : vector<8x8xf32>
    %c0_410 = arith.constant 0 : index
    %c0_411 = arith.constant 0 : index
    %c0_412 = arith.constant 0 : index
    %619 = vector.load %arg12[%c0_410, %c0_411, %c0_412] : memref<8x32x8xf32, #tpu.memory_space<vmem>>, vector<1x32x8xf32>
    %620 = vector.shape_cast %619 : vector<1x32x8xf32> to vector<32x8xf32>
    %cst_413 = arith.constant dense<0.000000e+00> : vector<8x8xf32>
    %621 = tpu.matmul %559, %620, %cst_413 {dimension_numbers = #tpu.dot_dimension_numbers<[1], [0], [0], [1], [0, 0, 1, 1], [], []>} : vector<8x32xf32>, vector<32x8xf32>, vector<8x8xf32> -> vector<8x8xf32>
    %c0_414 = arith.constant 0 : index
    %c0_415 = arith.constant 0 : index
    %c0_416 = arith.constant 0 : index
    %622 = vector.load %arg13[%c0_414, %c0_415, %c0_416] : memref<8x1x8xf32, #tpu.memory_space<vmem>>, vector<1x1x8xf32>
    %623 = vector.shape_cast %622 : vector<1x1x8xf32> to vector<1x8xf32>
    %624 = vector.broadcast %623 : vector<1x8xf32> to vector<8x8xf32>
    %625 = arith.addf %621, %624 : vector<8x8xf32>
    %cst_417 = arith.constant dense<0.000000e+00> : vector<8x8xf32>
    %626 = tpu.matmul %611, %618, %cst_417 {dimension_numbers = #tpu.dot_dimension_numbers<[1], [1], [0], [0], [0, 0, 1, 0], [], []>} : vector<8x8xf32>, vector<8x8xf32>, vector<8x8xf32> -> vector<8x8xf32>
    %627 = arith.addf %626, %597 : vector<8x8xf32>
    %cst_418 = arith.constant dense<0xFF800000> : vector<8xf32>
    %628 = vector.multi_reduction <maximumf>, %627, %cst_418 [1] : vector<8x8xf32> to vector<8xf32>
    %629 = vector.shape_cast %628 : vector<8xf32> to vector<8x1xf32>
    %630 = vector.broadcast %629 : vector<8x1xf32> to vector<8x8xf32>
    %631 = arith.subf %627, %630 : vector<8x8xf32>
    %632 = math.exp %631 : vector<8x8xf32>
    %cst_419 = arith.constant dense<0.000000e+00> : vector<8xf32>
    %633 = vector.multi_reduction <add>, %632, %cst_419 [1] : vector<8x8xf32> to vector<8xf32>
    %634 = vector.shape_cast %633 : vector<8xf32> to vector<8x1xf32>
    %635 = tpu.reciprocal %634 {approx = true} : vector<8x1xf32> -> vector<8x1xf32>
    %636 = vector.broadcast %635 : vector<8x1xf32> to vector<8x8xf32>
    %637 = arith.mulf %632, %636 : vector<8x8xf32>
    %cst_420 = arith.constant dense<0.000000e+00> : vector<8x8xf32>
    %638 = tpu.matmul %637, %625, %cst_420 {dimension_numbers = #tpu.dot_dimension_numbers<[1], [0], [0], [1], [0, 0, 1, 1], [], []>} : vector<8x8xf32>, vector<8x8xf32>, vector<8x8xf32> -> vector<8x8xf32>
    %c0_421 = arith.constant 0 : index
    %c0_422 = arith.constant 0 : index
    %c0_423 = arith.constant 0 : index
    %639 = vector.load %arg14[%c0_421, %c0_422, %c0_423] : memref<8x8x32xf32, #tpu.memory_space<vmem>>, vector<1x8x32xf32>
    %640 = vector.shape_cast %639 : vector<1x8x32xf32> to vector<8x32xf32>
    %cst_424 = arith.constant dense<0.000000e+00> : vector<8x32xf32>
    %641 = tpu.matmul %638, %640, %cst_424 {dimension_numbers = #tpu.dot_dimension_numbers<[1], [0], [0], [1], [0, 0, 1, 1], [], []>} : vector<8x8xf32>, vector<8x32xf32>, vector<8x32xf32> -> vector<8x32xf32>
    %642 = arith.addf %602, %641 : vector<8x32xf32>
    %c1_425 = arith.constant 1 : index
    %c0_426 = arith.constant 0 : index
    %c0_427 = arith.constant 0 : index
    %643 = vector.load %arg8[%c1_425, %c0_426, %c0_427] : memref<8x32x8xf32, #tpu.memory_space<vmem>>, vector<1x32x8xf32>
    %644 = vector.shape_cast %643 : vector<1x32x8xf32> to vector<32x8xf32>
    %cst_428 = arith.constant dense<0.000000e+00> : vector<8x8xf32>
    %645 = tpu.matmul %559, %644, %cst_428 {dimension_numbers = #tpu.dot_dimension_numbers<[1], [0], [0], [1], [0, 0, 1, 1], [], []>} : vector<8x32xf32>, vector<32x8xf32>, vector<8x8xf32> -> vector<8x8xf32>
    %c1_429 = arith.constant 1 : index
    %c0_430 = arith.constant 0 : index
    %c0_431 = arith.constant 0 : index
    %646 = vector.load %arg9[%c1_429, %c0_430, %c0_431] : memref<8x1x8xf32, #tpu.memory_space<vmem>>, vector<1x1x8xf32>
    %647 = vector.shape_cast %646 : vector<1x1x8xf32> to vector<1x8xf32>
    %648 = vector.broadcast %647 : vector<1x8xf32> to vector<8x8xf32>
    %649 = arith.addf %645, %648 : vector<8x8xf32>
    %cst_432 = arith.constant 0.353553385 : f32
    %650 = vector.broadcast %cst_432 : f32 to vector<8x8xf32>
    %651 = arith.mulf %649, %650 : vector<8x8xf32>
    %c1_433 = arith.constant 1 : index
    %c0_434 = arith.constant 0 : index
    %c0_435 = arith.constant 0 : index
    %652 = vector.load %arg10[%c1_433, %c0_434, %c0_435] : memref<8x32x8xf32, #tpu.memory_space<vmem>>, vector<1x32x8xf32>
    %653 = vector.shape_cast %652 : vector<1x32x8xf32> to vector<32x8xf32>
    %cst_436 = arith.constant dense<0.000000e+00> : vector<8x8xf32>
    %654 = tpu.matmul %559, %653, %cst_436 {dimension_numbers = #tpu.dot_dimension_numbers<[1], [0], [0], [1], [0, 0, 1, 1], [], []>} : vector<8x32xf32>, vector<32x8xf32>, vector<8x8xf32> -> vector<8x8xf32>
    %c1_437 = arith.constant 1 : index
    %c0_438 = arith.constant 0 : index
    %c0_439 = arith.constant 0 : index
    %655 = vector.load %arg11[%c1_437, %c0_438, %c0_439] : memref<8x1x8xf32, #tpu.memory_space<vmem>>, vector<1x1x8xf32>
    %656 = vector.shape_cast %655 : vector<1x1x8xf32> to vector<1x8xf32>
    %657 = vector.broadcast %656 : vector<1x8xf32> to vector<8x8xf32>
    %658 = arith.addf %654, %657 : vector<8x8xf32>
    %c1_440 = arith.constant 1 : index
    %c0_441 = arith.constant 0 : index
    %c0_442 = arith.constant 0 : index
    %659 = vector.load %arg12[%c1_440, %c0_441, %c0_442] : memref<8x32x8xf32, #tpu.memory_space<vmem>>, vector<1x32x8xf32>
    %660 = vector.shape_cast %659 : vector<1x32x8xf32> to vector<32x8xf32>
    %cst_443 = arith.constant dense<0.000000e+00> : vector<8x8xf32>
    %661 = tpu.matmul %559, %660, %cst_443 {dimension_numbers = #tpu.dot_dimension_numbers<[1], [0], [0], [1], [0, 0, 1, 1], [], []>} : vector<8x32xf32>, vector<32x8xf32>, vector<8x8xf32> -> vector<8x8xf32>
    %c1_444 = arith.constant 1 : index
    %c0_445 = arith.constant 0 : index
    %c0_446 = arith.constant 0 : index
    %662 = vector.load %arg13[%c1_444, %c0_445, %c0_446] : memref<8x1x8xf32, #tpu.memory_space<vmem>>, vector<1x1x8xf32>
    %663 = vector.shape_cast %662 : vector<1x1x8xf32> to vector<1x8xf32>
    %664 = vector.broadcast %663 : vector<1x8xf32> to vector<8x8xf32>
    %665 = arith.addf %661, %664 : vector<8x8xf32>
    %cst_447 = arith.constant dense<0.000000e+00> : vector<8x8xf32>
    %666 = tpu.matmul %651, %658, %cst_447 {dimension_numbers = #tpu.dot_dimension_numbers<[1], [1], [0], [0], [0, 0, 1, 0], [], []>} : vector<8x8xf32>, vector<8x8xf32>, vector<8x8xf32> -> vector<8x8xf32>
    %667 = arith.addf %666, %597 : vector<8x8xf32>
    %cst_448 = arith.constant dense<0xFF800000> : vector<8xf32>
    %668 = vector.multi_reduction <maximumf>, %667, %cst_448 [1] : vector<8x8xf32> to vector<8xf32>
    %669 = vector.shape_cast %668 : vector<8xf32> to vector<8x1xf32>
    %670 = vector.broadcast %669 : vector<8x1xf32> to vector<8x8xf32>
    %671 = arith.subf %667, %670 : vector<8x8xf32>
    %672 = math.exp %671 : vector<8x8xf32>
    %cst_449 = arith.constant dense<0.000000e+00> : vector<8xf32>
    %673 = vector.multi_reduction <add>, %672, %cst_449 [1] : vector<8x8xf32> to vector<8xf32>
    %674 = vector.shape_cast %673 : vector<8xf32> to vector<8x1xf32>
    %675 = tpu.reciprocal %674 {approx = true} : vector<8x1xf32> -> vector<8x1xf32>
    %676 = vector.broadcast %675 : vector<8x1xf32> to vector<8x8xf32>
    %677 = arith.mulf %672, %676 : vector<8x8xf32>
    %cst_450 = arith.constant dense<0.000000e+00> : vector<8x8xf32>
    %678 = tpu.matmul %677, %665, %cst_450 {dimension_numbers = #tpu.dot_dimension_numbers<[1], [0], [0], [1], [0, 0, 1, 1], [], []>} : vector<8x8xf32>, vector<8x8xf32>, vector<8x8xf32> -> vector<8x8xf32>
    %c1_451 = arith.constant 1 : index
    %c0_452 = arith.constant 0 : index
    %c0_453 = arith.constant 0 : index
    %679 = vector.load %arg14[%c1_451, %c0_452, %c0_453] : memref<8x8x32xf32, #tpu.memory_space<vmem>>, vector<1x8x32xf32>
    %680 = vector.shape_cast %679 : vector<1x8x32xf32> to vector<8x32xf32>
    %cst_454 = arith.constant dense<0.000000e+00> : vector<8x32xf32>
    %681 = tpu.matmul %678, %680, %cst_454 {dimension_numbers = #tpu.dot_dimension_numbers<[1], [0], [0], [1], [0, 0, 1, 1], [], []>} : vector<8x8xf32>, vector<8x32xf32>, vector<8x32xf32> -> vector<8x32xf32>
    %682 = arith.addf %642, %681 : vector<8x32xf32>
    %c2_455 = arith.constant 2 : index
    %c0_456 = arith.constant 0 : index
    %c0_457 = arith.constant 0 : index
    %683 = vector.load %arg8[%c2_455, %c0_456, %c0_457] : memref<8x32x8xf32, #tpu.memory_space<vmem>>, vector<1x32x8xf32>
    %684 = vector.shape_cast %683 : vector<1x32x8xf32> to vector<32x8xf32>
    %cst_458 = arith.constant dense<0.000000e+00> : vector<8x8xf32>
    %685 = tpu.matmul %559, %684, %cst_458 {dimension_numbers = #tpu.dot_dimension_numbers<[1], [0], [0], [1], [0, 0, 1, 1], [], []>} : vector<8x32xf32>, vector<32x8xf32>, vector<8x8xf32> -> vector<8x8xf32>
    %c2_459 = arith.constant 2 : index
    %c0_460 = arith.constant 0 : index
    %c0_461 = arith.constant 0 : index
    %686 = vector.load %arg9[%c2_459, %c0_460, %c0_461] : memref<8x1x8xf32, #tpu.memory_space<vmem>>, vector<1x1x8xf32>
    %687 = vector.shape_cast %686 : vector<1x1x8xf32> to vector<1x8xf32>
    %688 = vector.broadcast %687 : vector<1x8xf32> to vector<8x8xf32>
    %689 = arith.addf %685, %688 : vector<8x8xf32>
    %cst_462 = arith.constant 0.353553385 : f32
    %690 = vector.broadcast %cst_462 : f32 to vector<8x8xf32>
    %691 = arith.mulf %689, %690 : vector<8x8xf32>
    %c2_463 = arith.constant 2 : index
    %c0_464 = arith.constant 0 : index
    %c0_465 = arith.constant 0 : index
    %692 = vector.load %arg10[%c2_463, %c0_464, %c0_465] : memref<8x32x8xf32, #tpu.memory_space<vmem>>, vector<1x32x8xf32>
    %693 = vector.shape_cast %692 : vector<1x32x8xf32> to vector<32x8xf32>
    %cst_466 = arith.constant dense<0.000000e+00> : vector<8x8xf32>
    %694 = tpu.matmul %559, %693, %cst_466 {dimension_numbers = #tpu.dot_dimension_numbers<[1], [0], [0], [1], [0, 0, 1, 1], [], []>} : vector<8x32xf32>, vector<32x8xf32>, vector<8x8xf32> -> vector<8x8xf32>
    %c2_467 = arith.constant 2 : index
    %c0_468 = arith.constant 0 : index
    %c0_469 = arith.constant 0 : index
    %695 = vector.load %arg11[%c2_467, %c0_468, %c0_469] : memref<8x1x8xf32, #tpu.memory_space<vmem>>, vector<1x1x8xf32>
    %696 = vector.shape_cast %695 : vector<1x1x8xf32> to vector<1x8xf32>
    %697 = vector.broadcast %696 : vector<1x8xf32> to vector<8x8xf32>
    %698 = arith.addf %694, %697 : vector<8x8xf32>
    %c2_470 = arith.constant 2 : index
    %c0_471 = arith.constant 0 : index
    %c0_472 = arith.constant 0 : index
    %699 = vector.load %arg12[%c2_470, %c0_471, %c0_472] : memref<8x32x8xf32, #tpu.memory_space<vmem>>, vector<1x32x8xf32>
    %700 = vector.shape_cast %699 : vector<1x32x8xf32> to vector<32x8xf32>
    %cst_473 = arith.constant dense<0.000000e+00> : vector<8x8xf32>
    %701 = tpu.matmul %559, %700, %cst_473 {dimension_numbers = #tpu.dot_dimension_numbers<[1], [0], [0], [1], [0, 0, 1, 1], [], []>} : vector<8x32xf32>, vector<32x8xf32>, vector<8x8xf32> -> vector<8x8xf32>
    %c2_474 = arith.constant 2 : index
    %c0_475 = arith.constant 0 : index
    %c0_476 = arith.constant 0 : index
    %702 = vector.load %arg13[%c2_474, %c0_475, %c0_476] : memref<8x1x8xf32, #tpu.memory_space<vmem>>, vector<1x1x8xf32>
    %703 = vector.shape_cast %702 : vector<1x1x8xf32> to vector<1x8xf32>
    %704 = vector.broadcast %703 : vector<1x8xf32> to vector<8x8xf32>
    %705 = arith.addf %701, %704 : vector<8x8xf32>
    %cst_477 = arith.constant dense<0.000000e+00> : vector<8x8xf32>
    %706 = tpu.matmul %691, %698, %cst_477 {dimension_numbers = #tpu.dot_dimension_numbers<[1], [1], [0], [0], [0, 0, 1, 0], [], []>} : vector<8x8xf32>, vector<8x8xf32>, vector<8x8xf32> -> vector<8x8xf32>
    %707 = arith.addf %706, %597 : vector<8x8xf32>
    %cst_478 = arith.constant dense<0xFF800000> : vector<8xf32>
    %708 = vector.multi_reduction <maximumf>, %707, %cst_478 [1] : vector<8x8xf32> to vector<8xf32>
    %709 = vector.shape_cast %708 : vector<8xf32> to vector<8x1xf32>
    %710 = vector.broadcast %709 : vector<8x1xf32> to vector<8x8xf32>
    %711 = arith.subf %707, %710 : vector<8x8xf32>
    %712 = math.exp %711 : vector<8x8xf32>
    %cst_479 = arith.constant dense<0.000000e+00> : vector<8xf32>
    %713 = vector.multi_reduction <add>, %712, %cst_479 [1] : vector<8x8xf32> to vector<8xf32>
    %714 = vector.shape_cast %713 : vector<8xf32> to vector<8x1xf32>
    %715 = tpu.reciprocal %714 {approx = true} : vector<8x1xf32> -> vector<8x1xf32>
    %716 = vector.broadcast %715 : vector<8x1xf32> to vector<8x8xf32>
    %717 = arith.mulf %712, %716 : vector<8x8xf32>
    %cst_480 = arith.constant dense<0.000000e+00> : vector<8x8xf32>
    %718 = tpu.matmul %717, %705, %cst_480 {dimension_numbers = #tpu.dot_dimension_numbers<[1], [0], [0], [1], [0, 0, 1, 1], [], []>} : vector<8x8xf32>, vector<8x8xf32>, vector<8x8xf32> -> vector<8x8xf32>
    %c2_481 = arith.constant 2 : index
    %c0_482 = arith.constant 0 : index
    %c0_483 = arith.constant 0 : index
    %719 = vector.load %arg14[%c2_481, %c0_482, %c0_483] : memref<8x8x32xf32, #tpu.memory_space<vmem>>, vector<1x8x32xf32>
    %720 = vector.shape_cast %719 : vector<1x8x32xf32> to vector<8x32xf32>
    %cst_484 = arith.constant dense<0.000000e+00> : vector<8x32xf32>
    %721 = tpu.matmul %718, %720, %cst_484 {dimension_numbers = #tpu.dot_dimension_numbers<[1], [0], [0], [1], [0, 0, 1, 1], [], []>} : vector<8x8xf32>, vector<8x32xf32>, vector<8x32xf32> -> vector<8x32xf32>
    %722 = arith.addf %682, %721 : vector<8x32xf32>
    %c3_485 = arith.constant 3 : index
    %c0_486 = arith.constant 0 : index
    %c0_487 = arith.constant 0 : index
    %723 = vector.load %arg8[%c3_485, %c0_486, %c0_487] : memref<8x32x8xf32, #tpu.memory_space<vmem>>, vector<1x32x8xf32>
    %724 = vector.shape_cast %723 : vector<1x32x8xf32> to vector<32x8xf32>
    %cst_488 = arith.constant dense<0.000000e+00> : vector<8x8xf32>
    %725 = tpu.matmul %559, %724, %cst_488 {dimension_numbers = #tpu.dot_dimension_numbers<[1], [0], [0], [1], [0, 0, 1, 1], [], []>} : vector<8x32xf32>, vector<32x8xf32>, vector<8x8xf32> -> vector<8x8xf32>
    %c3_489 = arith.constant 3 : index
    %c0_490 = arith.constant 0 : index
    %c0_491 = arith.constant 0 : index
    %726 = vector.load %arg9[%c3_489, %c0_490, %c0_491] : memref<8x1x8xf32, #tpu.memory_space<vmem>>, vector<1x1x8xf32>
    %727 = vector.shape_cast %726 : vector<1x1x8xf32> to vector<1x8xf32>
    %728 = vector.broadcast %727 : vector<1x8xf32> to vector<8x8xf32>
    %729 = arith.addf %725, %728 : vector<8x8xf32>
    %cst_492 = arith.constant 0.353553385 : f32
    %730 = vector.broadcast %cst_492 : f32 to vector<8x8xf32>
    %731 = arith.mulf %729, %730 : vector<8x8xf32>
    %c3_493 = arith.constant 3 : index
    %c0_494 = arith.constant 0 : index
    %c0_495 = arith.constant 0 : index
    %732 = vector.load %arg10[%c3_493, %c0_494, %c0_495] : memref<8x32x8xf32, #tpu.memory_space<vmem>>, vector<1x32x8xf32>
    %733 = vector.shape_cast %732 : vector<1x32x8xf32> to vector<32x8xf32>
    %cst_496 = arith.constant dense<0.000000e+00> : vector<8x8xf32>
    %734 = tpu.matmul %559, %733, %cst_496 {dimension_numbers = #tpu.dot_dimension_numbers<[1], [0], [0], [1], [0, 0, 1, 1], [], []>} : vector<8x32xf32>, vector<32x8xf32>, vector<8x8xf32> -> vector<8x8xf32>
    %c3_497 = arith.constant 3 : index
    %c0_498 = arith.constant 0 : index
    %c0_499 = arith.constant 0 : index
    %735 = vector.load %arg11[%c3_497, %c0_498, %c0_499] : memref<8x1x8xf32, #tpu.memory_space<vmem>>, vector<1x1x8xf32>
    %736 = vector.shape_cast %735 : vector<1x1x8xf32> to vector<1x8xf32>
    %737 = vector.broadcast %736 : vector<1x8xf32> to vector<8x8xf32>
    %738 = arith.addf %734, %737 : vector<8x8xf32>
    %c3_500 = arith.constant 3 : index
    %c0_501 = arith.constant 0 : index
    %c0_502 = arith.constant 0 : index
    %739 = vector.load %arg12[%c3_500, %c0_501, %c0_502] : memref<8x32x8xf32, #tpu.memory_space<vmem>>, vector<1x32x8xf32>
    %740 = vector.shape_cast %739 : vector<1x32x8xf32> to vector<32x8xf32>
    %cst_503 = arith.constant dense<0.000000e+00> : vector<8x8xf32>
    %741 = tpu.matmul %559, %740, %cst_503 {dimension_numbers = #tpu.dot_dimension_numbers<[1], [0], [0], [1], [0, 0, 1, 1], [], []>} : vector<8x32xf32>, vector<32x8xf32>, vector<8x8xf32> -> vector<8x8xf32>
    %c3_504 = arith.constant 3 : index
    %c0_505 = arith.constant 0 : index
    %c0_506 = arith.constant 0 : index
    %742 = vector.load %arg13[%c3_504, %c0_505, %c0_506] : memref<8x1x8xf32, #tpu.memory_space<vmem>>, vector<1x1x8xf32>
    %743 = vector.shape_cast %742 : vector<1x1x8xf32> to vector<1x8xf32>
    %744 = vector.broadcast %743 : vector<1x8xf32> to vector<8x8xf32>
    %745 = arith.addf %741, %744 : vector<8x8xf32>
    %cst_507 = arith.constant dense<0.000000e+00> : vector<8x8xf32>
    %746 = tpu.matmul %731, %738, %cst_507 {dimension_numbers = #tpu.dot_dimension_numbers<[1], [1], [0], [0], [0, 0, 1, 0], [], []>} : vector<8x8xf32>, vector<8x8xf32>, vector<8x8xf32> -> vector<8x8xf32>
    %747 = arith.addf %746, %597 : vector<8x8xf32>
    %cst_508 = arith.constant dense<0xFF800000> : vector<8xf32>
    %748 = vector.multi_reduction <maximumf>, %747, %cst_508 [1] : vector<8x8xf32> to vector<8xf32>
    %749 = vector.shape_cast %748 : vector<8xf32> to vector<8x1xf32>
    %750 = vector.broadcast %749 : vector<8x1xf32> to vector<8x8xf32>
    %751 = arith.subf %747, %750 : vector<8x8xf32>
    %752 = math.exp %751 : vector<8x8xf32>
    %cst_509 = arith.constant dense<0.000000e+00> : vector<8xf32>
    %753 = vector.multi_reduction <add>, %752, %cst_509 [1] : vector<8x8xf32> to vector<8xf32>
    %754 = vector.shape_cast %753 : vector<8xf32> to vector<8x1xf32>
    %755 = tpu.reciprocal %754 {approx = true} : vector<8x1xf32> -> vector<8x1xf32>
    %756 = vector.broadcast %755 : vector<8x1xf32> to vector<8x8xf32>
    %757 = arith.mulf %752, %756 : vector<8x8xf32>
    %cst_510 = arith.constant dense<0.000000e+00> : vector<8x8xf32>
    %758 = tpu.matmul %757, %745, %cst_510 {dimension_numbers = #tpu.dot_dimension_numbers<[1], [0], [0], [1], [0, 0, 1, 1], [], []>} : vector<8x8xf32>, vector<8x8xf32>, vector<8x8xf32> -> vector<8x8xf32>
    %c3_511 = arith.constant 3 : index
    %c0_512 = arith.constant 0 : index
    %c0_513 = arith.constant 0 : index
    %759 = vector.load %arg14[%c3_511, %c0_512, %c0_513] : memref<8x8x32xf32, #tpu.memory_space<vmem>>, vector<1x8x32xf32>
    %760 = vector.shape_cast %759 : vector<1x8x32xf32> to vector<8x32xf32>
    %cst_514 = arith.constant dense<0.000000e+00> : vector<8x32xf32>
    %761 = tpu.matmul %758, %760, %cst_514 {dimension_numbers = #tpu.dot_dimension_numbers<[1], [0], [0], [1], [0, 0, 1, 1], [], []>} : vector<8x8xf32>, vector<8x32xf32>, vector<8x32xf32> -> vector<8x32xf32>
    %762 = arith.addf %722, %761 : vector<8x32xf32>
    %763 = arith.addf %559, %762 : vector<8x32xf32>
    %c0_515 = arith.constant 0 : index
    %c0_516 = arith.constant 0 : index
    %c0_517 = arith.constant 0 : index
    %764 = vector.load %arg16[%c0_515, %c0_516, %c0_517] : memref<2x1x32xf32, #tpu.memory_space<vmem>>, vector<1x1x32xf32>
    %765 = vector.shape_cast %764 : vector<1x1x32xf32> to vector<1x32xf32>
    %c0_518 = arith.constant 0 : index
    %c0_519 = arith.constant 0 : index
    %c0_520 = arith.constant 0 : index
    %766 = vector.load %arg17[%c0_518, %c0_519, %c0_520] : memref<2x1x32xf32, #tpu.memory_space<vmem>>, vector<1x1x32xf32>
    %767 = vector.shape_cast %766 : vector<1x1x32xf32> to vector<1x32xf32>
    %cst_521 = arith.constant dense<0.000000e+00> : vector<8xf32>
    %768 = vector.multi_reduction <add>, %763, %cst_521 [1] : vector<8x32xf32> to vector<8xf32>
    %769 = vector.shape_cast %768 : vector<8xf32> to vector<8x1xf32>
    %cst_522 = arith.constant 3.200000e+01 : f32
    %770 = vector.broadcast %cst_522 : f32 to vector<8x1xf32>
    %771 = arith.divf %769, %770 : vector<8x1xf32>
    %772 = vector.broadcast %771 : vector<8x1xf32> to vector<8x32xf32>
    %773 = arith.subf %763, %772 : vector<8x32xf32>
    %774 = arith.mulf %773, %773 : vector<8x32xf32>
    %cst_523 = arith.constant dense<0.000000e+00> : vector<8xf32>
    %775 = vector.multi_reduction <add>, %774, %cst_523 [1] : vector<8x32xf32> to vector<8xf32>
    %776 = vector.shape_cast %775 : vector<8xf32> to vector<8x1xf32>
    %cst_524 = arith.constant 3.200000e+01 : f32
    %777 = vector.broadcast %cst_524 : f32 to vector<8x1xf32>
    %778 = arith.divf %776, %777 : vector<8x1xf32>
    %cst_525 = arith.constant 9.99999974E-6 : f32
    %779 = vector.broadcast %cst_525 : f32 to vector<8x1xf32>
    %780 = arith.addf %778, %779 : vector<8x1xf32>
    %781 = math.rsqrt %780 : vector<8x1xf32>
    %782 = vector.broadcast %781 : vector<8x1xf32> to vector<8x32xf32>
    %783 = arith.mulf %773, %782 : vector<8x32xf32>
    %784 = vector.broadcast %765 : vector<1x32xf32> to vector<8x32xf32>
    %785 = arith.mulf %783, %784 : vector<8x32xf32>
    %786 = vector.broadcast %767 : vector<1x32xf32> to vector<8x32xf32>
    %787 = arith.addf %785, %786 : vector<8x32xf32>
    %c0_526 = arith.constant 0 : index
    %c0_527 = arith.constant 0 : index
    %c0_528 = arith.constant 0 : index
    %788 = vector.load %arg20[%c0_526, %c0_527, %c0_528] : memref<2x32x128xf32, #tpu.memory_space<vmem>>, vector<1x32x128xf32>
    %789 = vector.shape_cast %788 : vector<1x32x128xf32> to vector<32x128xf32>
    %cst_529 = arith.constant dense<0.000000e+00> : vector<8x128xf32>
    %790 = tpu.matmul %787, %789, %cst_529 {dimension_numbers = #tpu.dot_dimension_numbers<[1], [0], [0], [1], [0, 0, 1, 1], [], []>} : vector<8x32xf32>, vector<32x128xf32>, vector<8x128xf32> -> vector<8x128xf32>
    %c0_530 = arith.constant 0 : index
    %c0_531 = arith.constant 0 : index
    %c0_532 = arith.constant 0 : index
    %791 = vector.load %arg21[%c0_530, %c0_531, %c0_532] : memref<2x1x128xf32, #tpu.memory_space<vmem>>, vector<1x1x128xf32>
    %792 = vector.shape_cast %791 : vector<1x1x128xf32> to vector<1x128xf32>
    %793 = vector.broadcast %792 : vector<1x128xf32> to vector<8x128xf32>
    %794 = arith.addf %790, %793 : vector<8x128xf32>
    %cst_533 = arith.constant 0.000000e+00 : f32
    %795 = vector.broadcast %cst_533 : f32 to vector<8x128xf32>
    %796 = arith.maximumf %794, %795 : vector<8x128xf32>
    %c0_534 = arith.constant 0 : index
    %c0_535 = arith.constant 0 : index
    %c0_536 = arith.constant 0 : index
    %797 = vector.load %arg22[%c0_534, %c0_535, %c0_536] : memref<2x128x32xf32, #tpu.memory_space<vmem>>, vector<1x128x32xf32>
    %798 = vector.shape_cast %797 : vector<1x128x32xf32> to vector<128x32xf32>
    %cst_537 = arith.constant dense<0.000000e+00> : vector<8x32xf32>
    %799 = tpu.matmul %796, %798, %cst_537 {dimension_numbers = #tpu.dot_dimension_numbers<[1], [0], [0], [1], [0, 0, 1, 1], [], []>} : vector<8x128xf32>, vector<128x32xf32>, vector<8x32xf32> -> vector<8x32xf32>
    %c0_538 = arith.constant 0 : index
    %c0_539 = arith.constant 0 : index
    %c0_540 = arith.constant 0 : index
    %800 = vector.load %arg23[%c0_538, %c0_539, %c0_540] : memref<2x1x32xf32, #tpu.memory_space<vmem>>, vector<1x1x32xf32>
    %801 = vector.shape_cast %800 : vector<1x1x32xf32> to vector<1x32xf32>
    %802 = vector.broadcast %801 : vector<1x32xf32> to vector<8x32xf32>
    %803 = arith.addf %799, %802 : vector<8x32xf32>
    %804 = arith.addf %787, %803 : vector<8x32xf32>
    %c0_541 = arith.constant 0 : index
    %c0_542 = arith.constant 0 : index
    %c0_543 = arith.constant 0 : index
    %805 = vector.load %arg18[%c0_541, %c0_542, %c0_543] : memref<2x1x32xf32, #tpu.memory_space<vmem>>, vector<1x1x32xf32>
    %806 = vector.shape_cast %805 : vector<1x1x32xf32> to vector<1x32xf32>
    %c0_544 = arith.constant 0 : index
    %c0_545 = arith.constant 0 : index
    %c0_546 = arith.constant 0 : index
    %807 = vector.load %arg19[%c0_544, %c0_545, %c0_546] : memref<2x1x32xf32, #tpu.memory_space<vmem>>, vector<1x1x32xf32>
    %808 = vector.shape_cast %807 : vector<1x1x32xf32> to vector<1x32xf32>
    %cst_547 = arith.constant dense<0.000000e+00> : vector<8xf32>
    %809 = vector.multi_reduction <add>, %804, %cst_547 [1] : vector<8x32xf32> to vector<8xf32>
    %810 = vector.shape_cast %809 : vector<8xf32> to vector<8x1xf32>
    %cst_548 = arith.constant 3.200000e+01 : f32
    %811 = vector.broadcast %cst_548 : f32 to vector<8x1xf32>
    %812 = arith.divf %810, %811 : vector<8x1xf32>
    %813 = vector.broadcast %812 : vector<8x1xf32> to vector<8x32xf32>
    %814 = arith.subf %804, %813 : vector<8x32xf32>
    %815 = arith.mulf %814, %814 : vector<8x32xf32>
    %cst_549 = arith.constant dense<0.000000e+00> : vector<8xf32>
    %816 = vector.multi_reduction <add>, %815, %cst_549 [1] : vector<8x32xf32> to vector<8xf32>
    %817 = vector.shape_cast %816 : vector<8xf32> to vector<8x1xf32>
    %cst_550 = arith.constant 3.200000e+01 : f32
    %818 = vector.broadcast %cst_550 : f32 to vector<8x1xf32>
    %819 = arith.divf %817, %818 : vector<8x1xf32>
    %cst_551 = arith.constant 9.99999974E-6 : f32
    %820 = vector.broadcast %cst_551 : f32 to vector<8x1xf32>
    %821 = arith.addf %819, %820 : vector<8x1xf32>
    %822 = math.rsqrt %821 : vector<8x1xf32>
    %823 = vector.broadcast %822 : vector<8x1xf32> to vector<8x32xf32>
    %824 = arith.mulf %814, %823 : vector<8x32xf32>
    %825 = vector.broadcast %806 : vector<1x32xf32> to vector<8x32xf32>
    %826 = arith.mulf %824, %825 : vector<8x32xf32>
    %827 = vector.broadcast %808 : vector<1x32xf32> to vector<8x32xf32>
    %828 = arith.addf %826, %827 : vector<8x32xf32>
    %cst_552 = arith.constant 0.000000e+00 : f32
    %829 = vector.broadcast %cst_552 : f32 to vector<8x32xf32>
    %c1_553 = arith.constant 1 : index
    %c0_554 = arith.constant 0 : index
    %c0_555 = arith.constant 0 : index
    %830 = vector.load %arg15[%c1_553, %c0_554, %c0_555] : memref<2x1x32xf32, #tpu.memory_space<vmem>>, vector<1x1x32xf32>
    %831 = vector.shape_cast %830 : vector<1x1x32xf32> to vector<1x32xf32>
    %832 = vector.broadcast %831 : vector<1x32xf32> to vector<8x32xf32>
    %833 = arith.addf %829, %832 : vector<8x32xf32>
    %c4_556 = arith.constant 4 : index
    %c0_557 = arith.constant 0 : index
    %c0_558 = arith.constant 0 : index
    %834 = vector.load %arg8[%c4_556, %c0_557, %c0_558] : memref<8x32x8xf32, #tpu.memory_space<vmem>>, vector<1x32x8xf32>
    %835 = vector.shape_cast %834 : vector<1x32x8xf32> to vector<32x8xf32>
    %cst_559 = arith.constant dense<0.000000e+00> : vector<8x8xf32>
    %836 = tpu.matmul %828, %835, %cst_559 {dimension_numbers = #tpu.dot_dimension_numbers<[1], [0], [0], [1], [0, 0, 1, 1], [], []>} : vector<8x32xf32>, vector<32x8xf32>, vector<8x8xf32> -> vector<8x8xf32>
    %c4_560 = arith.constant 4 : index
    %c0_561 = arith.constant 0 : index
    %c0_562 = arith.constant 0 : index
    %837 = vector.load %arg9[%c4_560, %c0_561, %c0_562] : memref<8x1x8xf32, #tpu.memory_space<vmem>>, vector<1x1x8xf32>
    %838 = vector.shape_cast %837 : vector<1x1x8xf32> to vector<1x8xf32>
    %839 = vector.broadcast %838 : vector<1x8xf32> to vector<8x8xf32>
    %840 = arith.addf %836, %839 : vector<8x8xf32>
    %cst_563 = arith.constant 0.353553385 : f32
    %841 = vector.broadcast %cst_563 : f32 to vector<8x8xf32>
    %842 = arith.mulf %840, %841 : vector<8x8xf32>
    %c4_564 = arith.constant 4 : index
    %c0_565 = arith.constant 0 : index
    %c0_566 = arith.constant 0 : index
    %843 = vector.load %arg10[%c4_564, %c0_565, %c0_566] : memref<8x32x8xf32, #tpu.memory_space<vmem>>, vector<1x32x8xf32>
    %844 = vector.shape_cast %843 : vector<1x32x8xf32> to vector<32x8xf32>
    %cst_567 = arith.constant dense<0.000000e+00> : vector<8x8xf32>
    %845 = tpu.matmul %828, %844, %cst_567 {dimension_numbers = #tpu.dot_dimension_numbers<[1], [0], [0], [1], [0, 0, 1, 1], [], []>} : vector<8x32xf32>, vector<32x8xf32>, vector<8x8xf32> -> vector<8x8xf32>
    %c4_568 = arith.constant 4 : index
    %c0_569 = arith.constant 0 : index
    %c0_570 = arith.constant 0 : index
    %846 = vector.load %arg11[%c4_568, %c0_569, %c0_570] : memref<8x1x8xf32, #tpu.memory_space<vmem>>, vector<1x1x8xf32>
    %847 = vector.shape_cast %846 : vector<1x1x8xf32> to vector<1x8xf32>
    %848 = vector.broadcast %847 : vector<1x8xf32> to vector<8x8xf32>
    %849 = arith.addf %845, %848 : vector<8x8xf32>
    %c4_571 = arith.constant 4 : index
    %c0_572 = arith.constant 0 : index
    %c0_573 = arith.constant 0 : index
    %850 = vector.load %arg12[%c4_571, %c0_572, %c0_573] : memref<8x32x8xf32, #tpu.memory_space<vmem>>, vector<1x32x8xf32>
    %851 = vector.shape_cast %850 : vector<1x32x8xf32> to vector<32x8xf32>
    %cst_574 = arith.constant dense<0.000000e+00> : vector<8x8xf32>
    %852 = tpu.matmul %828, %851, %cst_574 {dimension_numbers = #tpu.dot_dimension_numbers<[1], [0], [0], [1], [0, 0, 1, 1], [], []>} : vector<8x32xf32>, vector<32x8xf32>, vector<8x8xf32> -> vector<8x8xf32>
    %c4_575 = arith.constant 4 : index
    %c0_576 = arith.constant 0 : index
    %c0_577 = arith.constant 0 : index
    %853 = vector.load %arg13[%c4_575, %c0_576, %c0_577] : memref<8x1x8xf32, #tpu.memory_space<vmem>>, vector<1x1x8xf32>
    %854 = vector.shape_cast %853 : vector<1x1x8xf32> to vector<1x8xf32>
    %855 = vector.broadcast %854 : vector<1x8xf32> to vector<8x8xf32>
    %856 = arith.addf %852, %855 : vector<8x8xf32>
    %cst_578 = arith.constant dense<0.000000e+00> : vector<8x8xf32>
    %857 = tpu.matmul %842, %849, %cst_578 {dimension_numbers = #tpu.dot_dimension_numbers<[1], [1], [0], [0], [0, 0, 1, 0], [], []>} : vector<8x8xf32>, vector<8x8xf32>, vector<8x8xf32> -> vector<8x8xf32>
    %858 = arith.addf %857, %597 : vector<8x8xf32>
    %cst_579 = arith.constant dense<0xFF800000> : vector<8xf32>
    %859 = vector.multi_reduction <maximumf>, %858, %cst_579 [1] : vector<8x8xf32> to vector<8xf32>
    %860 = vector.shape_cast %859 : vector<8xf32> to vector<8x1xf32>
    %861 = vector.broadcast %860 : vector<8x1xf32> to vector<8x8xf32>
    %862 = arith.subf %858, %861 : vector<8x8xf32>
    %863 = math.exp %862 : vector<8x8xf32>
    %cst_580 = arith.constant dense<0.000000e+00> : vector<8xf32>
    %864 = vector.multi_reduction <add>, %863, %cst_580 [1] : vector<8x8xf32> to vector<8xf32>
    %865 = vector.shape_cast %864 : vector<8xf32> to vector<8x1xf32>
    %866 = tpu.reciprocal %865 {approx = true} : vector<8x1xf32> -> vector<8x1xf32>
    %867 = vector.broadcast %866 : vector<8x1xf32> to vector<8x8xf32>
    %868 = arith.mulf %863, %867 : vector<8x8xf32>
    %cst_581 = arith.constant dense<0.000000e+00> : vector<8x8xf32>
    %869 = tpu.matmul %868, %856, %cst_581 {dimension_numbers = #tpu.dot_dimension_numbers<[1], [0], [0], [1], [0, 0, 1, 1], [], []>} : vector<8x8xf32>, vector<8x8xf32>, vector<8x8xf32> -> vector<8x8xf32>
    %c4_582 = arith.constant 4 : index
    %c0_583 = arith.constant 0 : index
    %c0_584 = arith.constant 0 : index
    %870 = vector.load %arg14[%c4_582, %c0_583, %c0_584] : memref<8x8x32xf32, #tpu.memory_space<vmem>>, vector<1x8x32xf32>
    %871 = vector.shape_cast %870 : vector<1x8x32xf32> to vector<8x32xf32>
    %cst_585 = arith.constant dense<0.000000e+00> : vector<8x32xf32>
    %872 = tpu.matmul %869, %871, %cst_585 {dimension_numbers = #tpu.dot_dimension_numbers<[1], [0], [0], [1], [0, 0, 1, 1], [], []>} : vector<8x8xf32>, vector<8x32xf32>, vector<8x32xf32> -> vector<8x32xf32>
    %873 = arith.addf %833, %872 : vector<8x32xf32>
    %c5_586 = arith.constant 5 : index
    %c0_587 = arith.constant 0 : index
    %c0_588 = arith.constant 0 : index
    %874 = vector.load %arg8[%c5_586, %c0_587, %c0_588] : memref<8x32x8xf32, #tpu.memory_space<vmem>>, vector<1x32x8xf32>
    %875 = vector.shape_cast %874 : vector<1x32x8xf32> to vector<32x8xf32>
    %cst_589 = arith.constant dense<0.000000e+00> : vector<8x8xf32>
    %876 = tpu.matmul %828, %875, %cst_589 {dimension_numbers = #tpu.dot_dimension_numbers<[1], [0], [0], [1], [0, 0, 1, 1], [], []>} : vector<8x32xf32>, vector<32x8xf32>, vector<8x8xf32> -> vector<8x8xf32>
    %c5_590 = arith.constant 5 : index
    %c0_591 = arith.constant 0 : index
    %c0_592 = arith.constant 0 : index
    %877 = vector.load %arg9[%c5_590, %c0_591, %c0_592] : memref<8x1x8xf32, #tpu.memory_space<vmem>>, vector<1x1x8xf32>
    %878 = vector.shape_cast %877 : vector<1x1x8xf32> to vector<1x8xf32>
    %879 = vector.broadcast %878 : vector<1x8xf32> to vector<8x8xf32>
    %880 = arith.addf %876, %879 : vector<8x8xf32>
    %cst_593 = arith.constant 0.353553385 : f32
    %881 = vector.broadcast %cst_593 : f32 to vector<8x8xf32>
    %882 = arith.mulf %880, %881 : vector<8x8xf32>
    %c5_594 = arith.constant 5 : index
    %c0_595 = arith.constant 0 : index
    %c0_596 = arith.constant 0 : index
    %883 = vector.load %arg10[%c5_594, %c0_595, %c0_596] : memref<8x32x8xf32, #tpu.memory_space<vmem>>, vector<1x32x8xf32>
    %884 = vector.shape_cast %883 : vector<1x32x8xf32> to vector<32x8xf32>
    %cst_597 = arith.constant dense<0.000000e+00> : vector<8x8xf32>
    %885 = tpu.matmul %828, %884, %cst_597 {dimension_numbers = #tpu.dot_dimension_numbers<[1], [0], [0], [1], [0, 0, 1, 1], [], []>} : vector<8x32xf32>, vector<32x8xf32>, vector<8x8xf32> -> vector<8x8xf32>
    %c5_598 = arith.constant 5 : index
    %c0_599 = arith.constant 0 : index
    %c0_600 = arith.constant 0 : index
    %886 = vector.load %arg11[%c5_598, %c0_599, %c0_600] : memref<8x1x8xf32, #tpu.memory_space<vmem>>, vector<1x1x8xf32>
    %887 = vector.shape_cast %886 : vector<1x1x8xf32> to vector<1x8xf32>
    %888 = vector.broadcast %887 : vector<1x8xf32> to vector<8x8xf32>
    %889 = arith.addf %885, %888 : vector<8x8xf32>
    %c5_601 = arith.constant 5 : index
    %c0_602 = arith.constant 0 : index
    %c0_603 = arith.constant 0 : index
    %890 = vector.load %arg12[%c5_601, %c0_602, %c0_603] : memref<8x32x8xf32, #tpu.memory_space<vmem>>, vector<1x32x8xf32>
    %891 = vector.shape_cast %890 : vector<1x32x8xf32> to vector<32x8xf32>
    %cst_604 = arith.constant dense<0.000000e+00> : vector<8x8xf32>
    %892 = tpu.matmul %828, %891, %cst_604 {dimension_numbers = #tpu.dot_dimension_numbers<[1], [0], [0], [1], [0, 0, 1, 1], [], []>} : vector<8x32xf32>, vector<32x8xf32>, vector<8x8xf32> -> vector<8x8xf32>
    %c5_605 = arith.constant 5 : index
    %c0_606 = arith.constant 0 : index
    %c0_607 = arith.constant 0 : index
    %893 = vector.load %arg13[%c5_605, %c0_606, %c0_607] : memref<8x1x8xf32, #tpu.memory_space<vmem>>, vector<1x1x8xf32>
    %894 = vector.shape_cast %893 : vector<1x1x8xf32> to vector<1x8xf32>
    %895 = vector.broadcast %894 : vector<1x8xf32> to vector<8x8xf32>
    %896 = arith.addf %892, %895 : vector<8x8xf32>
    %cst_608 = arith.constant dense<0.000000e+00> : vector<8x8xf32>
    %897 = tpu.matmul %882, %889, %cst_608 {dimension_numbers = #tpu.dot_dimension_numbers<[1], [1], [0], [0], [0, 0, 1, 0], [], []>} : vector<8x8xf32>, vector<8x8xf32>, vector<8x8xf32> -> vector<8x8xf32>
    %898 = arith.addf %897, %597 : vector<8x8xf32>
    %cst_609 = arith.constant dense<0xFF800000> : vector<8xf32>
    %899 = vector.multi_reduction <maximumf>, %898, %cst_609 [1] : vector<8x8xf32> to vector<8xf32>
    %900 = vector.shape_cast %899 : vector<8xf32> to vector<8x1xf32>
    %901 = vector.broadcast %900 : vector<8x1xf32> to vector<8x8xf32>
    %902 = arith.subf %898, %901 : vector<8x8xf32>
    %903 = math.exp %902 : vector<8x8xf32>
    %cst_610 = arith.constant dense<0.000000e+00> : vector<8xf32>
    %904 = vector.multi_reduction <add>, %903, %cst_610 [1] : vector<8x8xf32> to vector<8xf32>
    %905 = vector.shape_cast %904 : vector<8xf32> to vector<8x1xf32>
    %906 = tpu.reciprocal %905 {approx = true} : vector<8x1xf32> -> vector<8x1xf32>
    %907 = vector.broadcast %906 : vector<8x1xf32> to vector<8x8xf32>
    %908 = arith.mulf %903, %907 : vector<8x8xf32>
    %cst_611 = arith.constant dense<0.000000e+00> : vector<8x8xf32>
    %909 = tpu.matmul %908, %896, %cst_611 {dimension_numbers = #tpu.dot_dimension_numbers<[1], [0], [0], [1], [0, 0, 1, 1], [], []>} : vector<8x8xf32>, vector<8x8xf32>, vector<8x8xf32> -> vector<8x8xf32>
    %c5_612 = arith.constant 5 : index
    %c0_613 = arith.constant 0 : index
    %c0_614 = arith.constant 0 : index
    %910 = vector.load %arg14[%c5_612, %c0_613, %c0_614] : memref<8x8x32xf32, #tpu.memory_space<vmem>>, vector<1x8x32xf32>
    %911 = vector.shape_cast %910 : vector<1x8x32xf32> to vector<8x32xf32>
    %cst_615 = arith.constant dense<0.000000e+00> : vector<8x32xf32>
    %912 = tpu.matmul %909, %911, %cst_615 {dimension_numbers = #tpu.dot_dimension_numbers<[1], [0], [0], [1], [0, 0, 1, 1], [], []>} : vector<8x8xf32>, vector<8x32xf32>, vector<8x32xf32> -> vector<8x32xf32>
    %913 = arith.addf %873, %912 : vector<8x32xf32>
    %c6_616 = arith.constant 6 : index
    %c0_617 = arith.constant 0 : index
    %c0_618 = arith.constant 0 : index
    %914 = vector.load %arg8[%c6_616, %c0_617, %c0_618] : memref<8x32x8xf32, #tpu.memory_space<vmem>>, vector<1x32x8xf32>
    %915 = vector.shape_cast %914 : vector<1x32x8xf32> to vector<32x8xf32>
    %cst_619 = arith.constant dense<0.000000e+00> : vector<8x8xf32>
    %916 = tpu.matmul %828, %915, %cst_619 {dimension_numbers = #tpu.dot_dimension_numbers<[1], [0], [0], [1], [0, 0, 1, 1], [], []>} : vector<8x32xf32>, vector<32x8xf32>, vector<8x8xf32> -> vector<8x8xf32>
    %c6_620 = arith.constant 6 : index
    %c0_621 = arith.constant 0 : index
    %c0_622 = arith.constant 0 : index
    %917 = vector.load %arg9[%c6_620, %c0_621, %c0_622] : memref<8x1x8xf32, #tpu.memory_space<vmem>>, vector<1x1x8xf32>
    %918 = vector.shape_cast %917 : vector<1x1x8xf32> to vector<1x8xf32>
    %919 = vector.broadcast %918 : vector<1x8xf32> to vector<8x8xf32>
    %920 = arith.addf %916, %919 : vector<8x8xf32>
    %cst_623 = arith.constant 0.353553385 : f32
    %921 = vector.broadcast %cst_623 : f32 to vector<8x8xf32>
    %922 = arith.mulf %920, %921 : vector<8x8xf32>
    %c6_624 = arith.constant 6 : index
    %c0_625 = arith.constant 0 : index
    %c0_626 = arith.constant 0 : index
    %923 = vector.load %arg10[%c6_624, %c0_625, %c0_626] : memref<8x32x8xf32, #tpu.memory_space<vmem>>, vector<1x32x8xf32>
    %924 = vector.shape_cast %923 : vector<1x32x8xf32> to vector<32x8xf32>
    %cst_627 = arith.constant dense<0.000000e+00> : vector<8x8xf32>
    %925 = tpu.matmul %828, %924, %cst_627 {dimension_numbers = #tpu.dot_dimension_numbers<[1], [0], [0], [1], [0, 0, 1, 1], [], []>} : vector<8x32xf32>, vector<32x8xf32>, vector<8x8xf32> -> vector<8x8xf32>
    %c6_628 = arith.constant 6 : index
    %c0_629 = arith.constant 0 : index
    %c0_630 = arith.constant 0 : index
    %926 = vector.load %arg11[%c6_628, %c0_629, %c0_630] : memref<8x1x8xf32, #tpu.memory_space<vmem>>, vector<1x1x8xf32>
    %927 = vector.shape_cast %926 : vector<1x1x8xf32> to vector<1x8xf32>
    %928 = vector.broadcast %927 : vector<1x8xf32> to vector<8x8xf32>
    %929 = arith.addf %925, %928 : vector<8x8xf32>
    %c6_631 = arith.constant 6 : index
    %c0_632 = arith.constant 0 : index
    %c0_633 = arith.constant 0 : index
    %930 = vector.load %arg12[%c6_631, %c0_632, %c0_633] : memref<8x32x8xf32, #tpu.memory_space<vmem>>, vector<1x32x8xf32>
    %931 = vector.shape_cast %930 : vector<1x32x8xf32> to vector<32x8xf32>
    %cst_634 = arith.constant dense<0.000000e+00> : vector<8x8xf32>
    %932 = tpu.matmul %828, %931, %cst_634 {dimension_numbers = #tpu.dot_dimension_numbers<[1], [0], [0], [1], [0, 0, 1, 1], [], []>} : vector<8x32xf32>, vector<32x8xf32>, vector<8x8xf32> -> vector<8x8xf32>
    %c6_635 = arith.constant 6 : index
    %c0_636 = arith.constant 0 : index
    %c0_637 = arith.constant 0 : index
    %933 = vector.load %arg13[%c6_635, %c0_636, %c0_637] : memref<8x1x8xf32, #tpu.memory_space<vmem>>, vector<1x1x8xf32>
    %934 = vector.shape_cast %933 : vector<1x1x8xf32> to vector<1x8xf32>
    %935 = vector.broadcast %934 : vector<1x8xf32> to vector<8x8xf32>
    %936 = arith.addf %932, %935 : vector<8x8xf32>
    %cst_638 = arith.constant dense<0.000000e+00> : vector<8x8xf32>
    %937 = tpu.matmul %922, %929, %cst_638 {dimension_numbers = #tpu.dot_dimension_numbers<[1], [1], [0], [0], [0, 0, 1, 0], [], []>} : vector<8x8xf32>, vector<8x8xf32>, vector<8x8xf32> -> vector<8x8xf32>
    %938 = arith.addf %937, %597 : vector<8x8xf32>
    %cst_639 = arith.constant dense<0xFF800000> : vector<8xf32>
    %939 = vector.multi_reduction <maximumf>, %938, %cst_639 [1] : vector<8x8xf32> to vector<8xf32>
    %940 = vector.shape_cast %939 : vector<8xf32> to vector<8x1xf32>
    %941 = vector.broadcast %940 : vector<8x1xf32> to vector<8x8xf32>
    %942 = arith.subf %938, %941 : vector<8x8xf32>
    %943 = math.exp %942 : vector<8x8xf32>
    %cst_640 = arith.constant dense<0.000000e+00> : vector<8xf32>
    %944 = vector.multi_reduction <add>, %943, %cst_640 [1] : vector<8x8xf32> to vector<8xf32>
    %945 = vector.shape_cast %944 : vector<8xf32> to vector<8x1xf32>
    %946 = tpu.reciprocal %945 {approx = true} : vector<8x1xf32> -> vector<8x1xf32>
    %947 = vector.broadcast %946 : vector<8x1xf32> to vector<8x8xf32>
    %948 = arith.mulf %943, %947 : vector<8x8xf32>
    %cst_641 = arith.constant dense<0.000000e+00> : vector<8x8xf32>
    %949 = tpu.matmul %948, %936, %cst_641 {dimension_numbers = #tpu.dot_dimension_numbers<[1], [0], [0], [1], [0, 0, 1, 1], [], []>} : vector<8x8xf32>, vector<8x8xf32>, vector<8x8xf32> -> vector<8x8xf32>
    %c6_642 = arith.constant 6 : index
    %c0_643 = arith.constant 0 : index
    %c0_644 = arith.constant 0 : index
    %950 = vector.load %arg14[%c6_642, %c0_643, %c0_644] : memref<8x8x32xf32, #tpu.memory_space<vmem>>, vector<1x8x32xf32>
    %951 = vector.shape_cast %950 : vector<1x8x32xf32> to vector<8x32xf32>
    %cst_645 = arith.constant dense<0.000000e+00> : vector<8x32xf32>
    %952 = tpu.matmul %949, %951, %cst_645 {dimension_numbers = #tpu.dot_dimension_numbers<[1], [0], [0], [1], [0, 0, 1, 1], [], []>} : vector<8x8xf32>, vector<8x32xf32>, vector<8x32xf32> -> vector<8x32xf32>
    %953 = arith.addf %913, %952 : vector<8x32xf32>
    %c7_646 = arith.constant 7 : index
    %c0_647 = arith.constant 0 : index
    %c0_648 = arith.constant 0 : index
    %954 = vector.load %arg8[%c7_646, %c0_647, %c0_648] : memref<8x32x8xf32, #tpu.memory_space<vmem>>, vector<1x32x8xf32>
    %955 = vector.shape_cast %954 : vector<1x32x8xf32> to vector<32x8xf32>
    %cst_649 = arith.constant dense<0.000000e+00> : vector<8x8xf32>
    %956 = tpu.matmul %828, %955, %cst_649 {dimension_numbers = #tpu.dot_dimension_numbers<[1], [0], [0], [1], [0, 0, 1, 1], [], []>} : vector<8x32xf32>, vector<32x8xf32>, vector<8x8xf32> -> vector<8x8xf32>
    %c7_650 = arith.constant 7 : index
    %c0_651 = arith.constant 0 : index
    %c0_652 = arith.constant 0 : index
    %957 = vector.load %arg9[%c7_650, %c0_651, %c0_652] : memref<8x1x8xf32, #tpu.memory_space<vmem>>, vector<1x1x8xf32>
    %958 = vector.shape_cast %957 : vector<1x1x8xf32> to vector<1x8xf32>
    %959 = vector.broadcast %958 : vector<1x8xf32> to vector<8x8xf32>
    %960 = arith.addf %956, %959 : vector<8x8xf32>
    %cst_653 = arith.constant 0.353553385 : f32
    %961 = vector.broadcast %cst_653 : f32 to vector<8x8xf32>
    %962 = arith.mulf %960, %961 : vector<8x8xf32>
    %c7_654 = arith.constant 7 : index
    %c0_655 = arith.constant 0 : index
    %c0_656 = arith.constant 0 : index
    %963 = vector.load %arg10[%c7_654, %c0_655, %c0_656] : memref<8x32x8xf32, #tpu.memory_space<vmem>>, vector<1x32x8xf32>
    %964 = vector.shape_cast %963 : vector<1x32x8xf32> to vector<32x8xf32>
    %cst_657 = arith.constant dense<0.000000e+00> : vector<8x8xf32>
    %965 = tpu.matmul %828, %964, %cst_657 {dimension_numbers = #tpu.dot_dimension_numbers<[1], [0], [0], [1], [0, 0, 1, 1], [], []>} : vector<8x32xf32>, vector<32x8xf32>, vector<8x8xf32> -> vector<8x8xf32>
    %c7_658 = arith.constant 7 : index
    %c0_659 = arith.constant 0 : index
    %c0_660 = arith.constant 0 : index
    %966 = vector.load %arg11[%c7_658, %c0_659, %c0_660] : memref<8x1x8xf32, #tpu.memory_space<vmem>>, vector<1x1x8xf32>
    %967 = vector.shape_cast %966 : vector<1x1x8xf32> to vector<1x8xf32>
    %968 = vector.broadcast %967 : vector<1x8xf32> to vector<8x8xf32>
    %969 = arith.addf %965, %968 : vector<8x8xf32>
    %c7_661 = arith.constant 7 : index
    %c0_662 = arith.constant 0 : index
    %c0_663 = arith.constant 0 : index
    %970 = vector.load %arg12[%c7_661, %c0_662, %c0_663] : memref<8x32x8xf32, #tpu.memory_space<vmem>>, vector<1x32x8xf32>
    %971 = vector.shape_cast %970 : vector<1x32x8xf32> to vector<32x8xf32>
    %cst_664 = arith.constant dense<0.000000e+00> : vector<8x8xf32>
    %972 = tpu.matmul %828, %971, %cst_664 {dimension_numbers = #tpu.dot_dimension_numbers<[1], [0], [0], [1], [0, 0, 1, 1], [], []>} : vector<8x32xf32>, vector<32x8xf32>, vector<8x8xf32> -> vector<8x8xf32>
    %c7_665 = arith.constant 7 : index
    %c0_666 = arith.constant 0 : index
    %c0_667 = arith.constant 0 : index
    %973 = vector.load %arg13[%c7_665, %c0_666, %c0_667] : memref<8x1x8xf32, #tpu.memory_space<vmem>>, vector<1x1x8xf32>
    %974 = vector.shape_cast %973 : vector<1x1x8xf32> to vector<1x8xf32>
    %975 = vector.broadcast %974 : vector<1x8xf32> to vector<8x8xf32>
    %976 = arith.addf %972, %975 : vector<8x8xf32>
    %cst_668 = arith.constant dense<0.000000e+00> : vector<8x8xf32>
    %977 = tpu.matmul %962, %969, %cst_668 {dimension_numbers = #tpu.dot_dimension_numbers<[1], [1], [0], [0], [0, 0, 1, 0], [], []>} : vector<8x8xf32>, vector<8x8xf32>, vector<8x8xf32> -> vector<8x8xf32>
    %978 = arith.addf %977, %597 : vector<8x8xf32>
    %cst_669 = arith.constant dense<0xFF800000> : vector<8xf32>
    %979 = vector.multi_reduction <maximumf>, %978, %cst_669 [1] : vector<8x8xf32> to vector<8xf32>
    %980 = vector.shape_cast %979 : vector<8xf32> to vector<8x1xf32>
    %981 = vector.broadcast %980 : vector<8x1xf32> to vector<8x8xf32>
    %982 = arith.subf %978, %981 : vector<8x8xf32>
    %983 = math.exp %982 : vector<8x8xf32>
    %cst_670 = arith.constant dense<0.000000e+00> : vector<8xf32>
    %984 = vector.multi_reduction <add>, %983, %cst_670 [1] : vector<8x8xf32> to vector<8xf32>
    %985 = vector.shape_cast %984 : vector<8xf32> to vector<8x1xf32>
    %986 = tpu.reciprocal %985 {approx = true} : vector<8x1xf32> -> vector<8x1xf32>
    %987 = vector.broadcast %986 : vector<8x1xf32> to vector<8x8xf32>
    %988 = arith.mulf %983, %987 : vector<8x8xf32>
    %cst_671 = arith.constant dense<0.000000e+00> : vector<8x8xf32>
    %989 = tpu.matmul %988, %976, %cst_671 {dimension_numbers = #tpu.dot_dimension_numbers<[1], [0], [0], [1], [0, 0, 1, 1], [], []>} : vector<8x8xf32>, vector<8x8xf32>, vector<8x8xf32> -> vector<8x8xf32>
    %c7_672 = arith.constant 7 : index
    %c0_673 = arith.constant 0 : index
    %c0_674 = arith.constant 0 : index
    %990 = vector.load %arg14[%c7_672, %c0_673, %c0_674] : memref<8x8x32xf32, #tpu.memory_space<vmem>>, vector<1x8x32xf32>
    %991 = vector.shape_cast %990 : vector<1x8x32xf32> to vector<8x32xf32>
    %cst_675 = arith.constant dense<0.000000e+00> : vector<8x32xf32>
    %992 = tpu.matmul %989, %991, %cst_675 {dimension_numbers = #tpu.dot_dimension_numbers<[1], [0], [0], [1], [0, 0, 1, 1], [], []>} : vector<8x8xf32>, vector<8x32xf32>, vector<8x32xf32> -> vector<8x32xf32>
    %993 = arith.addf %953, %992 : vector<8x32xf32>
    %994 = arith.addf %828, %993 : vector<8x32xf32>
    %c1_676 = arith.constant 1 : index
    %c0_677 = arith.constant 0 : index
    %c0_678 = arith.constant 0 : index
    %995 = vector.load %arg16[%c1_676, %c0_677, %c0_678] : memref<2x1x32xf32, #tpu.memory_space<vmem>>, vector<1x1x32xf32>
    %996 = vector.shape_cast %995 : vector<1x1x32xf32> to vector<1x32xf32>
    %c1_679 = arith.constant 1 : index
    %c0_680 = arith.constant 0 : index
    %c0_681 = arith.constant 0 : index
    %997 = vector.load %arg17[%c1_679, %c0_680, %c0_681] : memref<2x1x32xf32, #tpu.memory_space<vmem>>, vector<1x1x32xf32>
    %998 = vector.shape_cast %997 : vector<1x1x32xf32> to vector<1x32xf32>
    %cst_682 = arith.constant dense<0.000000e+00> : vector<8xf32>
    %999 = vector.multi_reduction <add>, %994, %cst_682 [1] : vector<8x32xf32> to vector<8xf32>
    %1000 = vector.shape_cast %999 : vector<8xf32> to vector<8x1xf32>
    %cst_683 = arith.constant 3.200000e+01 : f32
    %1001 = vector.broadcast %cst_683 : f32 to vector<8x1xf32>
    %1002 = arith.divf %1000, %1001 : vector<8x1xf32>
    %1003 = vector.broadcast %1002 : vector<8x1xf32> to vector<8x32xf32>
    %1004 = arith.subf %994, %1003 : vector<8x32xf32>
    %1005 = arith.mulf %1004, %1004 : vector<8x32xf32>
    %cst_684 = arith.constant dense<0.000000e+00> : vector<8xf32>
    %1006 = vector.multi_reduction <add>, %1005, %cst_684 [1] : vector<8x32xf32> to vector<8xf32>
    %1007 = vector.shape_cast %1006 : vector<8xf32> to vector<8x1xf32>
    %cst_685 = arith.constant 3.200000e+01 : f32
    %1008 = vector.broadcast %cst_685 : f32 to vector<8x1xf32>
    %1009 = arith.divf %1007, %1008 : vector<8x1xf32>
    %cst_686 = arith.constant 9.99999974E-6 : f32
    %1010 = vector.broadcast %cst_686 : f32 to vector<8x1xf32>
    %1011 = arith.addf %1009, %1010 : vector<8x1xf32>
    %1012 = math.rsqrt %1011 : vector<8x1xf32>
    %1013 = vector.broadcast %1012 : vector<8x1xf32> to vector<8x32xf32>
    %1014 = arith.mulf %1004, %1013 : vector<8x32xf32>
    %1015 = vector.broadcast %996 : vector<1x32xf32> to vector<8x32xf32>
    %1016 = arith.mulf %1014, %1015 : vector<8x32xf32>
    %1017 = vector.broadcast %998 : vector<1x32xf32> to vector<8x32xf32>
    %1018 = arith.addf %1016, %1017 : vector<8x32xf32>
    %c1_687 = arith.constant 1 : index
    %c0_688 = arith.constant 0 : index
    %c0_689 = arith.constant 0 : index
    %1019 = vector.load %arg20[%c1_687, %c0_688, %c0_689] : memref<2x32x128xf32, #tpu.memory_space<vmem>>, vector<1x32x128xf32>
    %1020 = vector.shape_cast %1019 : vector<1x32x128xf32> to vector<32x128xf32>
    %cst_690 = arith.constant dense<0.000000e+00> : vector<8x128xf32>
    %1021 = tpu.matmul %1018, %1020, %cst_690 {dimension_numbers = #tpu.dot_dimension_numbers<[1], [0], [0], [1], [0, 0, 1, 1], [], []>} : vector<8x32xf32>, vector<32x128xf32>, vector<8x128xf32> -> vector<8x128xf32>
    %c1_691 = arith.constant 1 : index
    %c0_692 = arith.constant 0 : index
    %c0_693 = arith.constant 0 : index
    %1022 = vector.load %arg21[%c1_691, %c0_692, %c0_693] : memref<2x1x128xf32, #tpu.memory_space<vmem>>, vector<1x1x128xf32>
    %1023 = vector.shape_cast %1022 : vector<1x1x128xf32> to vector<1x128xf32>
    %1024 = vector.broadcast %1023 : vector<1x128xf32> to vector<8x128xf32>
    %1025 = arith.addf %1021, %1024 : vector<8x128xf32>
    %cst_694 = arith.constant 0.000000e+00 : f32
    %1026 = vector.broadcast %cst_694 : f32 to vector<8x128xf32>
    %1027 = arith.maximumf %1025, %1026 : vector<8x128xf32>
    %c1_695 = arith.constant 1 : index
    %c0_696 = arith.constant 0 : index
    %c0_697 = arith.constant 0 : index
    %1028 = vector.load %arg22[%c1_695, %c0_696, %c0_697] : memref<2x128x32xf32, #tpu.memory_space<vmem>>, vector<1x128x32xf32>
    %1029 = vector.shape_cast %1028 : vector<1x128x32xf32> to vector<128x32xf32>
    %cst_698 = arith.constant dense<0.000000e+00> : vector<8x32xf32>
    %1030 = tpu.matmul %1027, %1029, %cst_698 {dimension_numbers = #tpu.dot_dimension_numbers<[1], [0], [0], [1], [0, 0, 1, 1], [], []>} : vector<8x128xf32>, vector<128x32xf32>, vector<8x32xf32> -> vector<8x32xf32>
    %c1_699 = arith.constant 1 : index
    %c0_700 = arith.constant 0 : index
    %c0_701 = arith.constant 0 : index
    %1031 = vector.load %arg23[%c1_699, %c0_700, %c0_701] : memref<2x1x32xf32, #tpu.memory_space<vmem>>, vector<1x1x32xf32>
    %1032 = vector.shape_cast %1031 : vector<1x1x32xf32> to vector<1x32xf32>
    %1033 = vector.broadcast %1032 : vector<1x32xf32> to vector<8x32xf32>
    %1034 = arith.addf %1030, %1033 : vector<8x32xf32>
    %1035 = arith.addf %1018, %1034 : vector<8x32xf32>
    %c1_702 = arith.constant 1 : index
    %c0_703 = arith.constant 0 : index
    %c0_704 = arith.constant 0 : index
    %1036 = vector.load %arg18[%c1_702, %c0_703, %c0_704] : memref<2x1x32xf32, #tpu.memory_space<vmem>>, vector<1x1x32xf32>
    %1037 = vector.shape_cast %1036 : vector<1x1x32xf32> to vector<1x32xf32>
    %c1_705 = arith.constant 1 : index
    %c0_706 = arith.constant 0 : index
    %c0_707 = arith.constant 0 : index
    %1038 = vector.load %arg19[%c1_705, %c0_706, %c0_707] : memref<2x1x32xf32, #tpu.memory_space<vmem>>, vector<1x1x32xf32>
    %1039 = vector.shape_cast %1038 : vector<1x1x32xf32> to vector<1x32xf32>
    %cst_708 = arith.constant dense<0.000000e+00> : vector<8xf32>
    %1040 = vector.multi_reduction <add>, %1035, %cst_708 [1] : vector<8x32xf32> to vector<8xf32>
    %1041 = vector.shape_cast %1040 : vector<8xf32> to vector<8x1xf32>
    %cst_709 = arith.constant 3.200000e+01 : f32
    %1042 = vector.broadcast %cst_709 : f32 to vector<8x1xf32>
    %1043 = arith.divf %1041, %1042 : vector<8x1xf32>
    %1044 = vector.broadcast %1043 : vector<8x1xf32> to vector<8x32xf32>
    %1045 = arith.subf %1035, %1044 : vector<8x32xf32>
    %1046 = arith.mulf %1045, %1045 : vector<8x32xf32>
    %cst_710 = arith.constant dense<0.000000e+00> : vector<8xf32>
    %1047 = vector.multi_reduction <add>, %1046, %cst_710 [1] : vector<8x32xf32> to vector<8xf32>
    %1048 = vector.shape_cast %1047 : vector<8xf32> to vector<8x1xf32>
    %cst_711 = arith.constant 3.200000e+01 : f32
    %1049 = vector.broadcast %cst_711 : f32 to vector<8x1xf32>
    %1050 = arith.divf %1048, %1049 : vector<8x1xf32>
    %cst_712 = arith.constant 9.99999974E-6 : f32
    %1051 = vector.broadcast %cst_712 : f32 to vector<8x1xf32>
    %1052 = arith.addf %1050, %1051 : vector<8x1xf32>
    %1053 = math.rsqrt %1052 : vector<8x1xf32>
    %1054 = vector.broadcast %1053 : vector<8x1xf32> to vector<8x32xf32>
    %1055 = arith.mulf %1045, %1054 : vector<8x32xf32>
    %1056 = vector.broadcast %1037 : vector<1x32xf32> to vector<8x32xf32>
    %1057 = arith.mulf %1055, %1056 : vector<8x32xf32>
    %1058 = vector.broadcast %1039 : vector<1x32xf32> to vector<8x32xf32>
    %1059 = arith.addf %1057, %1058 : vector<8x32xf32>
    %1060 = vector.extract_strided_slice %1059 {offsets = [0, 0], sizes = [2, 32], strides = [1, 1]} : vector<8x32xf32> to vector<2x32xf32>
    %c8 = arith.constant 8 : index
    %c0_713 = arith.constant 0 : index
    %c0_714 = arith.constant 0 : index
    %1061 = vector.load %arg24[%c8, %c0_713, %c0_714] : memref<12x32x32xf32, #tpu.memory_space<vmem>>, vector<1x32x32xf32>
    %1062 = vector.shape_cast %1061 : vector<1x32x32xf32> to vector<32x32xf32>
    %cst_715 = arith.constant dense<0.000000e+00> : vector<2x32xf32>
    %1063 = tpu.matmul %1060, %1062, %cst_715 {dimension_numbers = #tpu.dot_dimension_numbers<[1], [0], [0], [1], [0, 0, 1, 1], [], []>} : vector<2x32xf32>, vector<32x32xf32>, vector<2x32xf32> -> vector<2x32xf32>
    %1064 = arith.addf %551, %1063 : vector<2x32xf32>
    %1065 = vector.extract_strided_slice %1059 {offsets = [2, 0], sizes = [2, 32], strides = [1, 1]} : vector<8x32xf32> to vector<2x32xf32>
    %c9 = arith.constant 9 : index
    %c0_716 = arith.constant 0 : index
    %c0_717 = arith.constant 0 : index
    %1066 = vector.load %arg24[%c9, %c0_716, %c0_717] : memref<12x32x32xf32, #tpu.memory_space<vmem>>, vector<1x32x32xf32>
    %1067 = vector.shape_cast %1066 : vector<1x32x32xf32> to vector<32x32xf32>
    %cst_718 = arith.constant dense<0.000000e+00> : vector<2x32xf32>
    %1068 = tpu.matmul %1065, %1067, %cst_718 {dimension_numbers = #tpu.dot_dimension_numbers<[1], [0], [0], [1], [0, 0, 1, 1], [], []>} : vector<2x32xf32>, vector<32x32xf32>, vector<2x32xf32> -> vector<2x32xf32>
    %1069 = arith.addf %1064, %1068 : vector<2x32xf32>
    %1070 = vector.extract_strided_slice %1059 {offsets = [4, 0], sizes = [2, 32], strides = [1, 1]} : vector<8x32xf32> to vector<2x32xf32>
    %c10 = arith.constant 10 : index
    %c0_719 = arith.constant 0 : index
    %c0_720 = arith.constant 0 : index
    %1071 = vector.load %arg24[%c10, %c0_719, %c0_720] : memref<12x32x32xf32, #tpu.memory_space<vmem>>, vector<1x32x32xf32>
    %1072 = vector.shape_cast %1071 : vector<1x32x32xf32> to vector<32x32xf32>
    %cst_721 = arith.constant dense<0.000000e+00> : vector<2x32xf32>
    %1073 = tpu.matmul %1070, %1072, %cst_721 {dimension_numbers = #tpu.dot_dimension_numbers<[1], [0], [0], [1], [0, 0, 1, 1], [], []>} : vector<2x32xf32>, vector<32x32xf32>, vector<2x32xf32> -> vector<2x32xf32>
    %1074 = arith.addf %1069, %1073 : vector<2x32xf32>
    %1075 = vector.extract_strided_slice %1059 {offsets = [6, 0], sizes = [2, 32], strides = [1, 1]} : vector<8x32xf32> to vector<2x32xf32>
    %c11 = arith.constant 11 : index
    %c0_722 = arith.constant 0 : index
    %c0_723 = arith.constant 0 : index
    %1076 = vector.load %arg24[%c11, %c0_722, %c0_723] : memref<12x32x32xf32, #tpu.memory_space<vmem>>, vector<1x32x32xf32>
    %1077 = vector.shape_cast %1076 : vector<1x32x32xf32> to vector<32x32xf32>
    %cst_724 = arith.constant dense<0.000000e+00> : vector<2x32xf32>
    %1078 = tpu.matmul %1075, %1077, %cst_724 {dimension_numbers = #tpu.dot_dimension_numbers<[1], [0], [0], [1], [0, 0, 1, 1], [], []>} : vector<2x32xf32>, vector<32x32xf32>, vector<2x32xf32> -> vector<2x32xf32>
    %1079 = arith.addf %1074, %1078 : vector<2x32xf32>
    %cst_725 = arith.constant 0.000000e+00 : f32
    %1080 = vector.broadcast %cst_725 : f32 to vector<2x32xf32>
    %1081 = arith.maximumf %1079, %1080 : vector<2x32xf32>
    %c0_726 = arith.constant 0 : index
    %c0_727 = arith.constant 0 : index
    %1082 = vector.load %arg26[%c0_726, %c0_727] : memref<32x4xf32, #tpu.memory_space<vmem>>, vector<32x4xf32>
    %cst_728 = arith.constant dense<0.000000e+00> : vector<2x4xf32>
    %1083 = tpu.matmul %1081, %1082, %cst_728 {dimension_numbers = #tpu.dot_dimension_numbers<[1], [0], [0], [1], [0, 0, 1, 1], [], []>} : vector<2x32xf32>, vector<32x4xf32>, vector<2x4xf32> -> vector<2x4xf32>
    %c0_729 = arith.constant 0 : index
    %c0_730 = arith.constant 0 : index
    %1084 = vector.load %arg27[%c0_729, %c0_730] : memref<1x4xf32, #tpu.memory_space<vmem>>, vector<1x4xf32>
    %1085 = vector.broadcast %1084 : vector<1x4xf32> to vector<2x4xf32>
    %1086 = arith.addf %1083, %1085 : vector<2x4xf32>
    %cst_731 = arith.constant 2.000000e+01 : f32
    %1087 = vector.broadcast %cst_731 : f32 to vector<2x4xf32>
    %1088 = arith.cmpf ogt, %1086, %1087 : vector<2x4xf32>
    %cst_732 = arith.constant 2.000000e+01 : f32
    %1089 = vector.broadcast %cst_732 : f32 to vector<2x4xf32>
    %1090 = arith.minimumf %1086, %1089 : vector<2x4xf32>
    %1091 = math.exp %1090 : vector<2x4xf32>
    %1092 = math.log1p %1091 : vector<2x4xf32>
    %1093 = arith.select %1088, %1086, %1092 : vector<2x4xi1>, vector<2x4xf32>
    %c0_733 = arith.constant 0 : index
    %c0_734 = arith.constant 0 : index
    %1094 = vector.load %arg28[%c0_733, %c0_734] : memref<2x4xf32, #tpu.memory_space<vmem>>, vector<2x4xf32>
    tpu.vector_store %arg28[%c0_733, %c0_734], %1093 {strides = array<i32>} : memref<2x4xf32, #tpu.memory_space<vmem>>, vector<2x4xf32>,
    return
  }
}

</mosaic_0001>

<bundles_post_ra>
// kernel: fwd.1
= control target key start
LH: loop header
LB: loop body
LE: loop exit
PB: predicated region body
PF: predicated region fallthrough
CT: control target
= control target key end

     0   :  { %s15314_s0 = inlined_call_operand.vmem [shape: f32[16,6], index: 0, kind: input, shape index: {}]   ;;  %s15315_s1 = inlined_call_operand.vmem [shape: f32[16,32], index: 1, kind: input, shape index: {}]   ;;  %s15316_s2 = inlined_call_operand.vmem [shape: f32[8,3], index: 2, kind: input, shape index: {}]   ;;  %s15317_s3 = inlined_call_operand.vmem [shape: f32[8,32], index: 3, kind: input, shape index: {}]   ;;  %s15318_s4 = inlined_call_operand.vmem [shape: f32[6,32], index: 4, kind: input, shape index: {}]   ;;  %s15319_s5 = inlined_call_operand.vmem [shape: f32[1,32], index: 5, kind: input, shape index: {}]   ;;  %s15320_s6 = inlined_call_operand.vmem [shape: f32[3,32], index: 6, kind: input, shape index: {}]   ;;  %s15321_s7 = inlined_call_operand.vmem [shape: f32[1,32], index: 7, kind: input, shape index: {}]   ;;  %s15322_s8 = inlined_call_operand.vmem [shape: f32[8,32,8], index: 8, kind: input, shape index: {}]   ;;  %s15323_s9 = inlined_call_operand.vmem [shape: f32[8,1,8], index: 9, kind: input, shape index: {}]   ;;  %s15324_s10 = inlined_call_operand.vmem [shape: f32[8,32,8], index: 10, kind: input, shape index: {}]   ;;  %s15325_s11 = inlined_call_operand.vmem [shape: f32[8,1,8], index: 11, kind: input, shape index: {}]   ;;  %s15326_s12 = inlined_call_operand.vmem [shape: f32[8,32,8], index: 12, kind: input, shape index: {}]   ;;  %s15327_s13 = inlined_call_operand.vmem [shape: f32[8,1,8], index: 13, kind: input, shape index: {}]   ;;  %s15328_s14 = inlined_call_operand.vmem [shape: f32[8,8,32], index: 14, kind: input, shape index: {}]   ;;  %s15329_s15 = inlined_call_operand.vmem [shape: f32[2,1,32], index: 15, kind: input, shape index: {}]   ;;  %s15330_s16 = inlined_call_operand.vmem [shape: f32[2,1,32], index: 16, kind: input, shape index: {}]   ;;  %s15331_s17 = inlined_call_operand.vmem [shape: f32[2,1,32], index: 17, kind: input, shape index: {}]   ;;  %s15332_s18 = inlined_call_operand.vmem [shape: f32[2,1,32], index: 18, kind: input, shape index: {}]   ;;  %s15333_s19 = inlined_call_operand.vmem [shape: f32[2,1,32], index: 19, kind: input, shape index: {}]   ;;  %s15334_s20 = inlined_call_operand.vmem [shape: f32[2,32,128], index: 20, kind: input, shape index: {}]   ;;  %s15335_s21 = inlined_call_operand.vmem [shape: f32[2,1,128], index: 21, kind: input, shape index: {}]   ;;  %s15336_s22 = inlined_call_operand.vmem [shape: f32[2,128,32], index: 22, kind: input, shape index: {}]   ;;  %s15337_s23 = inlined_call_operand.vmem [shape: f32[2,1,32], index: 23, kind: input, shape index: {}]   ;;  %s15338_s24 = inlined_call_operand.vmem [shape: f32[12,32,32], index: 24, kind: input, shape index: {}]   ;;  %s15339_s25 = inlined_call_operand.vmem [shape: f32[1,32], index: 25, kind: input, shape index: {}]   ;;  %s15340_s26 = inlined_call_operand.vmem [shape: f32[32,4], index: 26, kind: input, shape index: {}]   ;;  %s15341_s27 = inlined_call_operand.vmem [shape: f32[1,4], index: 27, kind: input, shape index: {}]   ;;  %s15342_s28 = inlined_call_operand.hbm [shape: f32[2,4], index: 28, kind: output, shape index: {}]  }
   0x1   :  { %15374 = sst [smem:[#allocation25_spill]] %s15314_s0 }
   0x2   :  { %15375 = sst [smem:[#allocation26_spill]] %s15315_s1 }
   0x3   :  { %15376 = sst [smem:[#allocation27_spill]] %s15316_s2 }
   0x4   :  { %15377 = sst [smem:[#allocation28_spill]] %s15317_s3 }
   0x5   :  { %15378 = sst [smem:[#allocation29_spill]] %s15318_s4 }
   0x6   :  { %15379 = sst [smem:[#allocation30_spill]] %s15319_s5 }
   0x7   :  { %15380 = sst [smem:[#allocation31_spill]] %s15320_s6 }
   0x8   :  { %15381 = sst [smem:[#allocation32_spill]] %s15321_s7 }
   0x9   :  { %15382 = sst [smem:[#allocation33_spill]] %s15322_s8 }
   0xa   :  { %15383 = sst [smem:[#allocation34_spill]] %s15323_s9 }
   0xb   :  { %15384 = sst [smem:[#allocation35_spill]] %s15324_s10 }
   0xc   :  { %15385 = sst [smem:[#allocation36_spill]] %s15325_s11 }
   0xd   :  { %15386 = sst [smem:[#allocation37_spill]] %s15326_s12 }
   0xe   :  { %s15387_s9 = sld [smem:[#allocation29_spill]]  ;;  %vm107_vm0 = vcmask 1045504   ;;  %s15388_s6 = sld [smem:[#allocation25_spill]]  ;;  %vm100_vm1 = vcmask 48128  }
   0xf   :  { %s15389_s2 = sld [smem:[#allocation33_spill]] }
  0x14   :  { %v92_v0 = vld [vmem:[%s15387_s9] sm:$0x3f]  ;;  %v91_v2 = vld [vmem:[%s15388_s6 + $0x8] sm:$0xff] }
  0x15   :  { %v90_v1 = vld [vmem:[%s15388_s6] sm:$0xff]  ;;  %11221 = vmatprep.subr.msk.mxu0 %vm107_vm0, %v92_v0  ;;  %v244_v4 = vld [vmem:[%s15389_s2 + $0x8] sm:$0xff] }
  0x16   :  { %11223 = vmatprep.mubr.msk.f32.mxu0 %vm100_vm1, %v90_v1  ;;  %v243_v3 = vld [vmem:[%s15389_s2] sm:$0xff] }
  0x17   :  { %33 = vsyncpa [#allocation3], 0  ;;  %11222 = vmatpush3.msk.msra.mxu0 %vm107_vm0, %v92_v0  ;;  %v13395_v5 = vpack.c.bf16 %v244_v4, %v243_v3  ;;  %v245_v6 = vld [vmem:[%s15389_s2 + $0x10] sm:$0xff]  ;;  %v246_v7 = vld [vmem:[%s15389_s2 + $0x18] sm:$0xff]  ;;  %s15390_s3 = sld [smem:[#allocation35_spill]]  ;;  %s15391_s29 = sld [smem:[#allocation30_spill]]  ;;  %v190_v50 = vlaneseq }
  0x18   :  { %11224 = vmatmul.mubr.msk.f32.vlgmr.msra.gmra.mrb[0].mxu0 %vm100_vm1, %v91_v2  ;;  %v13405_v8 = vpack.c.bf16 %v246_v7, %v245_v6  ;;  %s15392_s1 = sld [smem:[#allocation26_spill]]  ;;  %vm254_vm2 = vcmask 261120   ;;  %s15393_s11 = sld [smem:[#allocation37_spill]]  ;;  %vm510_vm3 = vcmask 64512   ;;  %v10253_v42 = vld [vmem:[%s15327_s13] ss:$0 sm:$0xff] }
  0x19   :  { %12359 = vmatprep.subr.bf16.mxu1 %v13395_v5  ;;  %s15394_s30 = sld [smem:[#allocation34_spill]]  ;;  %s15395_s0 = sld [smem:[#allocation36_spill]]  ;;  %vm13483_vm4 = vmpackc.low %vm510_vm3, %vm510_vm3  ;;  %v191_v51 = vshrl.u32 %v190_v50, 7  ;;  %v194_v52 = vand.u32 127, %v190_v50  ;;  %v13230_v57 = vmov -1e+30  }
  0x1a   :  { %12361 = vmatpush3.bf16.msra.mxu1 %v13395_v5  ;;  %vm598_vm7 = vcmask 130048   ;;  %vm13232_vm8 = vmmov 0   ;;  %vm5817_vm9 = vcmask 1042432   ;;  %vm5813_vm10 = vcmask 23552   ;;  %s15420_s9 = sld [smem:[#allocation32_spill]] }
  0x1b   :  { %12363 = vmatprep.subr.bf16.mxu1 %v13405_v8  ;;  %v192_v53 = vadd.s32 8, %v191_v51  ;;  %v199_v54 = vand.u32 1, %v191_v51  ;;  %v223_v55 = vand.u32 1, %v194_v52  ;;  %vm10226_vm12 = vcmask 25600  }
  0x1d   :  { %v338_v9 = vld [vmem:[%s15390_s3] sm:$0xff]  ;;  %v339_v10 = vld [vmem:[%s15390_s3 + $0x8] sm:$0xff]  ;;  %v340_v19 = vld [vmem:[%s15390_s3 + $0x10] sm:$0xff]  ;;  %v206_v56 = vand.u32 1, %v192_v53  ;;  %vm231_vm5 = vcmp.eq.s32.totalorder %v199_v54, %v223_v55 }
  0x1e   :  { %12365 = vmatpush3.bf16.msra.mxu1 %v13405_v8  ;;  %v13415_v11 = vpack.c.bf16 %v339_v10, %v338_v9  ;;  %v10242_v12 = vld [vmem:[%s15391_s29] ss:$0 sm:$0xff]  ;;  %v187_v17 = vld [vmem:[%s15392_s1 + $0x8] sm:$0xff]  ;;  %v341_v20 = vld [vmem:[%s15390_s3 + $0x18] sm:$0xff]  ;;  %v13495_v58 = vsel %vm231_vm5, 0.0, %v13230_v57 }
  0x1f   :  { %v186_v16 = vld [vmem:[%s15392_s1] sm:$0xff]  ;;  %v13437_v23 = vpack.c.bf16 %v341_v20, %v340_v19  ;;  %v425_v25 = vld [vmem:[%s15393_s11 + $0x8] sm:$0xff]  ;;  %v426_v27 = vld [vmem:[%s15393_s11 + $0x10] sm:$0xff]  ;;  %vm232_vm6 = vcmp.eq.s32.totalorder %v206_v56, %v223_v55 }
  0x20   :  { %12367 = vmatprep.subr.bf16.mxu1 %v13415_v11  ;;  %v424_v24 = vld [vmem:[%s15393_s11] sm:$0xff]  ;;  %v427_v28 = vld [vmem:[%s15393_s11 + $0x18] sm:$0xff]  ;;  %v13497_v60 = vsel %vm232_vm6, 0.0, %v13230_v57 }
  0x21   :  { %v13453_v26 = vpack.c.bf16 %v425_v25, %v424_v24  ;;  %v13463_v29 = vpack.c.bf16 %v427_v28, %v426_v27  ;;  %v10247_v30 = vld [vmem:[%s15394_s30] ss:$0 sm:$0xff]  ;;  %v10266_v27 = vld [vmem:[%s15389_s2 + $0x30] sm:$0xff]  ;;  %v10267_v28 = vld [vmem:[%s15389_s2 + $0x38] sm:$0xff] }
  0x22   :  { %v10250_v35 = vld [vmem:[%s15395_s0] ss:$0 sm:$0xff]  ;;  %v10285_v53 = vld [vmem:[%s15327_s13 + $0x1] ss:$0 sm:$0xff] }
  0xeb   :  { %v11225_v13 = vpop.f32.mrb[0].mxu0 }
  0xec   :  { %v183_v14 = vadd.f32 %v11225_v13, %v10242_v12  ;;  %v177_v15 = vpop.f32.mrb[1].mxu0 }
  0xed   :  { %v178_v18 = vadd.f32 %v10242_v12, %v177_v15  ;;  %v10264_v15 = vld [vmem:[%s15389_s2 + $0x20] sm:$0xff] }
  0xee   :  { %v13435_v22 = vadd.f32 %v187_v17, %v183_v14 }
  0xef   :  { %v13433_v21 = vadd.f32 %v186_v16, %v178_v18  ;;  %v10265_v16 = vld [vmem:[%s15389_s2 + $0x28] sm:$0xff]  ;;  %v702_v18 = vld [vmem:[%s15328_s14] sm:$0xff] }
  0xf0   :  { %v13511_v17 = vpack.c.bf16 %v10265_v16, %v10264_v15 }
  0xf1   :  { %11234 = vmatprep.mubr.msk.f32.mxu1 %vm254_vm2, %v13433_v21 }
  0xf2   :  { %11235 = vmatmul.mubr.msk.f32.vlgmr.msra.gmra.mrb[0].mxu1 %vm254_vm2, %v13435_v22 }
  0xf3   :  { %12369 = vmatpush3.bf16.msra.mxu1 %v13415_v11  ;;  %11245 = vmatprep.mubr.msk.f32.mxu1 %vm254_vm2, %v13433_v21 }
  0xf4   :  { %12371 = vmatprep.subr.bf16.mxu1 %v13437_v23 }
  0xf7   :  { %12373 = vmatpush3.bf16.msra.mxu1 %v13437_v23 }
  0xf8   :  { %12375 = vmatprep.subr.bf16.mxu1 %v13453_v26 }
  0xfa   :  { %11246 = vmatmul.mubr.msk.f32.vlgmr.msra.gmra.mrb[2].mxu1 %vm254_vm2, %v13435_v22 }
  0xfb   :  { %12377 = vmatpush3.bf16.msra.mxu1 %v13453_v26  ;;  %11256 = vmatprep.mubr.msk.f32.mxu1 %vm254_vm2, %v13433_v21 }
  0xfc   :  { %12379 = vmatprep.subr.bf16.mxu1 %v13463_v29 }
  0xff   :  { %12381 = vmatpush3.bf16.msra.mxu1 %v13463_v29 }
 0x102   :  { %11257 = vmatmul.mubr.msk.f32.vlgmr.msra.gmra.mrb[4].mxu1 %vm254_vm2, %v13435_v22 }
 0x1c5   :  { %v11236_v31 = vpop.f32.mrb[0].mxu1 }
 0x1c6   :  { %v327_v32 = vpop.f32.mrb[1].mxu1  ;;  %v333_v43 = vadd.f32 %v11236_v31, %v10247_v30 }
 0x1c7   :  { %v328_v33 = vadd.f32 %v10247_v30, %v327_v32  ;;  %v13524_v32 = vpack.c.bf16 %v10267_v28, %v10266_v27 }
 0x1c8   :  { %v337_v48 = vmul.f32 0.35355338, %v333_v43  ;;  %v10274_v43 = vld [vmem:[%s15390_s3 + $0x30] sm:$0xff] }
 0x1c9   :  { %v336_v34 = vmul.f32 0.35355338, %v328_v33  ;;  %v10280_v33 = vld [vmem:[%s15393_s11 + $0x20] sm:$0xff] }
 0x1cb   :  { %11263 = vmatprep.mubr.msk.f32.mxu0 %vm510_vm3, %v336_v34  ;;  %v10281_v34 = vld [vmem:[%s15393_s11 + $0x28] sm:$0xff] }
 0x1cd   :  { %v11247_v36 = vpop.f32.mrb[2].mxu1 }
 0x1ce   :  { %v421_v37 = vadd.f32 %v11247_v36, %v10250_v35  ;;  %v415_v38 = vpop.f32.mrb[3].mxu1  ;;  %v10282_v36 = vld [vmem:[%s15393_s11 + $0x30] sm:$0xff] }
 0x1cf   :  { %v416_v39 = vadd.f32 %v10250_v35, %v415_v38  ;;  %v13537_v35 = vpack.c.bf16 %v10281_v34, %v10280_v33  ;;  %v10294_v34 = vld [vmem:[%s15328_s14 + $0x8] sm:$0xff] }
 0x1d1   :  { %v12382_v41 = vpack.c.bf16 %v421_v37, %v416_v39  ;;  %v10283_v37 = vld [vmem:[%s15393_s11 + $0x38] sm:$0xff]  ;;  %v10272_v39 = vld [vmem:[%s15390_s3 + $0x20] sm:$0xff] }
 0x1d2   :  { %v13547_v38 = vpack.c.bf16 %v10283_v37, %v10282_v36 }
 0x1d3   :  { %12384 = vmatprep.subr.msk.bf16.mxu0 %vm13483_vm4, %v12382_v41 }
 0x1d4   :  { %12387 = vmatpush3.bf16.xpose.msk.msra.mxu0 %vm13483_vm4, %v12382_v41  ;;  %v10273_v41 = vld [vmem:[%s15390_s3 + $0x28] sm:$0xff] }
 0x1d5   :  { %v11258_v44 = vpop.f32.mrb[4].mxu1  ;;  %11273 = vmatprep.subr.mxu0 %v702_v18 }
 0x1d6   :  { %v507_v45 = vadd.f32 %v11258_v44, %v10253_v42  ;;  %v501_v46 = vpop.f32.mrb[5].mxu1  ;;  %v10275_v44 = vld [vmem:[%s15390_s3 + $0x38] sm:$0xff] }
 0x1d7   :  { %v502_v47 = vadd.f32 %v10253_v42, %v501_v46  ;;  %v13564_v42 = vpack.c.bf16 %v10273_v41, %v10272_v39  ;;  %v10299_v41 = vld [vmem:[%s15389_s2 + $0x50] sm:$0xff] }
 0x1d9   :  { %v12388_v49 = vpack.c.bf16 %v507_v45, %v502_v47  ;;  %v13573_v47 = vpack.c.bf16 %v10275_v44, %v10274_v43  ;;  %v10300_v43 = vld [vmem:[%s15389_s2 + $0x58] sm:$0xff] }
 0x1db   :  { %11264 = vmatmul.mubr.msk.f32.vlgmr.msra.gmra.mrb[2].mxu0 %vm510_vm3, %v337_v48  ;;  %12389 = vmatprep.subr.bf16.mxu1 %v12388_v49  ;;  %v10269_v48 = vld [vmem:[%s15394_s30 + $0x1] ss:$0 sm:$0xff] }
 0x1dc   :  { %12391 = vmatpush3.bf16.msra.mxu1 %v12388_v49  ;;  %11274 = vmatpush3.msra.mxu0 %v702_v18 }
 0x1dd   :  { %12393 = vmatprep.subr.bf16.mxu1 %v13511_v17  ;;  %12401 = vmatprep.subr.bf16.mxu0 %v13564_v42 }
 0x2ae   :  { %v11265_v59 = vpop.f32.mrb[2].mxu0 }
 0x2af   :  { %v589_v61 = vpop.f32.mrb[3].mxu0  ;;  %v595_v63 = vadd.f32 %v11265_v59, %v13497_v60 }
 0x2b0   :  { %v590_v62 = vadd.f32 %v589_v61, %v13495_v58  ;;  %v10277_v61 = vld [vmem:[%s15395_s0 + $0x1] ss:$0 sm:$0xff] }
 0x2b1   :  { %v602_v1 = vsel %vm598_vm7, %v595_v63, -inf }
 0x2b2   :  { %v599_v0 = vsel %vm598_vm7, %v590_v62, -inf }
 0x2b3   :  { %600 = vmax.xlane.f32.xlu0 %v599_v0 }
 0x2b7   :  { %603 = vmax.xlane.f32.xlu0 %v602_v1 }
 0x340   :  { %v601_v2 = vpop.xlane.xlu0 %600 }
 0x341   :  { %v605_v3 = vsub.f32 %v590_v62, %v601_v2 }
 0x343   :  { %v607_v4 = vmul.f32 1.442695, %v605_v3 }
 0x344   :  { %v604_v6 = vpop.xlane.xlu0 %603 }
 0x345   :  { %13036 = vpow2.f32 %v607_v4  ;;  %v606_v7 = vsub.f32 %v595_v63, %v604_v6 }
 0x347   :  { %v609_v9 = vmul.f32 1.442695, %v606_v7 }
 0x349   :  { %13038 = vpow2.f32 %v609_v9 }
 0x34f   :  { %v13037_v10 = vpop.eup %13036 }
 0x350   :  { %v611_v12 = vsel %vm598_vm7, %v13037_v10, 0.0 }
 0x351   :  { %612 = vadd.xlane.f32.xlu1 %v611_v12 }
 0x353   :  { %v13039_v13 = vpop.eup %13038 }
 0x354   :  { %v614_v14 = vsel %vm598_vm7, %v13039_v13, 0.0 }
 0x355   :  { %615 = vadd.xlane.f32.xlu1 %v614_v14 }
 0x3de   :  { %v613_v19 = vpop.xlane.xlu1 %612 }
 0x3df   :  { %13040 = vrcp.f32 %v613_v19 }
 0x3e2   :  { %v616_v20 = vpop.xlane.xlu1 %615 }
 0x3e3   :  { %13042 = vrcp.f32 %v616_v20 }
 0x3e9   :  { %v13041_v24 = vpop.eup %13040 }
 0x3ea   :  { %v619_v25 = vmul.f32 %v13041_v24, %v13037_v10 }
 0x3ec   :  { %11270 = vmatprep.mubr.msk.f32.mxu1 %vm598_vm7, %v619_v25 }
 0x3ed   :  { %v13043_v30 = vpop.eup %13042 }
 0x3ee   :  { %v620_v31 = vmul.f32 %v13043_v30, %v13039_v13  ;;  %v10297_v30 = vld [vmem:[%s15389_s2 + $0x40] sm:$0xff] }
 0x3f0   :  { %11271 = vmatmul.mubr.msk.f32.vlgmr.msra.gmra.mrb[6].mxu1 %vm598_vm7, %v620_v31  ;;  %v10298_v31 = vld [vmem:[%s15389_s2 + $0x48] sm:$0xff] }
 0x3f1   :  { %12395 = vmatpush3.bf16.msra.mxu1 %v13511_v17  ;;  %11286 = vmatprep.mubr.msk.f32.mxu1 %vm254_vm2, %v13433_v21  ;;  %v13611_v33 = vpack.c.bf16 %v10298_v31, %v10297_v30 }
 0x3f2   :  { %12397 = vmatprep.subr.bf16.mxu1 %v13524_v32 }
 0x3f5   :  { %12399 = vmatpush3.bf16.msra.mxu1 %v13524_v32 }
 0x3f6   :  { %12409 = vmatprep.subr.bf16.mxu1 %v13537_v35 }
 0x3f8   :  { %11287 = vmatmul.mubr.msk.f32.vlgmr.msra.gmra.mrb[8].mxu1 %vm254_vm2, %v13435_v22 }
 0x3f9   :  { %12411 = vmatpush3.bf16.msra.mxu1 %v13537_v35  ;;  %11308 = vmatprep.mubr.msk.f32.mxu1 %vm254_vm2, %v13433_v21 }
 0x3fa   :  { %12413 = vmatprep.subr.bf16.mxu1 %v13547_v38 }
 0x3fd   :  { %12415 = vmatpush3.bf16.msra.mxu1 %v13547_v38 }
 0x400   :  { %11309 = vmatmul.mubr.msk.f32.vlgmr.msra.gmra.mrb[10].mxu1 %vm254_vm2, %v13435_v22 }
 0x4c3   :  { %v11272_v45 = vpop.f32.mrb[6].mxu1 }
 0x4c4   :  { %v693_v46 = vpop.f32.mrb[7].mxu1 }
 0x4c5   :  { %11275 = vmatprep.mubr.msk.f32.mxu0 %vm510_vm3, %v693_v46 }
 0x4c6   :  { %11276 = vmatmul.mubr.msk.f32.vlgmr.msra.gmra.mrb[4].mxu0 %vm510_vm3, %v11272_v45 }
 0x4c7   :  { %12403 = vmatpush3.bf16.msra.mxu0 %v13564_v42  ;;  %11297 = vmatprep.mubr.msk.f32.mxu0 %vm254_vm2, %v13433_v21 }
 0x4c8   :  { %12405 = vmatprep.subr.bf16.mxu0 %v13573_v47 }
 0x4cb   :  { %v11288_v49 = vpop.f32.mrb[8].mxu1  ;;  %12407 = vmatpush3.bf16.msra.mxu0 %v13573_v47 }
 0x4cc   :  { %v865_v50 = vpop.f32.mrb[9].mxu1  ;;  %v871_v3 = vadd.f32 %v11288_v49, %v10269_v48  ;;  %v10313_v49 = vld [vmem:[%s15393_s11 + $0x40] sm:$0xff] }
 0x4cd   :  { %v866_v51 = vadd.f32 %v10269_v48, %v865_v50  ;;  %v13623_v48 = vpack.c.bf16 %v10300_v43, %v10299_v41  ;;  %v10314_v50 = vld [vmem:[%s15393_s11 + $0x48] sm:$0xff] }
 0x4ce   :  { %11298 = vmatmul.mubr.msk.f32.vlgmr.msra.gmra.mrb[6].mxu0 %vm254_vm2, %v13435_v22  ;;  %v875_v4 = vmul.f32 0.35355338, %v871_v3 }
 0x4cf   :  { %v874_v52 = vmul.f32 0.35355338, %v866_v51  ;;  %v13637_v51 = vpack.c.bf16 %v10314_v50, %v10313_v49 }
 0x4d1   :  { %11315 = vmatprep.mubr.msk.f32.mxu0 %vm510_vm3, %v874_v52  ;;  %v10315_v52 = vld [vmem:[%s15393_s11 + $0x50] sm:$0xff] }
 0x4d3   :  { %v11310_v54 = vpop.f32.mrb[10].mxu1 }
 0x4d4   :  { %v1049_v55 = vadd.f32 %v11310_v54, %v10285_v53  ;;  %v1043_v56 = vpop.f32.mrb[11].mxu1 }
 0x4d5   :  { %v1044_v57 = vadd.f32 %v10285_v53, %v1043_v56  ;;  %v10316_v53 = vld [vmem:[%s15393_s11 + $0x58] sm:$0xff]  ;;  %v10306_v56 = vld [vmem:[%s15390_s3 + $0x48] sm:$0xff] }
 0x4d6   :  { %v13647_v54 = vpack.c.bf16 %v10316_v53, %v10315_v52 }
 0x4d7   :  { %v12422_v59 = vpack.c.bf16 %v1049_v55, %v1044_v57  ;;  %v10305_v55 = vld [vmem:[%s15390_s3 + $0x40] sm:$0xff] }
 0x4d8   :  { %v13664_v57 = vpack.c.bf16 %v10306_v56, %v10305_v55  ;;  %v10330_v55 = vld [vmem:[%s15389_s2 + $0x60] sm:$0xff]  ;;  %v10331_v56 = vld [vmem:[%s15389_s2 + $0x68] sm:$0xff] }
 0x4d9   :  { %12423 = vmatprep.subr.bf16.mxu1 %v12422_v59 }
 0x4da   :  { %12425 = vmatpush3.bf16.msra.mxu1 %v12422_v59  ;;  %v10307_v59 = vld [vmem:[%s15390_s3 + $0x50] sm:$0xff] }
 0x4db   :  { %12427 = vmatprep.subr.bf16.mxu1 %v13611_v33 }
 0x5a1   :  { %v11299_v62 = vpop.f32.mrb[6].mxu0 }
 0x5a2   :  { %v961_v63 = vadd.f32 %v11299_v62, %v10277_v61  ;;  %v955_v0 = vpop.f32.mrb[7].mxu0 }
 0x5a3   :  { %v956_v1 = vadd.f32 %v10277_v61, %v955_v0  ;;  %v10308_v61 = vld [vmem:[%s15390_s3 + $0x58] sm:$0xff] }
 0x5a4   :  { %v13673_v0 = vpack.c.bf16 %v10308_v61, %v10307_v59  ;;  %v13711_v59 = vpack.c.bf16 %v10331_v56, %v10330_v55  ;;  %v10327_v61 = vld [vmem:[%s15328_s14 + $0x10] sm:$0xff] }
 0x5a5   :  { %v12416_v2 = vpack.c.bf16 %v961_v63, %v956_v1  ;;  %v10302_v1 = vld [vmem:[%s15394_s30 + $0x2] ss:$0 sm:$0xff] }
 0x5a7   :  { %12418 = vmatprep.subr.msk.bf16.mxu0 %vm13483_vm4, %v12416_v2 }
 0x5a8   :  { %12421 = vmatpush3.bf16.xpose.msk.msra.mxu0 %vm13483_vm4, %v12416_v2 }
 0x5a9   :  { %11325 = vmatprep.subr.mxu0 %v10294_v34 }
 0x5af   :  { %11316 = vmatmul.mubr.msk.f32.vlgmr.msra.gmra.mrb[8].mxu0 %vm510_vm3, %v875_v4 }
 0x5b0   :  { %11326 = vmatpush3.msra.mxu0 %v10294_v34 }
 0x5b1   :  { %12435 = vmatprep.subr.bf16.mxu0 %v13664_v57 }
 0x682   :  { %v11317_v6 = vpop.f32.mrb[8].mxu0 }
 0x683   :  { %v1136_v7 = vadd.f32 %v11317_v6, %v13497_v60  ;;  %v1130_v9 = vpop.f32.mrb[9].mxu0 }
 0x684   :  { %v1131_v10 = vadd.f32 %v1130_v9, %v13495_v58 }
 0x685   :  { %v1142_v12 = vsel %vm598_vm7, %v1136_v7, -inf }
 0x686   :  { %1143 = vmax.xlane.f32.xlu1 %v1142_v12  ;;  %v1139_v13 = vsel %vm598_vm7, %v1131_v10, -inf }
 0x687   :  { %1140 = vmax.xlane.f32.xlu0 %v1139_v13 }
 0x713   :  { %v1144_v14 = vpop.xlane.xlu1 %1143 }
 0x714   :  { %v1146_v15 = vsub.f32 %v1136_v7, %v1144_v14  ;;  %v1141_v16 = vpop.xlane.xlu0 %1140  ;;  %v10318_v7 = vld [vmem:[%s15327_s13 + $0x2] ss:$0 sm:$0xff] }
 0x715   :  { %v1145_v18 = vsub.f32 %v1131_v10, %v1141_v16 }
 0x716   :  { %v1149_v19 = vmul.f32 1.442695, %v1146_v15  ;;  %v10310_v15 = vld [vmem:[%s15395_s0 + $0x2] ss:$0 sm:$0xff] }
 0x717   :  { %v1147_v20 = vmul.f32 1.442695, %v1145_v18 }
 0x718   :  { %13044 = vpow2.f32 %v1149_v19 }
 0x719   :  { %13046 = vpow2.f32 %v1147_v20 }
 0x722   :  { %v13045_v24 = vpop.eup %13044 }
 0x723   :  { %v13047_v25 = vpop.eup %13046  ;;  %v1154_v27 = vsel %vm598_vm7, %v13045_v24, 0.0 }
 0x724   :  { %1155 = vadd.xlane.f32.xlu1 %v1154_v27  ;;  %v1151_v28 = vsel %vm598_vm7, %v13047_v25, 0.0 }
 0x725   :  { %1152 = vadd.xlane.f32.xlu0 %v1151_v28 }
 0x7b1   :  { %v1156_v36 = vpop.xlane.xlu1 %1155 }
 0x7b2   :  { %13048 = vrcp.f32 %v1156_v36  ;;  %v1153_v37 = vpop.xlane.xlu0 %1152 }
 0x7b3   :  { %13050 = vrcp.f32 %v1153_v37 }
 0x7bc   :  { %v13049_v39 = vpop.eup %13048 }
 0x7bd   :  { %v13051_v44 = vpop.eup %13050  ;;  %v1160_v46 = vmul.f32 %v13049_v39, %v13045_v24 }
 0x7be   :  { %v1159_v45 = vmul.f32 %v13051_v44, %v13047_v25 }
 0x7c0   :  { %11322 = vmatprep.mubr.msk.f32.mxu1 %vm598_vm7, %v1159_v45 }
 0x7c1   :  { %11323 = vmatmul.mubr.msk.f32.vlgmr.msra.gmra.mrb[12].mxu1 %vm598_vm7, %v1160_v46 }
 0x7c2   :  { %12429 = vmatpush3.bf16.msra.mxu1 %v13611_v33  ;;  %11338 = vmatprep.mubr.msk.f32.mxu1 %vm254_vm2, %v13433_v21 }
 0x7c3   :  { %12431 = vmatprep.subr.bf16.mxu1 %v13623_v48 }
 0x7c6   :  { %12433 = vmatpush3.bf16.msra.mxu1 %v13623_v48 }
 0x7c7   :  { %12443 = vmatprep.subr.bf16.mxu1 %v13637_v51 }
 0x7c9   :  { %11339 = vmatmul.mubr.msk.f32.vlgmr.msra.gmra.mrb[14].mxu1 %vm254_vm2, %v13435_v22 }
 0x7ca   :  { %12445 = vmatpush3.bf16.msra.mxu1 %v13637_v51  ;;  %11360 = vmatprep.mubr.msk.f32.mxu1 %vm254_vm2, %v13433_v21 }
 0x7cb   :  { %12447 = vmatprep.subr.bf16.mxu1 %v13647_v54 }
 0x7ce   :  { %12449 = vmatpush3.bf16.msra.mxu1 %v13647_v54 }
 0x7d1   :  { %11361 = vmatmul.mubr.msk.f32.vlgmr.msra.gmra.mrb[16].mxu1 %vm254_vm2, %v13435_v22 }
 0x894   :  { %v11324_v62 = vpop.f32.mrb[12].mxu1 }
 0x895   :  { %v1233_v63 = vpop.f32.mrb[13].mxu1 }
 0x896   :  { %11327 = vmatprep.mubr.msk.f32.mxu0 %vm510_vm3, %v1233_v63 }
 0x897   :  { %11328 = vmatmul.mubr.msk.f32.vlgmr.msra.gmra.mrb[4].mxu0 %vm510_vm3, %v11324_v62 }
 0x898   :  { %12437 = vmatpush3.bf16.msra.mxu0 %v13664_v57  ;;  %11349 = vmatprep.mubr.msk.f32.mxu0 %vm254_vm2, %v13433_v21 }
 0x899   :  { %12439 = vmatprep.subr.bf16.mxu0 %v13673_v0 }
 0x89c   :  { %v11340_v2 = vpop.f32.mrb[14].mxu1  ;;  %12441 = vmatpush3.bf16.msra.mxu0 %v13673_v0 }
 0x89d   :  { %v1406_v3 = vpop.f32.mrb[15].mxu1  ;;  %v1412_v25 = vadd.f32 %v11340_v2, %v10302_v1  ;;  %v10332_v2 = vld [vmem:[%s15389_s2 + $0x70] sm:$0xff] }
 0x89e   :  { %v1407_v4 = vadd.f32 %v10302_v1, %v1406_v3  ;;  %v10333_v3 = vld [vmem:[%s15389_s2 + $0x78] sm:$0xff] }
 0x89f   :  { %11350 = vmatmul.mubr.msk.f32.vlgmr.msra.gmra.mrb[10].mxu0 %vm254_vm2, %v13435_v22  ;;  %v1416_v27 = vmul.f32 0.35355338, %v1412_v25  ;;  %v10341_v25 = vld [vmem:[%s15390_s3 + $0x78] sm:$0xff] }
 0x8a0   :  { %v1415_v6 = vmul.f32 0.35355338, %v1407_v4 }
 0x8a2   :  { %11367 = vmatprep.mubr.msk.f32.mxu0 %vm510_vm3, %v1415_v6 }
 0x8a4   :  { %v11362_v9 = vpop.f32.mrb[16].mxu1 }
 0x8a5   :  { %v1590_v10 = vadd.f32 %v11362_v9, %v10318_v7  ;;  %v1584_v12 = vpop.f32.mrb[17].mxu1  ;;  %v13723_v9 = vpack.c.bf16 %v10333_v3, %v10332_v2 }
 0x8a6   :  { %v1585_v13 = vadd.f32 %v10318_v7, %v1584_v12  ;;  %v10347_v12 = vld [vmem:[%s15393_s11 + $0x68] sm:$0xff] }
 0x8a8   :  { %v12456_v14 = vpack.c.bf16 %v1590_v10, %v1585_v13  ;;  %v10346_v10 = vld [vmem:[%s15393_s11 + $0x60] sm:$0xff] }
 0x8a9   :  { %v13737_v13 = vpack.c.bf16 %v10347_v12, %v10346_v10 }
 0x8aa   :  { %12457 = vmatprep.subr.bf16.mxu1 %v12456_v14 }
 0x8ab   :  { %12459 = vmatpush3.bf16.msra.mxu1 %v12456_v14  ;;  %v10348_v14 = vld [vmem:[%s15393_s11 + $0x70] sm:$0xff] }
 0x8ac   :  { %12461 = vmatprep.subr.bf16.mxu1 %v13711_v59 }
 0x972   :  { %v11351_v16 = vpop.f32.mrb[10].mxu0 }
 0x973   :  { %v1502_v18 = vadd.f32 %v11351_v16, %v10310_v15  ;;  %v1496_v19 = vpop.f32.mrb[11].mxu0 }
 0x974   :  { %v1497_v20 = vadd.f32 %v10310_v15, %v1496_v19  ;;  %v10349_v15 = vld [vmem:[%s15393_s11 + $0x78] sm:$0xff]  ;;  %v10339_v19 = vld [vmem:[%s15390_s3 + $0x68] sm:$0xff] }
 0x975   :  { %v13747_v16 = vpack.c.bf16 %v10349_v15, %v10348_v14 }
 0x976   :  { %v12450_v24 = vpack.c.bf16 %v1502_v18, %v1497_v20  ;;  %v10338_v18 = vld [vmem:[%s15390_s3 + $0x60] sm:$0xff] }
 0x977   :  { %v13764_v20 = vpack.c.bf16 %v10339_v19, %v10338_v18 }
 0x978   :  { %12452 = vmatprep.subr.msk.bf16.mxu0 %vm13483_vm4, %v12450_v24 }
 0x979   :  { %12455 = vmatpush3.bf16.xpose.msk.msra.mxu0 %vm13483_vm4, %v12450_v24  ;;  %v10340_v24 = vld [vmem:[%s15390_s3 + $0x70] sm:$0xff] }
 0x97a   :  { %11377 = vmatprep.subr.mxu0 %v10327_v61 }
 0x980   :  { %11368 = vmatmul.mubr.msk.f32.vlgmr.msra.gmra.mrb[12].mxu0 %vm510_vm3, %v1416_v27 }
 0x981   :  { %11378 = vmatpush3.msra.mxu0 %v10327_v61 }
 0x982   :  { %12469 = vmatprep.subr.bf16.mxu0 %v13764_v20 }
 0xa53   :  { %v11369_v28 = vpop.f32.mrb[12].mxu0 }
 0xa54   :  { %v1677_v30 = vadd.f32 %v11369_v28, %v13497_v60  ;;  %v1671_v31 = vpop.f32.mrb[13].mxu0 }
 0xa55   :  { %v1672_v34 = vadd.f32 %v1671_v31, %v13495_v58  ;;  %v10335_v31 = vld [vmem:[%s15394_s30 + $0x3] ss:$0 sm:$0xff] }
 0xa56   :  { %v1683_v36 = vsel %vm598_vm7, %v1677_v30, -inf }
 0xa57   :  { %1684 = vmax.xlane.f32.xlu1 %v1683_v36  ;;  %v1680_v37 = vsel %vm598_vm7, %v1672_v34, -inf }
 0xa58   :  { %1681 = vmax.xlane.f32.xlu0 %v1680_v37 }
 0xae4   :  { %v1685_v39 = vpop.xlane.xlu1 %1684 }
 0xae5   :  { %v1687_v41 = vsub.f32 %v1677_v30, %v1685_v39  ;;  %v1682_v43 = vpop.xlane.xlu0 %1681  ;;  %v13773_v30 = vpack.c.bf16 %v10341_v25, %v10340_v24 }
 0xae6   :  { %v1686_v44 = vsub.f32 %v1672_v34, %v1682_v43 }
 0xae7   :  { %v1690_v45 = vmul.f32 1.442695, %v1687_v41  ;;  %v10351_v41 = vld [vmem:[%s15327_s13 + $0x3] ss:$0 sm:$0xff] }
 0xae8   :  { %v1688_v46 = vmul.f32 1.442695, %v1686_v44 }
 0xae9   :  { %13052 = vpow2.f32 %v1690_v45 }
 0xaea   :  { %13054 = vpow2.f32 %v1688_v46 }
 0xaf3   :  { %v13053_v49 = vpop.eup %13052 }
 0xaf4   :  { %v13055_v50 = vpop.eup %13054  ;;  %v1695_v52 = vsel %vm598_vm7, %v13053_v49, 0.0 }
 0xaf5   :  { %1696 = vadd.xlane.f32.xlu1 %v1695_v52  ;;  %v1692_v53 = vsel %vm598_vm7, %v13055_v50, 0.0 }
 0xaf6   :  { %1693 = vadd.xlane.f32.xlu0 %v1692_v53 }
 0xb82   :  { %v1697_v62 = vpop.xlane.xlu1 %1696 }
 0xb83   :  { %13056 = vrcp.f32 %v1697_v62  ;;  %v1694_v63 = vpop.xlane.xlu0 %1693 }
 0xb84   :  { %13058 = vrcp.f32 %v1694_v63 }
 0xb8d   :  { %v13057_v1 = vpop.eup %13056 }
 0xb8e   :  { %v13059_v4 = vpop.eup %13058  ;;  %v1701_v7 = vmul.f32 %v13057_v1, %v13053_v49 }
 0xb8f   :  { %v1700_v6 = vmul.f32 %v13059_v4, %v13055_v50  ;;  %v10343_v50 = vld [vmem:[%s15395_s0 + $0x3] ss:$0 sm:$0xff] }
 0xb91   :  { %11374 = vmatprep.mubr.msk.f32.mxu1 %vm598_vm7, %v1700_v6 }
 0xb92   :  { %11375 = vmatmul.mubr.msk.f32.vlgmr.msra.gmra.mrb[18].mxu1 %vm598_vm7, %v1701_v7 }
 0xb93   :  { %12463 = vmatpush3.bf16.msra.mxu1 %v13711_v59  ;;  %11390 = vmatprep.mubr.msk.f32.mxu1 %vm254_vm2, %v13433_v21 }
 0xb94   :  { %12465 = vmatprep.subr.bf16.mxu1 %v13723_v9 }
 0xb97   :  { %12467 = vmatpush3.bf16.msra.mxu1 %v13723_v9 }
 0xb98   :  { %12477 = vmatprep.subr.bf16.mxu1 %v13737_v13 }
 0xb9a   :  { %11391 = vmatmul.mubr.msk.f32.vlgmr.msra.gmra.mrb[20].mxu1 %vm254_vm2, %v13435_v22 }
 0xb9b   :  { %12479 = vmatpush3.bf16.msra.mxu1 %v13737_v13  ;;  %11412 = vmatprep.mubr.msk.f32.mxu1 %vm254_vm2, %v13433_v21 }
 0xb9c   :  { %12481 = vmatprep.subr.bf16.mxu1 %v13747_v16 }
 0xb9f   :  { %12483 = vmatpush3.bf16.msra.mxu1 %v13747_v16 }
 0xba2   :  { %11413 = vmatmul.mubr.msk.f32.vlgmr.msra.gmra.mrb[22].mxu1 %vm254_vm2, %v13435_v22 }
 0xc65   :  { %v11376_v27 = vpop.f32.mrb[18].mxu1 }
 0xc66   :  { %v1774_v28 = vpop.f32.mrb[19].mxu1 }
 0xc67   :  { %11379 = vmatprep.mubr.msk.f32.mxu0 %vm510_vm3, %v1774_v28 }
 0xc68   :  { %11380 = vmatmul.mubr.msk.f32.vlgmr.msra.gmra.mrb[4].mxu0 %vm510_vm3, %v11376_v27 }
 0xc69   :  { %12471 = vmatpush3.bf16.msra.mxu0 %v13764_v20  ;;  %11401 = vmatprep.mubr.msk.f32.mxu0 %vm254_vm2, %v13433_v21 }
 0xc6a   :  { %12473 = vmatprep.subr.bf16.mxu0 %v13773_v30 }
 0xc6d   :  { %v11392_v34 = vpop.f32.mrb[20].mxu1  ;;  %12475 = vmatpush3.bf16.msra.mxu0 %v13773_v30 }
 0xc6e   :  { %v1947_v36 = vpop.f32.mrb[21].mxu1  ;;  %v1953_v62 = vadd.f32 %v11392_v34, %v10335_v31 }
 0xc6f   :  { %v1948_v37 = vadd.f32 %v10335_v31, %v1947_v36  ;;  %v10360_v31 = vld [vmem:[%s15328_s14 + $0x18] sm:$0xff] }
 0xc70   :  { %11402 = vmatmul.mubr.msk.f32.vlgmr.msra.gmra.mrb[14].mxu0 %vm254_vm2, %v13435_v22  ;;  %v1957_v63 = vmul.f32 0.35355338, %v1953_v62 }
 0xc71   :  { %v1956_v39 = vmul.f32 0.35355338, %v1948_v37 }
 0xc73   :  { %11419 = vmatprep.mubr.msk.f32.mxu0 %vm510_vm3, %v1956_v39 }
 0xc75   :  { %v11414_v43 = vpop.f32.mrb[22].mxu1 }
 0xc76   :  { %v2131_v44 = vadd.f32 %v11414_v43, %v10351_v41  ;;  %v2125_v45 = vpop.f32.mrb[23].mxu1 }
 0xc77   :  { %v2126_v46 = vadd.f32 %v10351_v41, %v2125_v45 }
 0xc79   :  { %v12490_v49 = vpack.c.bf16 %v2131_v44, %v2126_v46  ;;  %v10246_v46 = vld [vmem:[%s15329_s15] ss:$0 sm:$0xff] }
 0xc7b   :  { %12491 = vmatprep.subr.bf16.mxu1 %v12490_v49 }
 0xc7c   :  { %12493 = vmatpush3.bf16.msra.mxu1 %v12490_v49 }
 0xd43   :  { %v11403_v52 = vpop.f32.mrb[14].mxu0 }
 0xd44   :  { %v2043_v53 = vadd.f32 %v11403_v52, %v10343_v50  ;;  %v2037_v55 = vpop.f32.mrb[15].mxu0 }
 0xd45   :  { %v2038_v56 = vadd.f32 %v10343_v50, %v2037_v55 }
 0xd47   :  { %v12484_v61 = vpack.c.bf16 %v2043_v53, %v2038_v56 }
 0xd49   :  { %12486 = vmatprep.subr.msk.bf16.mxu0 %vm13483_vm4, %v12484_v61 }
 0xd4a   :  { %12489 = vmatpush3.bf16.xpose.msk.msra.mxu0 %vm13483_vm4, %v12484_v61 }
 0xd4b   :  { %11429 = vmatprep.subr.mxu0 %v10360_v31 }
 0xd51   :  { %11420 = vmatmul.mubr.msk.f32.vlgmr.msra.gmra.mrb[16].mxu0 %vm510_vm3, %v1957_v63 }
 0xd52   :  { %11430 = vmatpush3.msra.mxu0 %v10360_v31 }
 0xe24   :  { %v11421_v1 = vpop.f32.mrb[16].mxu0 }
 0xe25   :  { %v2218_v2 = vadd.f32 %v11421_v1, %v13497_v60  ;;  %v2212_v3 = vpop.f32.mrb[17].mxu0 }
 0xe26   :  { %v2213_v4 = vadd.f32 %v2212_v3, %v13495_v58 }
 0xe27   :  { %v2224_v6 = vsel %vm598_vm7, %v2218_v2, -inf }
 0xe28   :  { %2225 = vmax.xlane.f32.xlu1 %v2224_v6  ;;  %v2221_v7 = vsel %vm598_vm7, %v2213_v4, -inf }
 0xe29   :  { %2222 = vmax.xlane.f32.xlu0 %v2221_v7 }
 0xeb5   :  { %v2226_v10 = vpop.xlane.xlu1 %2225 }
 0xeb6   :  { %v2228_v12 = vsub.f32 %v2218_v2, %v2226_v10  ;;  %v2223_v14 = vpop.xlane.xlu0 %2222 }
 0xeb7   :  { %v2227_v15 = vsub.f32 %v2213_v4, %v2223_v14  ;;  %v2457_v14 = vld [vmem:[%s15334_s20 + $0x8] sm:$0xff] }
 0xeb8   :  { %v2231_v18 = vmul.f32 1.442695, %v2228_v12  ;;  %v2456_v12 = vld [vmem:[%s15334_s20] sm:$0xff] }
 0xeb9   :  { %v2229_v19 = vmul.f32 1.442695, %v2227_v15  ;;  %v13835_v15 = vpack.c.bf16 %v2457_v14, %v2456_v12 }
 0xeba   :  { %13060 = vpow2.f32 %v2231_v18  ;;  %v2458_v18 = vld [vmem:[%s15334_s20 + $0x10] sm:$0xff] }
 0xebb   :  { %13062 = vpow2.f32 %v2229_v19  ;;  %12495 = vmatprep.subr.bf16.mxu1 %v13835_v15  ;;  %v2459_v19 = vld [vmem:[%s15334_s20 + $0x18] sm:$0xff] }
 0xec4   :  { %v13061_v24 = vpop.eup %13060 }
 0xec5   :  { %v13063_v25 = vpop.eup %13062  ;;  %v2236_v27 = vsel %vm598_vm7, %v13061_v24, 0.0 }
 0xec6   :  { %2237 = vadd.xlane.f32.xlu1 %v2236_v27  ;;  %v2233_v28 = vsel %vm598_vm7, %v13063_v25, 0.0  ;;  %v2551_v27 = vld [vmem:[%s15336_s22 + $0x8] sm:$0xff] }
 0xec7   :  { %2234 = vadd.xlane.f32.xlu0 %v2233_v28  ;;  %v2552_v28 = vld [vmem:[%s15336_s22 + $0x10] sm:$0xff] }
 0xf53   :  { %v2238_v34 = vpop.xlane.xlu1 %2237 }
 0xf54   :  { %13064 = vrcp.f32 %v2238_v34  ;;  %v2235_v36 = vpop.xlane.xlu0 %2234  ;;  %v2553_v34 = vld [vmem:[%s15336_s22 + $0x18] sm:$0xff] }
 0xf55   :  { %13066 = vrcp.f32 %v2235_v36  ;;  %v13863_v36 = vpack.c.bf16 %v2553_v34, %v2552_v28 }
 0xf5e   :  { %v13065_v37 = vpop.eup %13064 }
 0xf5f   :  { %v13067_v39 = vpop.eup %13066  ;;  %v2242_v43 = vmul.f32 %v13065_v37, %v13061_v24  ;;  %v13845_v24 = vpack.c.bf16 %v2459_v19, %v2458_v18  ;;  %v2554_v37 = vld [vmem:[%s15336_s22 + $0x20] sm:$0xff] }
 0xf60   :  { %v2241_v41 = vmul.f32 %v13067_v39, %v13063_v25  ;;  %v2550_v25 = vld [vmem:[%s15336_s22] sm:$0xff]  ;;  %v2555_v39 = vld [vmem:[%s15336_s22 + $0x28] sm:$0xff] }
 0xf61   :  { %v13858_v31 = vpack.c.bf16 %v2551_v27, %v2550_v25  ;;  %v10364_v19 = vld [vmem:[%s15331_s17] ss:$0 sm:$0xff] }
 0xf62   :  { %11426 = vmatprep.mubr.msk.f32.mxu1 %vm598_vm7, %v2241_v41  ;;  %v13874_v41 = vpack.c.bf16 %v2555_v39, %v2554_v37  ;;  %v2564_v37 = vld [vmem:[%s15336_s22 + $0x70] sm:$0xff]  ;;  %v10365_v39 = vld [vmem:[%s15335_s21] ss:$0 sm:$0xff] }
 0xf63   :  { %11427 = vmatmul.mubr.msk.f32.vlgmr.msra.gmra.mrb[24].mxu1 %vm598_vm7, %v2242_v43  ;;  %12503 = vmatprep.subr.bf16.mxu0 %v13858_v31  ;;  %v2556_v43 = vld [vmem:[%s15336_s22 + $0x30] sm:$0xff] }
 0xf64   :  { %12497 = vmatpush3.bf16.msra.mxu1 %v13835_v15 }
 0xf65   :  { %12499 = vmatprep.subr.bf16.mxu1 %v13845_v24 }
 0xf68   :  { %12501 = vmatpush3.bf16.msra.mxu1 %v13845_v24 }
0x1036   :  { %v11428_v44 = vpop.f32.mrb[24].mxu1 }
0x1037   :  { %v2315_v45 = vpop.f32.mrb[25].mxu1 }
0x1038   :  { %11431 = vmatprep.mubr.msk.f32.mxu0 %vm510_vm3, %v2315_v45 }
0x1039   :  { %11432 = vmatmul.mubr.msk.f32.vlgmr.msra.gmra.mrb[4].mxu0 %vm510_vm3, %v11428_v44  ;;  %v2557_v44 = vld [vmem:[%s15336_s22 + $0x38] sm:$0xff] }
0x103a   :  { %12505 = vmatpush3.bf16.msra.mxu0 %v13858_v31  ;;  %v13884_v45 = vpack.c.bf16 %v2557_v44, %v2556_v43 }
0x103b   :  { %12507 = vmatprep.subr.bf16.mxu0 %v13863_v36 }
0x103e   :  { %12509 = vmatpush3.bf16.msra.mxu0 %v13863_v36 }
0x103f   :  { %12511 = vmatprep.subr.bf16.mxu0 %v13874_v41 }
0x1042   :  { %12513 = vmatpush3.bf16.msra.mxu0 %v13874_v41 }
0x1043   :  { %12515 = vmatprep.subr.bf16.mxu0 %v13884_v45 }
0x1046   :  { %12517 = vmatpush3.bf16.msra.mxu0 %v13884_v45 }
0x110c   :  { %v11433_v49 = vpop.f32.mrb[4].mxu0 }
0x110d   :  { %v12992_v50 = vadd.f32 %v11433_v49, %v10246_v46  ;;  %v2398_v52 = vpop.f32.mrb[5].mxu0  ;;  %v2559_v49 = vld [vmem:[%s15336_s22 + $0x48] sm:$0xff] }
0x110e   :  { %v12993_v53 = vadd.f32 %v10246_v46, %v2398_v52  ;;  %v2558_v46 = vld [vmem:[%s15336_s22 + $0x40] sm:$0xff]  ;;  %v2560_v52 = vld [vmem:[%s15336_s22 + $0x50] sm:$0xff] }
0x110f   :  { %v2410_v55 = vadd.f32 %v12992_v50, %v13435_v22  ;;  %v13894_v50 = vpack.c.bf16 %v2559_v49, %v2558_v46 }
0x1110   :  { %v2409_v56 = vadd.f32 %v12993_v53, %v13433_v21  ;;  %v2561_v53 = vld [vmem:[%s15336_s22 + $0x58] sm:$0xff] }
0x1111   :  { %v2416_v61 = vsel %vm254_vm2, %v2410_v55, 0.0  ;;  %12519 = vmatprep.subr.bf16.mxu0 %v13894_v50 }
0x1112   :  { %2417 = vadd.xlane.f32.xlu1 %v2416_v61  ;;  %v2413_v62 = vsel %vm254_vm2, %v2409_v56, 0.0  ;;  %v2563_v61 = vld [vmem:[%s15336_s22 + $0x68] sm:$0xff]  ;;  %12521 = vmatpush3.bf16.msra.mxu0 %v13894_v50 }
0x1113   :  { %2414 = vadd.xlane.f32.xlu0 %v2413_v62 }
0x119f   :  { %v2418_v63 = vpop.xlane.xlu1 %2417 }
0x11a0   :  { %v2421_v1 = vmul.f32 0.03125, %v2418_v63  ;;  %v2415_v2 = vpop.xlane.xlu0 %2414 }
0x11a1   :  { %v2420_v3 = vmul.f32 0.03125, %v2415_v2 }
0x11a2   :  { %v13819_v4 = vsub.f32 %v2410_v55, %v2421_v1  ;;  %v13904_v55 = vpack.c.bf16 %v2561_v53, %v2560_v52 }
0x11a3   :  { %v13821_v6 = vsub.f32 %v2409_v56, %v2420_v3  ;;  %v2562_v56 = vld [vmem:[%s15336_s22 + $0x60] sm:$0xff] }
0x11a4   :  { %v2425_v7 = vmul.f32 %v13819_v4, %v13819_v4  ;;  %12523 = vmatprep.subr.bf16.mxu0 %v13904_v55  ;;  %v13914_v62 = vpack.c.bf16 %v2563_v61, %v2562_v56  ;;  %v10368_v56 = vld [vmem:[%s15337_s23] ss:$0 sm:$0xff] }
0x11a5   :  { %v2424_v21 = vmul.f32 %v13821_v6, %v13821_v6  ;;  %12525 = vmatpush3.bf16.msra.mxu0 %v13904_v55 }
0x11a6   :  { %v2429_v22 = vsel %vm254_vm2, %v2425_v7, 0.0  ;;  %12527 = vmatprep.subr.bf16.mxu0 %v13914_v62 }
0x11a7   :  { %2430 = vadd.xlane.f32.xlu1 %v2429_v22  ;;  %v2426_v10 = vsel %vm254_vm2, %v2424_v21, 0.0 }
0x11a8   :  { %2427 = vadd.xlane.f32.xlu0 %v2426_v10  ;;  %v10363_v10 = vld [vmem:[%s15330_s16] ss:$0 sm:$0xff] }
0x11a9   :  { %12529 = vmatpush3.bf16.msra.mxu0 %v13914_v62 }
0x1234   :  { %v2431_v63 = vpop.xlane.xlu1 %2430 }
0x1235   :  { %v2433_v1 = vmul.f32 0.03125, %v2431_v63  ;;  %v2428_v2 = vpop.xlane.xlu0 %2427 }
0x1236   :  { %v2432_v3 = vmul.f32 0.03125, %v2428_v2 }
0x1237   :  { %v2435_v7 = vadd.f32 1e-05, %v2433_v1 }
0x1238   :  { %v2434_v21 = vadd.f32 1e-05, %v2432_v3 }
0x1239   :  { %13068 = vrsqrt.f32 %v2435_v7 }
0x123a   :  { %13070 = vrsqrt.f32 %v2434_v21 }
0x1243   :  { %v13069_v22 = vpop.eup %13068 }
0x1244   :  { %v13071_v12 = vpop.eup %13070  ;;  %v2439_v14 = vmul.f32 %v13069_v22, %v13819_v4  ;;  %v2565_v4 = vld [vmem:[%s15336_s22 + $0x78] sm:$0xff] }
0x1245   :  { %v2438_v18 = vmul.f32 %v13071_v12, %v13821_v6  ;;  %v13935_v6 = vpack.c.bf16 %v2565_v4, %v2564_v37 }
0x1246   :  { %v2447_v25 = vmul.f32 %v10363_v10, %v2439_v14 }
0x1247   :  { %v2446_v27 = vmul.f32 %v10363_v10, %v2438_v18  ;;  %12531 = vmatprep.subr.bf16.mxu0 %v13935_v6 }
0x1248   :  { %v2455_v34 = vadd.f32 %v10364_v19, %v2447_v25  ;;  %12533 = vmatpush3.bf16.msra.mxu0 %v13935_v6 }
0x1249   :  { %v2454_v28 = vadd.f32 %v10364_v19, %v2446_v27 }
0x124b   :  { %11442 = vmatprep.mubr.msk.f32.mxu1 %vm254_vm2, %v2454_v28 }
0x124c   :  { %11443 = vmatmul.mubr.msk.f32.vlgmr.msra.gmra.mrb[26].mxu1 %vm254_vm2, %v2455_v34 }
0x131f   :  { %v11444_v43 = vpop.f32.mrb[26].mxu1 }
0x1320   :  { %v2545_v44 = vadd.f32 %v11444_v43, %v10365_v39  ;;  %v2539_v46 = vpop.f32.mrb[27].mxu1 }
0x1321   :  { %v2540_v49 = vadd.f32 %v10365_v39, %v2539_v46  ;;  %v10374_v39 = vld [vmem:[%s15389_s2 + $0x88] sm:$0xff]  ;;  %v10376_v46 = vld [vmem:[%s15389_s2 + $0x98] sm:$0xff] }
0x1322   :  { %v2549_v53 = vmax.f32 %v2545_v44, 0.0  ;;  %v10375_v44 = vld [vmem:[%s15389_s2 + $0x90] sm:$0xff] }
0x1323   :  { %v2548_v52 = vmax.f32 %v2540_v49, 0.0  ;;  %v13965_v49 = vpack.c.bf16 %v10376_v46, %v10375_v44  ;;  %v10390_v44 = vld [vmem:[%s15393_s11 + $0x88] sm:$0xff] }
0x1325   :  { %11477 = vmatprep.mubr.f32.mxu0 %v2548_v52  ;;  %v10381_v52 = vld [vmem:[%s15390_s3 + $0x80] sm:$0xff] }
0x1326   :  { %11478 = vmatmul.mubr.f32.vlgmr.msra.gmra.mrb[18].mxu0 %v2549_v53  ;;  %v10382_v53 = vld [vmem:[%s15390_s3 + $0x88] sm:$0xff] }
0x13f9   :  { %v11479_v61 = vpop.f32.mrb[18].mxu0 }
0x13fa   :  { %v2645_v63 = vadd.f32 %v11479_v61, %v10368_v56  ;;  %v2639_v1 = vpop.f32.mrb[19].mxu0 }
0x13fb   :  { %v2640_v2 = vadd.f32 %v10368_v56, %v2639_v1  ;;  %v13975_v56 = vpack.c.bf16 %v10382_v53, %v10381_v52  ;;  %v10391_v52 = vld [vmem:[%s15393_s11 + $0x90] sm:$0xff]  ;;  %v10392_v53 = vld [vmem:[%s15393_s11 + $0x98] sm:$0xff] }
0x13fc   :  { %v2649_v3 = vadd.f32 %v2645_v63, %v2455_v34 }
0x13fd   :  { %v2648_v7 = vadd.f32 %v2640_v2, %v2454_v28  ;;  %v10373_v28 = vld [vmem:[%s15389_s2 + $0x80] sm:$0xff] }
0x13fe   :  { %v2655_v21 = vsel %vm254_vm2, %v2649_v3, 0.0  ;;  %v13955_v43 = vpack.c.bf16 %v10374_v39, %v10373_v28 }
0x13ff   :  { %2656 = vadd.xlane.f32.xlu1 %v2655_v21  ;;  %v2652_v22 = vsel %vm254_vm2, %v2648_v7, 0.0 }
0x1400   :  { %2653 = vadd.xlane.f32.xlu0 %v2652_v22  ;;  %12535 = vmatprep.subr.bf16.mxu1 %v13955_v43  ;;  %v10369_v22 = vld [vmem:[%s15332_s18] ss:$0 sm:$0xff] }
0x1401   :  { %12537 = vmatpush3.bf16.msra.mxu1 %v13955_v43 }
0x1402   :  { %12539 = vmatprep.subr.bf16.mxu1 %v13965_v49 }
0x1405   :  { %12541 = vmatpush3.bf16.msra.mxu1 %v13965_v49 }
0x1406   :  { %12543 = vmatprep.subr.bf16.mxu1 %v13975_v56 }
0x148c   :  { %v2657_v10 = vpop.xlane.xlu1 %2656 }
0x148d   :  { %v2659_v12 = vmul.f32 0.03125, %v2657_v10  ;;  %v2654_v14 = vpop.xlane.xlu0 %2653 }
0x148e   :  { %v2658_v18 = vmul.f32 0.03125, %v2654_v14 }
0x148f   :  { %v2661_v19 = vsub.f32 %v2649_v3, %v2659_v12 }
0x1490   :  { %v2660_v25 = vsub.f32 %v2648_v7, %v2658_v18  ;;  %v10370_v18 = vld [vmem:[%s15333_s19] ss:$0 sm:$0xff] }
0x1491   :  { %v2663_v27 = vmul.f32 %v2661_v19, %v2661_v19 }
0x1492   :  { %v2662_v37 = vmul.f32 %v2660_v25, %v2660_v25 }
0x1493   :  { %v2667_v4 = vsel %vm254_vm2, %v2663_v27, 0.0 }
0x1494   :  { %2668 = vadd.xlane.f32.xlu1 %v2667_v4  ;;  %v2664_v34 = vsel %vm254_vm2, %v2662_v37, 0.0  ;;  %v10383_v4 = vld [vmem:[%s15390_s3 + $0x90] sm:$0xff] }
0x1495   :  { %2665 = vadd.xlane.f32.xlu0 %v2664_v34  ;;  %v10384_v34 = vld [vmem:[%s15390_s3 + $0x98] sm:$0xff] }
0x1521   :  { %v2669_v61 = vpop.xlane.xlu1 %2668 }
0x1522   :  { %v2671_v63 = vmul.f32 0.03125, %v2669_v61  ;;  %v2666_v1 = vpop.xlane.xlu0 %2665  ;;  %v14020_v61 = vpack.c.bf16 %v10392_v53, %v10391_v52 }
0x1523   :  { %v2670_v2 = vmul.f32 0.03125, %v2666_v1 }
0x1524   :  { %v2673_v3 = vadd.f32 1e-05, %v2671_v63  ;;  %v10378_v63 = vld [vmem:[%s15394_s30 + $0x4] ss:$0 sm:$0xff] }
0x1525   :  { %v2672_v7 = vadd.f32 1e-05, %v2670_v2 }
0x1526   :  { %13072 = vrsqrt.f32 %v2673_v3 }
0x1527   :  { %13074 = vrsqrt.f32 %v2672_v7 }
0x1530   :  { %v13073_v21 = vpop.eup %13072 }
0x1531   :  { %v13075_v10 = vpop.eup %13074  ;;  %v2677_v12 = vmul.f32 %v13073_v21, %v2661_v19  ;;  %v13994_v19 = vpack.c.bf16 %v10384_v34, %v10383_v4  ;;  %v10386_v21 = vld [vmem:[%s15395_s0 + $0x4] ss:$0 sm:$0xff] }
0x1532   :  { %v2676_v14 = vmul.f32 %v13075_v10, %v2660_v25  ;;  %v10389_v25 = vld [vmem:[%s15393_s11 + $0x80] sm:$0xff] }
0x1533   :  { %v2685_v27 = vmul.f32 %v10369_v22, %v2677_v12  ;;  %v14010_v46 = vpack.c.bf16 %v10390_v44, %v10389_v25  ;;  %v10394_v34 = vld [vmem:[%s15327_s13 + $0x4] ss:$0 sm:$0xff] }
0x1534   :  { %v2684_v37 = vmul.f32 %v10369_v22, %v2676_v14  ;;  %v10406_v14 = vld [vmem:[%s15389_s2 + $0xa0] sm:$0xff] }
0x1535   :  { %v13992_v39 = vadd.f32 %v10370_v18, %v2685_v27 }
0x1536   :  { %v13990_v28 = vadd.f32 %v10370_v18, %v2684_v37  ;;  %v10407_v18 = vld [vmem:[%s15389_s2 + $0xa8] sm:$0xff] }
0x1537   :  { %v14044_v4 = vpack.c.bf16 %v10407_v18, %v10406_v14  ;;  %v10424_v14 = vld [vmem:[%s15393_s11 + $0xb0] sm:$0xff]  ;;  %v10425_v18 = vld [vmem:[%s15393_s11 + $0xb8] sm:$0xff] }
0x1538   :  { %11488 = vmatprep.mubr.msk.f32.mxu1 %vm254_vm2, %v13990_v28 }
0x1539   :  { %11489 = vmatmul.mubr.msk.f32.vlgmr.msra.gmra.mrb[28].mxu1 %vm254_vm2, %v13992_v39  ;;  %15398 = vst [vmem:[#allocation5_spill] sm:$0xff] %v14044_v4 }
0x153a   :  { %12545 = vmatpush3.bf16.msra.mxu1 %v13975_v56  ;;  %11499 = vmatprep.mubr.msk.f32.mxu1 %vm254_vm2, %v13990_v28 }
0x153b   :  { %12547 = vmatprep.subr.bf16.mxu1 %v13994_v19 }
0x153e   :  { %12549 = vmatpush3.bf16.msra.mxu1 %v13994_v19 }
0x153f   :  { %12551 = vmatprep.subr.bf16.mxu1 %v14010_v46 }
0x1541   :  { %11500 = vmatmul.mubr.msk.f32.vlgmr.msra.gmra.mrb[30].mxu1 %vm254_vm2, %v13992_v39 }
0x1542   :  { %12553 = vmatpush3.bf16.msra.mxu1 %v14010_v46  ;;  %11510 = vmatprep.mubr.msk.f32.mxu1 %vm254_vm2, %v13990_v28 }
0x1543   :  { %12555 = vmatprep.subr.bf16.mxu1 %v14020_v61 }
0x1546   :  { %12557 = vmatpush3.bf16.msra.mxu1 %v14020_v61 }
0x1549   :  { %11511 = vmatmul.mubr.msk.f32.vlgmr.msra.gmra.mrb[32].mxu1 %vm254_vm2, %v13992_v39 }
0x160c   :  { %v11490_v1 = vpop.f32.mrb[28].mxu1 }
0x160d   :  { %v2788_v2 = vpop.f32.mrb[29].mxu1  ;;  %v2794_v25 = vadd.f32 %v11490_v1, %v10378_v63  ;;  %v10423_v1 = vld [vmem:[%s15393_s11 + $0xa8] sm:$0xff] }
0x160e   :  { %v2789_v3 = vadd.f32 %v10378_v63, %v2788_v2  ;;  %v10408_v2 = vld [vmem:[%s15389_s2 + $0xb0] sm:$0xff]  ;;  %v10422_v63 = vld [vmem:[%s15393_s11 + $0xa0] sm:$0xff] }
0x1610   :  { %v2797_v7 = vmul.f32 0.35355338, %v2789_v3  ;;  %v10409_v3 = vld [vmem:[%s15389_s2 + $0xb8] sm:$0xff] }
0x1612   :  { %11517 = vmatprep.mubr.msk.f32.mxu1 %vm510_vm3, %v2797_v7 }
0x1614   :  { %v11501_v22 = vpop.f32.mrb[30].mxu1 }
0x1615   :  { %v2884_v10 = vadd.f32 %v11501_v22, %v10386_v21  ;;  %v2878_v12 = vpop.f32.mrb[31].mxu1 }
0x1616   :  { %v2879_v27 = vadd.f32 %v10386_v21, %v2878_v12  ;;  %v2798_v21 = vmul.f32 0.35355338, %v2794_v25  ;;  %v14073_v12 = vpack.c.bf16 %v10423_v1, %v10422_v63 }
0x1618   :  { %v12558_v37 = vpack.c.bf16 %v2884_v10, %v2879_v27  ;;  %v14060_v10 = vpack.c.bf16 %v10409_v3, %v10408_v2  ;;  %15400 = vst [vmem:[#allocation7_spill] sm:$0xff] %v14073_v12  ;;  %v14083_v27 = vpack.c.bf16 %v10425_v18, %v10424_v14 }
0x161a   :  { %12560 = vmatprep.subr.msk.bf16.mxu1 %vm13483_vm4, %v12558_v37  ;;  %15399 = vst [vmem:[#allocation6_spill] sm:$0xff] %v14060_v10  ;;  %15401 = vst [vmem:[#allocation8_spill] sm:$0xff] %v14083_v27 }
0x161b   :  { %12563 = vmatpush3.bf16.xpose.msk.msra.mxu1 %vm13483_vm4, %v12558_v37 }
0x161c   :  { %v11512_v44 = vpop.f32.mrb[32].mxu1  ;;  %12569 = vmatprep.subr.bf16.mxu1 %v14044_v4 }
0x161d   :  { %v2972_v52 = vadd.f32 %v11512_v44, %v10394_v34  ;;  %v2966_v53 = vpop.f32.mrb[33].mxu1 }
0x161e   :  { %v2967_v7 = vadd.f32 %v10394_v34, %v2966_v53 }
0x1620   :  { %v12564_v22 = vpack.c.bf16 %v2972_v52, %v2967_v7  ;;  %v10427_v7 = vld [vmem:[%s15327_s13 + $0x5] ss:$0 sm:$0xff] }
0x1622   :  { %11518 = vmatmul.mubr.msk.f32.vlgmr.msra.gmra.mrb[34].mxu1 %vm510_vm3, %v2798_v21  ;;  %12565 = vmatprep.subr.bf16.mxu0 %v12564_v22 }
0x1623   :  { %12567 = vmatpush3.bf16.msra.mxu0 %v12564_v22  ;;  %12571 = vmatpush3.bf16.msra.mxu1 %v14044_v4 }
0x1624   :  { %11540 = vmatprep.mubr.msk.f32.mxu1 %vm254_vm2, %v13990_v28  ;;  %12573 = vmatprep.subr.bf16.mxu1 %v14060_v10 }
0x1627   :  { %12575 = vmatpush3.bf16.msra.mxu1 %v14060_v10 }
0x1628   :  { %12585 = vmatprep.subr.bf16.mxu1 %v14073_v12 }
0x162a   :  { %11541 = vmatmul.mubr.msk.f32.vlgmr.msra.gmra.mrb[36].mxu1 %vm254_vm2, %v13992_v39 }
0x162b   :  { %12587 = vmatpush3.bf16.msra.mxu1 %v14073_v12  ;;  %11562 = vmatprep.mubr.msk.f32.mxu1 %vm254_vm2, %v13990_v28 }
0x162c   :  { %12589 = vmatprep.subr.bf16.mxu1 %v14083_v27 }
0x162f   :  { %12591 = vmatpush3.bf16.msra.mxu1 %v14083_v27 }
0x1632   :  { %11563 = vmatmul.mubr.msk.f32.vlgmr.msra.gmra.mrb[38].mxu1 %vm254_vm2, %v13992_v39 }
0x16f5   :  { %v11519_v37 = vpop.f32.mrb[34].mxu1 }
0x16f6   :  { %v3059_v34 = vadd.f32 %v11519_v37, %v13497_v60  ;;  %v3053_v25 = vpop.f32.mrb[35].mxu1 }
0x16f7   :  { %v3054_v44 = vadd.f32 %v3053_v25, %v13495_v58 }
0x16f8   :  { %v3065_v52 = vsel %vm598_vm7, %v3059_v34, -inf }
0x16f9   :  { %3066 = vmax.xlane.f32.xlu1 %v3065_v52  ;;  %v3062_v53 = vsel %vm598_vm7, %v3054_v44, -inf }
0x16fa   :  { %3063 = vmax.xlane.f32.xlu0 %v3062_v53 }
0x16fd   :  { %v14098_v2 = vpop.f32.mrb[36].mxu1 }
0x16fe   :  { %v3329_v3 = vpop.f32.mrb[37].mxu1 }
0x1705   :  { %v11564_v21 = vpop.f32.mrb[38].mxu1 }
0x1706   :  { %v3513_v22 = vadd.f32 %v11564_v21, %v10427_v7  ;;  %v3507_v63 = vpop.f32.mrb[39].mxu1 }
0x1707   :  { %v3508_v1 = vadd.f32 %v10427_v7, %v3507_v63  ;;  %v10403_v7 = vld [vmem:[%s15328_s14 + $0x20] sm:$0xff] }
0x1708   :  { %11527 = vmatprep.subr.mxu0 %v10403_v7 }
0x1709   :  { %v12598_v14 = vpack.c.bf16 %v3513_v22, %v3508_v1 }
0x170b   :  { %12599 = vmatprep.subr.bf16.mxu1 %v12598_v14 }
0x170c   :  { %12601 = vmatpush3.bf16.msra.mxu1 %v12598_v14  ;;  %v10415_v14 = vld [vmem:[%s15390_s3 + $0xa8] sm:$0xff] }
0x1786   :  { %v3067_v18 = vpop.xlane.xlu1 %3066 }
0x1787   :  { %v3069_v37 = vsub.f32 %v3059_v34, %v3067_v18  ;;  %v3064_v25 = vpop.xlane.xlu0 %3063 }
0x1788   :  { %v3068_v52 = vsub.f32 %v3054_v44, %v3064_v25 }
0x1789   :  { %v3072_v27 = vmul.f32 1.442695, %v3069_v37 }
0x178a   :  { %v3070_v53 = vmul.f32 1.442695, %v3068_v52 }
0x178b   :  { %13076 = vpow2.f32 %v3072_v27 }
0x178c   :  { %13078 = vpow2.f32 %v3070_v53  ;;  %v10411_v53 = vld [vmem:[%s15394_s30 + $0x5] ss:$0 sm:$0xff] }
0x1795   :  { %v13077_v12 = vpop.eup %13076 }
0x1796   :  { %v13079_v10 = vpop.eup %13078  ;;  %v3077_v4 = vsel %vm598_vm7, %v13077_v12, 0.0 }
0x1797   :  { %3078 = vadd.xlane.f32.xlu1 %v3077_v4  ;;  %v3074_v21 = vsel %vm598_vm7, %v13079_v10, 0.0  ;;  %v10414_v4 = vld [vmem:[%s15390_s3 + $0xa0] sm:$0xff] }
0x1798   :  { %3075 = vadd.xlane.f32.xlu0 %v3074_v21  ;;  %v14116_v18 = vpack.c.bf16 %v10415_v14, %v10414_v4  ;;  %v3330_v21 = vadd.f32 %v10411_v53, %v3329_v3  ;;  %v3335_v3 = vadd.f32 %v14098_v2, %v10411_v53 }
0x179a   :  { %v3339_v4 = vmul.f32 0.35355338, %v3335_v3 }
0x1824   :  { %v3079_v34 = vpop.xlane.xlu1 %3078 }
0x1825   :  { %13080 = vrcp.f32 %v3079_v34  ;;  %v3076_v44 = vpop.xlane.xlu0 %3075  ;;  %v10419_v34 = vld [vmem:[%s15395_s0 + $0x5] ss:$0 sm:$0xff] }
0x1826   :  { %13082 = vrcp.f32 %v3076_v44 }
0x182f   :  { %v13081_v22 = vpop.eup %13080 }
0x1830   :  { %v13083_v27 = vpop.eup %13082  ;;  %v3083_v1 = vmul.f32 %v13081_v22, %v13077_v12  ;;  %v10417_v12 = vld [vmem:[%s15390_s3 + $0xb8] sm:$0xff] }
0x1831   :  { %v3082_v63 = vmul.f32 %v13083_v27, %v13079_v10  ;;  %v10416_v10 = vld [vmem:[%s15390_s3 + $0xb0] sm:$0xff] }
0x1832   :  { %v14125_v52 = vpack.c.bf16 %v10417_v12, %v10416_v10 }
0x1833   :  { %11524 = vmatprep.mubr.msk.f32.mxu0 %vm598_vm7, %v3082_v63 }
0x1834   :  { %11525 = vmatmul.mubr.msk.f32.vlgmr.msra.gmra.mrb[20].mxu0 %vm598_vm7, %v3083_v1 }
0x1835   :  { %11528 = vmatpush3.msra.mxu0 %v10403_v7  ;;  %v3338_v7 = vmul.f32 0.35355338, %v3330_v21 }
0x1836   :  { %12577 = vmatprep.subr.bf16.mxu0 %v14116_v18 }
0x1907   :  { %v11526_v37 = vpop.f32.mrb[20].mxu0 }
0x1908   :  { %v3156_v25 = vpop.f32.mrb[21].mxu0 }
0x1909   :  { %11529 = vmatprep.mubr.msk.f32.mxu0 %vm510_vm3, %v3156_v25 }
0x190a   :  { %11530 = vmatmul.mubr.msk.f32.vlgmr.msra.gmra.mrb[22].mxu0 %vm510_vm3, %v11526_v37 }
0x190b   :  { %12579 = vmatpush3.bf16.msra.mxu0 %v14116_v18  ;;  %11551 = vmatprep.mubr.msk.f32.mxu0 %vm254_vm2, %v13990_v28 }
0x190c   :  { %12581 = vmatprep.subr.bf16.mxu0 %v14125_v52 }
0x190f   :  { %12583 = vmatpush3.bf16.msra.mxu0 %v14125_v52 }
0x1912   :  { %11552 = vmatmul.mubr.msk.f32.vlgmr.msra.gmra.mrb[24].mxu0 %vm254_vm2, %v13992_v39 }
0x1913   :  { %11569 = vmatprep.mubr.msk.f32.mxu0 %vm510_vm3, %v3338_v7 }
0x19e5   :  { %v11553_v44 = vpop.f32.mrb[24].mxu0 }
0x19e6   :  { %v3425_v22 = vadd.f32 %v11553_v44, %v10419_v34  ;;  %v3419_v27 = vpop.f32.mrb[25].mxu0 }
0x19e7   :  { %v3420_v63 = vadd.f32 %v10419_v34, %v3419_v27 }
0x19e9   :  { %v12592_v1 = vpack.c.bf16 %v3425_v22, %v3420_v63 }
0x19eb   :  { %12594 = vmatprep.subr.msk.bf16.mxu0 %vm13483_vm4, %v12592_v1 }
0x19ec   :  { %12597 = vmatpush3.bf16.xpose.msk.msra.mxu0 %vm13483_vm4, %v12592_v1 }
0x19f3   :  { %11570 = vmatmul.mubr.msk.f32.vlgmr.msra.gmra.mrb[26].mxu0 %vm510_vm3, %v3339_v4  ;;  %v10439_v4 = vld [vmem:[%s15389_s2 + $0xc0] sm:$0xff] }
0x1ac6   :  { %v11571_v14 = vpop.f32.mrb[26].mxu0 }
0x1ac7   :  { %v3600_v10 = vadd.f32 %v11571_v14, %v13497_v60  ;;  %v3594_v12 = vpop.f32.mrb[27].mxu0  ;;  %v10440_v14 = vld [vmem:[%s15389_s2 + $0xc8] sm:$0xff] }
0x1ac8   :  { %v3595_v37 = vadd.f32 %v3594_v12, %v13495_v58  ;;  %v10436_v12 = vld [vmem:[%s15328_s14 + $0x28] sm:$0xff] }
0x1ac9   :  { %v3606_v25 = vsel %vm598_vm7, %v3600_v10, -inf  ;;  %11579 = vmatprep.subr.mxu0 %v10436_v12 }
0x1aca   :  { %3607 = vmax.xlane.f32.xlu1 %v3606_v25  ;;  %v3603_v21 = vsel %vm598_vm7, %v3595_v37, -inf  ;;  %11580 = vmatpush3.msra.mxu0 %v10436_v12  ;;  %v10447_v12 = vld [vmem:[%s15390_s3 + $0xc0] sm:$0xff] }
0x1acb   :  { %3604 = vmax.xlane.f32.xlu0 %v3603_v21 }
0x1b57   :  { %v3608_v7 = vpop.xlane.xlu1 %3607 }
0x1b58   :  { %v3610_v34 = vsub.f32 %v3600_v10, %v3608_v7  ;;  %v3605_v44 = vpop.xlane.xlu0 %3604  ;;  %v14161_v10 = vpack.c.bf16 %v10440_v14, %v10439_v4  ;;  %v10441_v7 = vld [vmem:[%s15389_s2 + $0xd0] sm:$0xff]  ;;  %v10458_v4 = vld [vmem:[%s15393_s11 + $0xd8] sm:$0xff] }
0x1b59   :  { %v3609_v22 = vsub.f32 %v3595_v37, %v3605_v44 }
0x1b5a   :  { %v3613_v2 = vmul.f32 1.442695, %v3610_v34  ;;  %12603 = vmatprep.subr.bf16.mxu1 %v14161_v10  ;;  %v10442_v34 = vld [vmem:[%s15389_s2 + $0xd8] sm:$0xff] }
0x1b5b   :  { %v3611_v53 = vmul.f32 1.442695, %v3609_v22 }
0x1b5c   :  { %13084 = vpow2.f32 %v3613_v2 }
0x1b5d   :  { %13086 = vpow2.f32 %v3611_v53  ;;  %v14173_v53 = vpack.c.bf16 %v10442_v34, %v10441_v7  ;;  %v10450_v7 = vld [vmem:[%s15390_s3 + $0xd8] sm:$0xff] }
0x1b66   :  { %v13085_v27 = vpop.eup %13084 }
0x1b67   :  { %v13087_v63 = vpop.eup %13086  ;;  %v3618_v1 = vsel %vm598_vm7, %v13085_v27, 0.0 }
0x1b68   :  { %3619 = vadd.xlane.f32.xlu1 %v3618_v1  ;;  %v3615_v3 = vsel %vm598_vm7, %v13087_v63, 0.0  ;;  %v10455_v1 = vld [vmem:[%s15393_s11 + $0xc0] sm:$0xff] }
0x1b69   :  { %3616 = vadd.xlane.f32.xlu0 %v3615_v3  ;;  %v10456_v3 = vld [vmem:[%s15393_s11 + $0xc8] sm:$0xff] }
0x1bf5   :  { %v3620_v37 = vpop.xlane.xlu1 %3619 }
0x1bf6   :  { %13088 = vrcp.f32 %v3620_v37  ;;  %v3617_v25 = vpop.xlane.xlu0 %3616  ;;  %v10448_v37 = vld [vmem:[%s15390_s3 + $0xc8] sm:$0xff] }
0x1bf7   :  { %13090 = vrcp.f32 %v3617_v25  ;;  %v14214_v25 = vpack.c.bf16 %v10448_v37, %v10447_v12  ;;  %v10460_v12 = vld [vmem:[%s15327_s13 + $0x6] ss:$0 sm:$0xff] }
0x1bf9   :  { %15403 = vst [vmem:[#allocation10_spill] sm:$0xff] %v14214_v25  ;;  %12611 = vmatprep.subr.bf16.mxu0 %v14214_v25 }
0x1c00   :  { %v13089_v21 = vpop.eup %13088 }
0x1c01   :  { %v13091_v44 = vpop.eup %13090  ;;  %v3624_v2 = vmul.f32 %v13089_v21, %v13085_v27  ;;  %v14187_v27 = vpack.c.bf16 %v10456_v3, %v10455_v1  ;;  %v10449_v21 = vld [vmem:[%s15390_s3 + $0xd0] sm:$0xff] }
0x1c02   :  { %v3623_v22 = vmul.f32 %v13091_v44, %v13087_v63  ;;  %v10457_v63 = vld [vmem:[%s15393_s11 + $0xd0] sm:$0xff] }
0x1c03   :  { %v14197_v14 = vpack.c.bf16 %v10458_v4, %v10457_v63 }
0x1c04   :  { %11576 = vmatprep.mubr.msk.f32.mxu1 %vm598_vm7, %v3623_v22  ;;  %v14223_v22 = vpack.c.bf16 %v10450_v7, %v10449_v21 }
0x1c05   :  { %11577 = vmatmul.mubr.msk.f32.vlgmr.msra.gmra.mrb[40].mxu1 %vm598_vm7, %v3624_v2  ;;  %15402 = vst [vmem:[#allocation9_spill] sm:$0xff] %v14197_v14  ;;  %v10444_v2 = vld [vmem:[%s15394_s30 + $0x6] ss:$0 sm:$0xff] }
0x1c06   :  { %12605 = vmatpush3.bf16.msra.mxu1 %v14161_v10  ;;  %11592 = vmatprep.mubr.msk.f32.mxu1 %vm254_vm2, %v13990_v28  ;;  %15404 = vst [vmem:[#allocation11_spill] sm:$0xff] %v14223_v22 }
0x1c07   :  { %12607 = vmatprep.subr.bf16.mxu1 %v14173_v53 }
0x1c0a   :  { %12609 = vmatpush3.bf16.msra.mxu1 %v14173_v53 }
0x1c0b   :  { %12619 = vmatprep.subr.bf16.mxu1 %v14187_v27 }
0x1c0d   :  { %11593 = vmatmul.mubr.msk.f32.vlgmr.msra.gmra.mrb[42].mxu1 %vm254_vm2, %v13992_v39 }
0x1c0e   :  { %12621 = vmatpush3.bf16.msra.mxu1 %v14187_v27  ;;  %11614 = vmatprep.mubr.msk.f32.mxu1 %vm254_vm2, %v13990_v28 }
0x1c0f   :  { %12623 = vmatprep.subr.bf16.mxu1 %v14197_v14 }
0x1c12   :  { %12625 = vmatpush3.bf16.msra.mxu1 %v14197_v14 }
0x1c15   :  { %11615 = vmatmul.mubr.msk.f32.vlgmr.msra.gmra.mrb[44].mxu1 %vm254_vm2, %v13992_v39 }
0x1cd8   :  { %v11578_v34 = vpop.f32.mrb[40].mxu1 }
0x1cd9   :  { %v3697_v44 = vpop.f32.mrb[41].mxu1 }
0x1cda   :  { %11581 = vmatprep.mubr.msk.f32.mxu0 %vm510_vm3, %v3697_v44 }
0x1cdb   :  { %11582 = vmatmul.mubr.msk.f32.vlgmr.msra.gmra.mrb[22].mxu0 %vm510_vm3, %v11578_v34 }
0x1cdc   :  { %12613 = vmatpush3.bf16.msra.mxu0 %v14214_v25  ;;  %11603 = vmatprep.mubr.msk.f32.mxu0 %vm254_vm2, %v13990_v28 }
0x1cdd   :  { %12615 = vmatprep.subr.bf16.mxu0 %v14223_v22 }
0x1ce0   :  { %v11594_v1 = vpop.f32.mrb[42].mxu1  ;;  %12617 = vmatpush3.bf16.msra.mxu0 %v14223_v22 }
0x1ce1   :  { %v3870_v3 = vpop.f32.mrb[43].mxu1 }
0x1ce2   :  { %v3871_v63 = vadd.f32 %v10444_v2, %v3870_v3  ;;  %v10452_v3 = vld [vmem:[%s15395_s0 + $0x6] ss:$0 sm:$0xff] }
0x1ce3   :  { %11604 = vmatmul.mubr.msk.f32.vlgmr.msra.gmra.mrb[28].mxu0 %vm254_vm2, %v13992_v39 }
0x1ce4   :  { %v3879_v4 = vmul.f32 0.35355338, %v3871_v63 }
0x1ce6   :  { %11621 = vmatprep.mubr.msk.f32.mxu0 %vm510_vm3, %v3879_v4 }
0x1ce8   :  { %v11616_v37 = vpop.f32.mrb[44].mxu1 }
0x1ce9   :  { %v4054_v21 = vadd.f32 %v11616_v37, %v10460_v12  ;;  %v4048_v7 = vpop.f32.mrb[45].mxu1  ;;  %v3876_v37 = vadd.f32 %v11594_v1, %v10444_v2 }
0x1cea   :  { %v4049_v34 = vadd.f32 %v10460_v12, %v4048_v7 }
0x1ceb   :  { %v3880_v12 = vmul.f32 0.35355338, %v3876_v37 }
0x1cec   :  { %v12632_v44 = vpack.c.bf16 %v4054_v21, %v4049_v34 }
0x1cee   :  { %12633 = vmatprep.subr.bf16.mxu1 %v12632_v44 }
0x1cef   :  { %12635 = vmatpush3.bf16.msra.mxu1 %v12632_v44 }
0x1db6   :  { %v11605_v22 = vpop.f32.mrb[28].mxu0 }
0x1db7   :  { %v3966_v25 = vadd.f32 %v11605_v22, %v10452_v3  ;;  %v3960_v63 = vpop.f32.mrb[29].mxu0 }
0x1db8   :  { %v3961_v14 = vadd.f32 %v10452_v3, %v3960_v63 }
0x1dba   :  { %v12626_v4 = vpack.c.bf16 %v3966_v25, %v3961_v14 }
0x1dbc   :  { %12628 = vmatprep.subr.msk.bf16.mxu0 %vm13483_vm4, %v12626_v4 }
0x1dbd   :  { %12631 = vmatpush3.bf16.xpose.msk.msra.mxu0 %vm13483_vm4, %v12626_v4 }
0x1dc4   :  { %11622 = vmatmul.mubr.msk.f32.vlgmr.msra.gmra.mrb[30].mxu0 %vm510_vm3, %v3880_v12 }
0x1e97   :  { %v11623_v21 = vpop.f32.mrb[30].mxu0 }
0x1e98   :  { %v4141_v7 = vadd.f32 %v11623_v21, %v13497_v60  ;;  %v4135_v34 = vpop.f32.mrb[31].mxu0 }
0x1e99   :  { %v4136_v44 = vadd.f32 %v4135_v34, %v13495_v58 }
0x1e9a   :  { %v4147_v22 = vsel %vm598_vm7, %v4141_v7, -inf }
0x1e9b   :  { %4148 = vmax.xlane.f32.xlu1 %v4147_v22  ;;  %v4144_v14 = vsel %vm598_vm7, %v4136_v44, -inf  ;;  %v10472_v22 = vld [vmem:[%s15389_s2 + $0xe0] sm:$0xff] }
0x1e9c   :  { %4145 = vmax.xlane.f32.xlu0 %v4144_v14  ;;  %v10469_v14 = vld [vmem:[%s15328_s14 + $0x30] sm:$0xff] }
0x1e9d   :  { %11631 = vmatprep.subr.mxu0 %v10469_v14 }
0x1e9e   :  { %11632 = vmatpush3.msra.mxu0 %v10469_v14  ;;  %v10489_v14 = vld [vmem:[%s15393_s11 + $0xe8] sm:$0xff] }
0x1f28   :  { %v4149_v25 = vpop.xlane.xlu1 %4148 }
0x1f29   :  { %v4151_v3 = vsub.f32 %v4141_v7, %v4149_v25  ;;  %v4146_v63 = vpop.xlane.xlu0 %4145  ;;  %v10473_v7 = vld [vmem:[%s15389_s2 + $0xe8] sm:$0xff] }
0x1f2a   :  { %v4150_v4 = vsub.f32 %v4136_v44, %v4146_v63  ;;  %v14261_v44 = vpack.c.bf16 %v10473_v7, %v10472_v22  ;;  %v10488_v7 = vld [vmem:[%s15393_s11 + $0xe0] sm:$0xff] }
0x1f2b   :  { %v4154_v2 = vmul.f32 1.442695, %v4151_v3 }
0x1f2c   :  { %v4152_v1 = vmul.f32 1.442695, %v4150_v4  ;;  %15405 = vst [vmem:[#allocation12_spill] sm:$0xff] %v14261_v44  ;;  %12637 = vmatprep.subr.bf16.mxu1 %v14261_v44  ;;  %v10474_v4 = vld [vmem:[%s15389_s2 + $0xf0] sm:$0xff] }
0x1f2d   :  { %13092 = vpow2.f32 %v4154_v2  ;;  %v10475_v2 = vld [vmem:[%s15389_s2 + $0xf8] sm:$0xff] }
0x1f2e   :  { %13094 = vpow2.f32 %v4152_v1  ;;  %v14273_v22 = vpack.c.bf16 %v10475_v2, %v10474_v4  ;;  %v10481_v4 = vld [vmem:[%s15390_s3 + $0xe8] sm:$0xff] }
0x1f30   :  { %15406 = vst [vmem:[#allocation13_spill] sm:$0xff] %v14273_v22 }
0x1f37   :  { %v13093_v37 = vpop.eup %13092 }
0x1f38   :  { %v13095_v12 = vpop.eup %13094  ;;  %v4159_v21 = vsel %vm598_vm7, %v13093_v37, 0.0 }
0x1f39   :  { %4160 = vadd.xlane.f32.xlu1 %v4159_v21  ;;  %v4156_v34 = vsel %vm598_vm7, %v13095_v12, 0.0 }
0x1f3a   :  { %4157 = vadd.xlane.f32.xlu0 %v4156_v34 }
0x1fc6   :  { %v4161_v25 = vpop.xlane.xlu1 %4160 }
0x1fc7   :  { %13096 = vrcp.f32 %v4161_v25  ;;  %v4158_v3 = vpop.xlane.xlu0 %4157  ;;  %v10491_v25 = vld [vmem:[%s15393_s11 + $0xf8] sm:$0xff] }
0x1fc8   :  { %13098 = vrcp.f32 %v4158_v3 }
0x1fd1   :  { %v13097_v63 = vpop.eup %13096 }
0x1fd2   :  { %v13099_v1 = vpop.eup %13098  ;;  %v4165_v34 = vmul.f32 %v13097_v63, %v13093_v37  ;;  %v14287_v37 = vpack.c.bf16 %v10489_v14, %v10488_v7  ;;  %v10480_v63 = vld [vmem:[%s15390_s3 + $0xe0] sm:$0xff] }
0x1fd3   :  { %v4164_v21 = vmul.f32 %v13099_v1, %v13095_v12  ;;  %v10490_v12 = vld [vmem:[%s15393_s11 + $0xf0] sm:$0xff]  ;;  %v14314_v2 = vpack.c.bf16 %v10481_v4, %v10480_v63  ;;  %s15419_s11 = sld [smem:[#allocation27_spill]] }
0x1fd4   :  { %15407 = vst [vmem:[#allocation14_spill] sm:$0xff] %v14287_v37  ;;  %v14297_v3 = vpack.c.bf16 %v10491_v25, %v10490_v12  ;;  %v10482_v1 = vld [vmem:[%s15390_s3 + $0xf0] sm:$0xff]  ;;  %v10477_v12 = vld [vmem:[%s15394_s30 + $0x7] ss:$0 sm:$0xff] }
0x1fd5   :  { %11628 = vmatprep.mubr.msk.f32.mxu1 %vm598_vm7, %v4164_v21  ;;  %15409 = vst [vmem:[#allocation16_spill] sm:$0xff] %v14314_v2  ;;  %12645 = vmatprep.subr.bf16.mxu0 %v14314_v2  ;;  %v10483_v21 = vld [vmem:[%s15390_s3 + $0xf8] sm:$0xff]  ;;  %s15418_s3 = sld [smem:[#allocation31_spill]] }
0x1fd6   :  { %11629 = vmatmul.mubr.msk.f32.vlgmr.msra.gmra.mrb[46].mxu1 %vm598_vm7, %v4165_v34  ;;  %15408 = vst [vmem:[#allocation15_spill] sm:$0xff] %v14297_v3  ;;  %v14323_v14 = vpack.c.bf16 %v10483_v21, %v10482_v1  ;;  %v10493_v21 = vld [vmem:[%s15327_s13 + $0x7] ss:$0 sm:$0xff] }
0x1fd7   :  { %12639 = vmatpush3.bf16.msra.mxu1 %v14261_v44  ;;  %11644 = vmatprep.mubr.msk.f32.mxu1 %vm254_vm2, %v13990_v28 }
0x1fd8   :  { %12641 = vmatprep.subr.bf16.mxu1 %v14273_v22  ;;  %15410 = vst [vmem:[#allocation17_spill] sm:$0xff] %v14323_v14 }
0x1fdb   :  { %12643 = vmatpush3.bf16.msra.mxu1 %v14273_v22 }
0x1fdc   :  { %12653 = vmatprep.subr.bf16.mxu1 %v14287_v37 }
0x1fde   :  { %11645 = vmatmul.mubr.msk.f32.vlgmr.msra.gmra.mrb[48].mxu1 %vm254_vm2, %v13992_v39 }
0x1fdf   :  { %12655 = vmatpush3.bf16.msra.mxu1 %v14287_v37  ;;  %11666 = vmatprep.mubr.msk.f32.mxu1 %vm254_vm2, %v13990_v28 }
0x1fe0   :  { %12657 = vmatprep.subr.bf16.mxu1 %v14297_v3 }
0x1fe3   :  { %12659 = vmatpush3.bf16.msra.mxu1 %v14297_v3 }
0x1fe6   :  { %11667 = vmatmul.mubr.msk.f32.vlgmr.msra.gmra.mrb[50].mxu1 %vm254_vm2, %v13992_v39 }
0x20a9   :  { %v11630_v34 = vpop.f32.mrb[46].mxu1 }
0x20aa   :  { %v4238_v7 = vpop.f32.mrb[47].mxu1 }
0x20ab   :  { %11633 = vmatprep.mubr.msk.f32.mxu0 %vm510_vm3, %v4238_v7 }
0x20ac   :  { %11634 = vmatmul.mubr.msk.f32.vlgmr.msra.gmra.mrb[22].mxu0 %vm510_vm3, %v11630_v34 }
0x20ad   :  { %12647 = vmatpush3.bf16.msra.mxu0 %v14314_v2  ;;  %11655 = vmatprep.mubr.msk.f32.mxu0 %vm254_vm2, %v13990_v28 }
0x20ae   :  { %12649 = vmatprep.subr.bf16.mxu0 %v14323_v14 }
0x20b1   :  { %v11646_v25 = vpop.f32.mrb[48].mxu1  ;;  %12651 = vmatpush3.bf16.msra.mxu0 %v14323_v14 }
0x20b2   :  { %v4411_v63 = vpop.f32.mrb[49].mxu1 }
0x20b3   :  { %v4412_v4 = vadd.f32 %v10477_v12, %v4411_v63  ;;  %v10485_v63 = vld [vmem:[%s15395_s0 + $0x7] ss:$0 sm:$0xff] }
0x20b4   :  { %11656 = vmatmul.mubr.msk.f32.vlgmr.msra.gmra.mrb[32].mxu0 %vm254_vm2, %v13992_v39 }
0x20b5   :  { %v4420_v1 = vmul.f32 0.35355338, %v4412_v4 }
0x20b7   :  { %11673 = vmatprep.mubr.msk.f32.mxu0 %vm510_vm3, %v4420_v1 }
0x20b9   :  { %v11668_v34 = vpop.f32.mrb[50].mxu1 }
0x20ba   :  { %v4595_v7 = vadd.f32 %v11668_v34, %v10493_v21  ;;  %v4589_v2 = vpop.f32.mrb[51].mxu1  ;;  %v4417_v34 = vadd.f32 %v11646_v25, %v10477_v12 }
0x20bb   :  { %v4590_v3 = vadd.f32 %v10493_v21, %v4589_v2 }
0x20bc   :  { %v4421_v2 = vmul.f32 0.35355338, %v4417_v34 }
0x20bd   :  { %v12666_v37 = vpack.c.bf16 %v4595_v7, %v4590_v3 }
0x20bf   :  { %12667 = vmatprep.subr.bf16.mxu1 %v12666_v37 }
0x20c0   :  { %12669 = vmatpush3.bf16.msra.mxu1 %v12666_v37 }
0x2187   :  { %v11657_v14 = vpop.f32.mrb[32].mxu0 }
0x2188   :  { %v4507_v22 = vadd.f32 %v11657_v14, %v10485_v63  ;;  %v4501_v4 = vpop.f32.mrb[33].mxu0 }
0x2189   :  { %v4502_v44 = vadd.f32 %v10485_v63, %v4501_v4 }
0x218b   :  { %v12660_v1 = vpack.c.bf16 %v4507_v22, %v4502_v44 }
0x218d   :  { %12662 = vmatprep.subr.msk.bf16.mxu0 %vm13483_vm4, %v12660_v1 }
0x218e   :  { %12665 = vmatpush3.bf16.xpose.msk.msra.mxu0 %vm13483_vm4, %v12660_v1 }
0x2195   :  { %11674 = vmatmul.mubr.msk.f32.vlgmr.msra.gmra.mrb[34].mxu0 %vm510_vm3, %v4421_v2 }
0x2268   :  { %v11675_v37 = vpop.f32.mrb[34].mxu0 }
0x2269   :  { %v4682_v3 = vadd.f32 %v11675_v37, %v13497_v60  ;;  %v4676_v21 = vpop.f32.mrb[35].mxu0  ;;  %v10502_v37 = vld [vmem:[%s15328_s14 + $0x38] sm:$0xff] }
0x226a   :  { %v4677_v7 = vadd.f32 %v4676_v21, %v13495_v58  ;;  %11683 = vmatprep.subr.mxu0 %v10502_v37 }
0x226b   :  { %v4688_v14 = vsel %vm598_vm7, %v4682_v3, -inf  ;;  %11684 = vmatpush3.msra.mxu0 %v10502_v37 }
0x226c   :  { %4689 = vmax.xlane.f32.xlu1 %v4688_v14  ;;  %v4685_v44 = vsel %vm598_vm7, %v4677_v7, -inf }
0x226d   :  { %4686 = vmax.xlane.f32.xlu0 %v4685_v44 }
0x22f9   :  { %v4690_v22 = vpop.xlane.xlu1 %4689 }
0x22fa   :  { %v4692_v63 = vsub.f32 %v4682_v3, %v4690_v22  ;;  %v4687_v40 = vpop.xlane.xlu0 %4686 }
0x22fb   :  { %v4691_v4 = vsub.f32 %v4677_v7, %v4687_v40 }
0x22fc   :  { %v4695_v12 = vmul.f32 1.442695, %v4692_v63 }
0x22fd   :  { %v4693_v25 = vmul.f32 1.442695, %v4691_v4  ;;  %v10372_v4 = vld [vmem:[%s15329_s15 + $0x1] ss:$0 sm:$0xff] }
0x22fe   :  { %13100 = vpow2.f32 %v4695_v12 }
0x22ff   :  { %13102 = vpow2.f32 %v4693_v25 }
0x2308   :  { %v13101_v1 = vpop.eup %13100 }
0x2309   :  { %v13103_v34 = vpop.eup %13102  ;;  %v4700_v60 = vsel %vm598_vm7, %v13101_v1, 0.0 }
0x230a   :  { %4701 = vadd.xlane.f32.xlu1 %v4700_v60  ;;  %v4697_v2 = vsel %vm598_vm7, %v13103_v34, 0.0 }
0x230b   :  { %4698 = vadd.xlane.f32.xlu0 %v4697_v2 }
0x2397   :  { %v4702_v3 = vpop.xlane.xlu1 %4701 }
0x2398   :  { %13104 = vrcp.f32 %v4702_v3  ;;  %v4699_v21 = vpop.xlane.xlu0 %4698 }
0x2399   :  { %13106 = vrcp.f32 %v4699_v21 }
0x23a2   :  { %v13105_v7 = vpop.eup %13104 }
0x23a3   :  { %v13107_v14 = vpop.eup %13106  ;;  %v4706_v22 = vmul.f32 %v13105_v7, %v13101_v1 }
0x23a4   :  { %v4705_v44 = vmul.f32 %v13107_v14, %v13103_v34 }
0x23a6   :  { %11680 = vmatprep.mubr.msk.f32.mxu1 %vm598_vm7, %v4705_v44 }
0x23a7   :  { %11681 = vmatmul.mubr.msk.f32.vlgmr.msra.gmra.mrb[52].mxu1 %vm598_vm7, %v4706_v22 }
0x247a   :  { %v11682_v63 = vpop.f32.mrb[52].mxu1 }
0x247b   :  { %v4779_v40 = vpop.f32.mrb[53].mxu1 }
0x247c   :  { %11685 = vmatprep.mubr.msk.f32.mxu0 %vm510_vm3, %v4779_v40 }
0x247d   :  { %11686 = vmatmul.mubr.msk.f32.vlgmr.msra.gmra.mrb[22].mxu0 %vm510_vm3, %v11682_v63 }
0x2550   :  { %v11687_v12 = vpop.f32.mrb[22].mxu0 }
0x2551   :  { %v12994_v25 = vadd.f32 %v11687_v12, %v10372_v4  ;;  %v4862_v60 = vpop.f32.mrb[23].mxu0  ;;  %v10509_v12 = vld [vmem:[%s15334_s20 + $0x20] sm:$0xff] }
0x2552   :  { %v12995_v2 = vadd.f32 %v10372_v4, %v4862_v60 }
0x2553   :  { %v4874_v1 = vadd.f32 %v12994_v25, %v13992_v39  ;;  %v10510_v25 = vld [vmem:[%s15334_s20 + $0x28] sm:$0xff] }
0x2554   :  { %v4873_v34 = vadd.f32 %v12995_v2, %v13990_v28  ;;  %v14385_v60 = vpack.c.bf16 %v10510_v25, %v10509_v12  ;;  %v10511_v2 = vld [vmem:[%s15334_s20 + $0x30] sm:$0xff]  ;;  %v10524_v12 = vld [vmem:[%s15336_s22 + $0xb8] sm:$0xff] }
0x2555   :  { %v4882_v37 = vsel %vm254_vm2, %v4874_v1, 0.0 }
0x2556   :  { %4883 = vadd.xlane.f32.xlu1 %v4882_v37  ;;  %v4879_v3 = vsel %vm254_vm2, %v4873_v34, 0.0  ;;  %12671 = vmatprep.subr.bf16.mxu1 %v14385_v60  ;;  %v10517_v37 = vld [vmem:[%s15336_s22 + $0x80] sm:$0xff] }
0x2557   :  { %4880 = vadd.xlane.f32.xlu0 %v4879_v3  ;;  %12673 = vmatpush3.bf16.msra.mxu1 %v14385_v60  ;;  %v10518_v3 = vld [vmem:[%s15336_s22 + $0x88] sm:$0xff] }
0x25e3   :  { %v4884_v21 = vpop.xlane.xlu1 %4883 }
0x25e4   :  { %v4886_v7 = vmul.f32 0.03125, %v4884_v21  ;;  %v4881_v14 = vpop.xlane.xlu0 %4880  ;;  %v10519_v21 = vld [vmem:[%s15336_s22 + $0x90] sm:$0xff] }
0x25e5   :  { %v4885_v44 = vmul.f32 0.03125, %v4881_v14  ;;  %v10520_v14 = vld [vmem:[%s15336_s22 + $0x98] sm:$0xff] }
0x25e6   :  { %v14369_v22 = vsub.f32 %v4874_v1, %v4886_v7  ;;  %v10512_v1 = vld [vmem:[%s15334_s20 + $0x38] sm:$0xff]  ;;  %v14408_v7 = vpack.c.bf16 %v10518_v3, %v10517_v37  ;;  %v10527_v3 = vld [vmem:[%s15336_s22 + $0xd0] sm:$0xff]  ;;  %s15421_s20 = sld [smem:[#allocation28_spill]] }
0x25e7   :  { %v14371_v63 = vsub.f32 %v4873_v34, %v4885_v44  ;;  %v14395_v34 = vpack.c.bf16 %v10512_v1, %v10511_v2  ;;  %v14413_v44 = vpack.c.bf16 %v10520_v14, %v10519_v21  ;;  %v10525_v2 = vld [vmem:[%s15336_s22 + $0xc0] sm:$0xff]  ;;  %v10526_v1 = vld [vmem:[%s15336_s22 + $0xc8] sm:$0xff]  ;;  %v10528_v21 = vld [vmem:[%s15336_s22 + $0xd8] sm:$0xff] }
0x25e8   :  { %v4890_v40 = vmul.f32 %v14369_v22, %v14369_v22  ;;  %12679 = vmatprep.subr.bf16.mxu0 %v14408_v7  ;;  %v14444_v37 = vpack.c.bf16 %v10526_v1, %v10525_v2  ;;  %v14454_v14 = vpack.c.bf16 %v10528_v21, %v10527_v3 }
0x25e9   :  { %v4889_v28 = vmul.f32 %v14371_v63, %v14371_v63  ;;  %12675 = vmatprep.subr.bf16.mxu1 %v14395_v34  ;;  %15411 = vst [vmem:[#allocation18_spill] sm:$0xff] %v14413_v44  ;;  %12681 = vmatpush3.bf16.msra.mxu0 %v14408_v7 }
0x25ea   :  { %v4894_v39 = vsel %vm254_vm2, %v4890_v40, 0.0  ;;  %12677 = vmatpush3.bf16.msra.mxu1 %v14395_v34  ;;  %v10521_v40 = vld [vmem:[%s15336_s22 + $0xa0] sm:$0xff]  ;;  %12683 = vmatprep.subr.bf16.mxu0 %v14413_v44  ;;  %15414 = vst [vmem:[#allocation21_spill] sm:$0xff] %v14444_v37  ;;  %15415 = vst [vmem:[#allocation22_spill] sm:$0xff] %v14454_v14 }
0x25eb   :  { %4895 = vadd.xlane.f32.xlu1 %v4894_v39  ;;  %v4891_v4 = vsel %vm254_vm2, %v4889_v28, 0.0  ;;  %v10522_v28 = vld [vmem:[%s15336_s22 + $0xa8] sm:$0xff] }
0x25ec   :  { %4892 = vadd.xlane.f32.xlu0 %v4891_v4  ;;  %v14424_v39 = vpack.c.bf16 %v10522_v28, %v10521_v40  ;;  %v10523_v4 = vld [vmem:[%s15336_s22 + $0xb0] sm:$0xff]  ;;  %v10529_v40 = vld [vmem:[%s15336_s22 + $0xe0] sm:$0xff]  ;;  %v10530_v28 = vld [vmem:[%s15336_s22 + $0xe8] sm:$0xff] }
0x25ed   :  { %12685 = vmatpush3.bf16.msra.mxu0 %v14413_v44  ;;  %v14434_v25 = vpack.c.bf16 %v10524_v12, %v10523_v4  ;;  %v14464_v4 = vpack.c.bf16 %v10530_v28, %v10529_v40  ;;  %v10507_v40 = vld [vmem:[%s15330_s16 + $0x1] ss:$0 sm:$0xff] }
0x25ee   :  { %15412 = vst [vmem:[#allocation19_spill] sm:$0xff] %v14424_v39  ;;  %12687 = vmatprep.subr.bf16.mxu0 %v14424_v39 }
0x25ef   :  { %15413 = vst [vmem:[#allocation20_spill] sm:$0xff] %v14434_v25  ;;  %15416 = vst [vmem:[#allocation23_spill] sm:$0xff] %v14464_v4 }
0x25f1   :  { %12689 = vmatpush3.bf16.msra.mxu0 %v14424_v39 }
0x25f2   :  { %12691 = vmatprep.subr.bf16.mxu0 %v14434_v25 }
0x25f5   :  { %12693 = vmatpush3.bf16.msra.mxu0 %v14434_v25 }
0x25f6   :  { %12695 = vmatprep.subr.bf16.mxu0 %v14444_v37 }
0x25f9   :  { %12697 = vmatpush3.bf16.msra.mxu0 %v14444_v37 }
0x25fa   :  { %12699 = vmatprep.subr.bf16.mxu0 %v14454_v14 }
0x25fd   :  { %12701 = vmatpush3.bf16.msra.mxu0 %v14454_v14 }
0x25fe   :  { %12703 = vmatprep.subr.bf16.mxu0 %v14464_v4 }
0x2601   :  { %12705 = vmatpush3.bf16.msra.mxu0 %v14464_v4 }
0x2678   :  { %v4896_v12 = vpop.xlane.xlu1 %4895 }
0x2679   :  { %v4898_v2 = vmul.f32 0.03125, %v4896_v12  ;;  %v4893_v1 = vpop.xlane.xlu0 %4892  ;;  %v10508_v12 = vld [vmem:[%s15331_s17 + $0x1] ss:$0 sm:$0xff] }
0x267a   :  { %v4897_v3 = vmul.f32 0.03125, %v4893_v1 }
0x267b   :  { %v4900_v21 = vadd.f32 1e-05, %v4898_v2 }
0x267c   :  { %v4899_v25 = vadd.f32 1e-05, %v4897_v3 }
0x267d   :  { %13108 = vrsqrt.f32 %v4900_v21 }
0x267e   :  { %13110 = vrsqrt.f32 %v4899_v25  ;;  %v15368_v25 = vmov 0.0  }
0x2687   :  { %v13109_v39 = vpop.eup %13108 }
0x2688   :  { %v13111_v28 = vpop.eup %13110  ;;  %v4904_v14 = vmul.f32 %v13109_v39, %v14369_v22  ;;  %v10531_v22 = vld [vmem:[%s15336_s22 + $0xf0] sm:$0xff] }
0x2689   :  { %v4903_v37 = vmul.f32 %v13111_v28, %v14371_v63  ;;  %v10532_v63 = vld [vmem:[%s15336_s22 + $0xf8] sm:$0xff] }
0x268a   :  { %v4912_v4 = vmul.f32 %v10507_v40, %v4904_v14  ;;  %v14491_v39 = vpack.c.bf16 %v10532_v63, %v10531_v22  ;;  %v5804_v22 = vld [vmem:[%s15419_s11] sm:$0xff]  ;;  %v15370_v63 = vmov 0.0|0.0  }
0x268b   :  { %v4911_v1 = vmul.f32 %v10507_v40, %v4903_v37  ;;  %v10514_v37 = vld [vmem:[%s15335_s21 + $0x1] ss:$0 sm:$0xff]  ;;  %12710 = vmatprep.subr.bf16.mxu1 %v15370_v63 }
0x268c   :  { %v14479_v3 = vadd.f32 %v10508_v12, %v4912_v4  ;;  %15417 = vst [vmem:[#allocation24_spill] sm:$0xff] %v14491_v39  ;;  %12707 = vmatprep.subr.bf16.mxu0 %v14491_v39 }
0x268d   :  { %v14477_v2 = vadd.f32 %v10508_v12, %v4911_v1  ;;  %12709 = vmatpush3.bf16.msra.mxu0 %v14491_v39  ;;  %v5805_v1 = vld [vmem:[%s15418_s3] sm:$0x7] }
0x268e   :  { %11822 = vmatprep.subr.mxu0 %v15368_v25 }
0x268f   :  { %11696 = vmatprep.mubr.msk.f32.mxu1 %vm254_vm2, %v14477_v2 }
0x2690   :  { %11697 = vmatmul.mubr.msk.f32.vlgmr.msra.gmra.mrb[54].mxu1 %vm254_vm2, %v14479_v3 }
0x2691   :  { %11742 = vmatprep.mubr.msk.f32.mxu1 %vm13232_vm8, %v15368_v25 }
0x2763   :  { %v11698_v14 = vpop.f32.mrb[54].mxu1 }
0x2764   :  { %v5012_v4 = vadd.f32 %v11698_v14, %v10514_v37  ;;  %v5006_v21 = vpop.f32.mrb[55].mxu1 }
0x2765   :  { %v5007_v40 = vadd.f32 %v10514_v37, %v5006_v21 }
0x2766   :  { %v5016_v12 = vmax.f32 %v5012_v4, 0.0  ;;  %v10576_v4 = vld [vmem:[%s15420_s9] ss:$0 sm:$0xff] }
0x2767   :  { %v5015_v28 = vmax.f32 %v5007_v40, 0.0  ;;  %v5891_v40 = vld [vmem:[%s15421_s20] sm:$0xff] }
0x2769   :  { %11731 = vmatprep.mubr.f32.mxu0 %v5015_v28 }
0x276a   :  { %11732 = vmatmul.mubr.f32.vlgmr.msra.gmra.mrb[36].mxu0 %v5016_v12 }
0x276b   :  { %11823 = vmatpush3.msk.msra.mxu0 %vm5817_vm9, %v5805_v1  ;;  %11824 = vmatprep.mubr.msk.f32.mxu0 %vm13232_vm8, %v15368_v25 }
0x276c   :  { %12758 = vmatprep.subr.bf16.mxu0 %v15370_v63 }
0x276e   :  { %11825 = vmatmul.mubr.msk.f32.vlgmr.msra.gmra.mrb[38].mxu0 %vm5813_vm10, %v5804_v22 }
0x276f   :  { %11835 = vmatprep.mubr.msk.f32.mxu0 %vm13232_vm8, %v15368_v25  ;;  %12760 = vmatpush3.bf16.msra.mxu0 %v13395_v5 }
0x2770   :  { %12761 = vmatprep.subr.bf16.mxu0 %v15370_v63 }
0x2773   :  { %12763 = vmatpush3.bf16.msra.mxu0 %v13405_v8 }
0x2774   :  { %12764 = vmatprep.subr.bf16.mxu0 %v15370_v63 }
0x283d   :  { %v11733_v37 = vpop.f32.mrb[36].mxu0 }
0x283e   :  { %v5108_v14 = vpop.f32.mrb[37].mxu0 }
0x2841   :  { %v5887_v21 = vpop.f32.mrb[38].mxu0 }
0x2842   :  { %v5888_v28 = vadd.f32 %v10576_v4, %v5887_v21  ;;  %v11826_v12 = vpop.f32.mrb[39].mxu0 }
0x2844   :  { %v14523_v5 = vadd.f32 %v5891_v40, %v5888_v28  ;;  %v13162_v28 = vld [vmem:[%s15327_s13] ss:$0 sm:$0xff] }
0x2846   :  { %11836 = vmatmul.mubr.msk.f32.vlgmr.msra.gmra.mrb[40].mxu0 %vm254_vm2, %v14523_v5 }
0x2847   :  { %12766 = vmatpush3.bf16.msra.mxu0 %v13415_v11  ;;  %11846 = vmatprep.mubr.msk.f32.mxu0 %vm13232_vm8, %v15368_v25 }
0x2848   :  { %12767 = vmatprep.subr.bf16.mxu0 %v15370_v63 }
0x284b   :  { %12769 = vmatpush3.bf16.msra.mxu0 %v13437_v23  ;;  %v13160_v23 = vld [vmem:[%s15394_s30] ss:$0 sm:$0xff] }
0x284c   :  { %12770 = vmatprep.subr.bf16.mxu0 %v15370_v63 }
0x284e   :  { %11847 = vmatmul.mubr.msk.f32.vlgmr.msra.gmra.mrb[42].mxu0 %vm254_vm2, %v14523_v5 }
0x284f   :  { %12772 = vmatpush3.bf16.msra.mxu0 %v13453_v26  ;;  %11857 = vmatprep.mubr.msk.f32.mxu0 %vm13232_vm8, %v15368_v25 }
0x2850   :  { %12773 = vmatprep.subr.bf16.mxu0 %v15370_v63 }
0x2853   :  { %12775 = vmatpush3.bf16.msra.mxu0 %v13463_v29  ;;  %v13161_v29 = vld [vmem:[%s15395_s0] ss:$0 sm:$0xff] }
0x2854   :  { %11860 = vmatprep.subr.mxu0 %v15368_v25 }
0x2856   :  { %11858 = vmatmul.mubr.msk.f32.vlgmr.msra.gmra.mrb[44].mxu0 %vm254_vm2, %v14523_v5 }
0x2857   :  { %11862 = vmatprep.mubr.msk.f32.mxu0 %vm13232_vm8, %v15368_v25 }
0x2919   :  { %v5962_v8 = vpop.f32.mrb[40].mxu0 }
0x291a   :  { %v11837_v11 = vpop.f32.mrb[41].mxu0  ;;  %v5963_v26 = vadd.f32 %v13160_v23, %v5962_v8 }
0x291b   :  { %v10534_v11 = vld [vmem:[%s15337_s23 + $0x1] ss:$0 sm:$0xff] }
0x291c   :  { %v5966_v21 = vmul.f32 0.35355338, %v5963_v26  ;;  %v5109_v23 = vadd.f32 %v10534_v11, %v5108_v14 }
0x2921   :  { %v6033_v1 = vpop.f32.mrb[42].mxu0 }
0x2922   :  { %v6034_v22 = vadd.f32 %v13161_v29, %v6033_v1  ;;  %v11848_v4 = vpop.f32.mrb[43].mxu0 }
0x2923   :  { %v5117_v4 = vadd.f32 %v5109_v23, %v14477_v2 }
0x2924   :  { %11861 = vmatpush3.xpose.msk.msra.mxu0 %vm510_vm3, %v6034_v22 }
0x2925   :  { %11865 = vmatprep.subr.mxu0 %v15368_v25 }
0x2927   :  { %11863 = vmatmul.mubr.msk.f32.vlgmr.msra.gmra.mrb[46].mxu0 %vm510_vm3, %v5966_v21  ;;  %v5123_v21 = vsel %vm254_vm2, %v5117_v4, 0.0 }
0x2928   :  { %11867 = vmatprep.mubr.msk.f32.mxu0 %vm13232_vm8, %v15368_v25 }
0x2929   :  { %v6103_v40 = vpop.f32.mrb[44].mxu0 }
0x292a   :  { %v6104_v12 = vadd.f32 %v13162_v28, %v6103_v40  ;;  %v11859_v8 = vpop.f32.mrb[45].mxu0 }
0x292c   :  { %11866 = vmatpush3.msra.mxu0 %v6104_v12 }
0x292d   :  { %11870 = vmatprep.subr.mxu0 %v15368_v25 }
0x29fa   :  { %v6179_v26 = vpop.f32.mrb[46].mxu0 }
0x29fb   :  { %v6180_v1 = vadd.f32 %v6179_v26, %v13495_v58  ;;  %v11864_v29 = vpop.f32.mrb[47].mxu0  ;;  %v5114_v26 = vadd.f32 %v11733_v37, %v10534_v11 }
0x29fd   :  { %v6183_v22 = vsel %vm510_vm3, %v6180_v1, -inf  ;;  %v5118_v2 = vadd.f32 %v5114_v26, %v14479_v3  ;;  %v5175_v3 = vld [vmem:[%s15338_s24 + $0x10] sm:$0xff] }
0x29fe   :  { %6184 = vmax.xlane.f32.xlu0 %v6183_v22 }
0x29ff   :  { %v5126_v23 = vsel %vm254_vm2, %v5118_v2, 0.0 }
0x2a02   :  { %5124 = vadd.xlane.f32.xlu0 %v5123_v21 }
0x2a8b   :  { %v6185_v40 = vpop.xlane.xlu0 %6184 }
0x2a8c   :  { %v6186_v28 = vsub.f32 %v6180_v1, %v6185_v40  ;;  %v5173_v1 = vld [vmem:[%s15338_s24] sm:$0xff] }
0x2a8e   :  { %v6187_v12 = vmul.f32 1.442695, %v6186_v28 }
0x2a8f   :  { %v5125_v8 = vpop.xlane.xlu0 %5124 }
0x2a90   :  { %13112 = vpow2.f32 %v6187_v12  ;;  %v5129_v25 = vmul.f32 0.03125, %v5125_v8 }
0x2a92   :  { %v5131_v63 = vsub.f32 %v5117_v4, %v5129_v25  ;;  %v5174_v25 = vld [vmem:[%s15338_s24 + $0x8] sm:$0xff] }
0x2a93   :  { %v12711_v22 = vpack.c.bf16 %v5174_v25, %v5173_v1 }
0x2a94   :  { %v5133_v14 = vmul.f32 %v5131_v63, %v5131_v63 }
0x2a95   :  { %12712 = vmatpush3.bf16.msra.mxu1 %v12711_v22 }
0x2a96   :  { %v5135_v39 = vsel %vm254_vm2, %v5133_v14, 0.0 }
0x2a97   :  { %5136 = vadd.xlane.f32.xlu0 %v5135_v39  ;;  %v15422_v39 = vmov 0.0|0.0  }
0x2a98   :  { %12713 = vmatprep.subr.bf16.mxu1 %v15422_v39 }
0x2a9a   :  { %v13113_v29 = vpop.eup %13112 }
0x2a9b   :  { %v6189_v44 = vsel %vm510_vm3, %v13113_v29, 0.0 }
0x2a9c   :  { %6190 = vadd.xlane.f32.xlu1 %v6189_v44  ;;  %v5176_v44 = vld [vmem:[%s15338_s24 + $0x18] sm:$0xff] }
0x2a9d   :  { %v12714_v37 = vpack.c.bf16 %v5176_v44, %v5175_v3  ;;  %v10541_v3 = vld [vmem:[%s15338_s24 + $0x20] sm:$0xff] }
0x2a9f   :  { %12715 = vmatpush3.bf16.msra.mxu1 %v12714_v37  ;;  %v14604_v37 = vld [vmem:[%s15333_s19 + $0x1] ss:$0 sm:$0xff] }
0x2aa0   :  { %5127 = vadd.xlane.f32.xlu1 %v5126_v23  ;;  %12716 = vmatprep.subr.bf16.mxu1 %v15422_v39  ;;  %v14592_v23 = vld [vmem:[%s15332_s18 + $0x1] ss:$0 sm:$0xff] }
0x2b24   :  { %v5137_v11 = vpop.xlane.xlu0 %5136 }
0x2b25   :  { %v5141_v4 = vmul.f32 0.03125, %v5137_v11 }
0x2b27   :  { %v5143_v21 = vadd.f32 1e-05, %v5141_v4 }
0x2b29   :  { %13114 = vrsqrt.f32 %v5143_v21  ;;  %v6191_v40 = vpop.xlane.xlu1 %6190  ;;  %v10543_v21 = vld [vmem:[%s15338_s24 + $0x30] sm:$0xff] }
0x2b2a   :  { %13116 = vrcp.f32 %v6191_v40  ;;  %v13163_v40 = vld [vmem:[%s15328_s14] sm:$0xff] }
0x2b2d   :  { %v5128_v28 = vpop.xlane.xlu1 %5127 }
0x2b2e   :  { %v5130_v12 = vmul.f32 0.03125, %v5128_v28  ;;  %v15423_v28 = vmov 0.0  }
0x2b30   :  { %v14585_v8 = vsub.f32 %v5118_v2, %v5130_v12  ;;  %v10542_v2 = vld [vmem:[%s15338_s24 + $0x28] sm:$0xff] }
0x2b32   :  { %v5134_v14 = vmul.f32 %v14585_v8, %v14585_v8 }
0x2b33   :  { %v13115_v26 = vpop.eup %13114 }
0x2b34   :  { %v13117_v1 = vpop.eup %13116  ;;  %v5147_v25 = vmul.f32 %v13115_v26, %v5131_v63  ;;  %v5138_v22 = vsel %vm254_vm2, %v5134_v14, 0.0  ;;  %v12717_v63 = vpack.c.bf16 %v10542_v2, %v10541_v3  ;;  %v10546_v14 = vld [vmem:[%s15338_s24 + $0x40] sm:$0xff]  ;;  %v10547_v26 = vld [vmem:[%s15338_s24 + $0x48] sm:$0xff]  ;;  %v10549_v3 = vld [vmem:[%s15338_s24 + $0x58] sm:$0xff] }
0x2b35   :  { %v6193_v44 = vmul.f32 %v13117_v1, %v13113_v29  ;;  %5139 = vadd.xlane.f32.xlu1 %v5138_v22  ;;  %v10544_v29 = vld [vmem:[%s15338_s24 + $0x38] sm:$0xff]  ;;  %v12723_v1 = vpack.c.bf16 %v10547_v26, %v10546_v14  ;;  %v10548_v22 = vld [vmem:[%s15338_s24 + $0x50] sm:$0xff]  ;;  %v10556_v14 = vld [vmem:[%s15338_s24 + $0x80] sm:$0xff] }
0x2b36   :  { %v5155_v11 = vmul.f32 %v14592_v23, %v5147_v25  ;;  %v12720_v12 = vpack.c.bf16 %v10544_v29, %v10543_v21  ;;  %v12726_v2 = vpack.c.bf16 %v10549_v3, %v10548_v22  ;;  %v10553_v29 = vld [vmem:[%s15338_s24 + $0x70] sm:$0xff]  ;;  %v10557_v26 = vld [vmem:[%s15338_s24 + $0x88] sm:$0xff]  ;;  %v10559_v3 = vld [vmem:[%s15338_s24 + $0x98] sm:$0xff] }
0x2b37   :  { %11868 = vmatmul.mubr.msk.f32.vlgmr.msra.gmra.mrb[48].mxu0 %vm510_vm3, %v6193_v44  ;;  %v10551_v44 = vld [vmem:[%s15338_s24 + $0x60] sm:$0xff]  ;;  %v10558_v22 = vld [vmem:[%s15338_s24 + $0x90] sm:$0xff] }
0x2b38   :  { %v5163_v4 = vadd.f32 %v14604_v37, %v5155_v11  ;;  %11871 = vmatpush3.msra.mxu0 %v13163_v40  ;;  %11872 = vmatprep.mubr.msk.f32.mxu0 %vm13232_vm8, %v15423_v28  ;;  %v10552_v11 = vld [vmem:[%s15338_s24 + $0x68] sm:$0xff]  ;;  %v10554_v40 = vld [vmem:[%s15338_s24 + $0x78] sm:$0xff] }
0x2b39   :  { %12782 = vmatprep.subr.bf16.mxu0 %v15422_v39 }
0x2b3a   :  { %11743 = vmatmul.mubr.msk.f32.vlgmr.msra.gmra.mrb[56].mxu1 %vm254_vm2, %v5163_v4  ;;  %v5256_v25 = vrot.slane %v5163_v4, 2  ;;  %v5335_v21 = vrot.slane %v5163_v4, 4 }
0x2b3b   :  { %12718 = vmatpush3.bf16.msra.mxu1 %v12717_v63  ;;  %11753 = vmatprep.mubr.msk.f32.mxu1 %vm13232_vm8, %v15423_v28  ;;  %v12729_v63 = vpack.c.bf16 %v10552_v11, %v10551_v44 }
0x2b3c   :  { %12719 = vmatprep.subr.bf16.mxu1 %v15422_v39 }
0x2b3f   :  { %12721 = vmatpush3.bf16.msra.mxu1 %v12720_v12  ;;  %v12732_v12 = vpack.c.bf16 %v10554_v40, %v10553_v29  ;;  %v10561_v29 = vld [vmem:[%s15338_s24 + $0xa0] sm:$0xff]  ;;  %v10562_v40 = vld [vmem:[%s15338_s24 + $0xa8] sm:$0xff] }
0x2b40   :  { %12722 = vmatprep.subr.bf16.mxu1 %v15422_v39 }
0x2b42   :  { %11754 = vmatmul.mubr.msk.f32.vlgmr.msra.gmra.mrb[56].mxu1 %vm254_vm2, %v5256_v25  ;;  %v5414_v25 = vrot.slane %v5163_v4, 6 }
0x2b43   :  { %12724 = vmatpush3.bf16.msra.mxu1 %v12723_v1  ;;  %11764 = vmatprep.mubr.msk.f32.mxu1 %vm13232_vm8, %v15423_v28  ;;  %v12735_v1 = vpack.c.bf16 %v10557_v26, %v10556_v14  ;;  %v12741_v14 = vpack.c.bf16 %v10562_v40, %v10561_v29  ;;  %v10573_v40 = vld [vmem:[%s15338_s24 + $0xf0] sm:$0xff] }
0x2b44   :  { %12725 = vmatprep.subr.bf16.mxu1 %v15422_v39 }
0x2b47   :  { %12727 = vmatpush3.bf16.msra.mxu1 %v12726_v2  ;;  %v12738_v2 = vpack.c.bf16 %v10559_v3, %v10558_v22 }
0x2b48   :  { %12728 = vmatprep.subr.bf16.mxu1 %v15422_v39 }
0x2b4a   :  { %11765 = vmatmul.mubr.msk.f32.vlgmr.msra.gmra.mrb[56].mxu1 %vm254_vm2, %v5335_v21 }
0x2b4b   :  { %12730 = vmatpush3.bf16.msra.mxu1 %v12729_v63  ;;  %11775 = vmatprep.mubr.msk.f32.mxu1 %vm13232_vm8, %v15423_v28 }
0x2b4c   :  { %12731 = vmatprep.subr.bf16.mxu1 %v15422_v39 }
0x2b4f   :  { %12733 = vmatpush3.bf16.msra.mxu1 %v12732_v12 }
0x2b50   :  { %12734 = vmatprep.subr.bf16.mxu1 %v15422_v39 }
0x2b52   :  { %11776 = vmatmul.mubr.msk.f32.vlgmr.msra.gmra.mrb[56].mxu1 %vm254_vm2, %v5414_v25 }
0x2b53   :  { %12736 = vmatpush3.bf16.msra.mxu1 %v12735_v1  ;;  %11786 = vmatprep.mubr.msk.f32.mxu1 %vm13232_vm8, %v15423_v28  ;;  %v10563_v1 = vld [vmem:[%s15338_s24 + $0xb0] sm:$0xff] }
0x2b54   :  { %12737 = vmatprep.subr.bf16.mxu1 %v15422_v39 }
0x2b57   :  { %12739 = vmatpush3.bf16.msra.mxu1 %v12738_v2  ;;  %v10568_v2 = vld [vmem:[%s15338_s24 + $0xd0] sm:$0xff] }
0x2b58   :  { %12740 = vmatprep.subr.bf16.mxu1 %v15422_v39 }
0x2bc2   :  { %v5140_v4 = vpop.xlane.xlu1 %5139 }
0x2bc3   :  { %v5142_v44 = vmul.f32 0.03125, %v5140_v4  ;;  %v10569_v4 = vld [vmem:[%s15338_s24 + $0xd8] sm:$0xff] }
0x2bc5   :  { %v5144_v11 = vadd.f32 1e-05, %v5142_v44  ;;  %v12750_v44 = vpack.c.bf16 %v10569_v4, %v10568_v2 }
0x2bc7   :  { %13118 = vrsqrt.f32 %v5144_v11  ;;  %v10571_v11 = vld [vmem:[%s15338_s24 + $0xe0] sm:$0xff] }
0x2bd1   :  { %v13119_v63 = vpop.eup %13118 }
0x2bd2   :  { %v5148_v21 = vmul.f32 %v13119_v63, %v14585_v8  ;;  %v10564_v8 = vld [vmem:[%s15338_s24 + $0xb8] sm:$0xff]  ;;  %v10572_v63 = vld [vmem:[%s15338_s24 + $0xe8] sm:$0xff] }
0x2bd3   :  { %v12744_v25 = vpack.c.bf16 %v10564_v8, %v10563_v1 }
0x2bd4   :  { %v5156_v12 = vmul.f32 %v14592_v23, %v5148_v21  ;;  %v10566_v23 = vld [vmem:[%s15338_s24 + $0xc0] sm:$0xff]  ;;  %v12753_v21 = vpack.c.bf16 %v10572_v63, %v10571_v11 }
0x2bd5   :  { %v13167_v11 = vld [vmem:[%s15327_s13 + $0x1] ss:$0 sm:$0xff] }
0x2bd6   :  { %v5164_v26 = vadd.f32 %v14604_v37, %v5156_v12  ;;  %v10567_v37 = vld [vmem:[%s15338_s24 + $0xc8] sm:$0xff]  ;;  %v10574_v12 = vld [vmem:[%s15338_s24 + $0xf8] sm:$0xff] }
0x2bd7   :  { %v12747_v22 = vpack.c.bf16 %v10567_v37, %v10566_v23  ;;  %v13165_v37 = vld [vmem:[%s15394_s30 + $0x1] ss:$0 sm:$0xff] }
0x2bd8   :  { %11787 = vmatmul.mubr.msk.f32.vlgmr.msra.gmra.mrb[56].mxu1 %vm254_vm2, %v5164_v26  ;;  %v5572_v3 = vrot.slane %v5164_v26, 2  ;;  %v5651_v29 = vrot.slane %v5164_v26, 4  ;;  %v5730_v1 = vrot.slane %v5164_v26, 6 }
0x2bd9   :  { %12742 = vmatpush3.bf16.msra.mxu1 %v12741_v14  ;;  %11797 = vmatprep.mubr.msk.f32.mxu1 %vm13232_vm8, %v15423_v28  ;;  %v12756_v14 = vpack.c.bf16 %v10574_v12, %v10573_v40 }
0x2bda   :  { %12743 = vmatprep.subr.bf16.mxu1 %v15422_v39 }
0x2bdd   :  { %12745 = vmatpush3.bf16.msra.mxu1 %v12744_v25 }
0x2bde   :  { %12746 = vmatprep.subr.bf16.mxu1 %v15422_v39 }
0x2be0   :  { %11798 = vmatmul.mubr.msk.f32.vlgmr.msra.gmra.mrb[56].mxu1 %vm254_vm2, %v5572_v3  ;;  %v13166_v3 = vld [vmem:[%s15395_s0 + $0x1] ss:$0 sm:$0xff] }
0x2be1   :  { %12748 = vmatpush3.bf16.msra.mxu1 %v12747_v22  ;;  %11808 = vmatprep.mubr.msk.f32.mxu1 %vm13232_vm8, %v15423_v28 }
0x2be2   :  { %12749 = vmatprep.subr.bf16.mxu1 %v15422_v39 }
0x2be5   :  { %12751 = vmatpush3.bf16.msra.mxu1 %v12750_v44 }
0x2be6   :  { %12752 = vmatprep.subr.bf16.mxu1 %v15422_v39 }
0x2be8   :  { %11809 = vmatmul.mubr.msk.f32.vlgmr.msra.gmra.mrb[56].mxu1 %vm254_vm2, %v5651_v29 }
0x2be9   :  { %12754 = vmatpush3.bf16.msra.mxu1 %v12753_v21  ;;  %11819 = vmatprep.mubr.msk.f32.mxu1 %vm13232_vm8, %v15423_v28 }
0x2bea   :  { %12755 = vmatprep.subr.bf16.mxu1 %v15422_v39 }
0x2bed   :  { %12757 = vmatpush3.bf16.msra.mxu1 %v12756_v14 }
0x2bee   :  { %12776 = vmatprep.subr.bf16.mxu1 %v15422_v39 }
0x2bf0   :  { %11820 = vmatmul.mubr.msk.f32.vlgmr.msra.gmra.mrb[56].mxu1 %vm254_vm2, %v5730_v1 }
0x2bf1   :  { %12778 = vmatpush3.bf16.msra.mxu1 %v13511_v17  ;;  %11883 = vmatprep.mubr.msk.f32.mxu1 %vm13232_vm8, %v15423_v28  ;;  %v13164_v17 = vld [vmem:[%s15328_s14 + $0x8] sm:$0xff] }
0x2bf2   :  { %12779 = vmatprep.subr.bf16.mxu1 %v15422_v39 }
0x2bf5   :  { %12781 = vmatpush3.bf16.msra.mxu1 %v13524_v32 }
0x2bf6   :  { %12788 = vmatprep.subr.bf16.mxu1 %v15422_v39 }
0x2bf8   :  { %11884 = vmatmul.mubr.msk.f32.vlgmr.msra.gmra.mrb[58].mxu1 %vm254_vm2, %v14523_v5 }
0x2bf9   :  { %12790 = vmatpush3.bf16.msra.mxu1 %v13537_v35  ;;  %11905 = vmatprep.mubr.msk.f32.mxu1 %vm13232_vm8, %v15423_v28 }
0x2bfa   :  { %12791 = vmatprep.subr.bf16.mxu1 %v15422_v39 }
0x2bfd   :  { %12793 = vmatpush3.bf16.msra.mxu1 %v13547_v38 }
0x2bfe   :  { %11918 = vmatprep.subr.mxu1 %v15423_v28 }
0x2c00   :  { %11906 = vmatmul.mubr.msk.f32.vlgmr.msra.gmra.mrb[60].mxu1 %vm254_vm2, %v14523_v5 }
0x2c01   :  { %11919 = vmatpush3.msra.mxu1 %v13164_v17  ;;  %11920 = vmatprep.mubr.msk.f32.mxu1 %vm13232_vm8, %v15423_v28 }
0x2c02   :  { %12800 = vmatprep.subr.bf16.mxu1 %v15422_v39 }
0x2c0a   :  { %v6263_v32 = vpop.f32.mrb[48].mxu0 }
0x2c0b   :  { %v11869_v35 = vpop.f32.mrb[49].mxu0  ;;  %11873 = vmatmul.mubr.msk.f32.vlgmr.msra.gmra.mrb[50].mxu0 %vm510_vm3, %v6263_v32 }
0x2c0c   :  { %12784 = vmatpush3.bf16.msra.mxu0 %v13564_v42  ;;  %11894 = vmatprep.mubr.msk.f32.mxu0 %vm13232_vm8, %v15423_v28 }
0x2c0d   :  { %12785 = vmatprep.subr.bf16.mxu0 %v15422_v39 }
0x2c10   :  { %12787 = vmatpush3.bf16.msra.mxu0 %v13573_v47 }
0x2c11   :  { %11908 = vmatprep.subr.mxu0 %v15423_v28 }
0x2c13   :  { %11895 = vmatmul.mubr.msk.f32.vlgmr.msra.gmra.mrb[52].mxu0 %vm254_vm2, %v14523_v5 }
0x2c14   :  { %11910 = vmatprep.mubr.msk.f32.mxu0 %vm13232_vm8, %v15423_v28 }
0x2ccb   :  { %v6407_v38 = vpop.f32.mrb[58].mxu1 }
0x2ccc   :  { %v11885_v26 = vpop.f32.mrb[59].mxu1  ;;  %v6408_v47 = vadd.f32 %v13165_v37, %v6407_v38 }
0x2cce   :  { %v6411_v44 = vmul.f32 0.35355338, %v6408_v47 }
0x2cd3   :  { %v6548_v8 = vpop.f32.mrb[60].mxu1 }
0x2cd4   :  { %v11907_v25 = vpop.f32.mrb[61].mxu1  ;;  %v6549_v63 = vadd.f32 %v13167_v11, %v6548_v8  ;;  %v13171_v11 = vld [vmem:[%s15395_s0 + $0x2] ss:$0 sm:$0xff] }
0x2cde   :  { %v14765_v42 = vpop.f32.mrb[50].mxu0 }
0x2cdf   :  { %v11874_v23 = vpop.f32.mrb[51].mxu0 }
0x2ce6   :  { %v6478_v22 = vpop.f32.mrb[52].mxu0 }
0x2ce7   :  { %v6479_v2 = vadd.f32 %v13166_v3, %v6478_v22  ;;  %v11896_v4 = vpop.f32.mrb[53].mxu0 }
0x2ce9   :  { %11909 = vmatpush3.xpose.msk.msra.mxu0 %vm510_vm3, %v6479_v2  ;;  %v13170_v2 = vld [vmem:[%s15394_s30 + $0x2] ss:$0 sm:$0xff] }
0x2cea   :  { %11913 = vmatprep.subr.mxu0 %v15423_v28 }
0x2cec   :  { %11911 = vmatmul.mubr.msk.f32.vlgmr.msra.gmra.mrb[54].mxu0 %vm510_vm3, %v6411_v44 }
0x2ced   :  { %11914 = vmatpush3.msra.mxu0 %v6549_v63  ;;  %11915 = vmatprep.mubr.msk.f32.mxu0 %vm13232_vm8, %v15423_v28 }
0x2cee   :  { %12794 = vmatprep.subr.bf16.mxu0 %v15422_v39 }
0x2dbf   :  { %v6624_v21 = vpop.f32.mrb[54].mxu0 }
0x2dc0   :  { %v6625_v29 = vadd.f32 %v6624_v21, %v13495_v58  ;;  %v11912_v40 = vpop.f32.mrb[55].mxu0 }
0x2dc2   :  { %v6628_v12 = vsel %vm510_vm3, %v6625_v29, -inf }
0x2dc3   :  { %6629 = vmax.xlane.f32.xlu0 %v6628_v12 }
0x2e50   :  { %v6630_v14 = vpop.xlane.xlu0 %6629 }
0x2e51   :  { %v6631_v1 = vsub.f32 %v6625_v29, %v6630_v14 }
0x2e53   :  { %v6632_v17 = vmul.f32 1.442695, %v6631_v1 }
0x2e55   :  { %13120 = vpow2.f32 %v6632_v17 }
0x2e5f   :  { %v13121_v32 = vpop.eup %13120 }
0x2e60   :  { %v6634_v35 = vsel %vm510_vm3, %v13121_v32, 0.0 }
0x2e61   :  { %6635 = vadd.xlane.f32.xlu1 %v6634_v35 }
0x2eee   :  { %v6636_v38 = vpop.xlane.xlu1 %6635 }
0x2eef   :  { %13122 = vrcp.f32 %v6636_v38 }
0x2ef9   :  { %v13123_v26 = vpop.eup %13122 }
0x2efa   :  { %v6638_v8 = vmul.f32 %v13123_v26, %v13121_v32 }
0x2efc   :  { %11916 = vmatmul.mubr.msk.f32.vlgmr.msra.gmra.mrb[56].mxu0 %vm510_vm3, %v6638_v8 }
0x2efd   :  { %12796 = vmatpush3.bf16.msra.mxu0 %v13611_v33  ;;  %11931 = vmatprep.mubr.msk.f32.mxu0 %vm13232_vm8, %v15423_v28  ;;  %v13168_v33 = vld [vmem:[%s15328_s14 + $0x10] sm:$0xff] }
0x2efe   :  { %12797 = vmatprep.subr.bf16.mxu0 %v15422_v39 }
0x2f01   :  { %12799 = vmatpush3.bf16.msra.mxu0 %v13623_v48 }
0x2f02   :  { %12806 = vmatprep.subr.bf16.mxu0 %v15422_v39 }
0x2f04   :  { %11932 = vmatmul.mubr.msk.f32.vlgmr.msra.gmra.mrb[58].mxu0 %vm254_vm2, %v14523_v5 }
0x2f05   :  { %12808 = vmatpush3.bf16.msra.mxu0 %v13637_v51  ;;  %11953 = vmatprep.mubr.msk.f32.mxu0 %vm13232_vm8, %v15423_v28 }
0x2f06   :  { %12809 = vmatprep.subr.bf16.mxu0 %v15422_v39 }
0x2f09   :  { %12811 = vmatpush3.bf16.msra.mxu0 %v13647_v54 }
0x2f0a   :  { %11966 = vmatprep.subr.mxu0 %v15423_v28 }
0x2f0c   :  { %11954 = vmatmul.mubr.msk.f32.vlgmr.msra.gmra.mrb[60].mxu0 %vm254_vm2, %v14523_v5 }
0x2f0d   :  { %11967 = vmatpush3.msra.mxu0 %v13168_v33  ;;  %11968 = vmatprep.mubr.msk.f32.mxu0 %vm13232_vm8, %v15423_v28 }
0x2f0e   :  { %12818 = vmatprep.subr.bf16.mxu0 %v15422_v39 }
0x2fcf   :  { %v6708_v48 = vpop.f32.mrb[56].mxu0 }
0x2fd0   :  { %v11917_v51 = vpop.f32.mrb[57].mxu0  ;;  %11921 = vmatmul.mubr.msk.f32.vlgmr.msra.gmra.mrb[62].mxu1 %vm510_vm3, %v6708_v48 }
0x2fd1   :  { %12802 = vmatpush3.bf16.msra.mxu1 %v13664_v57  ;;  %11942 = vmatprep.mubr.msk.f32.mxu1 %vm13232_vm8, %v15423_v28  ;;  %v13169_v57 = vld [vmem:[%s15329_s15] ss:$0 sm:$0xff] }
0x2fd2   :  { %12803 = vmatprep.subr.bf16.mxu1 %v15422_v39  ;;  %v6340_v47 = vadd.f32 %v13169_v57, %v14765_v42  ;;  %v13172_v42 = vld [vmem:[%s15327_s13 + $0x2] ss:$0 sm:$0xff] }
0x2fd5   :  { %12805 = vmatpush3.bf16.msra.mxu1 %v13673_v0 }
0x2fd6   :  { %11956 = vmatprep.subr.mxu1 %v15423_v28 }
0x2fd7   :  { %v6852_v54 = vpop.f32.mrb[58].mxu0 }
0x2fd8   :  { %v11933_v25 = vpop.f32.mrb[59].mxu0  ;;  %11943 = vmatmul.mubr.msk.f32.vlgmr.msra.gmra.mrb[64].mxu1 %vm254_vm2, %v14523_v5  ;;  %v6853_v4 = vadd.f32 %v13170_v2, %v6852_v54 }
0x2fd9   :  { %11958 = vmatprep.mubr.msk.f32.mxu1 %vm13232_vm8, %v15423_v28 }
0x2fda   :  { %v6856_v29 = vmul.f32 0.35355338, %v6853_v4 }
0x2fdf   :  { %v6993_v23 = vpop.f32.mrb[60].mxu0 }
0x2fe0   :  { %v11955_v37 = vpop.f32.mrb[61].mxu0  ;;  %v6994_v40 = vadd.f32 %v13172_v42, %v6993_v23 }
0x30a3   :  { %v6781_v22 = vpop.f32.mrb[62].mxu1 }
0x30a4   :  { %v14823_v0 = vadd.f32 %v6781_v22, %v6340_v47  ;;  %v11922_v3 = vpop.f32.mrb[63].mxu1 }
0x30a5   :  { %v13175_v3 = vld [vmem:[%s15395_s0 + $0x3] ss:$0 sm:$0xff] }
0x30ab   :  { %v6923_v44 = vpop.f32.mrb[64].mxu1 }
0x30ac   :  { %v6924_v63 = vadd.f32 %v13171_v11, %v6923_v44  ;;  %v11944_v21 = vpop.f32.mrb[65].mxu1 }
0x30ae   :  { %11957 = vmatpush3.xpose.msk.msra.mxu1 %vm510_vm3, %v6924_v63 }
0x30af   :  { %11961 = vmatprep.subr.mxu1 %v15423_v28 }
0x30b1   :  { %11959 = vmatmul.mubr.msk.f32.vlgmr.msra.gmra.mrb[66].mxu1 %vm510_vm3, %v6856_v29 }
0x30b2   :  { %11962 = vmatpush3.msra.mxu1 %v6994_v40  ;;  %11963 = vmatprep.mubr.msk.f32.mxu1 %vm13232_vm8, %v15423_v28 }
0x30b3   :  { %12812 = vmatprep.subr.bf16.mxu1 %v15422_v39 }
0x3184   :  { %v7069_v12 = vpop.f32.mrb[66].mxu1 }
0x3185   :  { %v7070_v14 = vadd.f32 %v7069_v12, %v13495_v58  ;;  %v11960_v1 = vpop.f32.mrb[67].mxu1 }
0x3187   :  { %v7073_v17 = vsel %vm510_vm3, %v7070_v14, -inf }
0x3188   :  { %7074 = vmax.xlane.f32.xlu0 %v7073_v17 }
0x3215   :  { %v7075_v32 = vpop.xlane.xlu0 %7074 }
0x3216   :  { %v7076_v35 = vsub.f32 %v7070_v14, %v7075_v32 }
0x3218   :  { %v7077_v38 = vmul.f32 1.442695, %v7076_v35 }
0x321a   :  { %13124 = vpow2.f32 %v7077_v38 }
0x3224   :  { %v13125_v26 = vpop.eup %13124 }
0x3225   :  { %v7079_v8 = vsel %vm510_vm3, %v13125_v26, 0.0 }
0x3226   :  { %7080 = vadd.xlane.f32.xlu1 %v7079_v8 }
0x32b3   :  { %v7081_v33 = vpop.xlane.xlu1 %7080 }
0x32b4   :  { %13126 = vrcp.f32 %v7081_v33 }
0x32be   :  { %v13127_v48 = vpop.eup %13126 }
0x32bf   :  { %v7083_v51 = vmul.f32 %v13127_v48, %v13125_v26 }
0x32c1   :  { %11964 = vmatmul.mubr.msk.f32.vlgmr.msra.gmra.mrb[68].mxu1 %vm510_vm3, %v7083_v51 }
0x32c2   :  { %12814 = vmatpush3.bf16.msra.mxu1 %v13711_v59  ;;  %11979 = vmatprep.mubr.msk.f32.mxu1 %vm13232_vm8, %v15423_v28  ;;  %v13173_v59 = vld [vmem:[%s15328_s14 + $0x18] sm:$0xff] }
0x32c3   :  { %12815 = vmatprep.subr.bf16.mxu1 %v15422_v39 }
0x32c6   :  { %12817 = vmatpush3.bf16.msra.mxu1 %v13723_v9 }
0x32c7   :  { %12824 = vmatprep.subr.bf16.mxu1 %v15422_v39 }
0x32c9   :  { %11980 = vmatmul.mubr.msk.f32.vlgmr.msra.gmra.mrb[70].mxu1 %vm254_vm2, %v14523_v5 }
0x32ca   :  { %12826 = vmatpush3.bf16.msra.mxu1 %v13737_v13  ;;  %12001 = vmatprep.mubr.msk.f32.mxu1 %vm13232_vm8, %v15423_v28 }
0x32cb   :  { %12827 = vmatprep.subr.bf16.mxu1 %v15422_v39 }
0x32ce   :  { %12829 = vmatpush3.bf16.msra.mxu1 %v13747_v16 }
0x32cf   :  { %12014 = vmatprep.subr.mxu1 %v15423_v28 }
0x32d1   :  { %12002 = vmatmul.mubr.msk.f32.vlgmr.msra.gmra.mrb[72].mxu1 %vm254_vm2, %v14523_v5 }
0x32d2   :  { %12015 = vmatpush3.msra.mxu1 %v13173_v59  ;;  %12016 = vmatprep.mubr.msk.f32.mxu1 %vm13232_vm8, %v15423_v28 }
0x32d3   :  { %12103 = vmatprep.subr.mxu1 %v15423_v28 }
0x3394   :  { %v7153_v9 = vpop.f32.mrb[68].mxu1 }
0x3395   :  { %v11965_v13 = vpop.f32.mrb[69].mxu1  ;;  %11969 = vmatmul.mubr.msk.f32.vlgmr.msra.gmra.mrb[62].mxu0 %vm510_vm3, %v7153_v9 }
0x3396   :  { %12820 = vmatpush3.bf16.msra.mxu0 %v13764_v20  ;;  %11990 = vmatprep.mubr.msk.f32.mxu0 %vm13232_vm8, %v15423_v28 }
0x3397   :  { %12821 = vmatprep.subr.bf16.mxu0 %v15422_v39 }
0x339a   :  { %12823 = vmatpush3.bf16.msra.mxu0 %v13773_v30  ;;  %v13174_v30 = vld [vmem:[%s15394_s30 + $0x3] ss:$0 sm:$0xff] }
0x339b   :  { %12004 = vmatprep.subr.mxu0 %v15423_v28 }
0x339c   :  { %v7297_v16 = vpop.f32.mrb[70].mxu1 }
0x339d   :  { %v11981_v54 = vpop.f32.mrb[71].mxu1  ;;  %11991 = vmatmul.mubr.msk.f32.vlgmr.msra.gmra.mrb[64].mxu0 %vm254_vm2, %v14523_v5  ;;  %v7298_v47 = vadd.f32 %v13174_v30, %v7297_v16 }
0x339e   :  { %12006 = vmatprep.mubr.msk.f32.mxu0 %vm13232_vm8, %v15423_v28 }
0x339f   :  { %v7301_v44 = vmul.f32 0.35355338, %v7298_v47  ;;  %v13178_v47 = vld [vmem:[%s15331_s17] ss:$0 sm:$0xff] }
0x33a4   :  { %v7438_v25 = vpop.f32.mrb[72].mxu1 }
0x33a5   :  { %v12003_v23 = vpop.f32.mrb[73].mxu1 }
0x3468   :  { %v7226_v20 = vpop.f32.mrb[62].mxu0 }
0x3469   :  { %v7230_v37 = vadd.f32 %v7226_v20, %v14823_v0  ;;  %v11970_v57 = vpop.f32.mrb[63].mxu0  ;;  %v13176_v0 = vld [vmem:[%s15327_s13 + $0x3] ss:$0 sm:$0xff] }
0x346a   :  { %v7439_v11 = vadd.f32 %v13176_v0, %v7438_v25 }
0x3470   :  { %v7368_v22 = vpop.f32.mrb[64].mxu0 }
0x3471   :  { %v7369_v2 = vadd.f32 %v13175_v3, %v7368_v22  ;;  %v11992_v4 = vpop.f32.mrb[65].mxu0 }
0x3473   :  { %12005 = vmatpush3.xpose.msk.msra.mxu0 %vm510_vm3, %v7369_v2 }
0x3474   :  { %12009 = vmatprep.subr.mxu0 %v15423_v28 }
0x3476   :  { %12007 = vmatmul.mubr.msk.f32.vlgmr.msra.gmra.mrb[66].mxu0 %vm510_vm3, %v7301_v44 }
0x3477   :  { %12010 = vmatpush3.msra.mxu0 %v7439_v11  ;;  %12011 = vmatprep.mubr.msk.f32.mxu0 %vm13232_vm8, %v15423_v28 }
0x3478   :  { %12830 = vmatprep.subr.bf16.mxu0 %v15422_v39 }
0x3549   :  { %v7514_v63 = vpop.f32.mrb[66].mxu0 }
0x354a   :  { %v7515_v21 = vadd.f32 %v7514_v63, %v13495_v58  ;;  %v12008_v29 = vpop.f32.mrb[67].mxu0 }
0x354c   :  { %v7518_v42 = vsel %vm510_vm3, %v7515_v21, -inf }
0x354d   :  { %7519 = vmax.xlane.f32.xlu0 %v7518_v42 }
0x35da   :  { %v7520_v40 = vpop.xlane.xlu0 %7519 }
0x35db   :  { %v7521_v12 = vsub.f32 %v7515_v21, %v7520_v40 }
0x35dd   :  { %v7522_v14 = vmul.f32 1.442695, %v7521_v12  ;;  %v13181_v12 = vld [vmem:[%s15332_s18] ss:$0 sm:$0xff] }
0x35df   :  { %13128 = vpow2.f32 %v7522_v14 }
0x35e9   :  { %v13129_v1 = vpop.eup %13128 }
0x35ea   :  { %v7524_v17 = vsel %vm510_vm3, %v13129_v1, 0.0 }
0x35eb   :  { %7525 = vadd.xlane.f32.xlu1 %v7524_v17 }
0x3678   :  { %v7526_v32 = vpop.xlane.xlu1 %7525 }
0x3679   :  { %13130 = vrcp.f32 %v7526_v32 }
0x3683   :  { %v13131_v35 = vpop.eup %13130 }
0x3684   :  { %v7528_v38 = vmul.f32 %v13131_v35, %v13129_v1  ;;  %v13182_v1 = vld [vmem:[%s15333_s19] ss:$0 sm:$0xff] }
0x3686   :  { %12012 = vmatmul.mubr.msk.f32.vlgmr.msra.gmra.mrb[68].mxu0 %vm510_vm3, %v7528_v38 }
0x3687   :  { %12832 = vmatpush3.bf16.msra.mxu0 %v13835_v15  ;;  %12027 = vmatprep.mubr.msk.f32.mxu0 %vm13232_vm8, %v15423_v28 }
0x3688   :  { %12833 = vmatprep.subr.bf16.mxu0 %v15422_v39 }
0x368b   :  { %12835 = vmatpush3.bf16.msra.mxu0 %v13845_v24 }
0x368c   :  { %12836 = vmatprep.subr.bf16.mxu0 %v15422_v39 }
0x3759   :  { %v7598_v26 = vpop.f32.mrb[68].mxu0 }
0x375a   :  { %v12013_v8 = vpop.f32.mrb[69].mxu0  ;;  %12017 = vmatmul.mubr.msk.f32.vlgmr.msra.gmra.mrb[74].mxu1 %vm510_vm3, %v7598_v26 }
0x375b   :  { %12105 = vmatprep.mubr.msk.f32.mxu1 %vm13232_vm8, %v15423_v28 }
0x382d   :  { %v7671_v33 = vpop.f32.mrb[74].mxu1 }
0x382e   :  { %v7675_v48 = vadd.f32 %v7671_v33, %v7230_v37  ;;  %v12018_v51 = vpop.f32.mrb[75].mxu1  ;;  %v13185_v33 = vld [vmem:[%s15328_s14 + $0x20] sm:$0xff] }
0x382f   :  { %v13186_v51 = vld [vmem:[%s15327_s13 + $0x4] ss:$0 sm:$0xff] }
0x3830   :  { %v7676_v15 = vadd.f32 %v7675_v48, %v14523_v5  ;;  %v13177_v5 = vld [vmem:[%s15330_s16] ss:$0 sm:$0xff] }
0x3832   :  { %v7677_v59 = vsel %vm254_vm2, %v7676_v15, 0.0 }
0x3833   :  { %7678 = vadd.xlane.f32.xlu0 %v7677_v59 }
0x38c0   :  { %v7679_v9 = vpop.xlane.xlu0 %7678 }
0x38c1   :  { %v7680_v13 = vmul.f32 0.03125, %v7679_v9 }
0x38c3   :  { %v7681_v24 = vsub.f32 %v7676_v15, %v7680_v13 }
0x38c5   :  { %v7682_v16 = vmul.f32 %v7681_v24, %v7681_v24 }
0x38c7   :  { %v7683_v54 = vsel %vm254_vm2, %v7682_v16, 0.0 }
0x38c8   :  { %7684 = vadd.xlane.f32.xlu1 %v7683_v54 }
0x3955   :  { %v7685_v25 = vpop.xlane.xlu1 %7684 }
0x3956   :  { %v7686_v23 = vmul.f32 0.03125, %v7685_v25 }
0x3958   :  { %v7687_v20 = vadd.f32 1e-05, %v7686_v23 }
0x395a   :  { %13132 = vrsqrt.f32 %v7687_v20 }
0x3964   :  { %v13133_v57 = vpop.eup %13132 }
0x3965   :  { %v7689_v30 = vmul.f32 %v13133_v57, %v7681_v24 }
0x3967   :  { %v7690_v37 = vmul.f32 %v13177_v5, %v7689_v30 }
0x3969   :  { %v7691_v22 = vadd.f32 %v13178_v47, %v7690_v37  ;;  %v15424_v47 = vld [vmem:[#allocation5_spill] sm:$0xff] }
0x396b   :  { %12028 = vmatmul.mubr.msk.f32.vlgmr.msra.gmra.mrb[70].mxu0 %vm254_vm2, %v7691_v22 }
0x396c   :  { %12838 = vmatpush3.bf16.msra.mxu0 %v13858_v31  ;;  %12062 = vmatprep.mubr.msk.f32.mxu0 %vm13232_vm8, %v15423_v28 }
0x396d   :  { %12839 = vmatprep.subr.bf16.mxu0 %v15422_v39 }
0x3970   :  { %12841 = vmatpush3.bf16.msra.mxu0 %v13863_v36  ;;  %v13179_v36 = vld [vmem:[%s15335_s21] ss:$0 sm:$0xff] }
0x3971   :  { %12842 = vmatprep.subr.bf16.mxu0 %v15422_v39 }
0x3974   :  { %12844 = vmatpush3.bf16.msra.mxu0 %v13874_v41 }
0x3975   :  { %12845 = vmatprep.subr.bf16.mxu0 %v15422_v39 }
0x3978   :  { %12847 = vmatpush3.bf16.msra.mxu0 %v13884_v45 }
0x3979   :  { %12848 = vmatprep.subr.bf16.mxu0 %v15422_v39 }
0x397c   :  { %12850 = vmatpush3.bf16.msra.mxu0 %v13894_v50 }
0x397d   :  { %12851 = vmatprep.subr.bf16.mxu0 %v15422_v39 }
0x3980   :  { %12853 = vmatpush3.bf16.msra.mxu0 %v13904_v55 }
0x3981   :  { %12854 = vmatprep.subr.bf16.mxu0 %v15422_v39 }
0x3984   :  { %12856 = vmatpush3.bf16.msra.mxu0 %v13914_v62  ;;  %v13180_v62 = vld [vmem:[%s15337_s23] ss:$0 sm:$0xff] }
0x3985   :  { %12857 = vmatprep.subr.bf16.mxu0 %v15422_v39 }
0x3988   :  { %12859 = vmatpush3.bf16.msra.mxu0 %v13935_v6 }
0x3989   :  { %12860 = vmatprep.subr.bf16.mxu0 %v15422_v39 }
0x3a3e   :  { %v7761_v31 = vpop.f32.mrb[70].mxu0 }
0x3a3f   :  { %v7762_v41 = vadd.f32 %v13179_v36, %v7761_v31  ;;  %v12029_v45 = vpop.f32.mrb[71].mxu0  ;;  %v15426_v31 = vld [vmem:[#allocation7_spill] sm:$0xff]  ;;  %v15427_v36 = vld [vmem:[#allocation8_spill] sm:$0xff] }
0x3a41   :  { %v7765_v50 = vmax.f32 %v7762_v41, 0.0  ;;  %v13187_v41 = vld [vmem:[%s15328_s14 + $0x28] sm:$0xff] }
0x3a43   :  { %12063 = vmatmul.mubr.f32.vlgmr.msra.gmra.mrb[72].mxu0 %v7765_v50 }
0x3a44   :  { %12862 = vmatpush3.bf16.msra.mxu0 %v13955_v43  ;;  %12073 = vmatprep.mubr.msk.f32.mxu0 %vm13232_vm8, %v15423_v28 }
0x3a45   :  { %12863 = vmatprep.subr.bf16.mxu0 %v15422_v39 }
0x3a48   :  { %12865 = vmatpush3.bf16.msra.mxu0 %v13965_v49 }
0x3a49   :  { %12866 = vmatprep.subr.bf16.mxu0 %v15422_v39 }
0x3b16   :  { %v7832_v55 = vpop.f32.mrb[72].mxu0 }
0x3b17   :  { %v7833_v6 = vadd.f32 %v13180_v62, %v7832_v55  ;;  %v12064_v3 = vpop.f32.mrb[73].mxu0 }
0x3b19   :  { %v7836_v2 = vadd.f32 %v7833_v6, %v7691_v22  ;;  %v15425_v22 = vld [vmem:[#allocation6_spill] sm:$0xff] }
0x3b1b   :  { %v7837_v4 = vsel %vm254_vm2, %v7836_v2, 0.0 }
0x3b1c   :  { %7838 = vadd.xlane.f32.xlu0 %v7837_v4  ;;  %v13188_v4 = vld [vmem:[%s15394_s30 + $0x5] ss:$0 sm:$0xff] }
0x3ba9   :  { %v7839_v43 = vpop.xlane.xlu0 %7838 }
0x3baa   :  { %v7840_v44 = vmul.f32 0.03125, %v7839_v43 }
0x3bac   :  { %v7841_v0 = vsub.f32 %v7836_v2, %v7840_v44  ;;  %v13189_v44 = vld [vmem:[%s15395_s0 + $0x5] ss:$0 sm:$0xff] }
0x3bae   :  { %v7842_v11 = vmul.f32 %v7841_v0, %v7841_v0 }
0x3bb0   :  { %v7843_v63 = vsel %vm254_vm2, %v7842_v11, 0.0 }
0x3bb1   :  { %7844 = vadd.xlane.f32.xlu1 %v7843_v63 }
0x3c3e   :  { %v7845_v49 = vpop.xlane.xlu1 %7844 }
0x3c3f   :  { %v7846_v21 = vmul.f32 0.03125, %v7845_v49  ;;  %v13190_v49 = vld [vmem:[%s15327_s13 + $0x5] ss:$0 sm:$0xff] }
0x3c41   :  { %v7847_v29 = vadd.f32 1e-05, %v7846_v21 }
0x3c43   :  { %13134 = vrsqrt.f32 %v7847_v29 }
0x3c4d   :  { %v13135_v42 = vpop.eup %13134 }
0x3c4e   :  { %v7849_v40 = vmul.f32 %v13135_v42, %v7841_v0 }
0x3c50   :  { %v7850_v14 = vmul.f32 %v13181_v12, %v7849_v40 }
0x3c52   :  { %v14954_v17 = vadd.f32 %v13182_v1, %v7850_v14 }
0x3c54   :  { %12074 = vmatmul.mubr.msk.f32.vlgmr.msra.gmra.mrb[74].mxu0 %vm254_vm2, %v14954_v17 }
0x3c55   :  { %12868 = vmatpush3.bf16.msra.mxu0 %v13975_v56  ;;  %12084 = vmatprep.mubr.msk.f32.mxu0 %vm13232_vm8, %v15423_v28 }
0x3c56   :  { %12869 = vmatprep.subr.bf16.mxu0 %v15422_v39 }
0x3c59   :  { %12871 = vmatpush3.bf16.msra.mxu0 %v13994_v19 }
0x3c5a   :  { %12872 = vmatprep.subr.bf16.mxu0 %v15422_v39 }
0x3c5c   :  { %12085 = vmatmul.mubr.msk.f32.vlgmr.msra.gmra.mrb[76].mxu0 %vm254_vm2, %v14954_v17 }
0x3c5d   :  { %12874 = vmatpush3.bf16.msra.mxu0 %v14010_v46  ;;  %12095 = vmatprep.mubr.msk.f32.mxu0 %vm13232_vm8, %v15423_v28  ;;  %v13183_v46 = vld [vmem:[%s15394_s30 + $0x4] ss:$0 sm:$0xff] }
0x3c5e   :  { %12875 = vmatprep.subr.bf16.mxu0 %v15422_v39 }
0x3c61   :  { %12877 = vmatpush3.bf16.msra.mxu0 %v14020_v61  ;;  %v13184_v61 = vld [vmem:[%s15395_s0 + $0x4] ss:$0 sm:$0xff] }
0x3c62   :  { %12098 = vmatprep.subr.mxu0 %v15423_v28 }
0x3c64   :  { %12096 = vmatmul.mubr.msk.f32.vlgmr.msra.gmra.mrb[78].mxu0 %vm254_vm2, %v14954_v17 }
0x3c65   :  { %12100 = vmatprep.mubr.msk.f32.mxu0 %vm13232_vm8, %v15423_v28 }
0x3d27   :  { %v7921_v56 = vpop.f32.mrb[74].mxu0 }
0x3d28   :  { %v12075_v19 = vpop.f32.mrb[75].mxu0  ;;  %v7922_v32 = vadd.f32 %v13183_v46, %v7921_v56 }
0x3d2a   :  { %v7925_v8 = vmul.f32 0.35355338, %v7922_v32 }
0x3d2f   :  { %v7992_v35 = vpop.f32.mrb[76].mxu0 }
0x3d30   :  { %v7993_v38 = vadd.f32 %v13184_v61, %v7992_v35  ;;  %v12086_v26 = vpop.f32.mrb[77].mxu0 }
0x3d31   :  { %v15429_v26 = vld [vmem:[#allocation10_spill] sm:$0xff] }
0x3d32   :  { %12099 = vmatpush3.xpose.msk.msra.mxu0 %vm510_vm3, %v7993_v38 }
0x3d33   :  { %12108 = vmatprep.subr.mxu0 %v15423_v28 }
0x3d35   :  { %12101 = vmatmul.mubr.msk.f32.vlgmr.msra.gmra.mrb[80].mxu0 %vm510_vm3, %v7925_v8  ;;  %v15430_v8 = vld [vmem:[#allocation11_spill] sm:$0xff] }
0x3d36   :  { %12109 = vmatpush3.msra.mxu0 %v13185_v33  ;;  %12110 = vmatprep.mubr.msk.f32.mxu0 %vm13232_vm8, %v15423_v28 }
0x3d37   :  { %v8062_v48 = vpop.f32.mrb[78].mxu0  ;;  %12884 = vmatprep.subr.bf16.mxu0 %v15422_v39 }
0x3d38   :  { %v8063_v15 = vadd.f32 %v13186_v51, %v8062_v48  ;;  %v12097_v59 = vpop.f32.mrb[79].mxu0 }
0x3d39   :  { %v13192_v59 = vld [vmem:[%s15329_s15 + $0x1] ss:$0 sm:$0xff] }
0x3d3a   :  { %12104 = vmatpush3.msra.mxu1 %v8063_v15 }
0x3d3b   :  { %12878 = vmatprep.subr.bf16.mxu1 %v15422_v39 }
0x3e08   :  { %v8138_v9 = vpop.f32.mrb[80].mxu0 }
0x3e09   :  { %v8139_v13 = vadd.f32 %v8138_v9, %v13495_v58  ;;  %v12102_v24 = vpop.f32.mrb[81].mxu0 }
0x3e0b   :  { %v8142_v16 = vsel %vm510_vm3, %v8139_v13, -inf }
0x3e0c   :  { %8143 = vmax.xlane.f32.xlu0 %v8142_v16 }
0x3e99   :  { %v8144_v54 = vpop.xlane.xlu0 %8143 }
0x3e9a   :  { %v8145_v25 = vsub.f32 %v8139_v13, %v8144_v54  ;;  %v13193_v54 = vld [vmem:[%s15394_s30 + $0x6] ss:$0 sm:$0xff] }
0x3e9c   :  { %v8146_v23 = vmul.f32 1.442695, %v8145_v25 }
0x3e9e   :  { %13136 = vpow2.f32 %v8146_v23 }
0x3ea8   :  { %v13137_v20 = vpop.eup %13136 }
0x3ea9   :  { %v8148_v57 = vsel %vm510_vm3, %v13137_v20, 0.0 }
0x3eaa   :  { %8149 = vadd.xlane.f32.xlu1 %v8148_v57 }
0x3f37   :  { %v8150_v30 = vpop.xlane.xlu1 %8149 }
0x3f38   :  { %13138 = vrcp.f32 %v8150_v30 }
0x3f42   :  { %v13139_v5 = vpop.eup %13138 }
0x3f43   :  { %v8152_v37 = vmul.f32 %v13139_v5, %v13137_v20  ;;  %v13194_v20 = vld [vmem:[%s15395_s0 + $0x6] ss:$0 sm:$0xff] }
0x3f45   :  { %12106 = vmatmul.mubr.msk.f32.vlgmr.msra.gmra.mrb[76].mxu1 %vm510_vm3, %v8152_v37  ;;  %v13195_v37 = vld [vmem:[%s15327_s13 + $0x6] ss:$0 sm:$0xff] }
0x3f46   :  { %12880 = vmatpush3.bf16.msra.mxu1 %v15424_v47  ;;  %12121 = vmatprep.mubr.msk.f32.mxu1 %vm13232_vm8, %v15423_v28 }
0x3f47   :  { %12881 = vmatprep.subr.bf16.mxu1 %v15422_v39 }
0x3f4a   :  { %12883 = vmatpush3.bf16.msra.mxu1 %v15425_v22 }
0x3f4b   :  { %12890 = vmatprep.subr.bf16.mxu1 %v15422_v39 }
0x3f4d   :  { %12122 = vmatmul.mubr.msk.f32.vlgmr.msra.gmra.mrb[78].mxu1 %vm254_vm2, %v14954_v17 }
0x3f4e   :  { %12892 = vmatpush3.bf16.msra.mxu1 %v15426_v31  ;;  %12143 = vmatprep.mubr.msk.f32.mxu1 %vm13232_vm8, %v15423_v28 }
0x3f4f   :  { %12893 = vmatprep.subr.bf16.mxu1 %v15422_v39 }
0x3f52   :  { %12895 = vmatpush3.bf16.msra.mxu1 %v15427_v36 }
0x3f53   :  { %12156 = vmatprep.subr.mxu1 %v15423_v28 }
0x3f55   :  { %12144 = vmatmul.mubr.msk.f32.vlgmr.msra.gmra.mrb[80].mxu1 %vm254_vm2, %v14954_v17 }
0x3f56   :  { %12157 = vmatpush3.msra.mxu1 %v13187_v41  ;;  %12158 = vmatprep.mubr.msk.f32.mxu1 %vm13232_vm8, %v15423_v28 }
0x3f57   :  { %12902 = vmatprep.subr.bf16.mxu1 %v15422_v39 }
0x4018   :  { %v8222_v45 = vpop.f32.mrb[76].mxu1 }
0x4019   :  { %v12107_v50 = vpop.f32.mrb[77].mxu1  ;;  %12111 = vmatmul.mubr.msk.f32.vlgmr.msra.gmra.mrb[82].mxu0 %vm510_vm3, %v8222_v45 }
0x401a   :  { %12886 = vmatpush3.bf16.msra.mxu0 %v14116_v18  ;;  %12132 = vmatprep.mubr.msk.f32.mxu0 %vm13232_vm8, %v15423_v28 }
0x401b   :  { %12887 = vmatprep.subr.bf16.mxu0 %v15422_v39 }
0x401e   :  { %12889 = vmatpush3.bf16.msra.mxu0 %v14125_v52 }
0x401f   :  { %12146 = vmatprep.subr.mxu0 %v15423_v28 }
0x4020   :  { %v8366_v55 = vpop.f32.mrb[78].mxu1 }
0x4021   :  { %v12123_v62 = vpop.f32.mrb[79].mxu1  ;;  %12133 = vmatmul.mubr.msk.f32.vlgmr.msra.gmra.mrb[84].mxu0 %vm254_vm2, %v14954_v17  ;;  %v8367_v52 = vadd.f32 %v13188_v4, %v8366_v55  ;;  %v15431_v4 = vld [vmem:[#allocation12_spill] sm:$0xff] }
0x4022   :  { %12148 = vmatprep.mubr.msk.f32.mxu0 %vm13232_vm8, %v15423_v28 }
0x4023   :  { %v8370_v63 = vmul.f32 0.35355338, %v8367_v52  ;;  %v15432_v52 = vld [vmem:[#allocation13_spill] sm:$0xff] }
0x4028   :  { %v8507_v6 = vpop.f32.mrb[80].mxu1 }
0x4029   :  { %v12145_v3 = vpop.f32.mrb[81].mxu1  ;;  %v8508_v21 = vadd.f32 %v13190_v49, %v8507_v6  ;;  %v15435_v49 = vld [vmem:[#allocation16_spill] sm:$0xff] }
0x40ec   :  { %v15032_v18 = vpop.f32.mrb[82].mxu0 }
0x40ed   :  { %v12112_v2 = vpop.f32.mrb[83].mxu0  ;;  %v8299_v9 = vadd.f32 %v13192_v59, %v15032_v18 }
0x40f4   :  { %v8437_v43 = vpop.f32.mrb[84].mxu0 }
0x40f5   :  { %v8438_v0 = vadd.f32 %v13189_v44, %v8437_v43  ;;  %v12134_v11 = vpop.f32.mrb[85].mxu0  ;;  %v15433_v43 = vld [vmem:[#allocation14_spill] sm:$0xff]  ;;  %v15434_v44 = vld [vmem:[#allocation15_spill] sm:$0xff] }
0x40f7   :  { %12147 = vmatpush3.xpose.msk.msra.mxu0 %vm510_vm3, %v8438_v0  ;;  %v13196_v0 = vld [vmem:[%s15328_s14 + $0x38] sm:$0xff] }
0x40f8   :  { %12151 = vmatprep.subr.mxu0 %v15423_v28 }
0x40fa   :  { %12149 = vmatmul.mubr.msk.f32.vlgmr.msra.gmra.mrb[86].mxu0 %vm510_vm3, %v8370_v63 }
0x40fb   :  { %12152 = vmatpush3.msra.mxu0 %v8508_v21  ;;  %12153 = vmatprep.mubr.msk.f32.mxu0 %vm13232_vm8, %v15423_v28  ;;  %v15436_v21 = vld [vmem:[#allocation17_spill] sm:$0xff] }
0x40fc   :  { %12896 = vmatprep.subr.bf16.mxu0 %v15422_v39 }
0x41cd   :  { %v8583_v29 = vpop.f32.mrb[86].mxu0 }
0x41ce   :  { %v8584_v42 = vadd.f32 %v8583_v29, %v13495_v58  ;;  %v12150_v40 = vpop.f32.mrb[87].mxu0 }
0x41d0   :  { %v8587_v12 = vsel %vm510_vm3, %v8584_v42, -inf }
0x41d1   :  { %8588 = vmax.xlane.f32.xlu0 %v8587_v12 }
0x425e   :  { %v8589_v14 = vpop.xlane.xlu0 %8588 }
0x425f   :  { %v8590_v1 = vsub.f32 %v8584_v42, %v8589_v14 }
0x4261   :  { %v8591_v56 = vmul.f32 1.442695, %v8590_v1 }
0x4263   :  { %13140 = vpow2.f32 %v8591_v56 }
0x426d   :  { %v13141_v19 = vpop.eup %13140 }
0x426e   :  { %v8593_v46 = vsel %vm510_vm3, %v13141_v19, 0.0 }
0x426f   :  { %8594 = vadd.xlane.f32.xlu1 %v8593_v46 }
0x42fc   :  { %v8595_v32 = vpop.xlane.xlu1 %8594 }
0x42fd   :  { %13142 = vrcp.f32 %v8595_v32 }
0x4307   :  { %v13143_v35 = vpop.eup %13142 }
0x4308   :  { %v8597_v61 = vmul.f32 %v13143_v35, %v13141_v19  ;;  %v13197_v19 = vld [vmem:[%s15394_s30 + $0x7] ss:$0 sm:$0xff] }
0x4309   :  { %v13198_v35 = vld [vmem:[%s15395_s0 + $0x7] ss:$0 sm:$0xff] }
0x430a   :  { %12154 = vmatmul.mubr.msk.f32.vlgmr.msra.gmra.mrb[88].mxu0 %vm510_vm3, %v8597_v61 }
0x430b   :  { %12898 = vmatpush3.bf16.msra.mxu0 %v14161_v10  ;;  %12169 = vmatprep.mubr.msk.f32.mxu0 %vm13232_vm8, %v15423_v28  ;;  %v15428_v10 = vld [vmem:[#allocation9_spill] sm:$0xff] }
0x430c   :  { %12899 = vmatprep.subr.bf16.mxu0 %v15422_v39 }
0x430f   :  { %12901 = vmatpush3.bf16.msra.mxu0 %v14173_v53  ;;  %v13191_v53 = vld [vmem:[%s15328_s14 + $0x30] sm:$0xff] }
0x4310   :  { %12908 = vmatprep.subr.bf16.mxu0 %v15422_v39 }
0x4312   :  { %12170 = vmatmul.mubr.msk.f32.vlgmr.msra.gmra.mrb[90].mxu0 %vm254_vm2, %v14954_v17 }
0x4313   :  { %12910 = vmatpush3.bf16.msra.mxu0 %v14187_v27  ;;  %12191 = vmatprep.mubr.msk.f32.mxu0 %vm13232_vm8, %v15423_v28 }
0x4314   :  { %12911 = vmatprep.subr.bf16.mxu0 %v15422_v39 }
0x4317   :  { %12913 = vmatpush3.bf16.msra.mxu0 %v15428_v10 }
0x4318   :  { %12204 = vmatprep.subr.mxu0 %v15423_v28 }
0x431a   :  { %12192 = vmatmul.mubr.msk.f32.vlgmr.msra.gmra.mrb[92].mxu0 %vm254_vm2, %v14954_v17 }
0x431b   :  { %12205 = vmatpush3.msra.mxu0 %v13191_v53  ;;  %12206 = vmatprep.mubr.msk.f32.mxu0 %vm13232_vm8, %v15423_v28 }
0x431c   :  { %12920 = vmatprep.subr.bf16.mxu0 %v15422_v39 }
0x43dd   :  { %v8667_v27 = vpop.f32.mrb[88].mxu0 }
0x43de   :  { %v12155_v38 = vpop.f32.mrb[89].mxu0  ;;  %12159 = vmatmul.mubr.msk.f32.vlgmr.msra.gmra.mrb[82].mxu1 %vm510_vm3, %v8667_v27  ;;  %v13199_v27 = vld [vmem:[%s15327_s13 + $0x7] ss:$0 sm:$0xff] }
0x43df   :  { %12904 = vmatpush3.bf16.msra.mxu1 %v15429_v26  ;;  %12180 = vmatprep.mubr.msk.f32.mxu1 %vm13232_vm8, %v15423_v28 }
0x43e0   :  { %12905 = vmatprep.subr.bf16.mxu1 %v15422_v39 }
0x43e3   :  { %12907 = vmatpush3.bf16.msra.mxu1 %v15430_v8 }
0x43e4   :  { %12194 = vmatprep.subr.mxu1 %v15423_v28 }
0x43e5   :  { %v8811_v33 = vpop.f32.mrb[90].mxu0 }
0x43e6   :  { %v12171_v48 = vpop.f32.mrb[91].mxu0  ;;  %12181 = vmatmul.mubr.msk.f32.vlgmr.msra.gmra.mrb[84].mxu1 %vm254_vm2, %v14954_v17  ;;  %v8812_v25 = vadd.f32 %v13193_v54, %v8811_v33 }
0x43e7   :  { %12196 = vmatprep.mubr.msk.f32.mxu1 %vm13232_vm8, %v15423_v28 }
0x43e8   :  { %v8815_v5 = vmul.f32 0.35355338, %v8812_v25 }
0x43ed   :  { %v8952_v51 = vpop.f32.mrb[92].mxu0 }
0x43ee   :  { %v12193_v15 = vpop.f32.mrb[93].mxu0  ;;  %v8953_v47 = vadd.f32 %v13195_v37, %v8952_v51 }
0x44b1   :  { %v8740_v13 = vpop.f32.mrb[82].mxu1 }
0x44b2   :  { %v15090_v24 = vadd.f32 %v8740_v13, %v8299_v9  ;;  %v12160_v16 = vpop.f32.mrb[83].mxu1 }
0x44b9   :  { %v8882_v23 = vpop.f32.mrb[84].mxu1 }
0x44ba   :  { %v8883_v57 = vadd.f32 %v13194_v20, %v8882_v23  ;;  %v12182_v30 = vpop.f32.mrb[85].mxu1  ;;  %v15438_v23 = vld [vmem:[#allocation19_spill] sm:$0xff]  ;;  %v15440_v20 = vld [vmem:[#allocation21_spill] sm:$0xff] }
0x44bb   :  { %v15443_v30 = vld [vmem:[#allocation24_spill] sm:$0xff] }
0x44bc   :  { %12195 = vmatpush3.xpose.msk.msra.mxu1 %vm510_vm3, %v8883_v57  ;;  %v15442_v57 = vld [vmem:[#allocation23_spill] sm:$0xff] }
0x44bd   :  { %12199 = vmatprep.subr.mxu1 %v15423_v28 }
0x44bf   :  { %12197 = vmatmul.mubr.msk.f32.vlgmr.msra.gmra.mrb[86].mxu1 %vm510_vm3, %v8815_v5 }
0x44c0   :  { %12200 = vmatpush3.msra.mxu1 %v8953_v47  ;;  %12201 = vmatprep.mubr.msk.f32.mxu1 %vm13232_vm8, %v15423_v28 }
0x44c1   :  { %12914 = vmatprep.subr.bf16.mxu1 %v15422_v39 }
0x4592   :  { %v9028_v22 = vpop.f32.mrb[86].mxu1 }
0x4593   :  { %v9029_v31 = vadd.f32 %v9028_v22, %v13495_v58  ;;  %v12198_v36 = vpop.f32.mrb[87].mxu1 }
0x4595   :  { %v9032_v41 = vsel %vm510_vm3, %v9029_v31, -inf }
0x4596   :  { %9033 = vmax.xlane.f32.xlu0 %v9032_v41 }
0x4623   :  { %v9034_v45 = vpop.xlane.xlu0 %9033 }
0x4624   :  { %v9035_v50 = vsub.f32 %v9029_v31, %v9034_v45 }
0x4626   :  { %v9036_v55 = vmul.f32 1.442695, %v9035_v50 }
0x4628   :  { %13144 = vpow2.f32 %v9036_v55 }
0x4632   :  { %v13145_v62 = vpop.eup %13144 }
0x4633   :  { %v9038_v6 = vsel %vm510_vm3, %v13145_v62, 0.0 }
0x4634   :  { %9039 = vadd.xlane.f32.xlu1 %v9038_v6 }
0x46c1   :  { %v9040_v3 = vpop.xlane.xlu1 %9039 }
0x46c2   :  { %13146 = vrcp.f32 %v9040_v3 }
0x46cc   :  { %v13147_v18 = vpop.eup %13146 }
0x46cd   :  { %v9042_v2 = vmul.f32 %v13147_v18, %v13145_v62 }
0x46cf   :  { %12202 = vmatmul.mubr.msk.f32.vlgmr.msra.gmra.mrb[88].mxu1 %vm510_vm3, %v9042_v2 }
0x46d0   :  { %12916 = vmatpush3.bf16.msra.mxu1 %v15431_v4  ;;  %12217 = vmatprep.mubr.msk.f32.mxu1 %vm13232_vm8, %v15423_v28 }
0x46d1   :  { %12917 = vmatprep.subr.bf16.mxu1 %v15422_v39 }
0x46d4   :  { %12919 = vmatpush3.bf16.msra.mxu1 %v15432_v52  ;;  %v13201_v52 = vld [vmem:[%s15331_s17 + $0x1] ss:$0 sm:$0xff] }
0x46d5   :  { %12926 = vmatprep.subr.bf16.mxu1 %v15422_v39 }
0x46d7   :  { %12218 = vmatmul.mubr.msk.f32.vlgmr.msra.gmra.mrb[90].mxu1 %vm254_vm2, %v14954_v17 }
0x46d8   :  { %12928 = vmatpush3.bf16.msra.mxu1 %v15433_v43  ;;  %12239 = vmatprep.mubr.msk.f32.mxu1 %vm13232_vm8, %v15423_v28 }
0x46d9   :  { %12929 = vmatprep.subr.bf16.mxu1 %v15422_v39 }
0x46dc   :  { %12931 = vmatpush3.bf16.msra.mxu1 %v15434_v44 }
0x46dd   :  { %12252 = vmatprep.subr.mxu1 %v15423_v28 }
0x46df   :  { %12240 = vmatmul.mubr.msk.f32.vlgmr.msra.gmra.mrb[92].mxu1 %vm254_vm2, %v14954_v17 }
0x46e0   :  { %12253 = vmatpush3.msra.mxu1 %v13196_v0  ;;  %12254 = vmatprep.mubr.msk.f32.mxu1 %vm13232_vm8, %v15423_v28  ;;  %v13202_v0 = vld [vmem:[%s15335_s21 + $0x1] ss:$0 sm:$0xff] }
0x46e1   :  { %12938 = vmatprep.subr.bf16.mxu1 %v15422_v39 }
0x47a2   :  { %v9112_v11 = vpop.f32.mrb[88].mxu1 }
0x47a3   :  { %v12203_v63 = vpop.f32.mrb[89].mxu1  ;;  %12207 = vmatmul.mubr.msk.f32.vlgmr.msra.gmra.mrb[94].mxu0 %vm510_vm3, %v9112_v11 }
0x47a4   :  { %12922 = vmatpush3.bf16.msra.mxu0 %v15435_v49  ;;  %12228 = vmatprep.mubr.msk.f32.mxu0 %vm13232_vm8, %v15423_v28 }
0x47a5   :  { %12923 = vmatprep.subr.bf16.mxu0 %v15422_v39 }
0x47a8   :  { %12925 = vmatpush3.bf16.msra.mxu0 %v15436_v21 }
0x47a9   :  { %12242 = vmatprep.subr.mxu0 %v15423_v28 }
0x47aa   :  { %v9256_v29 = vpop.f32.mrb[90].mxu1 }
0x47ab   :  { %v12219_v42 = vpop.f32.mrb[91].mxu1  ;;  %12229 = vmatmul.mubr.msk.f32.vlgmr.msra.gmra.mrb[96].mxu0 %vm254_vm2, %v14954_v17  ;;  %v9257_v46 = vadd.f32 %v13197_v19, %v9256_v29  ;;  %v13203_v29 = vld [vmem:[%s15337_s23 + $0x1] ss:$0 sm:$0xff] }
0x47ac   :  { %12244 = vmatprep.mubr.msk.f32.mxu0 %vm13232_vm8, %v15423_v28 }
0x47ad   :  { %v9260_v53 = vmul.f32 0.35355338, %v9257_v46 }
0x47b2   :  { %v9397_v40 = vpop.f32.mrb[92].mxu1 }
0x47b3   :  { %v12241_v12 = vpop.f32.mrb[93].mxu1  ;;  %v9398_v38 = vadd.f32 %v13199_v27, %v9397_v40  ;;  %v10640_v27 = vld [vmem:[%s15338_s24 + $0x118] sm:$0xff] }
0x4876   :  { %v9185_v14 = vpop.f32.mrb[94].mxu0 }
0x4877   :  { %v9189_v1 = vadd.f32 %v9185_v14, %v15090_v24  ;;  %v12208_v56 = vpop.f32.mrb[95].mxu0 }
0x487e   :  { %v9327_v32 = vpop.f32.mrb[96].mxu0 }
0x487f   :  { %v9328_v61 = vadd.f32 %v13198_v35, %v9327_v32  ;;  %v12230_v10 = vpop.f32.mrb[97].mxu0  ;;  %v10637_v35 = vld [vmem:[%s15338_s24 + $0x100] sm:$0xff] }
0x4881   :  { %12243 = vmatpush3.xpose.msk.msra.mxu0 %vm510_vm3, %v9328_v61  ;;  %v10638_v61 = vld [vmem:[%s15338_s24 + $0x108] sm:$0xff] }
0x4882   :  { %12247 = vmatprep.subr.mxu0 %v15423_v28  ;;  %v12963_v10 = vpack.c.bf16 %v10638_v61, %v10637_v35 }
0x4884   :  { %12245 = vmatmul.mubr.msk.f32.vlgmr.msra.gmra.mrb[98].mxu0 %vm510_vm3, %v9260_v53  ;;  %v10639_v53 = vld [vmem:[%s15338_s24 + $0x110] sm:$0xff] }
0x4885   :  { %12248 = vmatpush3.msra.mxu0 %v9398_v38  ;;  %12249 = vmatprep.mubr.msk.f32.mxu0 %vm13232_vm8, %v15423_v28  ;;  %v12966_v38 = vpack.c.bf16 %v10640_v27, %v10639_v53 }
0x4886   :  { %12932 = vmatprep.subr.bf16.mxu0 %v15422_v39 }
0x4957   :  { %v9473_v26 = vpop.f32.mrb[98].mxu0 }
0x4958   :  { %v9474_v8 = vadd.f32 %v9473_v26, %v13495_v58  ;;  %v12246_v33 = vpop.f32.mrb[99].mxu0  ;;  %v10128_v26 = vld [vmem:[%s15340_s26] sm:$0xff] }
0x495a   :  { %v9477_v48 = vsel %vm510_vm3, %v9474_v8, -inf }
0x495b   :  { %9478 = vmax.xlane.f32.xlu0 %v9477_v48 }
0x49e8   :  { %v9479_v51 = vpop.xlane.xlu0 %9478 }
0x49e9   :  { %v9480_v15 = vsub.f32 %v9474_v8, %v9479_v51  ;;  %v10129_v8 = vld [vmem:[%s15340_s26 + $0x8] sm:$0xff] }
0x49ea   :  { %v12987_v33 = vpack.c.bf16 %v10129_v8, %v10128_v26 }
0x49eb   :  { %v9481_v59 = vmul.f32 1.442695, %v9480_v15 }
0x49ed   :  { %13148 = vpow2.f32 %v9481_v59 }
0x49f7   :  { %v13149_v9 = vpop.eup %13148 }
0x49f8   :  { %v9483_v13 = vsel %vm510_vm3, %v13149_v9, 0.0 }
0x49f9   :  { %9484 = vadd.xlane.f32.xlu1 %v9483_v13  ;;  %v10642_v13 = vld [vmem:[%s15338_s24 + $0x120] sm:$0xff] }
0x4a86   :  { %v9485_v24 = vpop.xlane.xlu1 %9484 }
0x4a87   :  { %13150 = vrcp.f32 %v9485_v24  ;;  %v10643_v24 = vld [vmem:[%s15338_s24 + $0x128] sm:$0xff] }
0x4a91   :  { %v13151_v16 = vpop.eup %13150 }
0x4a92   :  { %v9487_v54 = vmul.f32 %v13151_v16, %v13149_v9  ;;  %v13204_v16 = vld [vmem:[%s15332_s18 + $0x1] ss:$0 sm:$0xff] }
0x4a94   :  { %12250 = vmatmul.mubr.msk.f32.vlgmr.msra.gmra.mrb[100].mxu0 %vm510_vm3, %v9487_v54 }
0x4a95   :  { %12934 = vmatpush3.bf16.msra.mxu0 %v14385_v60  ;;  %12265 = vmatprep.mubr.msk.f32.mxu0 %vm13232_vm8, %v15423_v28  ;;  %v15437_v60 = vld [vmem:[#allocation18_spill] sm:$0xff] }
0x4a96   :  { %12935 = vmatprep.subr.bf16.mxu0 %v15422_v39 }
0x4a99   :  { %12937 = vmatpush3.bf16.msra.mxu0 %v14395_v34  ;;  %v15439_v34 = vld [vmem:[#allocation20_spill] sm:$0xff] }
0x4a9a   :  { %12986 = vmatprep.subr.bf16.mxu0 %v15422_v39 }
0x4b67   :  { %v9557_v58 = vpop.f32.mrb[100].mxu0 }
0x4b68   :  { %v12251_v25 = vpop.f32.mrb[101].mxu0  ;;  %12255 = vmatmul.mubr.msk.f32.vlgmr.msra.gmra.mrb[94].mxu1 %vm510_vm3, %v9557_v58  ;;  %v12969_v58 = vpack.c.bf16 %v10643_v24, %v10642_v13 }
0x4b69   :  { %12940 = vmatpush3.bf16.msra.mxu1 %v14408_v7  ;;  %12300 = vmatprep.mubr.msk.f32.mxu1 %vm13232_vm8, %v15423_v28  ;;  %v15441_v7 = vld [vmem:[#allocation22_spill] sm:$0xff]  ;;  %v13205_v25 = vld [vmem:[%s15333_s19 + $0x1] ss:$0 sm:$0xff] }
0x4b6a   :  { %12941 = vmatprep.subr.bf16.mxu1 %v15422_v39 }
0x4b6d   :  { %12943 = vmatpush3.bf16.msra.mxu1 %v15437_v60 }
0x4b6e   :  { %12944 = vmatprep.subr.bf16.mxu1 %v15422_v39 }
0x4b71   :  { %12946 = vmatpush3.bf16.msra.mxu1 %v15438_v23  ;;  %v10644_v23 = vld [vmem:[%s15338_s24 + $0x130] sm:$0xff] }
0x4b72   :  { %12947 = vmatprep.subr.bf16.mxu1 %v15422_v39 }
0x4b75   :  { %12949 = vmatpush3.bf16.msra.mxu1 %v15439_v34  ;;  %v10645_v34 = vld [vmem:[%s15338_s24 + $0x138] sm:$0xff] }
0x4b76   :  { %12950 = vmatprep.subr.bf16.mxu1 %v15422_v39 }
0x4b79   :  { %12952 = vmatpush3.bf16.msra.mxu1 %v15440_v20  ;;  %v12972_v20 = vpack.c.bf16 %v10645_v34, %v10644_v23 }
0x4b7a   :  { %12953 = vmatprep.subr.bf16.mxu1 %v15422_v39 }
0x4b7d   :  { %12955 = vmatpush3.bf16.msra.mxu1 %v15441_v7  ;;  %v10647_v7 = vld [vmem:[%s15338_s24 + $0x140] sm:$0xff] }
0x4b7e   :  { %12956 = vmatprep.subr.bf16.mxu1 %v15422_v39 }
0x4b81   :  { %12958 = vmatpush3.bf16.msra.mxu1 %v15442_v57  ;;  %v10648_v57 = vld [vmem:[%s15338_s24 + $0x148] sm:$0xff] }
0x4b82   :  { %12959 = vmatprep.subr.bf16.mxu1 %v15422_v39 }
0x4b85   :  { %12961 = vmatpush3.bf16.msra.mxu1 %v15443_v30  ;;  %v12975_v30 = vpack.c.bf16 %v10648_v57, %v10647_v7 }
0x4b86   :  { %12962 = vmatprep.subr.bf16.mxu1 %v15422_v39 }
0x4c3b   :  { %v9630_v5 = vpop.f32.mrb[94].mxu1 }
0x4c3c   :  { %v9634_v37 = vadd.f32 %v9630_v5, %v9189_v1  ;;  %v12256_v47 = vpop.f32.mrb[95].mxu1 }
0x4c3d   :  { %v10650_v47 = vld [vmem:[%s15338_s24 + $0x158] sm:$0xff] }
0x4c3e   :  { %v9635_v22 = vadd.f32 %v9634_v37, %v14954_v17  ;;  %v13200_v17 = vld [vmem:[%s15330_s16 + $0x1] ss:$0 sm:$0xff]  ;;  %v10649_v37 = vld [vmem:[%s15338_s24 + $0x150] sm:$0xff] }
0x4c40   :  { %v9636_v31 = vsel %vm254_vm2, %v9635_v22, 0.0 }
0x4c41   :  { %9637 = vadd.xlane.f32.xlu0 %v9636_v31  ;;  %v10652_v31 = vld [vmem:[%s15338_s24 + $0x160] sm:$0xff] }
0x4cce   :  { %v9638_v36 = vpop.xlane.xlu0 %9637 }
0x4ccf   :  { %v9639_v41 = vmul.f32 0.03125, %v9638_v36  ;;  %v10653_v36 = vld [vmem:[%s15338_s24 + $0x168] sm:$0xff] }
0x4cd1   :  { %v9640_v45 = vsub.f32 %v9635_v22, %v9639_v41  ;;  %v12978_v22 = vpack.c.bf16 %v10650_v47, %v10649_v37  ;;  %v12981_v41 = vpack.c.bf16 %v10653_v36, %v10652_v31 }
0x4cd3   :  { %v9641_v50 = vmul.f32 %v9640_v45, %v9640_v45 }
0x4cd5   :  { %v9642_v55 = vsel %vm254_vm2, %v9641_v50, 0.0  ;;  %v10654_v50 = vld [vmem:[%s15338_s24 + $0x170] sm:$0xff] }
0x4cd6   :  { %9643 = vadd.xlane.f32.xlu1 %v9642_v55  ;;  %v10655_v55 = vld [vmem:[%s15338_s24 + $0x178] sm:$0xff] }
0x4d63   :  { %v9644_v62 = vpop.xlane.xlu1 %9643 }
0x4d64   :  { %v9645_v6 = vmul.f32 0.03125, %v9644_v62  ;;  %v12984_v62 = vpack.c.bf16 %v10655_v55, %v10654_v50 }
0x4d66   :  { %v9646_v3 = vadd.f32 1e-05, %v9645_v6 }
0x4d68   :  { %13152 = vrsqrt.f32 %v9646_v3  ;;  %v10130_v3 = vld [vmem:[%s15340_s26 + $0x10] sm:$0xff] }
0x4d72   :  { %v13153_v18 = vpop.eup %13152 }
0x4d73   :  { %v9648_v2 = vmul.f32 %v13153_v18, %v9640_v45  ;;  %v10131_v18 = vld [vmem:[%s15340_s26 + $0x18] sm:$0xff] }
0x4d75   :  { %v9649_v4 = vmul.f32 %v13200_v17, %v9648_v2  ;;  %v12990_v2 = vpack.c.bf16 %v10131_v18, %v10130_v3 }
0x4d77   :  { %v9650_v43 = vadd.f32 %v13201_v52, %v9649_v4 }
0x4d79   :  { %12266 = vmatmul.mubr.msk.f32.vlgmr.msra.gmra.mrb[102].mxu0 %vm254_vm2, %v9650_v43 }
0x4d7a   :  { %12355 = vmatprep.mubr.msk.f32.mxu0 %vm13232_vm8, %v15423_v28  ;;  %12988 = vmatpush3.bf16.msra.mxu0 %v12987_v33 }
0x4d7b   :  { %12989 = vmatprep.subr.bf16.mxu0 %v15422_v39 }
0x4d7e   :  { %12991 = vmatpush3.bf16.msra.mxu0 %v12990_v2 }
0x4e4c   :  { %v9720_v44 = vpop.f32.mrb[102].mxu0 }
0x4e4d   :  { %v9721_v11 = vadd.f32 %v13202_v0, %v9720_v44  ;;  %v12267_v63 = vpop.f32.mrb[103].mxu0 }
0x4e4f   :  { %v9724_v49 = vmax.f32 %v9721_v11, 0.0 }
0x4e51   :  { %12301 = vmatmul.mubr.f32.vlgmr.msra.gmra.mrb[96].mxu1 %v9724_v49 }
0x4e52   :  { %12311 = vmatprep.mubr.msk.f32.mxu1 %vm13232_vm8, %v15423_v28  ;;  %12964 = vmatpush3.bf16.msra.mxu1 %v12963_v10 }
0x4e53   :  { %12965 = vmatprep.subr.bf16.mxu1 %v15422_v39 }
0x4e56   :  { %12967 = vmatpush3.bf16.msra.mxu1 %v12966_v38 }
0x4e57   :  { %12968 = vmatprep.subr.bf16.mxu1 %v15422_v39 }
0x4f24   :  { %v9791_v21 = vpop.f32.mrb[96].mxu1 }
0x4f25   :  { %v9792_v42 = vadd.f32 %v13203_v29, %v9791_v21  ;;  %v12302_v40 = vpop.f32.mrb[97].mxu1 }
0x4f27   :  { %v9795_v12 = vadd.f32 %v9792_v42, %v9650_v43  ;;  %v10657_v43 = vld [vmem:[%s15341_s27] ss:$0 sm:$0xff] }
0x4f29   :  { %v9796_v14 = vsel %vm254_vm2, %v9795_v12, 0.0 }
0x4f2a   :  { %9797 = vadd.xlane.f32.xlu0 %v9796_v14 }
0x4fb7   :  { %v9798_v1 = vpop.xlane.xlu0 %9797 }
0x4fb8   :  { %v9799_v56 = vmul.f32 0.03125, %v9798_v1 }
0x4fba   :  { %v9800_v19 = vsub.f32 %v9795_v12, %v9799_v56 }
0x4fbc   :  { %v9801_v46 = vmul.f32 %v9800_v19, %v9800_v19 }
0x4fbe   :  { %v9802_v32 = vsel %vm254_vm2, %v9801_v46, 0.0 }
0x4fbf   :  { %9803 = vadd.xlane.f32.xlu1 %v9802_v32 }
0x504c   :  { %v9804_v48 = vpop.xlane.xlu1 %9803 }
0x504d   :  { %v9805_v51 = vmul.f32 0.03125, %v9804_v48 }
0x504f   :  { %v9806_v15 = vadd.f32 1e-05, %v9805_v51 }
0x5051   :  { %13154 = vrsqrt.f32 %v9806_v15 }
0x505b   :  { %v13155_v59 = vpop.eup %13154 }
0x505c   :  { %v9808_v9 = vmul.f32 %v13155_v59, %v9800_v19 }
0x505e   :  { %v9809_v54 = vmul.f32 %v13204_v16, %v9808_v9 }
0x5060   :  { %v9810_v60 = vadd.f32 %v13205_v25, %v9809_v54 }
0x5062   :  { %12312 = vmatmul.mubr.msk.f32.vlgmr.msra.gmra.mrb[56].mxu1 %vm254_vm2, %v9810_v60  ;;  %v9895_v5 = vrot.slane %v9810_v60, 2  ;;  %v9974_v45 = vrot.slane %v9810_v60, 4  ;;  %v10053_v6 = vrot.slane %v9810_v60, 6 }
0x5063   :  { %12970 = vmatpush3.bf16.msra.mxu1 %v12969_v58  ;;  %12322 = vmatprep.mubr.msk.f32.mxu1 %vm13232_vm8, %v15423_v28 }
0x5064   :  { %12971 = vmatprep.subr.bf16.mxu1 %v15422_v39 }
0x5067   :  { %12973 = vmatpush3.bf16.msra.mxu1 %v12972_v20 }
0x5068   :  { %12974 = vmatprep.subr.bf16.mxu1 %v15422_v39 }
0x506a   :  { %12323 = vmatmul.mubr.msk.f32.vlgmr.msra.gmra.mrb[56].mxu1 %vm254_vm2, %v9895_v5 }
0x506b   :  { %12976 = vmatpush3.bf16.msra.mxu1 %v12975_v30  ;;  %12333 = vmatprep.mubr.msk.f32.mxu1 %vm13232_vm8, %v15423_v28 }
0x506c   :  { %12977 = vmatprep.subr.bf16.mxu1 %v15422_v39 }
0x506f   :  { %12979 = vmatpush3.bf16.msra.mxu1 %v12978_v22 }
0x5070   :  { %12980 = vmatprep.subr.bf16.mxu1 %v15422_v39 }
0x5072   :  { %12334 = vmatmul.mubr.msk.f32.vlgmr.msra.gmra.mrb[56].mxu1 %vm254_vm2, %v9974_v45 }
0x5073   :  { %12982 = vmatpush3.bf16.msra.mxu1 %v12981_v41  ;;  %12344 = vmatprep.mubr.msk.f32.mxu1 %vm13232_vm8, %v15423_v28  ;;  %v10539_v28 = vld [vmem:[%s15339_s25] ss:$0 sm:$0xff]  ;;  %s13234_s25 = smov [#allocation2]  }
0x5074   :  { %12983 = vmatprep.subr.bf16.mxu1 %v15422_v39  ;;  %s10234_s26 = sshll.u32 %s13234_s25, 4  ;;  %s10235_s26 = int_to_ptr.vmem [resolvable:$true] %s10234_s26 }
0x5075   :  { %s13206_s27 = scalar_lea.vmem %s10235_s26, 32  ;;  %p13211_p1 = scmp.lt.s32.totalorder %s10235_s26, %s10235_s26 }
0x5076   :  { %p13207_p0 = scmp.ne.s32.totalorder %s10235_s26, %s13206_s27  ;;  %p13212_p2 = scmp.lt.s32.totalorder %s13206_s27, %s13206_s27 }
0x5077   :  { %12985 = vmatpush3.bf16.msra.mxu1 %v12984_v62 }
0x5078   :  { %p13213_p3 = por %p13212_p2, %p13211_p1 }
0x507a   :  { %12345 = vmatmul.mubr.msk.f32.vlgmr.msra.gmra.mrb[56].mxu1 %vm254_vm2, %v10053_v6  ;;  %p13214_p4 = pnand %p13213_p3, %p13207_p0 }
0x514d   :  { %v10122_v17 = vpop.f32.mrb[56].mxu1 }
0x514e   :  { %v12996_v39 = vadd.f32 %v10539_v28, %v10122_v17  ;;  %v12346_v4 = vpop.f32.mrb[57].mxu1 }
0x5150   :  { %v10127_v52 = vmax.f32 %v12996_v39, 0.0 }
0x5152   :  { %12356 = vmatmul.mubr.msk.f32.vlgmr.msra.gmra.mrb[104].mxu0 %vm254_vm2, %v10127_v52 }
0x5225   :  { %v10208_v44 = vpop.f32.mrb[104].mxu0 }
0x5226   :  { %v10209_v0 = vadd.f32 %v10657_v43, %v10208_v44  ;;  %v12357_v11 = vpop.f32.mrb[105].mxu0 }
0x5228   :  { %v10213_v63 = vmin.f32 %v10209_v0, 20.0  ;;  %vm10212_vm13 = vcmp.gt.f32.partialorder %v10209_v0, 20.0 }
0x522a   :  { %v10214_v49 = vmul.f32 1.442695, %v10213_v63 }
0x522c   :  { %13156 = vpow2.f32 %v10214_v49 }
0x5236   :  { %v13157_v21 = vpop.eup %13156 }
0x5237   :  { %v10216_v29 = vadd.f32 1.0, %v13157_v21  ;;  %v10219_v42 = vmul.f32 -0.5, %v13157_v21  ;;  %v10222_v12 = vand.u32 2147483647, %v13157_v21 }
0x5239   :  { %13158 = vlog2.f32 %v10216_v29  ;;  %v10220_v40 = vadd.f32 1.0, %v10219_v42  ;;  %vm10223_vm11 = vcmp.lt.f32.partialorder %v10222_v12, 0.0004427343 }
0x523b   :  { %v10221_v56 = vmul.f32 %v13157_v21, %v10220_v40 }
0x5243   :  { %v13159_v14 = vpop.eup %13158 }
0x5244   :  { %v10218_v1 = vmul.f32 0.6931472, %v13159_v14 }
0x5246   :  { %v10224_v19 = vsel %vm10223_vm11, %v10221_v56, %v10218_v1 }
0x5247   :  { %v10225_v46 = vsel %vm10212_vm13, %v10209_v0, %v10224_v19 }
0x5248   :  { %10227 = vst.msk [vmem:[#allocation2] sm:$0x3] %vm10226_vm12, %v10225_v46 }
0x5249   :  { %13217 = shalt.err (!%p13214_p4)
}
0x524a   :  { %s13218_s17 = scalar_lea.hbm %s15342_s28, 32 }
0x524b   :  { %p13219_p5 = scmp.ne.s32.totalorder %s15342_s28, %s13218_s17  ;;  %p13222_p6 = scmp.lt.u32.totalorder %s13218_s17, %s15342_s28 }
0x524d   :  { %p13224_p7 = pnand %p13222_p6, %p13219_p5 }
0x524f   :  { %13227 = shalt.err (!%p13224_p7)
}
0x5250   :  { %10237 = dma.vmem_to_hbm [thread:$0]  %s10235_s26, 32, %s15342_s28, [#allocation3]  }
0x5251   :  { %13228 = dma.done.wait [#allocation3], 32  }
0x5252   :  { %13229 = vsyncadd [#allocation3], 4294967264 }
0x5253   :  { %10241 = vsyncpa [#allocation3], 1 }

</bundles_post_ra>
